<compile_context>
chip_gen: v6e
topology: v6e:2x2x1
jax: 0.10.0
libtpu: 0.0.40
codegen_flags: <defaults>
</compile_context>

<pallas_src>
import jax
import jax.numpy as jnp
from jax.experimental import pallas as pl
from jax.experimental.pallas import tpu as pltpu

EPS = 1e-5


def conv1x1_bn_kernel(x_ref, w_ref, gamma_ref, beta_ref, o_ref):
    # x_ref:     (Cin, M)        float32
    # w_ref:     (Cout_blk, Cin) float32
    # gamma_ref: (Cout_blk, 1)   float32
    # beta_ref:  (Cout_blk, 1)   float32
    # o_ref:     (Cout_blk, M)   float32
    conv = jnp.dot(
        w_ref[...], x_ref[...],
        preferred_element_type=jnp.float32,
        precision=jax.lax.Precision.HIGHEST,
    )                                                         # (Cout_blk, M)

    m = conv.shape[1]
    inv_m = 1.0 / m                                           # static scalar

    # Two-pass batch statistics per output channel (per row): numerically
    # stable vs. E[x^2]-E[x]^2 when |mean| >> std.
    mean = jnp.sum(conv, axis=-1, keepdims=True) * inv_m      # (Cout_blk, 1)
    centered = conv - mean                                    # (Cout_blk, M)
    var = jnp.sum(centered * centered, axis=-1, keepdims=True) * inv_m
    var = jnp.maximum(var, 0.0)
    inv_std = jax.lax.rsqrt(var + EPS)

    # Fold BN affine into a single per-channel scale; add beta.
    scale = gamma_ref[...] * inv_std                          # (Cout_blk, 1)
    o_ref[...] = centered * scale + beta_ref[...]


def conv1x1_bn(x_nchw, w_conv, gamma, beta, *, n_cout_blocks=2):
    """x_nchw: (N, Cin, H, W); w_conv: (Cout, Cin, 1, 1) or (Cout, Cin);
    gamma/beta: (Cout,). Returns (N, Cout, H, W) float32."""
    n, cin, h, w_sp = x_nchw.shape
    cout = w_conv.shape[0]
    m = n * h * w_sp

    # (N, Cin, H, W) -> (Cin, N*H*W). For N == 1 this is a pure reshape
    # (zero data movement).
    if n == 1:
        x_cm = x_nchw.reshape(cin, m)
    else:
        # TODO(synk): for N>1, avoid this extra HBM pass by adding N as an
        # "arbitrary" grid axis and accumulating BN stats across N in VMEM.
        x_cm = jnp.transpose(x_nchw, (1, 0, 2, 3)).reshape(cin, m)
    x_cm = x_cm.astype(jnp.float32)

    w_mat = w_conv.reshape(cout, cin).astype(jnp.float32)      # (Cout, Cin)
    gamma2 = gamma.reshape(cout, 1).astype(jnp.float32)
    beta2 = beta.reshape(cout, 1).astype(jnp.float32)

    # Output-channel split across the grid (2 -> one block per TC on v7x;
    # on single-TC v5e/v6e two steps are still cheap).
    if cout % n_cout_blocks != 0 or (cout // n_cout_blocks) % 8 != 0:
        n_cout_blocks = 1
    cb = cout // n_cout_blocks

    itemsize = 4
    cost = pl.CostEstimate(
        flops=2 * cout * cin * m,
        transcendentals=cout,                      # rsqrt per output channel
        bytes_accessed=(cin * m + cout * cin + 2 * cout + cout * m) * itemsize,
    )

    out_cm = pl.pallas_call(
        conv1x1_bn_kernel,
        out_shape=jax.ShapeDtypeStruct((cout, m), jnp.float32),
        grid=(n_cout_blocks,),
        in_specs=[
            pl.BlockSpec((cin, m), lambda i: (0, 0)),      # x: shared
            pl.BlockSpec((cb, cin), lambda i: (i, 0)),     # w: blocked on Cout
            pl.BlockSpec((cb, 1), lambda i: (i, 0)),       # gamma
            pl.BlockSpec((cb, 1), lambda i: (i, 0)),       # beta
        ],
        out_specs=pl.BlockSpec((cb, m), lambda i: (i, 0)),
        compiler_params=pltpu.CompilerParams(
            dimension_semantics=("parallel",)),
        cost_estimate=cost,
    )(x_cm, w_mat, gamma2, beta2)

    # (Cout, M) -> (N, Cout, H, W). Pure reshape for N == 1.
    if n == 1:
        return out_cm.reshape(1, cout, h, w_sp)
    return jnp.transpose(out_cm.reshape(cout, n, h, w_sp), (1, 0, 2, 3))


def reference(x_nchw, w_conv, gamma, beta):
    """Pure-JAX float32 reference (PyTorch training-mode forward semantics)."""
    n, cin, h, w_sp = x_nchw.shape
    cout = w_conv.shape[0]
    w_mat = w_conv.reshape(cout, cin)
    x_flat = jnp.transpose(x_nchw, (0, 2, 3, 1)).reshape(-1, cin)
    conv = x_flat @ w_mat.T                                   # (M, Cout)
    mean = jnp.mean(conv, axis=0, keepdims=True)
    var = jnp.mean((conv - mean) ** 2, axis=0, keepdims=True)
    y = (conv - mean) / jnp.sqrt(var + EPS) * gamma[None, :] + beta[None, :]
    return jnp.transpose(y.reshape(n, h, w_sp, cout), (0, 3, 1, 2))


if __name__ == "__main__":
    key = jax.random.PRNGKey(0)
    k_x, k_w, k_g, k_b = jax.random.split(key, 4)

    # Shapes implied by the module: input (1, 176, 14, 14), conv 176 -> 1056.
    N, CIN, H, W = 1, 176, 14, 14
    COUT = 1056

    x = jax.random.normal(k_x, (N, CIN, H, W), dtype=jnp.float32)
    w = jax.random.normal(k_w, (COUT, CIN, 1, 1), dtype=jnp.float32) * 0.05
    gamma = 1.0 + 0.1 * jax.random.normal(k_g, (COUT,), dtype=jnp.float32)
    beta = 0.1 * jax.random.normal(k_b, (COUT,), dtype=jnp.float32)

    out = conv1x1_bn(x, w, gamma, beta)
    out = jax.block_until_ready(out)

    ref = reference(x, w, gamma, beta)
    assert out.shape == (N, COUT, H, W), out.shape
    # f32 matmul (HIGHEST precision) + f32 BN -> tight tolerance.
    assert jnp.allclose(out, ref, atol=2e-3, rtol=2e-3), float(
        jnp.max(jnp.abs(out - ref)))

    print("KERNEL_OK")
</pallas_src>

<mosaic_0001>
module attributes {stable_mosaic.version = 11 : i64} {
  func.func @conv1x1_bn_kernel(%arg0: i32, %arg1: memref<176x196xf32, #tpu.memory_space<vmem>>, %arg2: memref<528x176xf32, #tpu.memory_space<vmem>>, %arg3: memref<528x1xf32, #tpu.memory_space<vmem>>, %arg4: memref<528x1xf32, #tpu.memory_space<vmem>>, %arg5: memref<528x196xf32, #tpu.memory_space<vmem>>) attributes {dimension_semantics = [#tpu.dimension_semantics<parallel>], iteration_bounds = array<i64: 2>, scalar_prefetch = 0 : i64, scratch_operands = 0 : i64, tpu.core_type = #tpu.core_type<tc>, window_params = [{pipeline_mode = #tpu.pipeline_mode<synchronous>, transform_indices = @transform_0, window_bounds = array<i64: 176, 196>}, {transform_indices = @transform_1, window_bounds = array<i64: 528, 176>}, {transform_indices = @transform_2, window_bounds = array<i64: 528, 1>}, {transform_indices = @transform_3, window_bounds = array<i64: 528, 1>}, {transform_indices = @transform_4, window_bounds = array<i64: 528, 196>}]} {
    %c0 = arith.constant 0 : index
    %c0_0 = arith.constant 0 : index
    %0 = vector.load %arg2[%c0, %c0_0] : memref<528x176xf32, #tpu.memory_space<vmem>>, vector<528x176xf32>
    %c0_1 = arith.constant 0 : index
    %c0_2 = arith.constant 0 : index
    %1 = vector.load %arg1[%c0_1, %c0_2] : memref<176x196xf32, #tpu.memory_space<vmem>>, vector<176x196xf32>
    %cst = arith.constant dense<0.000000e+00> : vector<528x196xf32>
    %2 = tpu.matmul %0, %1, %cst {dimension_numbers = #tpu.dot_dimension_numbers<[1], [0], [0], [1], [0, 0, 1, 1], [], []>, precision = #tpu.contract_precision<fp32>} : vector<528x176xf32>, vector<176x196xf32>, vector<528x196xf32> -> vector<528x196xf32>
    %cst_3 = arith.constant dense<0.000000e+00> : vector<528xf32>
    %3 = vector.multi_reduction <add>, %2, %cst_3 [1] : vector<528x196xf32> to vector<528xf32>
    %4 = vector.shape_cast %3 : vector<528xf32> to vector<528x1xf32>
    %cst_4 = arith.constant 0.00510204071 : f32
    %5 = vector.broadcast %cst_4 : f32 to vector<528x1xf32>
    %6 = arith.mulf %4, %5 : vector<528x1xf32>
    %7 = vector.broadcast %6 : vector<528x1xf32> to vector<528x196xf32>
    %8 = arith.subf %2, %7 : vector<528x196xf32>
    %9 = arith.mulf %8, %8 : vector<528x196xf32>
    %cst_5 = arith.constant dense<0.000000e+00> : vector<528xf32>
    %10 = vector.multi_reduction <add>, %9, %cst_5 [1] : vector<528x196xf32> to vector<528xf32>
    %11 = vector.shape_cast %10 : vector<528xf32> to vector<528x1xf32>
    %cst_6 = arith.constant 0.00510204071 : f32
    %12 = vector.broadcast %cst_6 : f32 to vector<528x1xf32>
    %13 = arith.mulf %11, %12 : vector<528x1xf32>
    %cst_7 = arith.constant 0.000000e+00 : f32
    %14 = vector.broadcast %cst_7 : f32 to vector<528x1xf32>
    %15 = arith.maximumf %13, %14 : vector<528x1xf32>
    %cst_8 = arith.constant 9.99999974E-6 : f32
    %16 = vector.broadcast %cst_8 : f32 to vector<528x1xf32>
    %17 = arith.addf %15, %16 : vector<528x1xf32>
    %18 = math.rsqrt %17 : vector<528x1xf32>
    %c0_9 = arith.constant 0 : index
    %c0_10 = arith.constant 0 : index
    %19 = vector.load %arg3[%c0_9, %c0_10] : memref<528x1xf32, #tpu.memory_space<vmem>>, vector<528x1xf32>
    %20 = arith.mulf %19, %18 : vector<528x1xf32>
    %21 = vector.broadcast %20 : vector<528x1xf32> to vector<528x196xf32>
    %22 = arith.mulf %8, %21 : vector<528x196xf32>
    %c0_11 = arith.constant 0 : index
    %c0_12 = arith.constant 0 : index
    %23 = vector.load %arg4[%c0_11, %c0_12] : memref<528x1xf32, #tpu.memory_space<vmem>>, vector<528x1xf32>
    %24 = vector.broadcast %23 : vector<528x1xf32> to vector<528x196xf32>
    %25 = arith.addf %22, %24 : vector<528x196xf32>
    %c0_13 = arith.constant 0 : index
    %c0_14 = arith.constant 0 : index
    %26 = vector.load %arg5[%c0_13, %c0_14] : memref<528x196xf32, #tpu.memory_space<vmem>>, vector<528x196xf32>
    tpu.vector_store %arg5[%c0_13, %c0_14], %25 {strides = array<i32>} : memref<528x196xf32, #tpu.memory_space<vmem>>, vector<528x196xf32>,
    return
  }
  func.func @transform_0(%arg0: i32) -> (i32, i32) {
    %c0_i32 = arith.constant 0 : i32
    %c0_i32_0 = arith.constant 0 : i32
    %c0_i32_1 = arith.constant 0 : i32
    return %c0_i32, %c0_i32_0 : i32, i32
  }
  func.func @transform_1(%arg0: i32) -> (i32, i32) {
    %c0_i32 = arith.constant 0 : i32
    %c0_i32_0 = arith.constant 0 : i32
    return %arg0, %c0_i32 : i32, i32
  }
  func.func @transform_2(%arg0: i32) -> (i32, i32) {
    %c0_i32 = arith.constant 0 : i32
    %c0_i32_0 = arith.constant 0 : i32
    return %arg0, %c0_i32 : i32, i32
  }
  func.func @transform_3(%arg0: i32) -> (i32, i32) {
    %c0_i32 = arith.constant 0 : i32
    %c0_i32_0 = arith.constant 0 : i32
    return %arg0, %c0_i32 : i32, i32
  }
  func.func @transform_4(%arg0: i32) -> (i32, i32) {
    %c0_i32 = arith.constant 0 : i32
    %c0_i32_0 = arith.constant 0 : i32
    return %arg0, %c0_i32 : i32, i32
  }
}

</mosaic_0001>

<bundles_post_ra>
// kernel: tpu_custom_call.1
= control target key start
LH: loop header
LB: loop body
LE: loop exit
PB: predicated region body
PF: predicated region fallthrough
CT: control target
= control target key end

     0   :  { %s8330_s15 = smov 0   ;;  %s14417_s0 = inlined_call_operand.vmem [shape: f32[176,196], index: 0, kind: input, shape index: {}]   ;;  %s14418_s1 = inlined_call_operand.vmem [shape: f32[1056,176], index: 1, kind: input, shape index: {}]   ;;  %s14419_s2 = inlined_call_operand.vmem [shape: f32[1056,1], index: 2, kind: input, shape index: {}]   ;;  %s14420_s3 = inlined_call_operand.vmem [shape: f32[1056,1], index: 3, kind: input, shape index: {}]   ;;  %s14421_s4 = inlined_call_operand.vmem [shape: f32[1056,196], index: 4, kind: output, shape index: {}]  }
   0x1 LB: > { %s8138_s16 = sadd.s32 4294967295, %s8302_s15   ;;  %p8142_p0 = scmp.ge.s32.totalorder %s8302_s15, 1  ;;  %s8302_s15 = sphi %s8330_s15, %s14_s15  }
   0x2   : > { %p186_p1 = scmp.lt.s32.totalorder %s8302_s15, 3 }
   0x4   : > { %p187_p2 = pnand %p8142_p0, %p186_p1 }
   0x6   : > { %190 = sbr.rel (%p187_p2) target bundleno = 2067 (0x813), region = 36 }
   0xb   : > { %v413_v0 = vld [vmem:[%s14417_s0 + $0xf8] sm:$0xff]  ;;  %v412_v1 = vld [vmem:[%s14417_s0 + $0xf0] sm:$0xff]  ;;  %v411_v2 = vld [vmem:[%s14417_s0 + $0xe8] sm:$0xff]  ;;  %s8701_s29 = smul.u32 66, %s8138_s16  ;;  %vm426_vm0 = vcmask 392192   ;;  %vm5679_vm1 = vcmask 556032  }
   0xc   : > { %v8347_v3 = vand.u32 4294901760, %v413_v0  ;;  %v8349_v4 = vand.u32 4294901760, %v412_v1  ;;  %v8351_v5 = vand.u32 4294901760, %v411_v2  ;;  %v410_v6 = vld [vmem:[%s14417_s0 + $0xe0] sm:$0xff]  ;;  %v409_v7 = vld [vmem:[%s14417_s0 + $0xd8] sm:$0xff]  ;;  %v408_v8 = vld [vmem:[%s14417_s0 + $0xd0] sm:$0xff] }
   0xd   : > { %v8362_v9 = vand.u32 4294901760, %v410_v6  ;;  %v8364_v10 = vand.u32 4294901760, %v409_v7  ;;  %v8366_v11 = vand.u32 4294901760, %v408_v8  ;;  %v407_v12 = vld [vmem:[%s14417_s0 + $0xc8] sm:$0xff]  ;;  %v406_v13 = vld [vmem:[%s14417_s0 + $0xc0] sm:$0xff]  ;;  %v405_v14 = vld [vmem:[%s14417_s0 + $0xb8] sm:$0xff] }
   0xe   : > { %626 = vmatprep.subr.mxu0 %v8347_v3  ;;  %v8378_v15 = vand.u32 4294901760, %v407_v12  ;;  %v8380_v16 = vand.u32 4294901760, %v406_v13  ;;  %v8382_v17 = vand.u32 4294901760, %v405_v14  ;;  %v8385_v18 = vsub.f32 %v413_v0, %v8347_v3  ;;  %v8390_v19 = vld [vmem:[%s14417_s0 + $0xb0] sm:$0xff]  ;;  %v8395_v20 = vld [vmem:[%s14417_s0 + $0xa8] sm:$0xff]  ;;  %v8400_v21 = vld [vmem:[%s14417_s0 + $0xa0] sm:$0xff] }
   0xf   : > { %628 = vmatpush1.msra.mxu0 %v8349_v4  ;;  %v8404_v22 = vand.u32 4294901760, %v8390_v19  ;;  %v8407_v23 = vsub.f32 %v412_v1, %v8349_v4  ;;  %v8410_v24 = vand.u32 4294901760, %v8395_v20  ;;  %v8413_v25 = vsub.f32 %v411_v2, %v8351_v5  ;;  %v8418_v26 = vld [vmem:[%s14417_s0 + $0x98] sm:$0xff]  ;;  %v8423_v27 = vld [vmem:[%s14417_s0 + $0x90] sm:$0xff]  ;;  %v8428_v28 = vld [vmem:[%s14417_s0 + $0x88] sm:$0xff]  ;;  %p225_p3 = scmp.lt.s32.totalorder %s8701_s29, 131 }
  0x10   : > { %15304 = vst [vmem:[#allocation2_spill] sm:$0xff] %v8385_v18  ;;  %630 = vmatprep.subr.mxu0 %v8351_v5  ;;  %v14435_v29 = vand.u32 4294901760, %v8385_v18  ;;  %v8433_v30 = vand.u32 4294901760, %v8400_v21  ;;  %v8436_v31 = vsub.f32 %v410_v6, %v8362_v9  ;;  %v8439_v32 = vand.u32 4294901760, %v8418_v26  ;;  %v8453_v37 = vld [vmem:[%s14417_s0 + $0x80] sm:$0xff]  ;;  %v8480_v46 = vld [vmem:[%s14417_s0 + $0x78] sm:$0xff] }
  0x11   : > { %15305 = vst [vmem:[#allocation3_spill] sm:$0xff] %v8404_v22  ;;  %15306 = vst [vmem:[#allocation4_spill] sm:$0xff] %v8407_v23  ;;  %632 = vmatpush1.msra.mxu0 %v8362_v9  ;;  %v14434_v33 = vand.u32 4294901760, %v8407_v23  ;;  %v14432_v34 = vand.u32 4294901760, %v8413_v25  ;;  %v8445_v35 = vsub.f32 %v409_v7, %v8364_v10  ;;  %v8448_v36 = vand.u32 4294901760, %v8423_v27  ;;  %v8493_v51 = vld [vmem:[%s14417_s0 + $0x70] sm:$0xff] }
  0x12   : > { %15307 = vst [vmem:[#allocation5_spill] sm:$0xff] %v8413_v25  ;;  %634 = vmatprep.subr.mxu0 %v8364_v10  ;;  %v1793_v38 = vsub.f32 %v8385_v18, %v14435_v29  ;;  %v14431_v39 = vand.u32 4294901760, %v8436_v31  ;;  %v8461_v40 = vsub.f32 %v408_v8, %v8366_v11  ;;  %v8464_v41 = vand.u32 4294901760, %v8428_v28  ;;  %v8503_v56 = vld [vmem:[%s14417_s0 + $0x68] sm:$0xff]  ;;  %v8518_v61 = vld [vmem:[%s14417_s0 + $0x60] sm:$0xff]  ;;  %v8533_v2 = vld [vmem:[%s14417_s0 + $0x58] sm:$0xff] }
  0x13   : > { %15308 = vst [vmem:[#allocation6_spill] sm:$0xff] %v8445_v35  ;;  %15309 = vst [vmem:[#allocation7_spill] sm:$0xff] %v8448_v36  ;;  %636 = vmatpush1.msra.mxu0 %v8366_v11  ;;  %v1799_v42 = vsub.f32 %v8407_v23, %v14434_v33  ;;  %v1805_v43 = vsub.f32 %v8413_v25, %v14432_v34  ;;  %v14429_v44 = vand.u32 4294901760, %v8445_v35  ;;  %v8488_v50 = vand.u32 4294901760, %v8453_v37  ;;  %v8669_v33 = vld [vmem:[%s14417_s0 + $0x18] sm:$0xff]  ;;  %s17171_s29 = smov (!%p225_p3, %s8701_s29), 131 }
  0x14   : > { %15310 = vst [vmem:[#allocation8_spill] sm:$0xff] %v8461_v40  ;;  %15311 = vst [vmem:[#allocation9_spill] sm:$0xff] %v8464_v41  ;;  %v8475_v45 = vsub.f32 %v407_v12, %v8378_v15  ;;  %638 = vmatprep.subr.mxu0 %v8378_v15  ;;  %v1794_v47 = vand.u32 4294901760, %v1793_v38  ;;  %v1811_v48 = vsub.f32 %v8436_v31, %v14431_v39  ;;  %v14427_v49 = vand.u32 4294901760, %v8461_v40  ;;  %s8151_s23 = sshll.u32 %s17171_s29, 4  ;;  %s8145_s11 = sshll.u32 %s17171_s29, 3 }
  0x15   : > { %15313 = vst [vmem:[#allocation11_spill] sm:$0xff] %v8488_v50  ;;  %640 = vmatpush1.msra.mxu0 %v8380_v16  ;;  %v1800_v52 = vand.u32 4294901760, %v1799_v42  ;;  %v1806_v53 = vand.u32 4294901760, %v1805_v43  ;;  %v1817_v54 = vsub.f32 %v8445_v35, %v14429_v44  ;;  %v8510_v59 = vsub.f32 %v406_v13, %v8380_v16  ;;  %v8547_v13 = vld [vmem:[%s14417_s0 + $0x50] sm:$0xff]  ;;  %v8642_v44 = vld [vmem:[%s14417_s0 + $0x28] sm:$0xff]  ;;  %s8920_s6 = scalar_lea.vmem %s14418_s1, %s8151_s23  ;;  %s11004_s14 = scalar_lea.vmem %s14420_s3, %s8145_s11 }
  0x16   : > { %15312 = vst [vmem:[#allocation10_spill] sm:$0xff] %v8475_v45  ;;  %v14426_v55 = vand.u32 4294901760, %v8475_v45  ;;  %642 = vmatprep.subr.mxu0 %v8382_v17  ;;  %1795 = vmatprep.subr.mxu1 %v1794_v47  ;;  %v1812_v57 = vand.u32 4294901760, %v1811_v48  ;;  %v1823_v58 = vsub.f32 %v8461_v40, %v14427_v49  ;;  %v8513_v60 = vand.u32 4294901760, %v8480_v46  ;;  %v8626_v49 = vld [vmem:[%s14417_s0 + $0x30] sm:$0xff]  ;;  %s13401_s19 = scalar_lea.vmem %s14419_s2, %s8145_s11  ;;  %s13607_s22 = scalar_lea.vmem %s14421_s4, %s8151_s23 }
  0x17   : > { %15314 = vst [vmem:[#allocation12_spill] sm:$0xff] %v8510_v59  ;;  %644 = vmatpush1.msra.mxu0 %v8404_v22  ;;  %1801 = vmatpush1.msra.mxu1 %v1800_v52  ;;  %v1818_v62 = vand.u32 4294901760, %v1817_v54  ;;  %v8525_v0 = vsub.f32 %v405_v14, %v8382_v17  ;;  %v8528_v1 = vand.u32 4294901760, %v8493_v51  ;;  %v14424_v7 = vand.u32 4294901760, %v8510_v59 }
  0x18   : > { %15315 = vst [vmem:[#allocation13_spill] sm:$0xff] %v8513_v60  ;;  %v1829_v63 = vsub.f32 %v8475_v45, %v14426_v55  ;;  %646 = vmatprep.subr.mxu0 %v8410_v24  ;;  %1807 = vmatprep.subr.mxu1 %v1806_v53  ;;  %v1824_v6 = vand.u32 4294901760, %v1823_v58  ;;  %v8539_v8 = vsub.f32 %v8390_v19, %v8404_v22  ;;  %v8542_v12 = vand.u32 4294901760, %v8503_v56 }
  0x19   : > { %15316 = vst [vmem:[#allocation14_spill] sm:$0xff] %v8525_v0  ;;  %15317 = vst [vmem:[#allocation15_spill] sm:$0xff] %v8528_v1  ;;  %648 = vmatpush1.msra.mxu0 %v8433_v30  ;;  %1813 = vmatpush1.msra.mxu1 %v1812_v57  ;;  %v14422_v38 = vand.u32 4294901760, %v8525_v0  ;;  %v8553_v42 = vsub.f32 %v8395_v20, %v8410_v24  ;;  %v8556_v19 = vand.u32 4294901760, %v8518_v61  ;;  %v8568_v52 = vand.u32 4294901760, %v8533_v2  ;;  %v8573_v20 = vld [vmem:[%s14417_s0 + $0x48] sm:$0xff] }
  0x1a   : > { %15318 = vst [vmem:[#allocation16_spill] sm:$0xff] %v8539_v8  ;;  %15319 = vst [vmem:[#allocation17_spill] sm:$0xff] %v8542_v12  ;;  %v1830_v14 = vand.u32 4294901760, %v1829_v63  ;;  %650 = vmatprep.subr.mxu0 %v8439_v32  ;;  %1819 = vmatprep.subr.mxu1 %v1818_v62  ;;  %v1835_v43 = vsub.f32 %v8510_v59, %v14424_v7  ;;  %v14423_v47 = vand.u32 4294901760, %v8539_v8  ;;  %v8585_v57 = vand.u32 4294901760, %v8547_v13 }
  0x1b   : > { %15320 = vst [vmem:[#allocation18_spill] sm:$0xff] %v8553_v42  ;;  %15321 = vst [vmem:[#allocation19_spill] sm:$0xff] %v8556_v19  ;;  %v8565_v48 = vsub.f32 %v8400_v21, %v8433_v30  ;;  %652 = vmatpush1.msra.mxu0 %v8448_v36  ;;  %1825 = vmatpush1.msra.mxu1 %v1824_v6  ;;  %v1841_v53 = vsub.f32 %v8525_v0, %v14422_v38  ;;  %v14425_v54 = vand.u32 4294901760, %v8553_v42 }
  0x1c   : > { %15323 = vst [vmem:[#allocation21_spill] sm:$0xff] %v8568_v52  ;;  %v8582_v21 = vsub.f32 %v8418_v26, %v8439_v32  ;;  %15325 = vst [vmem:[#allocation23_spill] sm:$0xff] %v8585_v57  ;;  %654 = vmatprep.subr.mxu0 %v8464_v41  ;;  %1831 = vmatprep.subr.mxu1 %v1830_v14  ;;  %v1836_v58 = vand.u32 4294901760, %v1835_v43  ;;  %v1847_v62 = vsub.f32 %v8539_v8, %v14423_v47  ;;  %v8599_v26 = vld [vmem:[%s14417_s0 + $0x40] sm:$0xff] }
  0x1d   : > { %15322 = vst [vmem:[#allocation20_spill] sm:$0xff] %v8565_v48  ;;  %v14428_v63 = vand.u32 4294901760, %v8565_v48  ;;  %v8594_v6 = vsub.f32 %v8423_v27, %v8448_v36  ;;  %656 = vmatpush1.msra.mxu0 %v8488_v50  ;;  %v1842_v38 = vand.u32 4294901760, %v1841_v53  ;;  %v1853_v14 = vsub.f32 %v8553_v42, %v14425_v54  ;;  %v8612_v27 = vld [vmem:[%s14417_s0 + $0x38] sm:$0xff] }
  0x1e   : > { %15324 = vst [vmem:[#allocation22_spill] sm:$0xff] %v8582_v21  ;;  %v14430_v43 = vand.u32 4294901760, %v8582_v21  ;;  %v8607_v47 = vand.u32 4294901760, %v8573_v20  ;;  %1837 = vmatpush1.msra.mxu1 %v1836_v58  ;;  %658 = vmatprep.subr.mxu0 %v8513_v60  ;;  %v1848_v7 = vand.u32 4294901760, %v1847_v62  ;;  %v8621_v55 = vsub.f32 %v8428_v28, %v8464_v41 }
  0x1f   : > { %15326 = vst [vmem:[#allocation24_spill] sm:$0xff] %v8594_v6  ;;  %v1859_v53 = vsub.f32 %v8565_v48, %v14428_v63  ;;  %v14433_v54 = vand.u32 4294901760, %v8594_v6  ;;  %1843 = vmatprep.subr.mxu1 %v1842_v38  ;;  %660 = vmatpush1.msra.mxu0 %v8528_v1  ;;  %v1854_v58 = vand.u32 4294901760, %v1853_v14  ;;  %v8633_v63 = vand.u32 4294901760, %v8599_v26 }
  0x20   : > { %15327 = vst [vmem:[#allocation25_spill] sm:$0xff] %v8607_v47  ;;  %15328 = vst [vmem:[#allocation26_spill] sm:$0xff] %v8621_v55  ;;  %v1865_v62 = vsub.f32 %v8582_v21, %v14430_v43  ;;  %v8637_v28 = vsub.f32 %v8453_v37, %v8488_v50  ;;  %1849 = vmatpush1.msra.mxu1 %v1848_v7  ;;  %662 = vmatprep.subr.mxu0 %v8542_v12  ;;  %v14438_v43 = vand.u32 4294901760, %v8621_v55  ;;  %v8655_v37 = vld [vmem:[%s14417_s0 + $0x20] sm:$0xff] }
  0x21   : > { %15329 = vst [vmem:[#allocation27_spill] sm:$0xff] %v8633_v63  ;;  %v1860_v38 = vand.u32 4294901760, %v1859_v53  ;;  %v1871_v14 = vsub.f32 %v8594_v6, %v14433_v54  ;;  %v8650_v39 = vand.u32 4294901760, %v8612_v27  ;;  %1855 = vmatprep.subr.mxu1 %v1854_v58  ;;  %664 = vmatpush1.msra.mxu0 %v8556_v19  ;;  %v8661_v34 = vsub.f32 %v8480_v46, %v8513_v60 }
  0x22   : > { %15330 = vst [vmem:[#allocation28_spill] sm:$0xff] %v8637_v28  ;;  %v1866_v7 = vand.u32 4294901760, %v1865_v62  ;;  %v14439_v53 = vand.u32 4294901760, %v8637_v28  ;;  %v8664_v54 = vand.u32 4294901760, %v8626_v49  ;;  %666 = vmatprep.subr.mxu0 %v8568_v52  ;;  %v1877_v62 = vsub.f32 %v8621_v55, %v14438_v43 }
  0x23   : > { %15331 = vst [vmem:[#allocation29_spill] sm:$0xff] %v8650_v39  ;;  %15332 = vst [vmem:[#allocation30_spill] sm:$0xff] %v8661_v34  ;;  %1861 = vmatpush1.msra.mxu1 %v1860_v38  ;;  %v1872_v58 = vand.u32 4294901760, %v1871_v14  ;;  %v8677_v46 = vsub.f32 %v8493_v51, %v8528_v1  ;;  %v8680_v29 = vand.u32 4294901760, %v8642_v44  ;;  %668 = vmatpush1.msra.mxu0 %v8585_v57  ;;  %v8692_v43 = vand.u32 4294901760, %v8655_v37  ;;  %v8697_v51 = vld [vmem:[%s14417_s0 + $0x10] sm:$0xff] }
  0x24   : > { %15333 = vst [vmem:[#allocation31_spill] sm:$0xff] %v8664_v54  ;;  %1867 = vmatprep.subr.mxu1 %v1866_v7  ;;  %v1883_v38 = vsub.f32 %v8637_v28, %v14439_v53  ;;  %v8689_v60 = vsub.f32 %v8503_v56, %v8542_v12  ;;  %670 = vmatprep.subr.mxu0 %v8607_v47  ;;  %v1878_v7 = vand.u32 4294901760, %v1877_v62  ;;  %v8710_v14 = vand.u32 4294901760, %v8669_v33  ;;  %v8715_v12 = vld [vmem:[%s14417_s0 + $0x8] sm:$0xff] }
  0x25   : > { %15334 = vst [vmem:[#allocation32_spill] sm:$0xff] %v8677_v46  ;;  %15335 = vst [vmem:[#allocation33_spill] sm:$0xff] %v8680_v29  ;;  %1873 = vmatpush1.msra.mxu1 %v1872_v58  ;;  %v8707_v56 = vsub.f32 %v8518_v61, %v8556_v19  ;;  %672 = vmatpush1.msra.mxu0 %v8633_v63  ;;  %v15340_v1 = vand.u32 4294901760, %v8661_v34  ;;  %v8724_v61 = vsub.f32 %v8533_v2, %v8568_v52  ;;  %v8741_v2 = vld [vmem:[%s14417_s0] sm:$0xff] }
  0x26   : > { %15336 = vst [vmem:[#allocation34_spill] sm:$0xff] %v8689_v60  ;;  %15337 = vst [vmem:[#allocation35_spill] sm:$0xff] %v8692_v43  ;;  %v1884_v58 = vand.u32 4294901760, %v1883_v38  ;;  %v14454_v53 = vand.u32 4294901760, %v8689_v60  ;;  %1879 = vmatprep.subr.mxu1 %v1878_v7  ;;  %674 = vmatprep.subr.mxu0 %v8650_v39  ;;  %v15342_v19 = vand.u32 4294901760, %v8677_v46  ;;  %v8732_v41 = vand.u32 4294901760, %v8697_v51 }
  0x27   : > { %15338 = vst [vmem:[#allocation36_spill] sm:$0xff] %v8707_v56  ;;  %15339 = vst [vmem:[#allocation37_spill] sm:$0xff] %v8710_v14  ;;  %v1889_v62 = vsub.f32 %v8661_v34, %v15340_v1  ;;  %v8736_v1 = vsub.f32 %v8547_v13, %v8585_v57  ;;  %676 = vmatpush1.msra.mxu0 %v8664_v54  ;;  %v8749_v52 = vand.u32 4294901760, %v8715_v12  ;;  %v8754_v13 = vld [vmem:[%s14417_s0 + $0x158] sm:$0xff] }
  0x28   : > { %15341 = vst [vmem:[#allocation38_spill] sm:$0xff] %v8724_v61  ;;  %v1895_v50 = vsub.f32 %v8677_v46, %v15342_v19  ;;  %15343 = vst [vmem:[#allocation39_spill] sm:$0xff] %v8732_v41  ;;  %1885 = vmatpush1.msra.mxu1 %v1884_v58  ;;  %v1901_v19 = vsub.f32 %v8689_v60, %v14454_v53  ;;  %678 = vmatprep.subr.mxu0 %v8680_v29  ;;  %v15346_v58 = vand.u32 4294901760, %v8707_v56  ;;  %v8769_v60 = vld [vmem:[%s14417_s0 + $0x150] sm:$0xff] }
  0x29   : > { %15344 = vst [vmem:[#allocation40_spill] sm:$0xff] %v8736_v1  ;;  %v1890_v7 = vand.u32 4294901760, %v1889_v62  ;;  %15345 = vst [vmem:[#allocation41_spill] sm:$0xff] %v8749_v52  ;;  %v14467_v53 = vand.u32 4294901760, %v8736_v1  ;;  %v8764_v38 = vsub.f32 %v8573_v20, %v8607_v47  ;;  %680 = vmatpush1.msra.mxu0 %v8692_v43  ;;  %v8780_v20 = vsub.f32 %v8599_v26, %v8633_v63  ;;  %v8798_v63 = vld [vmem:[%s14417_s0 + $0x140] sm:$0xff]  ;;  %v8812_v47 = vld [vmem:[%s14417_s0 + $0x138] sm:$0xff] }
  0x2a   : > { %v1896_v57 = vand.u32 4294901760, %v1895_v50  ;;  %v1907_v62 = vsub.f32 %v8707_v56, %v15346_v58  ;;  %v1902_v46 = vand.u32 4294901760, %v1901_v19  ;;  %v15348_v50 = vand.u32 4294901760, %v8724_v61  ;;  %682 = vmatprep.subr.mxu0 %v8710_v14 }
  0x2b   : > { %15347 = vst [vmem:[#allocation42_spill] sm:$0xff] %v8764_v38  ;;  %1891 = vmatprep.subr.mxu1 %v1890_v7  ;;  %v8776_v58 = vand.u32 4294901760, %v8741_v2  ;;  %15350 = vst [vmem:[#allocation44_spill] sm:$0xff] %v8780_v20  ;;  %v8785_v7 = vld [vmem:[%s14417_s0 + $0x148] sm:$0xff]  ;;  %v8793_v26 = vand.u32 4294901760, %v8754_v13  ;;  %684 = vmatpush1.msra.mxu0 %v8732_v41  ;;  %v8837_v56 = vsub.f32 %v8642_v44, %v8680_v29 }
  0x2c   : > { %v1913_v34 = vsub.f32 %v8724_v61, %v15348_v50  ;;  %1897 = vmatpush1.msra.mxu1 %v1896_v57  ;;  %v1908_v19 = vand.u32 4294901760, %v1907_v62  ;;  %v1919_v50 = vsub.f32 %v8736_v1, %v14467_v53  ;;  %v8804_v62 = vsub.f32 %v8612_v27, %v8650_v39  ;;  %686 = vmatprep.subr.mxu0 %v8749_v52  ;;  %v8859_v29 = vld [vmem:[%s14417_s0 + $0x128] sm:$0xff] }
  0x2d   : > { %15349 = vst [vmem:[#allocation43_spill] sm:$0xff] %v8776_v58  ;;  %15351 = vst [vmem:[#allocation45_spill] sm:$0xff] %v8793_v26  ;;  %1903 = vmatprep.subr.mxu1 %v1902_v46  ;;  %v8807_v53 = vand.u32 4294901760, %v8769_v60  ;;  %v15354_v46 = vand.u32 4294901760, %v8764_v38  ;;  %v8825_v57 = vsub.f32 %v8626_v49, %v8664_v54  ;;  %v8828_v39 = vand.u32 4294901760, %v8785_v7  ;;  %688 = vmatpush1.msra.mxu0 %v8776_v58 }
  0x2e   : > { %v1914_v61 = vand.u32 4294901760, %v1913_v34  ;;  %15352 = vst [vmem:[#allocation46_spill] sm:$0xff] %v8804_v62  ;;  %1909 = vmatpush1.msra.mxu1 %v1908_v19  ;;  %v1920_v34 = vand.u32 4294901760, %v1919_v50  ;;  %v15357_v1 = vand.u32 4294901760, %v8780_v20  ;;  %15358 = vst [vmem:[#allocation50_spill] sm:$0xff] %v8837_v56  ;;  %v8840_v49 = vand.u32 4294901760, %v8798_v63  ;;  %710 = vmatprep.subr.mxu0 %v8793_v26 }
  0x2f   : > { %15353 = vst [vmem:[#allocation47_spill] sm:$0xff] %v8807_v53  ;;  %v1925_v27 = vsub.f32 %v8764_v38, %v15354_v46  ;;  %15355 = vst [vmem:[#allocation48_spill] sm:$0xff] %v8825_v57  ;;  %v8851_v44 = vsub.f32 %v8655_v37, %v8692_v43  ;;  %v8854_v50 = vand.u32 4294901760, %v8812_v47  ;;  %712 = vmatpush2.msra.mxu0 %v8807_v53  ;;  %v15364_v43 = vand.u32 4294901760, %v8825_v57 }
  0x30   : > { %15356 = vst [vmem:[#allocation49_spill] sm:$0xff] %v8828_v39  ;;  %1915 = vmatprep.subr.mxu1 %v1914_v61  ;;  %v1931_v19 = vsub.f32 %v8780_v20, %v15357_v1  ;;  %15359 = vst [vmem:[#allocation51_spill] sm:$0xff] %v8840_v49  ;;  %v8845_v61 = vld [vmem:[%s14417_s0 + $0x130] sm:$0xff]  ;;  %v8868_v37 = vsub.f32 %v8669_v33, %v8710_v14  ;;  %714 = vmatprep.subr.mxu0 %v8828_v39  ;;  %v8886_v33 = vld [vmem:[%s14417_s0 + $0x120] sm:$0xff] }
  0x31   : > { %1921 = vmatpush1.msra.mxu1 %v1920_v34  ;;  %v1926_v46 = vand.u32 4294901760, %v1925_v27  ;;  %15360 = vst [vmem:[#allocation52_spill] sm:$0xff] %v8851_v44  ;;  %15361 = vst [vmem:[#allocation53_spill] sm:$0xff] %v8854_v50  ;;  %v15362_v34 = vand.u32 4294901760, %v8804_v62  ;;  %v1943_v20 = vsub.f32 %v8825_v57, %v15364_v43  ;;  %v8881_v1 = vsub.f32 %v8697_v51, %v8732_v41  ;;  %v8899_v51 = vld [vmem:[%s14417_s0 + $0x118] sm:$0xff] }
  0x32   : > { %v1932_v54 = vand.u32 4294901760, %v1931_v19  ;;  %15363 = vst [vmem:[#allocation54_spill] sm:$0xff] %v8868_v37  ;;  %v15367_v43 = vand.u32 4294901760, %v8837_v56  ;;  %716 = vmatpush2.msra.mxu0 %v8840_v49  ;;  %v8894_v57 = vand.u32 4294901760, %v8859_v29  ;;  %v8908_v19 = vsub.f32 %v8715_v12, %v8749_v52 }
  0x33   : > { %v1937_v27 = vsub.f32 %v8804_v62, %v15362_v34  ;;  %1927 = vmatprep.subr.mxu1 %v1926_v46  ;;  %v8877_v34 = vand.u32 4294901760, %v8845_v61  ;;  %15366 = vst [vmem:[#allocation56_spill] sm:$0xff] %v8881_v1  ;;  %v1944_v41 = vand.u32 4294901760, %v1943_v20  ;;  %718 = vmatprep.subr.mxu0 %v8854_v50  ;;  %v8927_v12 = vand.u32 4294901760, %v8886_v33 }
  0x34   : > { %1933 = vmatpush1.msra.mxu1 %v1932_v54  ;;  %v1949_v14 = vsub.f32 %v8837_v56, %v15367_v43  ;;  %15368 = vst [vmem:[#allocation57_spill] sm:$0xff] %v8894_v57  ;;  %v15369_v54 = vand.u32 4294901760, %v8851_v44  ;;  %15370 = vst [vmem:[#allocation58_spill] sm:$0xff] %v8908_v19  ;;  %v8913_v56 = vld [vmem:[%s14417_s0 + $0x110] sm:$0xff]  ;;  %v8931_v52 = vsub.f32 %v8741_v2, %v8776_v58  ;;  %v8944_v62 = vand.u32 4294901760, %v8899_v51  ;;  %v8949_v2 = vld [vmem:[%s14417_s0 + $0x100] sm:$0xff] }
  0x35   : > { %15365 = vst [vmem:[#allocation55_spill] sm:$0xff] %v8877_v34  ;;  %v1938_v46 = vand.u32 4294901760, %v1937_v27  ;;  %720 = vmatpush2.msra.mxu0 %v8877_v34  ;;  %15372 = vst [vmem:[#allocation59_spill] sm:$0xff] %v8927_v12  ;;  %v15377_v38 = vand.u32 4294901760, %v8908_v19 }
  0x36   : > { %v1955_v27 = vsub.f32 %v8851_v44, %v15369_v54  ;;  %v1950_v20 = vand.u32 4294901760, %v1949_v14  ;;  %v15371_v54 = vand.u32 4294901760, %v8868_v37  ;;  %15373 = vst [vmem:[#allocation60_spill] sm:$0xff] %v8931_v52  ;;  %v8936_v44 = vld [vmem:[%s14417_s0 + $0x108] sm:$0xff]  ;;  %722 = vmatprep.subr.mxu0 %v8894_v57  ;;  %15375 = vst [vmem:[#allocation61_spill] sm:$0xff] %v8944_v62 }
  0x37   : > { %1939 = vmatprep.subr.mxu1 %v1938_v46  ;;  %v15374_v46 = vand.u32 4294901760, %v8881_v1  ;;  %724 = vmatpush2.msra.mxu0 %v8927_v12 }
  0x38   : > { %v1961_v43 = vsub.f32 %v8868_v37, %v15371_v54  ;;  %1945 = vmatpush1.msra.mxu1 %v1944_v41  ;;  %v1956_v14 = vand.u32 4294901760, %v1955_v27  ;;  %v8955_v27 = vsub.f32 %v8754_v13, %v8793_v26  ;;  %v251_v37 = vld [vmem:[%s8920_s6 + $0x8] sm:$0xff]  ;;  %726 = vmatprep.subr.mxu0 %v8944_v62  ;;  %v8970_v41 = vand.u32 4294901760, %v8936_v44 }
  0x39   : > { %v1967_v54 = vsub.f32 %v8881_v1, %v15374_v46  ;;  %1951 = vmatprep.subr.mxu1 %v1950_v20  ;;  %v8958_v46 = vand.u32 4294901760, %v8913_v56  ;;  %v1973_v20 = vsub.f32 %v8908_v19, %v15377_v38  ;;  %v15380_v13 = vand.u32 4294901760, %v8931_v52 }
  0x3a   : > { %v1962_v58 = vand.u32 4294901760, %v1961_v43  ;;  %1957 = vmatpush1.msra.mxu1 %v1956_v14  ;;  %v8967_v43 = vsub.f32 %v8769_v60, %v8807_v53  ;;  %15379 = vst [vmem:[#allocation64_spill] sm:$0xff] %v8970_v41  ;;  %v8979_v38 = vsub.f32 %v8785_v7, %v8828_v39  ;;  %v250_v60 = vld [vmem:[%s8920_s6] sm:$0xff]  ;;  %v8990_v14 = vsub.f32 %v8798_v63, %v8840_v49  ;;  %v253_v63 = vld [vmem:[%s8920_s6 + $0x18] sm:$0xff] }
  0x3b   : > { %15376 = vst [vmem:[#allocation62_spill] sm:$0xff] %v8958_v46  ;;  %v1968_v1 = vand.u32 4294901760, %v1967_v54  ;;  %v1979_v26 = vsub.f32 %v8931_v52, %v15380_v13  ;;  %728 = vmatpush2.msra.mxu0 %v8958_v46  ;;  %v8982_v54 = vand.u32 4294901760, %v8949_v2  ;;  %v1974_v53 = vand.u32 4294901760, %v1973_v20 }
  0x3c   : > { %15378 = vst [vmem:[#allocation63_spill] sm:$0xff] %v8967_v43  ;;  %1963 = vmatprep.subr.mxu1 %v1962_v58  ;;  %15381 = vst [vmem:[#allocation65_spill] sm:$0xff] %v8979_v38  ;;  %v14516_v58 = vand.u32 4294901760, %v8967_v43  ;;  %730 = vmatprep.subr.mxu0 %v8970_v41  ;;  %v428_v13 = vsel %vm426_vm0, %v251_v37, 0  ;;  %v15384_v7 = vand.u32 4294901760, %v8955_v27  ;;  %v14518_v19 = vand.u32 4294901760, %v8979_v38 }
  0x3d   : > { %15382 = vst [vmem:[#allocation66_spill] sm:$0xff] %v8982_v54  ;;  %1969 = vmatpush1.msra.mxu1 %v1968_v1  ;;  %15383 = vst [vmem:[#allocation67_spill] sm:$0xff] %v8990_v14  ;;  %v1980_v52 = vand.u32 4294901760, %v1979_v26  ;;  %732 = vmatpush2.msra.mxu0 %v8982_v54  ;;  %v8997_v1 = vand.u32 4294901760, %v428_v13  ;;  %v9003_v20 = vand.u32 4294901760, %v250_v60  ;;  %v9007_v26 = vsub.f32 %v8812_v47, %v8854_v50 }
  0x3e   : > { %v2005_v39 = vsub.f32 %v8955_v27, %v15384_v7  ;;  %1975 = vmatprep.subr.mxu1 %v1974_v53  ;;  %v2011_v37 = vsub.f32 %v8967_v43, %v14516_v58  ;;  %2605 = vmatprep.subr.mxu0 %v8385_v18  ;;  %v2017_v53 = vsub.f32 %v8979_v38, %v14518_v19  ;;  %v15390_v18 = vand.u32 4294901760, %v8990_v14 }
  0x3f   : > { %15385 = vst [vmem:[#allocation68_spill] sm:$0xff] %v8997_v1  ;;  %15386 = vst [vmem:[#allocation69_spill] sm:$0xff] %v9003_v20  ;;  %1981 = vmatpush1.msra.mxu1 %v1980_v52  ;;  %v9014_v49 = vsub.f32 %v428_v13, %v8997_v1  ;;  %v9018_v58 = vsub.f32 %v8845_v61, %v8877_v34  ;;  %2075 = vmatprep.mubr.f32.mxu1 %v8997_v1  ;;  %v14525_v19 = vand.u32 4294901760, %v9007_v26 }
  0x40   : > { %15387 = vst [vmem:[#allocation70_spill] sm:$0xff] %v9007_v26  ;;  %v2006_v7 = vand.u32 4294901760, %v2005_v39  ;;  %v2012_v47 = vand.u32 4294901760, %v2011_v37  ;;  %v2023_v52 = vsub.f32 %v8990_v14, %v15390_v18  ;;  %v9026_v39 = vsub.f32 %v250_v60, %v9003_v20  ;;  %v252_v37 = vld [vmem:[%s8920_s6 + $0x10] sm:$0xff] }
  0x41   : > { %15388 = vst [vmem:[#allocation71_spill] sm:$0xff] %v9014_v49  ;;  %15389 = vst [vmem:[#allocation72_spill] sm:$0xff] %v9018_v58  ;;  %v2018_v13 = vand.u32 4294901760, %v2017_v53  ;;  %v14528_v50 = vand.u32 4294901760, %v9014_v49  ;;  %v14531_v61 = vand.u32 4294901760, %v9018_v58  ;;  %v9033_v34 = vsub.f32 %v8859_v29, %v8894_v57 }
  0x42   : > { %15391 = vst [vmem:[#allocation73_spill] sm:$0xff] %v9026_v39  ;;  %2007 = vmatprep.subr.mxu1 %v2006_v7  ;;  %v2024_v1 = vand.u32 4294901760, %v2023_v52  ;;  %v14536_v18 = vand.u32 4294901760, %v9026_v39  ;;  %v2029_v60 = vsub.f32 %v9007_v26, %v14525_v19  ;;  %v431_v7 = vsel %vm426_vm0, %v253_v63, 0 }
  0x43   : > { %15392 = vst [vmem:[#allocation74_spill] sm:$0xff] %v9033_v34  ;;  %2013 = vmatpush2.msra.mxu1 %v2012_v47  ;;  %v736_v53 = vsub.f32 %v9014_v49, %v14528_v50  ;;  %v2035_v29 = vsub.f32 %v9018_v58, %v14531_v61  ;;  %v14538_v47 = vand.u32 4294901760, %v9033_v34  ;;  %v9048_v52 = vand.u32 4294901760, %v431_v7 }
  0x44   : > { %2019 = vmatprep.subr.mxu1 %v2018_v13  ;;  %v742_v19 = vsub.f32 %v9026_v39, %v14536_v18  ;;  %v2030_v57 = vand.u32 4294901760, %v2029_v60  ;;  %v9055_v63 = vsub.f32 %v8886_v33, %v8927_v12  ;;  %v9057_v13 = vand.u32 4294901760, %v252_v37 }
  0x45   : > { %15393 = vst [vmem:[#allocation75_spill] sm:$0xff] %v9048_v52  ;;  %2025 = vmatpush2.msra.mxu1 %v2024_v1  ;;  %v737_v50 = vand.u32 4294901760, %v736_v53  ;;  %v2036_v49 = vand.u32 4294901760, %v2035_v29  ;;  %v2041_v61 = vsub.f32 %v9033_v34, %v14538_v47  ;;  %v9063_v58 = vsub.f32 %v431_v7, %v9048_v52  ;;  %v255_v1 = vld [vmem:[%s8920_s6 + $0x28] sm:$0xff] }
  0x46   : > { %15394 = vst [vmem:[#allocation76_spill] sm:$0xff] %v9055_v63  ;;  %15395 = vst [vmem:[#allocation77_spill] sm:$0xff] %v9057_v13  ;;  %v743_v26 = vand.u32 4294901760, %v742_v19  ;;  %2031 = vmatprep.subr.mxu1 %v2030_v57  ;;  %v14537_v60 = vand.u32 4294901760, %v9055_v63  ;;  %v9068_v18 = vsub.f32 %v252_v37, %v9057_v13  ;;  %v9072_v33 = vsub.f32 %v8899_v51, %v8944_v62  ;;  %v254_v37 = vld [vmem:[%s8920_s6 + $0x20] sm:$0xff] }
  0x47   : > { %15396 = vst [vmem:[#allocation78_spill] sm:$0xff] %v9063_v58  ;;  %738 = vmatprep.mubr.f32.mxu0 %v737_v50  ;;  %2037 = vmatpush2.msra.mxu1 %v2036_v49  ;;  %v2042_v53 = vand.u32 4294901760, %v2041_v61  ;;  %v14539_v29 = vand.u32 4294901760, %v9063_v58  ;;  %v9077_v7 = vsub.f32 %v8913_v56, %v8958_v46  ;;  %v9081_v57 = vsub.f32 %v8936_v44, %v8970_v41 }
  0x48   : > { %15397 = vst [vmem:[#allocation79_spill] sm:$0xff] %v9068_v18  ;;  %15398 = vst [vmem:[#allocation80_spill] sm:$0xff] %v9072_v33  ;;  %744 = vmatmul.mubr.f32.vlgmr.msra.gmra.mxu0 %v743_v26  ;;  %v2047_v19 = vsub.f32 %v9055_v63, %v14537_v60  ;;  %v14540_v50 = vand.u32 4294901760, %v9068_v18  ;;  %v14543_v49 = vand.u32 4294901760, %v9072_v33  ;;  %v434_v51 = vsel %vm426_vm0, %v255_v1, 0 }
  0x49   : > { %15399 = vst [vmem:[#allocation81_spill] sm:$0xff] %v9077_v7  ;;  %15400 = vst [vmem:[#allocation82_spill] sm:$0xff] %v9081_v57  ;;  %2043 = vmatprep.subr.mxu1 %v2042_v53  ;;  %v752_v56 = vsub.f32 %v9063_v58, %v14539_v29  ;;  %v14552_v44 = vand.u32 4294901760, %v9077_v7  ;;  %v9094_v61 = vand.u32 4294901760, %v434_v51  ;;  %2608 = vmatpush1.msra.mxu0 %v8407_v23  ;;  %v257_v29 = vld [vmem:[%s8920_s6 + $0x38] sm:$0xff]  ;;  %v256_v23 = vld [vmem:[%s8920_s6 + $0x30] sm:$0xff] }
  0x4a   : > { %v2048_v60 = vand.u32 4294901760, %v2047_v19  ;;  %v758_v1 = vsub.f32 %v9068_v18, %v14540_v50  ;;  %v2053_v53 = vsub.f32 %v9072_v33, %v14543_v49  ;;  %v9106_v47 = vsub.f32 %v8949_v2, %v8982_v54  ;;  %2611 = vmatprep.subr.mxu0 %v8413_v25  ;;  %v259_v58 = vld [vmem:[%s8920_s6 + $0x48] sm:$0xff]  ;;  %v258_v54 = vld [vmem:[%s8920_s6 + $0x40] sm:$0xff] }
  0x4b   : > { %15401 = vst [vmem:[#allocation83_spill] sm:$0xff] %v9094_v61  ;;  %v753_v26 = vand.u32 4294901760, %v752_v56  ;;  %v2059_v19 = vsub.f32 %v9077_v7, %v14552_v44  ;;  %v15403_v50 = vand.u32 4294901760, %v9081_v57  ;;  %v9117_v49 = vsub.f32 %v434_v51, %v9094_v61  ;;  %2614 = vmatpush1.msra.mxu0 %v8436_v31  ;;  %v261_v44 = vld [vmem:[%s8920_s6 + $0x58] sm:$0xff] }
  0x4c   : > { %15402 = vst [vmem:[#allocation84_spill] sm:$0xff] %v9106_v47  ;;  %2049 = vmatpush2.msra.mxu1 %v2048_v60  ;;  %v759_v2 = vand.u32 4294901760, %v758_v1  ;;  %v2054_v39 = vand.u32 4294901760, %v2053_v53  ;;  %v14557_v56 = vand.u32 4294901760, %v9106_v47  ;;  %v9123_v25 = vand.u32 4294901760, %v254_v37  ;;  %2617 = vmatprep.subr.mxu0 %v8445_v35 }
  0x4d   : > { %v2065_v18 = vsub.f32 %v9081_v57, %v15403_v50  ;;  %754 = vmatprep.mubr.f32.mxu0 %v753_v26  ;;  %v2060_v50 = vand.u32 4294901760, %v2059_v19  ;;  %v14559_v41 = vand.u32 4294901760, %v9117_v49  ;;  %v437_v57 = vsel %vm426_vm0, %v257_v29, 0  ;;  %2620 = vmatpush1.msra.mxu0 %v8461_v40 }
  0x4e   : > { %15404 = vst [vmem:[#allocation85_spill] sm:$0xff] %v9123_v25  ;;  %760 = vmatmul.mubr.f32.gmra.mxu0 %v759_v2  ;;  %2055 = vmatprep.subr.mxu1 %v2054_v39  ;;  %v2071_v60 = vsub.f32 %v9106_v47, %v14557_v56  ;;  %v9135_v1 = vsub.f32 %v254_v37, %v9123_v25  ;;  %v9137_v26 = vand.u32 4294901760, %v437_v57  ;;  %v9139_v53 = vand.u32 4294901760, %v256_v23  ;;  %v260_v2 = vld [vmem:[%s8920_s6 + $0x50] sm:$0xff] }
  0x4f   : > { %v2066_v51 = vand.u32 4294901760, %v2065_v18  ;;  %2061 = vmatpush2.msra.mxu1 %v2060_v50  ;;  %v768_v18 = vsub.f32 %v9117_v49, %v14559_v41  ;;  %v440_v29 = vsel %vm426_vm0, %v259_v58, 0  ;;  %v9145_v39 = vand.u32 4294901760, %v258_v54  ;;  %2623 = vmatprep.subr.mxu0 %v8475_v45  ;;  %v263_v41 = vld [vmem:[%s8920_s6 + $0x68] sm:$0xff]  ;;  %v264_v45 = vld [vmem:[%s8920_s6 + $0x70] sm:$0xff] }
  0x50   : > { %15405 = vst [vmem:[#allocation86_spill] sm:$0xff] %v9137_v26  ;;  %15406 = vst [vmem:[#allocation87_spill] sm:$0xff] %v9139_v53  ;;  %v443_v19 = vsel %vm426_vm0, %v261_v44, 0  ;;  %v2072_v37 = vand.u32 4294901760, %v2071_v60  ;;  %v14561_v56 = vand.u32 4294901760, %v9135_v1  ;;  %v9152_v40 = vsub.f32 %v437_v57, %v9137_v26  ;;  %2626 = vmatpush1.msra.mxu0 %v8510_v59  ;;  %v262_v60 = vld [vmem:[%s8920_s6 + $0x60] sm:$0xff] }
  0x51   : > { %15407 = vst [vmem:[#allocation88_spill] sm:$0xff] %v9145_v39  ;;  %2067 = vmatprep.subr.mxu1 %v2066_v51  ;;  %v9155_v50 = vsub.f32 %v256_v23, %v9139_v53  ;;  %v769_v58 = vand.u32 4294901760, %v768_v18  ;;  %v9159_v35 = vand.u32 4294901760, %v440_v29  ;;  %v9162_v44 = vsub.f32 %v258_v54, %v9145_v39  ;;  %2629 = vmatprep.subr.mxu0 %v8525_v0 }
  0x52   : > { %v9164_v51 = vand.u32 4294901760, %v443_v19  ;;  %2073 = vmatpush2.msra.mxu1 %v2072_v37  ;;  %v774_v23 = vsub.f32 %v9135_v1, %v14561_v56  ;;  %v9172_v18 = vand.u32 4294901760, %v260_v2  ;;  %2632 = vmatpush1.msra.mxu0 %v8539_v8  ;;  %v446_v57 = vsel %vm426_vm0, %v263_v41, 0 }
  0x53   : > { %15408 = vst [vmem:[#allocation89_spill] sm:$0xff] %v9155_v50  ;;  %15409 = vst [vmem:[#allocation90_spill] sm:$0xff] %v9159_v35  ;;  %770 = vmatprep.mubr.f32.mxu0 %v769_v58  ;;  %2077 = vmatmul.mubr.f32.vlgmr.msra.gmra.mxu1 %v9003_v20  ;;  %v9177_v54 = vsub.f32 %v440_v29, %v9159_v35  ;;  %v15415_v58 = vand.u32 4294901760, %v9152_v40  ;;  %v15416_v29 = vand.u32 4294901760, %v9155_v50  ;;  %v9202_v59 = vand.u32 4294901760, %v446_v57 }
  0x54   : > { %15410 = vst [vmem:[#allocation91_spill] sm:$0xff] %v9162_v44  ;;  %15411 = vst [vmem:[#allocation92_spill] sm:$0xff] %v9164_v51  ;;  %v9181_v56 = vsub.f32 %v443_v19, %v9164_v51  ;;  %v775_v0 = vand.u32 4294901760, %v774_v23  ;;  %3417 = vmatprep.subr.mxu1 %v8347_v3  ;;  %2083 = vmatprep.mubr.f32.mxu1 %v9048_v52  ;;  %v9194_v8 = vsub.f32 %v260_v2, %v9172_v18  ;;  %v265_v52 = vld [vmem:[%s8920_s6 + $0x78] sm:$0xff] }
  0x55   : > { %15412 = vst [vmem:[#allocation93_spill] sm:$0xff] %v9172_v18  ;;  %15413 = vst [vmem:[#allocation94_spill] sm:$0xff] %v9177_v54  ;;  %v784_v20 = vsub.f32 %v9152_v40, %v15415_v58  ;;  %v790_v37 = vsub.f32 %v9155_v50, %v15416_v29  ;;  %3419 = vmatpush1.msra.mxu1 %v8349_v4  ;;  %v15418_v19 = vand.u32 4294901760, %v9162_v44  ;;  %2635 = vmatprep.subr.mxu0 %v8553_v42 }
  0x56   : > { %15414 = vst [vmem:[#allocation95_spill] sm:$0xff] %v9181_v56  ;;  %15417 = vst [vmem:[#allocation96_spill] sm:$0xff] %v9194_v8  ;;  %776 = vmatmul.mubr.f32.gmra.mxu0 %v775_v0  ;;  %3421 = vmatprep.subr.mxu1 %v8351_v5  ;;  %v9209_v41 = vand.u32 4294901760, %v262_v60  ;;  %v9219_v0 = vsub.f32 %v446_v57, %v9202_v59 }
  0x57   : > { %v806_v23 = vsub.f32 %v9162_v44, %v15418_v19  ;;  %15419 = vst [vmem:[#allocation97_spill] sm:$0xff] %v9202_v59  ;;  %v785_v2 = vand.u32 4294901760, %v784_v20  ;;  %v791_v29 = vand.u32 4294901760, %v790_v37  ;;  %2085 = vmatmul.mubr.f32.gmra.mxu1 %v9057_v13  ;;  %v15421_v19 = vand.u32 4294901760, %v9177_v54  ;;  %v267_v20 = vld [vmem:[%s8920_s6 + $0x88] sm:$0xff]  ;;  %2638 = vmatpush1.msra.mxu0 %v8565_v48 }
  0x58   : > { %15420 = vst [vmem:[#allocation98_spill] sm:$0xff] %v9209_v41  ;;  %v15422_v44 = vand.u32 4294901760, %v9181_v56  ;;  %15423 = vst [vmem:[#allocation99_spill] sm:$0xff] %v9219_v0  ;;  %2091 = vmatprep.mubr.f32.mxu1 %v9094_v61  ;;  %v9225_v50 = vsub.f32 %v262_v60, %v9209_v41  ;;  %v9228_v13 = vand.u32 4294901760, %v264_v45  ;;  %3423 = vmatpush1.msra.mxu1 %v8362_v9 }
  0x59   : > { %v800_v58 = vsub.f32 %v9177_v54, %v15421_v19  ;;  %786 = vmatprep.mubr.f32.mxu0 %v785_v2  ;;  %v807_v37 = vand.u32 4294901760, %v806_v23  ;;  %v449_v19 = vsel %vm426_vm0, %v265_v52, 0  ;;  %v266_v54 = vld [vmem:[%s8920_s6 + $0x80] sm:$0xff]  ;;  %v14586_v2 = vand.u32 4294901760, %v9219_v0  ;;  %v269_v23 = vld [vmem:[%s8920_s6 + $0x98] sm:$0xff]  ;;  %2641 = vmatprep.subr.mxu0 %v8582_v21 }
  0x5a   : > { %v816_v42 = vsub.f32 %v9181_v56, %v15422_v44  ;;  %15424 = vst [vmem:[#allocation100_spill] sm:$0xff] %v9225_v50  ;;  %15425 = vst [vmem:[#allocation101_spill] sm:$0xff] %v9228_v13  ;;  %v15426_v56 = vand.u32 4294901760, %v9194_v8  ;;  %v9236_v61 = vand.u32 4294901760, %v449_v19  ;;  %792 = vmatmul.mubr.f32.gmra.mxu0 %v791_v29  ;;  %3425 = vmatprep.subr.mxu1 %v8364_v10  ;;  %v9255_v60 = vand.u32 4294901760, %v266_v54 }
  0x5b   : > { %v801_v44 = vand.u32 4294901760, %v800_v58  ;;  %v9242_v58 = vsub.f32 %v264_v45, %v9228_v13  ;;  %2093 = vmatmul.mubr.f32.gmra.mxu1 %v9123_v25  ;;  %v832_v48 = vsub.f32 %v9219_v0, %v14586_v2  ;;  %v268_v45 = vld [vmem:[%s8920_s6 + $0x90] sm:$0xff]  ;;  %v15432_v25 = vand.u32 4294901760, %v9225_v50  ;;  %2644 = vmatpush1.msra.mxu0 %v8594_v6 }
  0x5c   : > { %v822_v57 = vsub.f32 %v9194_v8, %v15426_v56  ;;  %15427 = vst [vmem:[#allocation102_spill] sm:$0xff] %v9236_v61  ;;  %v817_v52 = vand.u32 4294901760, %v816_v42  ;;  %v452_v56 = vsel %vm426_vm0, %v267_v20, 0  ;;  %v9251_v29 = vsub.f32 %v449_v19, %v9236_v61  ;;  %15431 = vst [vmem:[#allocation106_spill] sm:$0xff] %v9255_v60  ;;  %2099 = vmatprep.mubr.f32.mxu1 %v9137_v26  ;;  %v270_v19 = vld [vmem:[%s8920_s6 + $0xa0] sm:$0xff] }
  0x5d   : > { %15428 = vst [vmem:[#allocation103_spill] sm:$0xff] %v9242_v58  ;;  %802 = vmatprep.mubr.f32.mxu0 %v801_v44  ;;  %v9253_v42 = vand.u32 4294901760, %v452_v56  ;;  %3427 = vmatpush1.msra.mxu1 %v8366_v11  ;;  %v455_v20 = vsel %vm426_vm0, %v269_v23, 0  ;;  %v271_v44 = vld [vmem:[%s8920_s6 + $0xa8] sm:$0xff]  ;;  %v838_v2 = vsub.f32 %v9225_v50, %v15432_v25  ;;  %v9273_v23 = vsub.f32 %v266_v54, %v9255_v60 }
  0x5e   : > { %15429 = vst [vmem:[#allocation104_spill] sm:$0xff] %v9251_v29  ;;  %3429 = vmatprep.subr.mxu1 %v8378_v15  ;;  %808 = vmatmul.mubr.f32.gmra.mxu0 %v807_v37  ;;  %v823_v26 = vand.u32 4294901760, %v822_v57  ;;  %v9275_v8 = vand.u32 4294901760, %v455_v20  ;;  %v9277_v25 = vand.u32 4294901760, %v268_v45  ;;  %v15437_v21 = vand.u32 4294901760, %v9251_v29  ;;  %v273_v57 = vld [vmem:[%s8920_s6 + $0xb8] sm:$0xff] }
  0x5f   : > { %15430 = vst [vmem:[#allocation105_spill] sm:$0xff] %v9253_v42  ;;  %v9268_v0 = vsub.f32 %v452_v56, %v9253_v42  ;;  %15434 = vst [vmem:[#allocation108_spill] sm:$0xff] %v9273_v23  ;;  %3431 = vmatpush1.msra.mxu1 %v8380_v16  ;;  %818 = vmatprep.mubr.f32.mxu0 %v817_v52  ;;  %v833_v56 = vand.u32 4294901760, %v832_v48  ;;  %v458_v54 = vsel %vm426_vm0, %v271_v44, 0  ;;  %v839_v48 = vand.u32 4294901760, %v838_v2 }
  0x60   : > { %15435 = vst [vmem:[#allocation109_spill] sm:$0xff] %v9275_v8  ;;  %15436 = vst [vmem:[#allocation110_spill] sm:$0xff] %v9277_v25  ;;  %2101 = vmatmul.mubr.f32.gmra.mxu1 %v9139_v53  ;;  %v848_v6 = vsub.f32 %v9251_v29, %v15437_v21  ;;  %v9290_v50 = vsub.f32 %v455_v20, %v9275_v8  ;;  %v9292_v52 = vand.u32 4294901760, %v458_v54  ;;  %3433 = vmatprep.subr.mxu1 %v8382_v17 }
  0x61   : > { %15433 = vst [vmem:[#allocation107_spill] sm:$0xff] %v9268_v0  ;;  %2107 = vmatprep.mubr.f32.mxu1 %v9159_v35  ;;  %v15440_v53 = vand.u32 4294901760, %v9242_v58  ;;  %v9298_v37 = vand.u32 4294901760, %v270_v19  ;;  %3435 = vmatpush1.msra.mxu1 %v8404_v22  ;;  %v15442_v20 = vand.u32 4294901760, %v9268_v0  ;;  %v9307_v2 = vsub.f32 %v268_v45, %v9277_v25  ;;  %v277_v45 = vld [vmem:[%s8920_s6 + $0xd8] sm:$0xff] }
  0x62   : > { %15438 = vst [vmem:[#allocation111_spill] sm:$0xff] %v9290_v50  ;;  %15439 = vst [vmem:[#allocation112_spill] sm:$0xff] %v9292_v52  ;;  %2647 = vmatprep.subr.mxu0 %v8621_v55  ;;  %824 = vmatmul.mubr.f32.gmra.mxu0 %v823_v26  ;;  %v461_v29 = vsel %vm426_vm0, %v273_v57, 0  ;;  %v849_v55 = vand.u32 4294901760, %v848_v6  ;;  %v9316_v22 = vsub.f32 %v458_v54, %v9292_v52  ;;  %v15448_v26 = vand.u32 4294901760, %v9273_v23 }
  0x63   : > { %v854_v21 = vsub.f32 %v9242_v58, %v15440_v53  ;;  %15441 = vst [vmem:[#allocation113_spill] sm:$0xff] %v9298_v37  ;;  %v864_v44 = vsub.f32 %v9268_v0, %v15442_v20  ;;  %15443 = vst [vmem:[#allocation114_spill] sm:$0xff] %v9307_v2  ;;  %v272_v53 = vld [vmem:[%s8920_s6 + $0xb0] sm:$0xff]  ;;  %v275_v58 = vld [vmem:[%s8920_s6 + $0xc8] sm:$0xff]  ;;  %3437 = vmatprep.subr.mxu1 %v8410_v24  ;;  %834 = vmatprep.mubr.f32.mxu0 %v833_v56  ;;  %v9318_v20 = vand.u32 4294901760, %v461_v29 }
  0x64   : > { %2109 = vmatmul.mubr.f32.gmra.mxu1 %v9145_v39  ;;  %15444 = vst [vmem:[#allocation115_spill] sm:$0xff] %v9316_v22  ;;  %v9324_v35 = vsub.f32 %v270_v19, %v9298_v37  ;;  %v9326_v56 = vand.u32 4294901760, %v272_v53  ;;  %v464_v6 = vsel %vm426_vm0, %v275_v58, 0  ;;  %2650 = vmatpush1.msra.mxu0 %v8637_v28  ;;  %v274_v19 = vld [vmem:[%s8920_s6 + $0xc0] sm:$0xff]  ;;  %v15450_v58 = vand.u32 4294901760, %v9290_v50  ;;  %v276_v0 = vld [vmem:[%s8920_s6 + $0xd0] sm:$0xff] }
  0x65   : > { %15445 = vst [vmem:[#allocation116_spill] sm:$0xff] %v9318_v20  ;;  %2115 = vmatprep.mubr.f32.mxu1 %v9164_v51  ;;  %3439 = vmatpush1.msra.mxu1 %v8433_v30  ;;  %v855_v57 = vand.u32 4294901760, %v854_v21  ;;  %v865_v54 = vand.u32 4294901760, %v864_v44  ;;  %v870_v51 = vsub.f32 %v9273_v23, %v15448_v26  ;;  %v9335_v39 = vand.u32 4294901760, %v464_v6  ;;  %v15452_v21 = vld [vmem:[#allocation9_spill] sm:$0xff]  ;;  %v15456_v44 = vld [vmem:[#allocation30_spill] sm:$0xff] }
  0x66   : > { %15446 = vst [vmem:[#allocation117_spill] sm:$0xff] %v9324_v35  ;;  %15447 = vst [vmem:[#allocation118_spill] sm:$0xff] %v9326_v56  ;;  %3441 = vmatprep.subr.mxu1 %v8439_v32  ;;  %840 = vmatmul.mubr.f32.gmra.mxu0 %v839_v48  ;;  %v880_v48 = vsub.f32 %v9290_v50, %v15450_v58  ;;  %v9345_v28 = vsub.f32 %v461_v29, %v9318_v20  ;;  %v467_v26 = vsel %vm426_vm0, %v277_v45, 0  ;;  %v279_v58 = vld [vmem:[%s8920_s6 + $0xe8] sm:$0xff] }
  0x67   : > { %15449 = vst [vmem:[#allocation119_spill] sm:$0xff] %v9335_v39  ;;  %3443 = vmatpush1.msra.mxu1 %v8448_v36  ;;  %850 = vmatprep.mubr.f32.mxu0 %v849_v55  ;;  %v9352_v55 = vsub.f32 %v272_v53, %v9326_v56  ;;  %v15455_v50 = vld [vmem:[#allocation11_spill] sm:$0xff]  ;;  %v871_v29 = vand.u32 4294901760, %v870_v51  ;;  %v15457_v45 = vand.u32 4294901760, %v9307_v2  ;;  %v9363_v23 = vsub.f32 %v464_v6, %v9335_v39  ;;  %v282_v36 = vld [vmem:[%s8920_s6 + $0x100] sm:$0xff] }
  0x68   : > { %2117 = vmatmul.mubr.f32.gmra.mxu1 %v9172_v18  ;;  %15451 = vst [vmem:[#allocation120_spill] sm:$0xff] %v9345_v28  ;;  %3445 = vmatprep.subr.mxu1 %v15452_v21  ;;  %v9354_v18 = vand.u32 4294901760, %v274_v19  ;;  %v9365_v53 = vand.u32 4294901760, %v467_v26  ;;  %v15460_v21 = vld [vmem:[#allocation13_spill] sm:$0xff]  ;;  %v470_v6 = vsel %vm426_vm0, %v279_v58, 0  ;;  %v15472_v58 = vld [vmem:[#allocation36_spill] sm:$0xff] }
  0x69   : > { %2123 = vmatprep.mubr.f32.mxu1 %v9202_v59  ;;  %15453 = vst [vmem:[#allocation121_spill] sm:$0xff] %v9352_v55  ;;  %3447 = vmatpush1.msra.mxu1 %v15455_v50  ;;  %v886_v59 = vsub.f32 %v9307_v2, %v15457_v45  ;;  %15458 = vst [vmem:[#allocation123_spill] sm:$0xff] %v9363_v23  ;;  %v881_v50 = vand.u32 4294901760, %v880_v48  ;;  %v15462_v45 = vld [vmem:[#allocation32_spill] sm:$0xff]  ;;  %v15463_v2 = vand.u32 4294901760, %v9324_v35 }
  0x6a   : > { %15454 = vst [vmem:[#allocation122_spill] sm:$0xff] %v9354_v18  ;;  %2653 = vmatprep.subr.mxu0 %v15456_v44  ;;  %856 = vmatmul.mubr.f32.gmra.mxu0 %v855_v57  ;;  %15459 = vst [vmem:[#allocation124_spill] sm:$0xff] %v9365_v53  ;;  %v15461_v44 = vand.u32 4294901760, %v9316_v22  ;;  %v9382_v48 = vsub.f32 %v274_v19, %v9354_v18  ;;  %v15466_v57 = vld [vmem:[#allocation34_spill] sm:$0xff] }
  0x6b   : > { %3449 = vmatprep.subr.mxu1 %v15460_v21  ;;  %866 = vmatprep.mubr.f32.mxu0 %v865_v54  ;;  %v902_v54 = vsub.f32 %v9324_v35, %v15463_v2  ;;  %v9389_v21 = vsub.f32 %v467_v26, %v9365_v53  ;;  %v9391_v2 = vand.u32 4294901760, %v276_v0  ;;  %v15470_v35 = vand.u32 4294901760, %v9345_v28 }
  0x6c   : > { %2125 = vmatmul.mubr.f32.gmra.mxu1 %v9209_v41  ;;  %v896_v51 = vsub.f32 %v9316_v22, %v15461_v44  ;;  %2656 = vmatpush1.msra.mxu0 %v15462_v45  ;;  %15464 = vst [vmem:[#allocation125_spill] sm:$0xff] %v9382_v48  ;;  %v281_v44 = vld [vmem:[%s8920_s6 + $0xf8] sm:$0xff]  ;;  %v15465_v22 = vld [vmem:[#allocation15_spill] sm:$0xff] }
  0x6d   : > { %2131 = vmatprep.mubr.f32.mxu1 %v9236_v61  ;;  %3451 = vmatpush1.msra.mxu1 %v15465_v22  ;;  %v887_v61 = vand.u32 4294901760, %v886_v59  ;;  %15467 = vst [vmem:[#allocation126_spill] sm:$0xff] %v9389_v21  ;;  %15468 = vst [vmem:[#allocation127_spill] sm:$0xff] %v9391_v2  ;;  %v15469_v41 = vld [vmem:[#allocation17_spill] sm:$0xff]  ;;  %v278_v59 = vld [vmem:[%s8920_s6 + $0xe0] sm:$0xff]  ;;  %v473_v26 = vsel %vm426_vm0, %v281_v44, 0 }
  0x6e   : > { %2659 = vmatprep.subr.mxu0 %v15466_v57  ;;  %872 = vmatmul.mubr.f32.gmra.mxu0 %v871_v29  ;;  %v897_v19 = vand.u32 4294901760, %v896_v51  ;;  %v912_v57 = vsub.f32 %v9345_v28, %v15470_v35  ;;  %v9398_v29 = vand.u32 4294901760, %v470_v6  ;;  %v903_v22 = vand.u32 4294901760, %v902_v54  ;;  %v15474_v45 = vld [vmem:[#allocation19_spill] sm:$0xff]  ;;  %v15475_v35 = vld [vmem:[#allocation38_spill] sm:$0xff]  ;;  %v15479_v51 = vld [vmem:[#allocation21_spill] sm:$0xff] }
  0x6f   : > { %3453 = vmatprep.subr.mxu1 %v15469_v41  ;;  %882 = vmatprep.mubr.f32.mxu0 %v881_v50  ;;  %v15473_v50 = vand.u32 4294901760, %v9352_v55  ;;  %v283_v41 = vld [vmem:[%s8920_s6 + $0x108] sm:$0xff]  ;;  %v9416_v54 = vsub.f32 %v276_v0, %v9391_v2  ;;  %v15482_v28 = vld [vmem:[#allocation40_spill] sm:$0xff] }
  0x70   : > { %2133 = vmatmul.mubr.f32.gmra.mxu1 %v9228_v13  ;;  %15471 = vst [vmem:[#allocation128_spill] sm:$0xff] %v9398_v29  ;;  %2662 = vmatpush1.msra.mxu0 %v15472_v58  ;;  %v9418_v58 = vand.u32 4294901760, %v278_v59  ;;  %v476_v0 = vsel %vm426_vm0, %v283_v41, 0 }
  0x71   : > { %2139 = vmatprep.mubr.f32.mxu1 %v9253_v42  ;;  %v918_v13 = vsub.f32 %v9352_v55, %v15473_v50  ;;  %3455 = vmatpush1.msra.mxu1 %v15474_v45  ;;  %v15476_v42 = vand.u32 4294901760, %v9363_v23  ;;  %15477 = vst [vmem:[#allocation129_spill] sm:$0xff] %v9416_v54  ;;  %v280_v50 = vld [vmem:[%s8920_s6 + $0xf0] sm:$0xff]  ;;  %v913_v55 = vand.u32 4294901760, %v912_v57  ;;  %v15485_v57 = vld [vmem:[#allocation23_spill] sm:$0xff] }
  0x72   : > { %2665 = vmatprep.subr.mxu0 %v15475_v35  ;;  %888 = vmatmul.mubr.f32.gmra.mxu0 %v887_v61  ;;  %15478 = vst [vmem:[#allocation130_spill] sm:$0xff] %v9418_v58  ;;  %v9424_v61 = vsub.f32 %v470_v6, %v9398_v29  ;;  %v9426_v35 = vand.u32 4294901760, %v473_v26  ;;  %v15486_v6 = vld [vmem:[#allocation42_spill] sm:$0xff] }
  0x73   : > { %v928_v44 = vsub.f32 %v9363_v23, %v15476_v42  ;;  %3457 = vmatprep.subr.mxu1 %v15479_v51  ;;  %898 = vmatprep.mubr.f32.mxu0 %v897_v19  ;;  %v285_v42 = vld [vmem:[%s8920_s6 + $0x118] sm:$0xff]  ;;  %v919_v23 = vand.u32 4294901760, %v918_v13  ;;  %v15483_v51 = vand.u32 4294901760, %v9382_v48  ;;  %v9444_v13 = vsub.f32 %v278_v59, %v9418_v58  ;;  %v287_v59 = vld [vmem:[%s8920_s6 + $0x128] sm:$0xff] }
  0x74   : > { %2141 = vmatmul.mubr.f32.gmra.mxu1 %v9255_v60  ;;  %15480 = vst [vmem:[#allocation131_spill] sm:$0xff] %v9424_v61  ;;  %15481 = vst [vmem:[#allocation132_spill] sm:$0xff] %v9426_v35  ;;  %2668 = vmatpush1.msra.mxu0 %v15482_v28  ;;  %v9435_v60 = vand.u32 4294901760, %v280_v50  ;;  %v15492_v28 = vld [vmem:[#allocation44_spill] sm:$0xff] }
  0x75   : > { %2147 = vmatprep.mubr.f32.mxu1 %v9275_v8  ;;  %v934_v19 = vsub.f32 %v9382_v48, %v15483_v51  ;;  %3459 = vmatpush1.msra.mxu1 %v15485_v57  ;;  %v929_v45 = vand.u32 4294901760, %v928_v44  ;;  %v15487_v8 = vand.u32 4294901760, %v9389_v21  ;;  %15488 = vst [vmem:[#allocation23_spill] sm:$0xff] %v9444_v13  ;;  %v15489_v51 = vld [vmem:[#allocation25_spill] sm:$0xff]  ;;  %v9453_v44 = vand.u32 4294901760, %v476_v0  ;;  %v15495_v48 = vld [vmem:[#allocation27_spill] sm:$0xff] }
  0x76   : > { %15484 = vst [vmem:[#allocation133_spill] sm:$0xff] %v9435_v60  ;;  %2671 = vmatprep.subr.mxu0 %v15486_v6  ;;  %904 = vmatmul.mubr.f32.gmra.mxu0 %v903_v22  ;;  %v9451_v22 = vsub.f32 %v473_v26, %v9426_v35  ;;  %v15496_v26 = vld [vmem:[#allocation46_spill] sm:$0xff]  ;;  %v15497_v6 = vand.u32 4294901760, %v9416_v54 }
  0x77   : > { %v944_v41 = vsub.f32 %v9389_v21, %v15487_v8  ;;  %3461 = vmatprep.subr.mxu1 %v15489_v51  ;;  %914 = vmatprep.mubr.f32.mxu0 %v913_v55  ;;  %15491 = vst [vmem:[#allocation135_spill] sm:$0xff] %v9453_v44  ;;  %v479_v8 = vsel %vm426_vm0, %v285_v42, 0  ;;  %v935_v21 = vand.u32 4294901760, %v934_v19  ;;  %v9460_v55 = vsub.f32 %v280_v50, %v9435_v60  ;;  %v284_v19 = vld [vmem:[%s8920_s6 + $0x110] sm:$0xff]  ;;  %v15499_v50 = vld [vmem:[#allocation29_spill] sm:$0xff] }
  0x78   : > { %2149 = vmatmul.mubr.f32.gmra.mxu1 %v9277_v25  ;;  %15490 = vst [vmem:[#allocation134_spill] sm:$0xff] %v9451_v22  ;;  %2674 = vmatpush1.msra.mxu0 %v15492_v28  ;;  %v9462_v25 = vand.u32 4294901760, %v282_v36  ;;  %v950_v42 = vsub.f32 %v9416_v54, %v15497_v6  ;;  %v9470_v28 = vand.u32 4294901760, %v479_v8  ;;  %v482_v6 = vsel %vm426_vm0, %v287_v59, 0 }
  0x79   : > { %2155 = vmatprep.mubr.f32.mxu1 %v9292_v52  ;;  %15493 = vst [vmem:[#allocation136_spill] sm:$0xff] %v9460_v55  ;;  %3463 = vmatpush1.msra.mxu1 %v15495_v48  ;;  %v945_v51 = vand.u32 4294901760, %v944_v41  ;;  %v15500_v48 = vand.u32 4294901760, %v9424_v61  ;;  %v15502_v52 = vld [vmem:[#allocation48_spill] sm:$0xff]  ;;  %v15506_v41 = vld [vmem:[#allocation50_spill] sm:$0xff]  ;;  %v15507_v59 = vand.u32 4294901760, %v9444_v13 }
  0x7a   : > { %15494 = vst [vmem:[#allocation137_spill] sm:$0xff] %v9462_v25  ;;  %2677 = vmatprep.subr.mxu0 %v15496_v26  ;;  %920 = vmatmul.mubr.f32.gmra.mxu0 %v919_v23  ;;  %15498 = vst [vmem:[#allocation138_spill] sm:$0xff] %v9470_v28  ;;  %v9480_v26 = vsub.f32 %v476_v0, %v9453_v44  ;;  %v951_v0 = vand.u32 4294901760, %v950_v42  ;;  %v9498_v54 = vsub.f32 %v479_v8, %v9470_v28  ;;  %v15516_v42 = vld [vmem:[#allocation54_spill] sm:$0xff] }
  0x7b   : > { %3465 = vmatprep.subr.mxu1 %v15499_v50  ;;  %930 = vmatprep.mubr.f32.mxu0 %v929_v45  ;;  %v960_v23 = vsub.f32 %v9424_v61, %v15500_v48  ;;  %v9487_v45 = vsub.f32 %v282_v36, %v9462_v25  ;;  %v289_v48 = vld [vmem:[%s8920_s6 + $0x138] sm:$0xff]  ;;  %v15505_v61 = vld [vmem:[#allocation31_spill] sm:$0xff]  ;;  %v9500_v36 = vand.u32 4294901760, %v482_v6 }
  0x7c   : > { %2157 = vmatmul.mubr.f32.gmra.mxu1 %v9298_v37  ;;  %15501 = vst [vmem:[#allocation139_spill] sm:$0xff] %v9480_v26  ;;  %2680 = vmatpush1.msra.mxu0 %v15502_v52  ;;  %v9489_v37 = vand.u32 4294901760, %v284_v19  ;;  %15508 = vst [vmem:[#allocation142_spill] sm:$0xff] %v9498_v54  ;;  %v15510_v50 = vld [vmem:[#allocation33_spill] sm:$0xff]  ;;  %v286_v52 = vld [vmem:[%s8920_s6 + $0x120] sm:$0xff]  ;;  %v485_v8 = vsel %vm426_vm0, %v289_v48, 0 }
  0x7d   : > { %2163 = vmatprep.mubr.f32.mxu1 %v9318_v20  ;;  %15503 = vst [vmem:[#allocation140_spill] sm:$0xff] %v9487_v45  ;;  %3467 = vmatpush1.msra.mxu1 %v15505_v61  ;;  %v966_v20 = vsub.f32 %v9444_v13, %v15507_v59  ;;  %15509 = vst [vmem:[#allocation143_spill] sm:$0xff] %v9500_v36  ;;  %v961_v61 = vand.u32 4294901760, %v960_v23  ;;  %v15512_v59 = vld [vmem:[#allocation52_spill] sm:$0xff]  ;;  %v15513_v13 = vand.u32 4294901760, %v9460_v55 }
  0x7e   : > { %15504 = vst [vmem:[#allocation141_spill] sm:$0xff] %v9489_v37  ;;  %2683 = vmatprep.subr.mxu0 %v15506_v41  ;;  %936 = vmatmul.mubr.f32.gmra.mxu0 %v935_v21  ;;  %v15511_v41 = vand.u32 4294901760, %v9451_v22  ;;  %v9517_v23 = vsub.f32 %v284_v19, %v9489_v37  ;;  %v15521_v48 = vld [vmem:[#allocation56_spill] sm:$0xff] }
  0x7f   : > { %3469 = vmatprep.subr.mxu1 %v15510_v50  ;;  %946 = vmatprep.mubr.f32.mxu0 %v945_v51  ;;  %v982_v51 = vsub.f32 %v9460_v55, %v15513_v13  ;;  %v9524_v50 = vsub.f32 %v482_v6, %v9500_v36  ;;  %v9526_v13 = vand.u32 4294901760, %v286_v52  ;;  %v15519_v55 = vand.u32 4294901760, %v9480_v26 }
  0x80   : > { %2165 = vmatmul.mubr.f32.gmra.mxu1 %v9326_v56  ;;  %v976_v21 = vsub.f32 %v9451_v22, %v15511_v41  ;;  %2686 = vmatpush1.msra.mxu0 %v15512_v59  ;;  %15514 = vst [vmem:[#allocation144_spill] sm:$0xff] %v9517_v23  ;;  %v291_v41 = vld [vmem:[%s8920_s6 + $0x148] sm:$0xff]  ;;  %v15518_v56 = vld [vmem:[#allocation37_spill] sm:$0xff] }
  0x81   : > { %2171 = vmatprep.mubr.f32.mxu1 %v9335_v39  ;;  %v15515_v22 = vld [vmem:[#allocation35_spill] sm:$0xff]  ;;  %2689 = vmatprep.subr.mxu0 %v15516_v42  ;;  %v967_v39 = vand.u32 4294901760, %v966_v20  ;;  %15517 = vst [vmem:[#allocation145_spill] sm:$0xff] %v9526_v13  ;;  %v992_v42 = vsub.f32 %v9480_v26, %v15519_v55  ;;  %v288_v20 = vld [vmem:[%s8920_s6 + $0x130] sm:$0xff]  ;;  %v488_v6 = vsel %vm426_vm0, %v291_v41, 0  ;;  %v15524_v55 = vld [vmem:[#allocation58_spill] sm:$0xff] }
  0x82   : > { %3471 = vmatpush1.msra.mxu1 %v15515_v22  ;;  %952 = vmatmul.mubr.f32.gmra.mxu0 %v951_v0  ;;  %v977_v19 = vand.u32 4294901760, %v976_v21  ;;  %v9533_v0 = vand.u32 4294901760, %v485_v8  ;;  %v983_v22 = vand.u32 4294901760, %v982_v51  ;;  %v15523_v59 = vld [vmem:[#allocation39_spill] sm:$0xff]  ;;  %v9551_v51 = vsub.f32 %v286_v52, %v9526_v13  ;;  %v15527_v21 = vld [vmem:[#allocation41_spill] sm:$0xff]  ;;  %v15530_v26 = vld [vmem:[#allocation60_spill] sm:$0xff] }
  0x83   : > { %3473 = vmatprep.subr.mxu1 %v15518_v56  ;;  %962 = vmatprep.mubr.f32.mxu0 %v961_v61  ;;  %v15522_v61 = vand.u32 4294901760, %v9487_v45  ;;  %v293_v56 = vld [vmem:[%s8920_s6 + $0x158] sm:$0xff] }
  0x84   : > { %2173 = vmatmul.mubr.f32.gmra.mxu1 %v9354_v18  ;;  %15520 = vst [vmem:[#allocation146_spill] sm:$0xff] %v9533_v0  ;;  %2692 = vmatpush1.msra.mxu0 %v15521_v48  ;;  %v9553_v48 = vand.u32 4294901760, %v288_v20  ;;  %v491_v52 = vsel %vm426_vm0, %v293_v56, 0 }
  0x85   : > { %2179 = vmatprep.mubr.f32.mxu1 %v9365_v53  ;;  %v998_v18 = vsub.f32 %v9487_v45, %v15522_v61  ;;  %3475 = vmatpush1.msra.mxu1 %v15523_v59  ;;  %v15525_v53 = vand.u32 4294901760, %v9498_v54  ;;  %v290_v61 = vld [vmem:[%s8920_s6 + $0x140] sm:$0xff]  ;;  %v993_v45 = vand.u32 4294901760, %v992_v42  ;;  %v15533_v42 = vld [vmem:[#allocation43_spill] sm:$0xff]  ;;  %v292_v59 = vld [vmem:[%s8920_s6 + $0x150] sm:$0xff] }
  0x86   : > { %2695 = vmatprep.subr.mxu0 %v15524_v55  ;;  %968 = vmatmul.mubr.f32.gmra.mxu0 %v967_v39  ;;  %15526 = vst [vmem:[#allocation147_spill] sm:$0xff] %v9553_v48  ;;  %v9559_v39 = vsub.f32 %v485_v8, %v9533_v0  ;;  %v9561_v55 = vand.u32 4294901760, %v488_v6 }
  0x87   : > { %v1008_v41 = vsub.f32 %v9498_v54, %v15525_v53  ;;  %3477 = vmatprep.subr.mxu1 %v15527_v21  ;;  %978 = vmatprep.mubr.f32.mxu0 %v977_v19  ;;  %v295_v53 = vld [vmem:[%s8920_s6 + $0x168] sm:$0xff]  ;;  %v999_v54 = vand.u32 4294901760, %v998_v18  ;;  %v15531_v21 = vand.u32 4294901760, %v9517_v23  ;;  %v9579_v18 = vsub.f32 %v288_v20, %v9553_v48  ;;  %v297_v20 = vld [vmem:[%s8920_s6 + $0x178] sm:$0xff] }
  0x88   : > { %2181 = vmatmul.mubr.f32.gmra.mxu1 %v9391_v2  ;;  %15528 = vst [vmem:[#allocation148_spill] sm:$0xff] %v9559_v39  ;;  %15529 = vst [vmem:[#allocation149_spill] sm:$0xff] %v9561_v55  ;;  %2698 = vmatpush1.msra.mxu0 %v15530_v26  ;;  %v9570_v2 = vand.u32 4294901760, %v290_v61 }
  0x89   : > { %2187 = vmatprep.mubr.f32.mxu1 %v9398_v29  ;;  %v1014_v19 = vsub.f32 %v9517_v23, %v15531_v21  ;;  %3479 = vmatpush1.msra.mxu1 %v15533_v42  ;;  %v1009_v8 = vand.u32 4294901760, %v1008_v41  ;;  %v15534_v29 = vand.u32 4294901760, %v9524_v50  ;;  %15535 = vst [vmem:[#allocation43_spill] sm:$0xff] %v9579_v18  ;;  %v15536_v21 = vld [vmem:[#allocation45_spill] sm:$0xff]  ;;  %v9588_v41 = vand.u32 4294901760, %v491_v52  ;;  %v15539_v23 = vld [vmem:[#allocation47_spill] sm:$0xff] }
  0x8a   : > { %15532 = vst [vmem:[#allocation150_spill] sm:$0xff] %v9570_v2  ;;  %2721 = vmatprep.subr.mxu0 %v8955_v27  ;;  %984 = vmatmul.mubr.f32.gmra.mxu0 %v983_v22  ;;  %v9586_v22 = vsub.f32 %v488_v6, %v9561_v55 }
  0x8b   : > { %v1024_v56 = vsub.f32 %v9524_v50, %v15534_v29  ;;  %3501 = vmatprep.subr.mxu1 %v15536_v21  ;;  %994 = vmatprep.mubr.f32.mxu0 %v993_v45  ;;  %15537 = vst [vmem:[#allocation151_spill] sm:$0xff] %v9588_v41  ;;  %v494_v29 = vsel %vm426_vm0, %v295_v53, 0  ;;  %v1015_v26 = vand.u32 4294901760, %v1014_v19  ;;  %v9595_v45 = vsub.f32 %v290_v61, %v9570_v2  ;;  %v294_v19 = vld [vmem:[%s8920_s6 + $0x160] sm:$0xff]  ;;  %v15542_v61 = vld [vmem:[#allocation49_spill] sm:$0xff] }
  0x8c   : > { %2189 = vmatmul.mubr.f32.gmra.mxu1 %v9418_v58  ;;  %2724 = vmatpush2.msra.mxu0 %v8967_v43  ;;  %v9597_v58 = vand.u32 4294901760, %v292_v59  ;;  %v15540_v21 = vand.u32 4294901760, %v9551_v51  ;;  %v9605_v43 = vand.u32 4294901760, %v494_v29 }
  0x8d   : > { %2195 = vmatprep.mubr.f32.mxu1 %v9426_v35  ;;  %3503 = vmatpush2.msra.mxu1 %v15539_v23  ;;  %v1025_v6 = vand.u32 4294901760, %v1024_v56  ;;  %v15543_v23 = vand.u32 4294901760, %v9559_v39  ;;  %v15547_v56 = vld [vmem:[#allocation70_spill] sm:$0xff] }
  0x8e   : > { %15538 = vst [vmem:[#allocation152_spill] sm:$0xff] %v9597_v58  ;;  %2727 = vmatprep.subr.mxu0 %v8979_v38  ;;  %1000 = vmatmul.mubr.f32.gmra.mxu0 %v999_v54  ;;  %v1030_v53 = vsub.f32 %v9551_v51, %v15540_v21  ;;  %15541 = vst [vmem:[#allocation153_spill] sm:$0xff] %v9605_v43  ;;  %v9615_v38 = vsub.f32 %v491_v52, %v9588_v41  ;;  %v497_v21 = vsel %vm426_vm0, %v297_v20, 0 }
  0x8f   : > { %3505 = vmatprep.subr.mxu1 %v15542_v61  ;;  %1010 = vmatprep.mubr.f32.mxu0 %v1009_v8  ;;  %v1040_v54 = vsub.f32 %v9559_v39, %v15543_v23  ;;  %v9622_v8 = vsub.f32 %v292_v59, %v9597_v58  ;;  %v299_v23 = vld [vmem:[%s8920_s6 + $0x188] sm:$0xff]  ;;  %v15548_v20 = vand.u32 4294901760, %v9579_v18  ;;  %v9633_v35 = vsub.f32 %v494_v29, %v9605_v43  ;;  %v296_v39 = vld [vmem:[%s8920_s6 + $0x170] sm:$0xff] }
  0x90   : > { %2197 = vmatmul.mubr.f32.gmra.mxu1 %v9435_v60  ;;  %2730 = vmatpush2.msra.mxu0 %v8990_v14  ;;  %v9624_v60 = vand.u32 4294901760, %v294_v19  ;;  %v15546_v61 = vld [vmem:[#allocation51_spill] sm:$0xff]  ;;  %v1031_v52 = vand.u32 4294901760, %v1030_v53  ;;  %v9635_v59 = vand.u32 4294901760, %v497_v21  ;;  %v15551_v14 = vld [vmem:[#allocation53_spill] sm:$0xff]  ;;  %v500_v29 = vsel %vm426_vm0, %v299_v23, 0 }
  0x91   : > { %2203 = vmatprep.mubr.f32.mxu1 %v9453_v44  ;;  %15544 = vst [vmem:[#allocation154_spill] sm:$0xff] %v9622_v8  ;;  %3507 = vmatpush2.msra.mxu1 %v15546_v61  ;;  %v1046_v44 = vsub.f32 %v9579_v18, %v15548_v20  ;;  %15549 = vst [vmem:[#allocation156_spill] sm:$0xff] %v9633_v35  ;;  %v1041_v61 = vand.u32 4294901760, %v1040_v54  ;;  %v15553_v20 = vld [vmem:[#allocation72_spill] sm:$0xff]  ;;  %v15554_v18 = vand.u32 4294901760, %v9595_v45 }
  0x92   : > { %15545 = vst [vmem:[#allocation155_spill] sm:$0xff] %v9624_v60  ;;  %2733 = vmatprep.subr.mxu0 %v15547_v56  ;;  %1016 = vmatmul.mubr.f32.gmra.mxu0 %v1015_v26  ;;  %15550 = vst [vmem:[#allocation157_spill] sm:$0xff] %v9635_v59  ;;  %v15552_v56 = vand.u32 4294901760, %v9586_v22  ;;  %v9652_v54 = vsub.f32 %v294_v19, %v9624_v60 }
  0x93   : > { %3509 = vmatprep.subr.mxu1 %v15551_v14  ;;  %1026 = vmatprep.mubr.f32.mxu0 %v1025_v6  ;;  %v1062_v6 = vsub.f32 %v9595_v45, %v15554_v18  ;;  %v15556_v14 = vld [vmem:[#allocation55_spill] sm:$0xff]  ;;  %v1047_v53 = vand.u32 4294901760, %v1046_v44  ;;  %v9661_v18 = vand.u32 4294901760, %v296_v39  ;;  %v298_v44 = vld [vmem:[%s8920_s6 + $0x180] sm:$0xff] }
  0x94   : > { %2205 = vmatmul.mubr.f32.gmra.mxu1 %v9462_v25  ;;  %v1056_v26 = vsub.f32 %v9586_v22, %v15552_v56  ;;  %2736 = vmatpush2.msra.mxu0 %v15553_v20  ;;  %15555 = vst [vmem:[#allocation158_spill] sm:$0xff] %v9652_v54  ;;  %v301_v56 = vld [vmem:[%s8920_s6 + $0x198] sm:$0xff] }
  0x95   : > { %2211 = vmatprep.mubr.f32.mxu1 %v9470_v28  ;;  %3511 = vmatpush2.msra.mxu1 %v15556_v14  ;;  %v9659_v28 = vsub.f32 %v497_v21, %v9635_v59  ;;  %15558 = vst [vmem:[#allocation160_spill] sm:$0xff] %v9661_v18  ;;  %v15559_v25 = vld [vmem:[#allocation57_spill] sm:$0xff]  ;;  %v15560_v14 = vand.u32 4294901760, %v9615_v38  ;;  %v503_v21 = vsel %vm426_vm0, %v301_v56, 0  ;;  %v1063_v23 = vand.u32 4294901760, %v1062_v6 }
  0x96   : > { %2739 = vmatprep.subr.mxu0 %v9033_v34  ;;  %1032 = vmatmul.mubr.f32.gmra.mxu0 %v1031_v52  ;;  %v1057_v19 = vand.u32 4294901760, %v1056_v26  ;;  %v9668_v52 = vand.u32 4294901760, %v500_v29  ;;  %v9686_v6 = vsub.f32 %v296_v39, %v9661_v18 }
  0x97   : > { %15557 = vst [vmem:[#allocation159_spill] sm:$0xff] %v9659_v28  ;;  %3513 = vmatprep.subr.mxu1 %v15559_v25  ;;  %1042 = vmatprep.mubr.f32.mxu0 %v1041_v61  ;;  %v1072_v34 = vsub.f32 %v9615_v38, %v15560_v14  ;;  %v15562_v61 = vand.u32 4294901760, %v9622_v8  ;;  %v303_v25 = vld [vmem:[%s8920_s6 + $0x1a8] sm:$0xff]  ;;  %v15563_v14 = vand.u32 4294901760, %v9633_v35 }
  0x98   : > { %2213 = vmatmul.mubr.f32.gmra.mxu1 %v9489_v37  ;;  %15561 = vst [vmem:[#allocation161_spill] sm:$0xff] %v9668_v52  ;;  %2742 = vmatpush2.msra.mxu0 %v9055_v63  ;;  %15564 = vst [vmem:[#allocation162_spill] sm:$0xff] %v9686_v6  ;;  %v9688_v63 = vand.u32 4294901760, %v298_v44  ;;  %v506_v39 = vsel %vm426_vm0, %v303_v25, 0 }
  0x99   : > { %2219 = vmatprep.mubr.f32.mxu1 %v9500_v36  ;;  %v1078_v37 = vsub.f32 %v9622_v8, %v15562_v61  ;;  %3515 = vmatpush2.msra.mxu1 %v8927_v12  ;;  %v1088_v56 = vsub.f32 %v9633_v35, %v15563_v14  ;;  %v300_v61 = vld [vmem:[%s8920_s6 + $0x190] sm:$0xff]  ;;  %v1073_v26 = vand.u32 4294901760, %v1072_v34  ;;  %v305_v14 = vld [vmem:[%s8920_s6 + $0x1b8] sm:$0xff]  ;;  %v15570_v34 = vld [vmem:[#allocation82_spill] sm:$0xff] }
  0x9a   : > { %2745 = vmatprep.subr.mxu0 %v9072_v33  ;;  %1048 = vmatmul.mubr.f32.gmra.mxu0 %v1047_v53  ;;  %15565 = vst [vmem:[#allocation163_spill] sm:$0xff] %v9688_v63  ;;  %v9694_v53 = vsub.f32 %v500_v29, %v9668_v52  ;;  %v9696_v33 = vand.u32 4294901760, %v503_v21  ;;  %v302_v12 = vld [vmem:[%s8920_s6 + $0x1a0] sm:$0xff] }
  0x9b   : > { %3517 = vmatprep.subr.mxu1 %v8944_v62  ;;  %1058 = vmatprep.mubr.f32.mxu0 %v1057_v19  ;;  %v1079_v36 = vand.u32 4294901760, %v1078_v37  ;;  %v15568_v62 = vand.u32 4294901760, %v9652_v54  ;;  %v1089_v29 = vand.u32 4294901760, %v1088_v56  ;;  %v9714_v37 = vsub.f32 %v298_v44, %v9688_v63  ;;  %v307_v44 = vld [vmem:[%s8920_s6 + $0x1c8] sm:$0xff] }
  0x9c   : > { %2221 = vmatmul.mubr.f32.gmra.mxu1 %v9526_v13  ;;  %15566 = vst [vmem:[#allocation164_spill] sm:$0xff] %v9694_v53  ;;  %15567 = vst [vmem:[#allocation165_spill] sm:$0xff] %v9696_v33  ;;  %2748 = vmatpush2.msra.mxu0 %v9077_v7  ;;  %v9705_v13 = vand.u32 4294901760, %v300_v61  ;;  %v9723_v56 = vand.u32 4294901760, %v506_v39 }
  0x9d   : > { %2227 = vmatprep.mubr.f32.mxu1 %v9533_v0  ;;  %v1094_v19 = vsub.f32 %v9652_v54, %v15568_v62  ;;  %3519 = vmatpush2.msra.mxu1 %v8958_v46  ;;  %v15571_v0 = vand.u32 4294901760, %v9659_v28  ;;  %15572 = vst [vmem:[#allocation167_spill] sm:$0xff] %v9714_v37  ;;  %v15573_v62 = vld [vmem:[#allocation64_spill] sm:$0xff]  ;;  %v15578_v46 = vld [vmem:[#allocation66_spill] sm:$0xff] }
  0x9e   : > { %15569 = vst [vmem:[#allocation166_spill] sm:$0xff] %v9705_v13  ;;  %2751 = vmatprep.subr.mxu0 %v15570_v34  ;;  %1064 = vmatmul.mubr.f32.gmra.mxu0 %v1063_v23  ;;  %v9721_v23 = vsub.f32 %v503_v21, %v9696_v33  ;;  %15575 = vst [vmem:[#allocation169_spill] sm:$0xff] %v9723_v56  ;;  %v15579_v21 = vld [vmem:[#allocation2_spill] sm:$0xff] }
  0x9f   : > { %v1104_v25 = vsub.f32 %v9659_v28, %v15571_v0  ;;  %3521 = vmatprep.subr.mxu1 %v15573_v62  ;;  %1074 = vmatprep.mubr.f32.mxu0 %v1073_v26  ;;  %v509_v0 = vsel %vm426_vm0, %v305_v14, 0  ;;  %v1095_v7 = vand.u32 4294901760, %v1094_v19  ;;  %v9730_v26 = vsub.f32 %v300_v61, %v9705_v13  ;;  %v304_v61 = vld [vmem:[%s8920_s6 + $0x1b0] sm:$0xff] }
  0xa0   : > { %2229 = vmatmul.mubr.f32.gmra.mxu1 %v9553_v48  ;;  %15574 = vst [vmem:[#allocation168_spill] sm:$0xff] %v9721_v23  ;;  %2754 = vmatpush2.msra.mxu0 %v9106_v47  ;;  %v9732_v48 = vand.u32 4294901760, %v302_v12  ;;  %v15580_v62 = vand.u32 4294901760, %v15579_v21  ;;  %v15581_v14 = vand.u32 4294901760, %v9686_v6  ;;  %v9741_v19 = vand.u32 4294901760, %v509_v0 }
  0xa1   : > { %2235 = vmatprep.mubr.f32.mxu1 %v9561_v55  ;;  %15576 = vst [vmem:[#allocation170_spill] sm:$0xff] %v9730_v26  ;;  %3523 = vmatpush2.msra.mxu1 %v15578_v46  ;;  %v1105_v34 = vand.u32 4294901760, %v1104_v25  ;;  %v15583_v21 = vand.u32 4294901760, %v9694_v53  ;;  %v15587_v25 = vand.u32 4294901760, %v9714_v37  ;;  %v15590_v47 = vand.u32 4294901760, %v9721_v23 }
  0xa2   : > { %15577 = vst [vmem:[#allocation171_spill] sm:$0xff] %v9732_v48  ;;  %4320 = vmatprep.subr.mxu0 %v15580_v62  ;;  %1080 = vmatmul.mubr.f32.gmra.mxu0 %v1079_v36  ;;  %v1110_v55 = vsub.f32 %v9686_v6, %v15581_v14  ;;  %15582 = vst [vmem:[#allocation2_spill] sm:$0xff] %v9741_v19  ;;  %v9751_v62 = vsub.f32 %v506_v39, %v9723_v56  ;;  %v512_v14 = vsel %vm426_vm0, %v307_v44, 0  ;;  %v356_v6 = vld [vmem:[%s8920_s6 + $0x350] sm:$0xff] }
  0xa3   : > { %5043 = vmatprep.subr.mxu1 %v8347_v3  ;;  %1090 = vmatprep.mubr.f32.mxu0 %v1089_v29  ;;  %v1120_v36 = vsub.f32 %v9694_v53, %v15583_v21  ;;  %v9757_v3 = vsub.f32 %v302_v12, %v9732_v48  ;;  %v9759_v29 = vand.u32 4294901760, %v304_v61  ;;  %v1126_v39 = vsub.f32 %v9714_v37, %v15587_v25 }
  0xa4   : > { %2237 = vmatmul.mubr.f32.gmra.mxu1 %v9570_v2  ;;  %15584 = vst [vmem:[#allocation172_spill] sm:$0xff] %v9751_v62  ;;  %v309_v2 = vld [vmem:[%s8920_s6 + $0x1d8] sm:$0xff]  ;;  %v1111_v21 = vand.u32 4294901760, %v1110_v55  ;;  %v9766_v44 = vsub.f32 %v509_v0, %v9741_v19  ;;  %v9768_v46 = vand.u32 4294901760, %v512_v14  ;;  %v306_v55 = vld [vmem:[%s8920_s6 + $0x1c0] sm:$0xff]  ;;  %v15591_v0 = vand.u32 4294901760, %v9730_v26 }
  0xa5   : > { %2243 = vmatprep.mubr.f32.mxu1 %v9588_v41  ;;  %15585 = vst [vmem:[#allocation173_spill] sm:$0xff] %v9757_v3  ;;  %15586 = vst [vmem:[#allocation174_spill] sm:$0xff] %v9759_v29  ;;  %v1121_v12 = vand.u32 4294901760, %v1120_v36  ;;  %v1136_v41 = vsub.f32 %v9721_v23, %v15590_v47  ;;  %v515_v25 = vsel %vm426_vm0, %v309_v2, 0  ;;  %v9783_v36 = vsub.f32 %v304_v61, %v9759_v29 }
  0xa6   : > { %1096 = vmatmul.mubr.f32.gmra.mxu0 %v1095_v7  ;;  %15588 = vst [vmem:[#allocation175_spill] sm:$0xff] %v9766_v44  ;;  %15589 = vst [vmem:[#allocation176_spill] sm:$0xff] %v9768_v46  ;;  %v1142_v37 = vsub.f32 %v9730_v26, %v15591_v0  ;;  %v1127_v47 = vand.u32 4294901760, %v1126_v39  ;;  %v9790_v23 = vand.u32 4294901760, %v306_v55  ;;  %v15595_v0 = vand.u32 4294901760, %v9751_v62 }
  0xa7   : > { %1106 = vmatprep.mubr.f32.mxu0 %v1105_v34  ;;  %15592 = vst [vmem:[#allocation177_spill] sm:$0xff] %v9783_v36  ;;  %v1137_v2 = vand.u32 4294901760, %v1136_v41  ;;  %v9796_v34 = vand.u32 4294901760, %v515_v25  ;;  %v15597_v7 = vand.u32 4294901760, %v9757_v3  ;;  %v313_v41 = vld [vmem:[%s8920_s6 + $0x1f8] sm:$0xff]  ;;  %v15598_v26 = vand.u32 4294901760, %v9766_v44 }
  0xa8   : > { %2245 = vmatmul.mubr.f32.gmra.mxu1 %v9597_v58  ;;  %v311_v58 = vld [vmem:[%s8920_s6 + $0x1e8] sm:$0xff]  ;;  %15594 = vst [vmem:[#allocation179_spill] sm:$0xff] %v9790_v23  ;;  %v1152_v61 = vsub.f32 %v9751_v62, %v15595_v0 }
  0xa9   : > { %2251 = vmatprep.mubr.f32.mxu1 %v9605_v43  ;;  %v9788_v43 = vsub.f32 %v512_v14, %v9768_v46  ;;  %15596 = vst [vmem:[#allocation180_spill] sm:$0xff] %v9796_v34  ;;  %v518_v39 = vsel %vm426_vm0, %v311_v58, 0  ;;  %v1143_v14 = vand.u32 4294901760, %v1142_v37  ;;  %v1168_v0 = vsub.f32 %v9766_v44, %v15598_v26  ;;  %v310_v37 = vld [vmem:[%s8920_s6 + $0x1e0] sm:$0xff]  ;;  %v315_v62 = vld [vmem:[%s8920_s6 + $0x208] sm:$0xff] }
  0xaa   : > { %1112 = vmatmul.mubr.f32.gmra.mxu0 %v1111_v21  ;;  %v308_v21 = vld [vmem:[%s8920_s6 + $0x1d0] sm:$0xff]  ;;  %v521_v26 = vsel %vm426_vm0, %v313_v41, 0  ;;  %v15603_v44 = vand.u32 4294901760, %v9783_v36 }
  0xab   : > { %15593 = vst [vmem:[#allocation178_spill] sm:$0xff] %v9788_v43  ;;  %1122 = vmatprep.mubr.f32.mxu0 %v1121_v12  ;;  %v1158_v12 = vsub.f32 %v9757_v3, %v15597_v7  ;;  %v9813_v58 = vand.u32 4294901760, %v308_v21  ;;  %v1153_v7 = vand.u32 4294901760, %v1152_v61  ;;  %v9828_v3 = vand.u32 4294901760, %v310_v37  ;;  %v312_v41 = vld [vmem:[%s8920_s6 + $0x1f0] sm:$0xff] }
  0xac   : > { %2253 = vmatmul.mubr.f32.gmra.mxu1 %v9624_v60  ;;  %v9818_v60 = vsub.f32 %v515_v25, %v9796_v34  ;;  %v1169_v61 = vand.u32 4294901760, %v1168_v0  ;;  %v15605_v25 = vand.u32 4294901760, %v9788_v43  ;;  %v524_v0 = vsel %vm426_vm0, %v315_v62, 0  ;;  %v314_v62 = vld [vmem:[%s8920_s6 + $0x200] sm:$0xff] }
  0xad   : > { %2259 = vmatprep.mubr.f32.mxu1 %v9635_v59  ;;  %v9811_v59 = vsub.f32 %v306_v55, %v9790_v23  ;;  %15600 = vst [vmem:[#allocation182_spill] sm:$0xff] %v9813_v58  ;;  %v1159_v55 = vand.u32 4294901760, %v1158_v12  ;;  %15604 = vst [vmem:[#allocation185_spill] sm:$0xff] %v9828_v3 }
  0xae   : > { %1128 = vmatmul.mubr.f32.gmra.mxu0 %v1127_v47  ;;  %15601 = vst [vmem:[#allocation183_spill] sm:$0xff] %v9818_v60  ;;  %v9820_v47 = vand.u32 4294901760, %v518_v39 }
  0xaf   : > { %15599 = vst [vmem:[#allocation181_spill] sm:$0xff] %v9811_v59  ;;  %1138 = vmatprep.mubr.f32.mxu0 %v1137_v2  ;;  %v1174_v2 = vsub.f32 %v9783_v36, %v15603_v44  ;;  %v15611_v44 = vand.u32 4294901760, %v9811_v59  ;;  %v9857_v36 = vand.u32 4294901760, %v524_v0 }
  0xb0   : > { %2261 = vmatmul.mubr.f32.gmra.mxu1 %v9661_v18  ;;  %15602 = vst [vmem:[#allocation184_spill] sm:$0xff] %v9820_v47  ;;  %v1184_v18 = vsub.f32 %v9788_v43, %v15605_v25  ;;  %v9841_v12 = vsub.f32 %v518_v39, %v9820_v47  ;;  %v317_v25 = vld [vmem:[%s8920_s6 + $0x218] sm:$0xff]  ;;  %v9874_v43 = vand.u32 4294901760, %v314_v62 }
  0xb1   : > { %2267 = vmatprep.mubr.f32.mxu1 %v9668_v52  ;;  %v9835_v52 = vsub.f32 %v308_v21, %v9813_v58  ;;  %v1175_v53 = vand.u32 4294901760, %v1174_v2  ;;  %v9849_v21 = vsub.f32 %v310_v37, %v9828_v3  ;;  %v1190_v39 = vsub.f32 %v9811_v59, %v15611_v44  ;;  %15612 = vst [vmem:[#allocation191_spill] sm:$0xff] %v9857_v36 }
  0xb2   : > { %1144 = vmatmul.mubr.f32.gmra.mxu0 %v1143_v14  ;;  %15607 = vst [vmem:[#allocation187_spill] sm:$0xff] %v9841_v12  ;;  %v9843_v14 = vand.u32 4294901760, %v521_v26  ;;  %v15613_v37 = vand.u32 4294901760, %v9818_v60  ;;  %15616 = vst [vmem:[#allocation194_spill] sm:$0xff] %v9874_v43  ;;  %v15620_v44 = vand.u32 4294901760, %v9841_v12 }
  0xb3   : > { %15606 = vst [vmem:[#allocation186_spill] sm:$0xff] %v9835_v52  ;;  %1154 = vmatprep.mubr.f32.mxu0 %v1153_v7  ;;  %15609 = vst [vmem:[#allocation189_spill] sm:$0xff] %v9849_v21  ;;  %v9851_v7 = vand.u32 4294901760, %v312_v41 }
  0xb4   : > { %2269 = vmatmul.mubr.f32.gmra.mxu1 %v9688_v63  ;;  %15608 = vst [vmem:[#allocation188_spill] sm:$0xff] %v9843_v14  ;;  %v1185_v63 = vand.u32 4294901760, %v1184_v18  ;;  %v1200_v2 = vsub.f32 %v9818_v60, %v15613_v37  ;;  %v9866_v18 = vsub.f32 %v521_v26, %v9843_v14  ;;  %v1191_v37 = vand.u32 4294901760, %v1190_v39  ;;  %v316_v39 = vld [vmem:[%s8920_s6 + $0x210] sm:$0xff] }
  0xb5   : > { %2275 = vmatprep.mubr.f32.mxu1 %v9696_v33  ;;  %15610 = vst [vmem:[#allocation190_spill] sm:$0xff] %v9851_v7  ;;  %v527_v33 = vsel %vm426_vm0, %v317_v25, 0  ;;  %v9881_v25 = vsub.f32 %v524_v0, %v9857_v36  ;;  %v15621_v0 = vand.u32 4294901760, %v9849_v21 }
  0xb6   : > { %1160 = vmatmul.mubr.f32.gmra.mxu0 %v1159_v55  ;;  %15614 = vst [vmem:[#allocation192_spill] sm:$0xff] %v9866_v18  ;;  %v15617_v55 = vand.u32 4294901760, %v9835_v52  ;;  %v9883_v60 = vand.u32 4294901760, %v527_v33 }
  0xb7   : > { %1170 = vmatprep.mubr.f32.mxu0 %v1169_v61  ;;  %v9872_v61 = vsub.f32 %v312_v41, %v9851_v7  ;;  %15618 = vst [vmem:[#allocation195_spill] sm:$0xff] %v9881_v25  ;;  %v1201_v41 = vand.u32 4294901760, %v1200_v2  ;;  %v9898_v2 = vsub.f32 %v314_v62, %v9874_v43 }
  0xb8   : > { %2277 = vmatmul.mubr.f32.gmra.mxu1 %v9705_v13  ;;  %v319_v13 = vld [vmem:[%s8920_s6 + $0x228] sm:$0xff]  ;;  %v1206_v26 = vsub.f32 %v9835_v52, %v15617_v55  ;;  %15619 = vst [vmem:[#allocation196_spill] sm:$0xff] %v9883_v60  ;;  %v1222_v52 = vsub.f32 %v9849_v21, %v15621_v0  ;;  %v15625_v0 = vand.u32 4294901760, %v9866_v18  ;;  %v15628_v21 = vand.u32 4294901760, %v9881_v25 }
  0xb9   : > { %2283 = vmatprep.mubr.f32.mxu1 %v9723_v56  ;;  %15615 = vst [vmem:[#allocation193_spill] sm:$0xff] %v9872_v61  ;;  %v1216_v56 = vsub.f32 %v9841_v12, %v15620_v44  ;;  %v530_v55 = vsel %vm426_vm0, %v319_v13, 0  ;;  %15622 = vst [vmem:[#allocation197_spill] sm:$0xff] %v9898_v2  ;;  %v9905_v12 = vand.u32 4294901760, %v316_v39 }
  0xba   : > { %1176 = vmatmul.mubr.f32.gmra.mxu0 %v1175_v53  ;;  %v1207_v44 = vand.u32 4294901760, %v1206_v26  ;;  %v1232_v62 = vsub.f32 %v9866_v18, %v15625_v0  ;;  %v15627_v53 = vand.u32 4294901760, %v9872_v61  ;;  %v1248_v0 = vsub.f32 %v9881_v25, %v15628_v21  ;;  %v325_v18 = vld [vmem:[%s8920_s6 + $0x258] sm:$0xff] }
  0xbb   : > { %1186 = vmatprep.mubr.f32.mxu0 %v1185_v63  ;;  %15624 = vst [vmem:[#allocation199_spill] sm:$0xff] %v9905_v12  ;;  %v1217_v13 = vand.u32 4294901760, %v1216_v56  ;;  %v9911_v63 = vand.u32 4294901760, %v530_v55  ;;  %v323_v56 = vld [vmem:[%s8920_s6 + $0x248] sm:$0xff]  ;;  %v15633_v25 = vand.u32 4294901760, %v9898_v2 }
  0xbc   : > { %2285 = vmatmul.mubr.f32.gmra.mxu1 %v9732_v48  ;;  %v321_v48 = vld [vmem:[%s8920_s6 + $0x238] sm:$0xff]  ;;  %v536_v21 = vsel %vm426_vm0, %v323_v56, 0  ;;  %v322_v56 = vld [vmem:[%s8920_s6 + $0x240] sm:$0xff] }
  0xbd   : > { %2291 = vmatprep.mubr.f32.mxu1 %v9741_v19  ;;  %v9903_v19 = vsub.f32 %v527_v33, %v9883_v60  ;;  %15626 = vst [vmem:[#allocation200_spill] sm:$0xff] %v9911_v63  ;;  %v533_v26 = vsel %vm426_vm0, %v321_v48, 0  ;;  %v1223_v33 = vand.u32 4294901760, %v1222_v52  ;;  %v320_v52 = vld [vmem:[%s8920_s6 + $0x230] sm:$0xff] }
  0xbe   : > { %1192 = vmatmul.mubr.f32.gmra.mxu0 %v1191_v37  ;;  %v318_v37 = vld [vmem:[%s8920_s6 + $0x220] sm:$0xff] }
  0xbf   : > { %15623 = vst [vmem:[#allocation198_spill] sm:$0xff] %v9903_v19  ;;  %1202 = vmatprep.mubr.f32.mxu0 %v1201_v41  ;;  %v1238_v41 = vsub.f32 %v9872_v61, %v15627_v53  ;;  %v9928_v48 = vand.u32 4294901760, %v318_v37  ;;  %v1233_v53 = vand.u32 4294901760, %v1232_v62  ;;  %v9943_v61 = vand.u32 4294901760, %v320_v52 }
  0xc0   : > { %2293 = vmatmul.mubr.f32.gmra.mxu1 %v9759_v29  ;;  %v9933_v29 = vsub.f32 %v530_v55, %v9911_v63  ;;  %v1249_v62 = vand.u32 4294901760, %v1248_v0  ;;  %v15635_v55 = vand.u32 4294901760, %v9903_v19  ;;  %v539_v0 = vsel %vm426_vm0, %v325_v18, 0  ;;  %v324_v18 = vld [vmem:[%s8920_s6 + $0x250] sm:$0xff] }
  0xc1   : > { %2299 = vmatprep.mubr.f32.mxu1 %v9768_v46  ;;  %v9926_v46 = vsub.f32 %v316_v39, %v9905_v12  ;;  %15630 = vst [vmem:[#allocation202_spill] sm:$0xff] %v9928_v48  ;;  %v1239_v39 = vand.u32 4294901760, %v1238_v41  ;;  %15634 = vst [vmem:[#allocation205_spill] sm:$0xff] %v9943_v61 }
  0xc2   : > { %1208 = vmatmul.mubr.f32.gmra.mxu0 %v1207_v44  ;;  %15631 = vst [vmem:[#allocation203_spill] sm:$0xff] %v9933_v29  ;;  %v9935_v44 = vand.u32 4294901760, %v533_v26 }
  0xc3   : > { %15629 = vst [vmem:[#allocation201_spill] sm:$0xff] %v9926_v46  ;;  %1218 = vmatprep.mubr.f32.mxu0 %v1217_v13  ;;  %v1254_v13 = vsub.f32 %v9898_v2, %v15633_v25  ;;  %v15641_v25 = vand.u32 4294901760, %v9926_v46  ;;  %v9972_v2 = vand.u32 4294901760, %v539_v0 }
  0xc4   : > { %2301 = vmatmul.mubr.f32.gmra.mxu1 %v9790_v23  ;;  %15632 = vst [vmem:[#allocation204_spill] sm:$0xff] %v9935_v44  ;;  %v1264_v23 = vsub.f32 %v9903_v19, %v15635_v55  ;;  %v9956_v41 = vsub.f32 %v533_v26, %v9935_v44  ;;  %v327_v55 = vld [vmem:[%s8920_s6 + $0x268] sm:$0xff]  ;;  %v9989_v19 = vand.u32 4294901760, %v324_v18 }
  0xc5   : > { %2307 = vmatprep.mubr.f32.mxu1 %v9796_v34  ;;  %v9950_v34 = vsub.f32 %v318_v37, %v9928_v48  ;;  %v1255_v59 = vand.u32 4294901760, %v1254_v13  ;;  %v9964_v37 = vsub.f32 %v320_v52, %v9943_v61  ;;  %v1270_v26 = vsub.f32 %v9926_v46, %v15641_v25  ;;  %15642 = vst [vmem:[#allocation211_spill] sm:$0xff] %v9972_v2 }
  0xc6   : > { %1224 = vmatmul.mubr.f32.gmra.mxu0 %v1223_v33  ;;  %15637 = vst [vmem:[#allocation207_spill] sm:$0xff] %v9956_v41  ;;  %v9958_v33 = vand.u32 4294901760, %v536_v21  ;;  %v15643_v52 = vand.u32 4294901760, %v9933_v29  ;;  %15646 = vst [vmem:[#allocation214_spill] sm:$0xff] %v9989_v19  ;;  %v15650_v25 = vand.u32 4294901760, %v9956_v41 }
  0xc7   : > { %15636 = vst [vmem:[#allocation206_spill] sm:$0xff] %v9950_v34  ;;  %1234 = vmatprep.mubr.f32.mxu0 %v1233_v53  ;;  %15639 = vst [vmem:[#allocation209_spill] sm:$0xff] %v9964_v37  ;;  %v9966_v53 = vand.u32 4294901760, %v322_v56 }
  0xc8   : > { %2309 = vmatmul.mubr.f32.gmra.mxu1 %v9813_v58  ;;  %15638 = vst [vmem:[#allocation208_spill] sm:$0xff] %v9958_v33  ;;  %v1265_v58 = vand.u32 4294901760, %v1264_v23  ;;  %v1280_v13 = vsub.f32 %v9933_v29, %v15643_v52  ;;  %v9981_v23 = vsub.f32 %v536_v21, %v9958_v33  ;;  %v1271_v52 = vand.u32 4294901760, %v1270_v26  ;;  %v326_v26 = vld [vmem:[%s8920_s6 + $0x260] sm:$0xff] }
  0xc9   : > { %2315 = vmatprep.mubr.f32.mxu1 %v9820_v47  ;;  %15640 = vst [vmem:[#allocation210_spill] sm:$0xff] %v9966_v53  ;;  %v542_v47 = vsel %vm426_vm0, %v327_v55, 0  ;;  %v9996_v55 = vsub.f32 %v539_v0, %v9972_v2  ;;  %v15651_v0 = vand.u32 4294901760, %v9964_v37 }
  0xca   : > { %1240 = vmatmul.mubr.f32.gmra.mxu0 %v1239_v39  ;;  %15644 = vst [vmem:[#allocation212_spill] sm:$0xff] %v9981_v23  ;;  %v15647_v39 = vand.u32 4294901760, %v9950_v34  ;;  %v9998_v29 = vand.u32 4294901760, %v542_v47 }
  0xcb   : > { %1250 = vmatprep.mubr.f32.mxu0 %v1249_v62  ;;  %v9987_v62 = vsub.f32 %v322_v56, %v9966_v53  ;;  %15648 = vst [vmem:[#allocation215_spill] sm:$0xff] %v9996_v55  ;;  %v1281_v56 = vand.u32 4294901760, %v1280_v13  ;;  %v10013_v13 = vsub.f32 %v324_v18, %v9989_v19 }
  0xcc   : > { %2317 = vmatmul.mubr.f32.gmra.mxu1 %v9828_v3  ;;  %v329_v3 = vld [vmem:[%s8920_s6 + $0x278] sm:$0xff]  ;;  %v1286_v21 = vsub.f32 %v9950_v34, %v15647_v39  ;;  %15649 = vst [vmem:[#allocation216_spill] sm:$0xff] %v9998_v29  ;;  %v1302_v34 = vsub.f32 %v9964_v37, %v15651_v0  ;;  %v15655_v0 = vand.u32 4294901760, %v9981_v23  ;;  %v15658_v37 = vand.u32 4294901760, %v9996_v55 }
  0xcd   : > { %2323 = vmatprep.mubr.f32.mxu1 %v9843_v14  ;;  %15645 = vst [vmem:[#allocation213_spill] sm:$0xff] %v9987_v62  ;;  %v1296_v14 = vsub.f32 %v9956_v41, %v15650_v25  ;;  %v545_v39 = vsel %vm426_vm0, %v329_v3, 0  ;;  %15652 = vst [vmem:[#allocation217_spill] sm:$0xff] %v10013_v13  ;;  %v10020_v41 = vand.u32 4294901760, %v326_v26 }
  0xce   : > { %1256 = vmatmul.mubr.f32.gmra.mxu0 %v1255_v59  ;;  %v1287_v25 = vand.u32 4294901760, %v1286_v21  ;;  %v1312_v18 = vsub.f32 %v9981_v23, %v15655_v0  ;;  %v15657_v59 = vand.u32 4294901760, %v9987_v62  ;;  %v1328_v0 = vsub.f32 %v9996_v55, %v15658_v37  ;;  %v335_v23 = vld [vmem:[%s8920_s6 + $0x2a8] sm:$0xff] }
  0xcf   : > { %1266 = vmatprep.mubr.f32.mxu0 %v1265_v58  ;;  %15654 = vst [vmem:[#allocation219_spill] sm:$0xff] %v10020_v41  ;;  %v1297_v3 = vand.u32 4294901760, %v1296_v14  ;;  %v10026_v58 = vand.u32 4294901760, %v545_v39  ;;  %v333_v14 = vld [vmem:[%s8920_s6 + $0x298] sm:$0xff]  ;;  %v15663_v55 = vand.u32 4294901760, %v10013_v13 }
  0xd0   : > { %2325 = vmatmul.mubr.f32.gmra.mxu1 %v9851_v7  ;;  %v331_v7 = vld [vmem:[%s8920_s6 + $0x288] sm:$0xff]  ;;  %v551_v37 = vsel %vm426_vm0, %v333_v14, 0  ;;  %v332_v14 = vld [vmem:[%s8920_s6 + $0x290] sm:$0xff] }
  0xd1   : > { %2331 = vmatprep.mubr.f32.mxu1 %v9857_v36  ;;  %v10018_v36 = vsub.f32 %v542_v47, %v9998_v29  ;;  %15656 = vst [vmem:[#allocation220_spill] sm:$0xff] %v10026_v58  ;;  %v548_v21 = vsel %vm426_vm0, %v331_v7, 0  ;;  %v1303_v47 = vand.u32 4294901760, %v1302_v34  ;;  %v330_v34 = vld [vmem:[%s8920_s6 + $0x280] sm:$0xff] }
  0xd2   : > { %1272 = vmatmul.mubr.f32.gmra.mxu0 %v1271_v52  ;;  %v328_v52 = vld [vmem:[%s8920_s6 + $0x270] sm:$0xff] }
  0xd3   : > { %15653 = vst [vmem:[#allocation218_spill] sm:$0xff] %v10018_v36  ;;  %1282 = vmatprep.mubr.f32.mxu0 %v1281_v56  ;;  %v1318_v56 = vsub.f32 %v9987_v62, %v15657_v59  ;;  %v10043_v7 = vand.u32 4294901760, %v328_v52  ;;  %v1313_v59 = vand.u32 4294901760, %v1312_v18  ;;  %v10058_v62 = vand.u32 4294901760, %v330_v34 }
  0xd4   : > { %2333 = vmatmul.mubr.f32.gmra.mxu1 %v9874_v43  ;;  %v10048_v43 = vsub.f32 %v545_v39, %v10026_v58  ;;  %v1329_v18 = vand.u32 4294901760, %v1328_v0  ;;  %v15665_v39 = vand.u32 4294901760, %v10018_v36  ;;  %v554_v0 = vsel %vm426_vm0, %v335_v23, 0  ;;  %v334_v23 = vld [vmem:[%s8920_s6 + $0x2a0] sm:$0xff] }
  0xd5   : > { %2339 = vmatprep.mubr.f32.mxu1 %v9883_v60  ;;  %v10041_v60 = vsub.f32 %v326_v26, %v10020_v41  ;;  %15660 = vst [vmem:[#allocation222_spill] sm:$0xff] %v10043_v7  ;;  %v1319_v26 = vand.u32 4294901760, %v1318_v56  ;;  %15664 = vst [vmem:[#allocation225_spill] sm:$0xff] %v10058_v62 }
  0xd6   : > { %1288 = vmatmul.mubr.f32.gmra.mxu0 %v1287_v25  ;;  %15661 = vst [vmem:[#allocation223_spill] sm:$0xff] %v10048_v43  ;;  %v10050_v25 = vand.u32 4294901760, %v548_v21 }
  0xd7   : > { %15659 = vst [vmem:[#allocation221_spill] sm:$0xff] %v10041_v60  ;;  %1298 = vmatprep.mubr.f32.mxu0 %v1297_v3  ;;  %v1334_v3 = vsub.f32 %v10013_v13, %v15663_v55  ;;  %v15671_v55 = vand.u32 4294901760, %v10041_v60  ;;  %v10087_v13 = vand.u32 4294901760, %v554_v0 }
  0xd8   : > { %2341 = vmatmul.mubr.f32.gmra.mxu1 %v9905_v12  ;;  %15662 = vst [vmem:[#allocation224_spill] sm:$0xff] %v10050_v25  ;;  %v1344_v12 = vsub.f32 %v10018_v36, %v15665_v39  ;;  %v10071_v56 = vsub.f32 %v548_v21, %v10050_v25  ;;  %v337_v39 = vld [vmem:[%s8920_s6 + $0x2b8] sm:$0xff]  ;;  %v10104_v36 = vand.u32 4294901760, %v334_v23 }
  0xd9   : > { %2347 = vmatprep.mubr.f32.mxu1 %v9911_v63  ;;  %v10065_v63 = vsub.f32 %v328_v52, %v10043_v7  ;;  %v1335_v46 = vand.u32 4294901760, %v1334_v3  ;;  %v10079_v52 = vsub.f32 %v330_v34, %v10058_v62  ;;  %v1350_v21 = vsub.f32 %v10041_v60, %v15671_v55  ;;  %15672 = vst [vmem:[#allocation231_spill] sm:$0xff] %v10087_v13 }
  0xda   : > { %1304 = vmatmul.mubr.f32.gmra.mxu0 %v1303_v47  ;;  %15667 = vst [vmem:[#allocation227_spill] sm:$0xff] %v10071_v56  ;;  %v10073_v47 = vand.u32 4294901760, %v551_v37  ;;  %v15673_v34 = vand.u32 4294901760, %v10048_v43  ;;  %15676 = vst [vmem:[#allocation234_spill] sm:$0xff] %v10104_v36  ;;  %v15680_v55 = vand.u32 4294901760, %v10071_v56 }
  0xdb   : > { %15666 = vst [vmem:[#allocation226_spill] sm:$0xff] %v10065_v63  ;;  %1314 = vmatprep.mubr.f32.mxu0 %v1313_v59  ;;  %15669 = vst [vmem:[#allocation229_spill] sm:$0xff] %v10079_v52  ;;  %v10081_v59 = vand.u32 4294901760, %v332_v14 }
  0xdc   : > { %2349 = vmatmul.mubr.f32.gmra.mxu1 %v9928_v48  ;;  %15668 = vst [vmem:[#allocation228_spill] sm:$0xff] %v10073_v47  ;;  %v1345_v48 = vand.u32 4294901760, %v1344_v12  ;;  %v1360_v3 = vsub.f32 %v10048_v43, %v15673_v34  ;;  %v10096_v12 = vsub.f32 %v551_v37, %v10073_v47  ;;  %v1351_v34 = vand.u32 4294901760, %v1350_v21  ;;  %v336_v21 = vld [vmem:[%s8920_s6 + $0x2b0] sm:$0xff] }
  0xdd   : > { %2355 = vmatprep.mubr.f32.mxu1 %v9935_v44  ;;  %15670 = vst [vmem:[#allocation230_spill] sm:$0xff] %v10081_v59  ;;  %v557_v44 = vsel %vm426_vm0, %v337_v39, 0  ;;  %v10111_v39 = vsub.f32 %v554_v0, %v10087_v13  ;;  %v15681_v0 = vand.u32 4294901760, %v10079_v52 }
  0xde   : > { %1320 = vmatmul.mubr.f32.gmra.mxu0 %v1319_v26  ;;  %15674 = vst [vmem:[#allocation232_spill] sm:$0xff] %v10096_v12  ;;  %v15677_v26 = vand.u32 4294901760, %v10065_v63  ;;  %v10113_v43 = vand.u32 4294901760, %v557_v44 }
  0xdf   : > { %1330 = vmatprep.mubr.f32.mxu0 %v1329_v18  ;;  %v10102_v18 = vsub.f32 %v332_v14, %v10081_v59  ;;  %15678 = vst [vmem:[#allocation235_spill] sm:$0xff] %v10111_v39  ;;  %v1361_v14 = vand.u32 4294901760, %v1360_v3  ;;  %v10128_v3 = vsub.f32 %v334_v23, %v10104_v36 }
  0xe0   : > { %2357 = vmatmul.mubr.f32.gmra.mxu1 %v9943_v61  ;;  %v339_v61 = vld [vmem:[%s8920_s6 + $0x2c8] sm:$0xff]  ;;  %v1366_v37 = vsub.f32 %v10065_v63, %v15677_v26  ;;  %15679 = vst [vmem:[#allocation236_spill] sm:$0xff] %v10113_v43  ;;  %v1382_v63 = vsub.f32 %v10079_v52, %v15681_v0  ;;  %v15685_v0 = vand.u32 4294901760, %v10096_v12  ;;  %v15688_v52 = vand.u32 4294901760, %v10111_v39 }
  0xe1   : > { %2363 = vmatprep.mubr.f32.mxu1 %v9958_v33  ;;  %15675 = vst [vmem:[#allocation233_spill] sm:$0xff] %v10102_v18  ;;  %v1376_v33 = vsub.f32 %v10071_v56, %v15680_v55  ;;  %v560_v26 = vsel %vm426_vm0, %v339_v61, 0  ;;  %15682 = vst [vmem:[#allocation237_spill] sm:$0xff] %v10128_v3  ;;  %v10135_v56 = vand.u32 4294901760, %v336_v21 }
  0xe2   : > { %1336 = vmatmul.mubr.f32.gmra.mxu0 %v1335_v46  ;;  %v1367_v55 = vand.u32 4294901760, %v1366_v37  ;;  %v1392_v23 = vsub.f32 %v10096_v12, %v15685_v0  ;;  %v15687_v46 = vand.u32 4294901760, %v10102_v18  ;;  %v1408_v0 = vsub.f32 %v10111_v39, %v15688_v52  ;;  %v345_v12 = vld [vmem:[%s8920_s6 + $0x2f8] sm:$0xff] }
  0xe3   : > { %1346 = vmatprep.mubr.f32.mxu0 %v1345_v48  ;;  %15684 = vst [vmem:[#allocation239_spill] sm:$0xff] %v10135_v56  ;;  %v1377_v61 = vand.u32 4294901760, %v1376_v33  ;;  %v10141_v48 = vand.u32 4294901760, %v560_v26  ;;  %v343_v33 = vld [vmem:[%s8920_s6 + $0x2e8] sm:$0xff]  ;;  %v15693_v39 = vand.u32 4294901760, %v10128_v3 }
  0xe4   : > { %2365 = vmatmul.mubr.f32.gmra.mxu1 %v9966_v53  ;;  %v341_v53 = vld [vmem:[%s8920_s6 + $0x2d8] sm:$0xff]  ;;  %v566_v52 = vsel %vm426_vm0, %v343_v33, 0  ;;  %v342_v33 = vld [vmem:[%s8920_s6 + $0x2e0] sm:$0xff] }
  0xe5   : > { %2371 = vmatprep.mubr.f32.mxu1 %v9972_v2  ;;  %v10133_v2 = vsub.f32 %v557_v44, %v10113_v43  ;;  %15686 = vst [vmem:[#allocation240_spill] sm:$0xff] %v10141_v48  ;;  %v563_v37 = vsel %vm426_vm0, %v341_v53, 0  ;;  %v1383_v44 = vand.u32 4294901760, %v1382_v63  ;;  %v340_v63 = vld [vmem:[%s8920_s6 + $0x2d0] sm:$0xff] }
  0xe6   : > { %1352 = vmatmul.mubr.f32.gmra.mxu0 %v1351_v34  ;;  %v338_v34 = vld [vmem:[%s8920_s6 + $0x2c0] sm:$0xff] }
  0xe7   : > { %15683 = vst [vmem:[#allocation238_spill] sm:$0xff] %v10133_v2  ;;  %1362 = vmatprep.mubr.f32.mxu0 %v1361_v14  ;;  %v1398_v14 = vsub.f32 %v10102_v18, %v15687_v46  ;;  %v10158_v53 = vand.u32 4294901760, %v338_v34  ;;  %v1393_v46 = vand.u32 4294901760, %v1392_v23  ;;  %v10173_v18 = vand.u32 4294901760, %v340_v63 }
  0xe8   : > { %2373 = vmatmul.mubr.f32.gmra.mxu1 %v9989_v19  ;;  %v10163_v19 = vsub.f32 %v560_v26, %v10141_v48  ;;  %v1409_v23 = vand.u32 4294901760, %v1408_v0  ;;  %v15695_v26 = vand.u32 4294901760, %v10133_v2  ;;  %v569_v0 = vsel %vm426_vm0, %v345_v12, 0  ;;  %v344_v12 = vld [vmem:[%s8920_s6 + $0x2f0] sm:$0xff] }
  0xe9   : > { %2379 = vmatprep.mubr.f32.mxu1 %v9998_v29  ;;  %v10156_v29 = vsub.f32 %v336_v21, %v10135_v56  ;;  %15690 = vst [vmem:[#allocation242_spill] sm:$0xff] %v10158_v53  ;;  %v1399_v21 = vand.u32 4294901760, %v1398_v14  ;;  %15694 = vst [vmem:[#allocation245_spill] sm:$0xff] %v10173_v18 }
  0xea   : > { %1368 = vmatmul.mubr.f32.gmra.mxu0 %v1367_v55  ;;  %15691 = vst [vmem:[#allocation243_spill] sm:$0xff] %v10163_v19  ;;  %v10165_v55 = vand.u32 4294901760, %v563_v37 }
  0xeb   : > { %15689 = vst [vmem:[#allocation241_spill] sm:$0xff] %v10156_v29  ;;  %1378 = vmatprep.mubr.f32.mxu0 %v1377_v61  ;;  %v1414_v61 = vsub.f32 %v10128_v3, %v15693_v39  ;;  %v15701_v39 = vand.u32 4294901760, %v10156_v29  ;;  %v10202_v3 = vand.u32 4294901760, %v569_v0 }
  0xec   : > { %2381 = vmatmul.mubr.f32.gmra.mxu1 %v10020_v41  ;;  %15692 = vst [vmem:[#allocation244_spill] sm:$0xff] %v10165_v55  ;;  %v1424_v41 = vsub.f32 %v10133_v2, %v15695_v26  ;;  %v10186_v14 = vsub.f32 %v563_v37, %v10165_v55  ;;  %v347_v26 = vld [vmem:[%s8920_s6 + $0x308] sm:$0xff]  ;;  %v10219_v2 = vand.u32 4294901760, %v344_v12 }
  0xed   : > { %2387 = vmatprep.mubr.f32.mxu1 %v10026_v58  ;;  %v10180_v58 = vsub.f32 %v338_v34, %v10158_v53  ;;  %v1415_v60 = vand.u32 4294901760, %v1414_v61  ;;  %v10194_v34 = vsub.f32 %v340_v63, %v10173_v18  ;;  %v1430_v37 = vsub.f32 %v10156_v29, %v15701_v39  ;;  %15702 = vst [vmem:[#allocation251_spill] sm:$0xff] %v10202_v3  ;;  %v357_v29 = vld [vmem:[%s8920_s6 + $0x358] sm:$0xff] }
  0xee   : > { %1384 = vmatmul.mubr.f32.gmra.mxu0 %v1383_v44  ;;  %15697 = vst [vmem:[#allocation247_spill] sm:$0xff] %v10186_v14  ;;  %v10188_v44 = vand.u32 4294901760, %v566_v52  ;;  %v15703_v63 = vand.u32 4294901760, %v10163_v19  ;;  %15706 = vst [vmem:[#allocation254_spill] sm:$0xff] %v10219_v2  ;;  %v15710_v39 = vand.u32 4294901760, %v10186_v14 }
  0xef   : > { %15696 = vst [vmem:[#allocation246_spill] sm:$0xff] %v10180_v58  ;;  %1394 = vmatprep.mubr.f32.mxu0 %v1393_v46  ;;  %15699 = vst [vmem:[#allocation249_spill] sm:$0xff] %v10194_v34  ;;  %v10196_v46 = vand.u32 4294901760, %v342_v33 }
  0xf0   : > { %2389 = vmatmul.mubr.f32.gmra.mxu1 %v10043_v7  ;;  %15698 = vst [vmem:[#allocation248_spill] sm:$0xff] %v10188_v44  ;;  %v1425_v7 = vand.u32 4294901760, %v1424_v41  ;;  %v1440_v61 = vsub.f32 %v10163_v19, %v15703_v63  ;;  %v10211_v41 = vsub.f32 %v566_v52, %v10188_v44  ;;  %v1431_v63 = vand.u32 4294901760, %v1430_v37  ;;  %v346_v37 = vld [vmem:[%s8920_s6 + $0x300] sm:$0xff] }
  0xf1   : > { %2395 = vmatprep.mubr.f32.mxu1 %v10050_v25  ;;  %15700 = vst [vmem:[#allocation250_spill] sm:$0xff] %v10196_v46  ;;  %v572_v25 = vsel %vm426_vm0, %v347_v26, 0  ;;  %v10226_v26 = vsub.f32 %v569_v0, %v10202_v3  ;;  %v15711_v0 = vand.u32 4294901760, %v10194_v34 }
  0xf2   : > { %1400 = vmatmul.mubr.f32.gmra.mxu0 %v1399_v21  ;;  %15704 = vst [vmem:[#allocation252_spill] sm:$0xff] %v10211_v41  ;;  %v15707_v21 = vand.u32 4294901760, %v10180_v58  ;;  %v10228_v19 = vand.u32 4294901760, %v572_v25 }
  0xf3   : > { %1410 = vmatprep.mubr.f32.mxu0 %v1409_v23  ;;  %v10217_v23 = vsub.f32 %v342_v33, %v10196_v46  ;;  %15708 = vst [vmem:[#allocation255_spill] sm:$0xff] %v10226_v26  ;;  %v1441_v33 = vand.u32 4294901760, %v1440_v61  ;;  %v10243_v61 = vsub.f32 %v344_v12, %v10219_v2 }
  0xf4   : > { %2397 = vmatmul.mubr.f32.gmra.mxu1 %v10058_v62  ;;  %v349_v62 = vld [vmem:[%s8920_s6 + $0x318] sm:$0xff]  ;;  %v1446_v52 = vsub.f32 %v10180_v58, %v15707_v21  ;;  %15709 = vst [vmem:[#allocation256_spill] sm:$0xff] %v10228_v19  ;;  %v1462_v58 = vsub.f32 %v10194_v34, %v15711_v0  ;;  %v15715_v0 = vand.u32 4294901760, %v10211_v41  ;;  %v15718_v34 = vand.u32 4294901760, %v10226_v26 }
  0xf5   : > { %2403 = vmatprep.mubr.f32.mxu1 %v10073_v47  ;;  %15705 = vst [vmem:[#allocation253_spill] sm:$0xff] %v10217_v23  ;;  %v1456_v47 = vsub.f32 %v10186_v14, %v15710_v39  ;;  %v575_v21 = vsel %vm426_vm0, %v349_v62, 0  ;;  %15712 = vst [vmem:[#allocation257_spill] sm:$0xff] %v10243_v61  ;;  %v10250_v14 = vand.u32 4294901760, %v346_v37 }
  0xf6   : > { %1416 = vmatmul.mubr.f32.gmra.mxu0 %v1415_v60  ;;  %v1447_v39 = vand.u32 4294901760, %v1446_v52  ;;  %v1472_v12 = vsub.f32 %v10211_v41, %v15715_v0  ;;  %v15717_v60 = vand.u32 4294901760, %v10217_v23  ;;  %v1488_v0 = vsub.f32 %v10226_v26, %v15718_v34  ;;  %v355_v41 = vld [vmem:[%s8920_s6 + $0x348] sm:$0xff] }
  0xf7   : > { %1426 = vmatprep.mubr.f32.mxu0 %v1425_v7  ;;  %15714 = vst [vmem:[#allocation259_spill] sm:$0xff] %v10250_v14  ;;  %v1457_v62 = vand.u32 4294901760, %v1456_v47  ;;  %v10256_v7 = vand.u32 4294901760, %v575_v21  ;;  %v353_v47 = vld [vmem:[%s8920_s6 + $0x338] sm:$0xff]  ;;  %v15723_v26 = vand.u32 4294901760, %v10243_v61 }
  0xf8   : > { %2405 = vmatmul.mubr.f32.gmra.mxu1 %v10081_v59  ;;  %v351_v59 = vld [vmem:[%s8920_s6 + $0x328] sm:$0xff]  ;;  %v581_v34 = vsel %vm426_vm0, %v353_v47, 0  ;;  %v352_v47 = vld [vmem:[%s8920_s6 + $0x330] sm:$0xff] }
  0xf9   : > { %2411 = vmatprep.mubr.f32.mxu1 %v10087_v13  ;;  %v10248_v13 = vsub.f32 %v572_v25, %v10228_v19  ;;  %15716 = vst [vmem:[#allocation260_spill] sm:$0xff] %v10256_v7  ;;  %v578_v52 = vsel %vm426_vm0, %v351_v59, 0  ;;  %v1463_v25 = vand.u32 4294901760, %v1462_v58  ;;  %v350_v58 = vld [vmem:[%s8920_s6 + $0x320] sm:$0xff] }
  0xfa   : > { %1432 = vmatmul.mubr.f32.gmra.mxu0 %v1431_v63  ;;  %v348_v63 = vld [vmem:[%s8920_s6 + $0x310] sm:$0xff] }
  0xfb   : > { %15713 = vst [vmem:[#allocation258_spill] sm:$0xff] %v10248_v13  ;;  %1442 = vmatprep.mubr.f32.mxu0 %v1441_v33  ;;  %v1478_v33 = vsub.f32 %v10217_v23, %v15717_v60  ;;  %v10273_v59 = vand.u32 4294901760, %v348_v63  ;;  %v1473_v60 = vand.u32 4294901760, %v1472_v12  ;;  %v1494_v23 = vsub.f32 %v10243_v61, %v15723_v26 }
  0xfc   : > { %2413 = vmatmul.mubr.f32.gmra.mxu1 %v10104_v36  ;;  %v10278_v36 = vsub.f32 %v575_v21, %v10256_v7  ;;  %v1489_v12 = vand.u32 4294901760, %v1488_v0  ;;  %v15725_v21 = vand.u32 4294901760, %v10248_v13  ;;  %v584_v0 = vsel %vm426_vm0, %v355_v41, 0  ;;  %v354_v41 = vld [vmem:[%s8920_s6 + $0x340] sm:$0xff] }
  0xfd   : > { %2419 = vmatprep.mubr.f32.mxu1 %v10113_v43  ;;  %v10271_v43 = vsub.f32 %v346_v37, %v10250_v14  ;;  %15720 = vst [vmem:[#allocation262_spill] sm:$0xff] %v10273_v59  ;;  %v1479_v37 = vand.u32 4294901760, %v1478_v33 }
  0xfe   : > { %1448 = vmatmul.mubr.f32.gmra.mxu0 %v1447_v39  ;;  %15721 = vst [vmem:[#allocation263_spill] sm:$0xff] %v10278_v36  ;;  %v10280_v39 = vand.u32 4294901760, %v578_v52 }
  0xff   : > { %15719 = vst [vmem:[#allocation261_spill] sm:$0xff] %v10271_v43  ;;  %1458 = vmatprep.mubr.f32.mxu0 %v1457_v62  ;;  %v10288_v62 = vand.u32 4294901760, %v350_v58 }
 0x100   : > { %2421 = vmatmul.mubr.f32.gmra.mxu1 %v10135_v56  ;;  %15722 = vst [vmem:[#allocation264_spill] sm:$0xff] %v10280_v39  ;;  %v1504_v56 = vsub.f32 %v10248_v13, %v15725_v21  ;;  %v10301_v33 = vsub.f32 %v578_v52, %v10280_v39  ;;  %v10317_v13 = vand.u32 4294901760, %v584_v0  ;;  %v587_v52 = vsel %vm426_vm0, %v357_v29, 0 }
 0x101   : > { %2427 = vmatprep.mubr.f32.mxu1 %v10141_v48  ;;  %15724 = vst [vmem:[#allocation265_spill] sm:$0xff] %v10288_v62  ;;  %v10295_v48 = vsub.f32 %v348_v63, %v10273_v59  ;;  %v10308_v21 = vsub.f32 %v350_v58, %v10288_v62  ;;  %v10310_v63 = vand.u32 4294901760, %v352_v47 }
 0x102   : > { %1464 = vmatmul.mubr.f32.gmra.mxu0 %v1463_v25  ;;  %15727 = vst [vmem:[#allocation267_spill] sm:$0xff] %v10301_v33  ;;  %v10303_v25 = vand.u32 4294901760, %v581_v34  ;;  %15732 = vst [vmem:[#allocation271_spill] sm:$0xff] %v10317_v13  ;;  %v1505_v58 = vand.u32 4294901760, %v1504_v56  ;;  %v10334_v56 = vand.u32 4294901760, %v354_v41 }
 0x103   : > { %15726 = vst [vmem:[#allocation266_spill] sm:$0xff] %v10295_v48  ;;  %1474 = vmatprep.mubr.f32.mxu0 %v1473_v60  ;;  %15729 = vst [vmem:[#allocation269_spill] sm:$0xff] %v10308_v21  ;;  %v1495_v60 = vand.u32 4294901760, %v1494_v23 }
 0x104   : > { %2429 = vmatmul.mubr.f32.gmra.mxu1 %v10158_v53  ;;  %15728 = vst [vmem:[#allocation268_spill] sm:$0xff] %v10303_v25  ;;  %15730 = vst [vmem:[#allocation270_spill] sm:$0xff] %v10310_v63  ;;  %v15731_v53 = vand.u32 4294901760, %v10271_v43 }
 0x105   : > { %2435 = vmatprep.mubr.f32.mxu1 %v10165_v55  ;;  %v15733_v55 = vand.u32 4294901760, %v10278_v36  ;;  %15736 = vst [vmem:[#allocation274_spill] sm:$0xff] %v10334_v56 }
 0x106   : > { %1480 = vmatmul.mubr.f32.gmra.mxu0 %v1479_v37  ;;  %v1510_v26 = vsub.f32 %v10271_v43, %v15731_v53  ;;  %v10326_v37 = vsub.f32 %v581_v34, %v10303_v25  ;;  %v359_v43 = vld [vmem:[%s8920_s6 + $0x368] sm:$0xff]  ;;  %v15737_v34 = vand.u32 4294901760, %v10295_v48 }
 0x107   : > { %1490 = vmatprep.mubr.f32.mxu0 %v1489_v12  ;;  %v1520_v61 = vsub.f32 %v10278_v36, %v15733_v55  ;;  %v10341_v36 = vsub.f32 %v584_v0, %v10317_v13  ;;  %v15741_v0 = vand.u32 4294901760, %v10308_v21 }
 0x108   : > { %2437 = vmatmul.mubr.f32.gmra.mxu1 %v10173_v18  ;;  %15734 = vst [vmem:[#allocation272_spill] sm:$0xff] %v10326_v37  ;;  %v745_v53 = vpop.f32.mrf.mxu0  ;;  %v10332_v18 = vsub.f32 %v352_v47, %v10310_v63  ;;  %v1511_v55 = vand.u32 4294901760, %v1510_v26  ;;  %v15739_v47 = vand.u32 4294901760, %v10301_v33  ;;  %v10348_v26 = vand.u32 4294901760, %v587_v52 }
 0x109   : > { %2443 = vmatprep.mubr.f32.mxu1 %v10188_v44  ;;  %v1526_v44 = vsub.f32 %v10295_v48, %v15737_v34  ;;  %15738 = vst [vmem:[#allocation275_spill] sm:$0xff] %v10341_v36  ;;  %v1521_v29 = vand.u32 4294901760, %v1520_v61  ;;  %v590_v34 = vsel %vm426_vm0, %v359_v43, 0 }
 0x10a   : > { %15735 = vst [vmem:[#allocation273_spill] sm:$0xff] %v10332_v18  ;;  %1496 = vmatmul.mubr.f32.gmra.mxu0 %v1495_v60  ;;  %v747_v23 = vpop.f32.mrf.mxu0  ;;  %v1536_v12 = vsub.f32 %v10301_v33, %v15739_v47  ;;  %15740 = vst [vmem:[#allocation276_spill] sm:$0xff] %v10348_v26  ;;  %v361_v47 = vld [vmem:[%s8920_s6 + $0x378] sm:$0xff] }
 0x10b   : > { %1506 = vmatprep.mubr.f32.mxu0 %v1505_v58  ;;  %v1542_v58 = vsub.f32 %v10308_v21, %v15741_v0  ;;  %v1527_v33 = vand.u32 4294901760, %v1526_v44  ;;  %v15744_v0 = vand.u32 4294901760, %v10326_v37  ;;  %v10371_v21 = vand.u32 4294901760, %v590_v34  ;;  %v363_v44 = vld [vmem:[%s8920_s6 + $0x388] sm:$0xff] }
 0x10c   : > { %2445 = vmatmul.mubr.f32.gmra.mxu1 %v10196_v46  ;;  %v10358_v46 = vsub.f32 %v354_v41, %v10334_v56  ;;  %v1537_v43 = vand.u32 4294901760, %v1536_v12  ;;  %v10369_v41 = vsub.f32 %v587_v52, %v10348_v26  ;;  %v593_v48 = vsel %vm426_vm0, %v361_v47, 0  ;;  %v360_v47 = vld [vmem:[%s8920_s6 + $0x370] sm:$0xff] }
 0x10d   : > { %2451 = vmatprep.mubr.f32.mxu1 %v10202_v3  ;;  %v10362_v3 = vand.u32 4294901760, %v356_v6  ;;  %v1552_v61 = vsub.f32 %v10326_v37, %v15744_v0  ;;  %15746 = vst [vmem:[#allocation280_spill] sm:$0xff] %v10371_v21  ;;  %v15748_v52 = vand.u32 4294901760, %v10341_v36  ;;  %v10394_v28 = vsub.f32 %v590_v34, %v10371_v21 }
 0x10e   : > { %15742 = vst [vmem:[#allocation277_spill] sm:$0xff] %v10358_v46  ;;  %1512 = vmatmul.mubr.f32.gmra.mxu0 %v1511_v55  ;;  %v761_v60 = vpop.f32.mrf.mxu0  ;;  %15745 = vst [vmem:[#allocation279_spill] sm:$0xff] %v10369_v41  ;;  %v358_v55 = vld [vmem:[%s8920_s6 + $0x360] sm:$0xff] }
 0x10f   : > { %15743 = vst [vmem:[#allocation278_spill] sm:$0xff] %v10362_v3  ;;  %1522 = vmatprep.mubr.f32.mxu0 %v1521_v29  ;;  %v1543_v29 = vand.u32 4294901760, %v1542_v58  ;;  %v1568_v37 = vsub.f32 %v10341_v36, %v15748_v52  ;;  %v10385_v54 = vsub.f32 %v356_v6, %v10362_v3  ;;  %v596_v58 = vsel %vm426_vm0, %v363_v44, 0  ;;  %15751 = vst [vmem:[#allocation283_spill] sm:$0xff] %v10394_v28  ;;  %v365_v36 = vld [vmem:[%s8920_s6 + $0x398] sm:$0xff] }
 0x110   : > { %2453 = vmatmul.mubr.f32.gmra.mxu1 %v10219_v2  ;;  %v15747_v2 = vand.u32 4294901760, %v10332_v18  ;;  %v763_v0 = vpop.f32.mrf.mxu0  ;;  %v10396_v52 = vand.u32 4294901760, %v593_v48 }
 0x111   : > { %2459 = vmatprep.mubr.f32.mxu1 %v10228_v19  ;;  %15749 = vst [vmem:[#allocation281_spill] sm:$0xff] %v10385_v54  ;;  %v10387_v19 = vand.u32 4294901760, %v358_v55  ;;  %v1569_v8 = vand.u32 4294901760, %v1568_v37 }
 0x112   : > { %v1558_v12 = vsub.f32 %v10332_v18, %v15747_v2  ;;  %1528 = vmatmul.mubr.f32.gmra.mxu0 %v1527_v33  ;;  %v1553_v2 = vand.u32 4294901760, %v1552_v61  ;;  %15752 = vst [vmem:[#allocation284_spill] sm:$0xff] %v10396_v52  ;;  %v10405_v61 = vand.u32 4294901760, %v360_v47  ;;  %v10407_v33 = vand.u32 4294901760, %v596_v58 }
 0x113   : > { %15750 = vst [vmem:[#allocation282_spill] sm:$0xff] %v10387_v19  ;;  %1538 = vmatprep.mubr.f32.mxu0 %v1537_v43  ;;  %v2078_v20 = vpop.f32.mrf.mxu1  ;;  %v15754_v43 = vand.u32 4294901760, %v10358_v46 }
 0x114   : > { %2461 = vmatmul.mubr.f32.gmra.mxu1 %v10250_v14  ;;  %v10398_v6 = vadd.f32 %v2078_v20, %v745_v53  ;;  %v1559_v44 = vand.u32 4294901760, %v1558_v12  ;;  %15755 = vst [vmem:[#allocation286_spill] sm:$0xff] %v10405_v61  ;;  %15756 = vst [vmem:[#allocation287_spill] sm:$0xff] %v10407_v33  ;;  %v10413_v53 = vsub.f32 %v358_v55, %v10387_v19 }
 0x115   : > { %2467 = vmatprep.mubr.f32.mxu1 %v10256_v7  ;;  %v2080_v18 = vpop.f32.mrf.mxu1  ;;  %v1574_v14 = vsub.f32 %v10358_v46, %v15754_v43  ;;  %v362_v7 = vld [vmem:[%s8920_s6 + $0x380] sm:$0xff]  ;;  %v15759_v43 = vand.u32 4294901760, %v10369_v41 }
 0x116   : > { %15753 = vst [vmem:[#allocation285_spill] sm:$0xff] %v10398_v6  ;;  %v777_v34 = vpop.f32.mrf.mxu0  ;;  %1544 = vmatmul.mubr.f32.gmra.mxu0 %v1543_v29  ;;  %v10409_v35 = vadd.f32 %v2080_v18, %v747_v23  ;;  %15758 = vst [vmem:[#allocation289_spill] sm:$0xff] %v10413_v53  ;;  %v10422_v18 = vsub.f32 %v593_v48, %v10396_v52  ;;  %v599_v23 = vsel %vm426_vm0, %v365_v36, 0  ;;  %v10434_v29 = vand.u32 4294901760, %v362_v7  ;;  %v367_v48 = vld [vmem:[%s8920_s6 + $0x3a8] sm:$0xff] }
 0x117   : > { %1554 = vmatprep.mubr.f32.mxu0 %v1553_v2  ;;  %v2086_v12 = vpop.f32.mrf.mxu1  ;;  %v1584_v46 = vsub.f32 %v10369_v41, %v15759_v43  ;;  %v1575_v20 = vand.u32 4294901760, %v1574_v14  ;;  %v10432_v43 = vsub.f32 %v596_v58, %v10407_v33  ;;  %v10443_v14 = vand.u32 4294901760, %v599_v23 }
 0x118   : > { %15757 = vst [vmem:[#allocation288_spill] sm:$0xff] %v10409_v35  ;;  %2469 = vmatmul.mubr.f32.gmra.mxu1 %v10273_v59  ;;  %15760 = vst [vmem:[#allocation290_spill] sm:$0xff] %v10422_v18  ;;  %v779_v37 = vpop.f32.mrf.mxu0  ;;  %v10425_v55 = vadd.f32 %v2086_v12, %v761_v60  ;;  %v10429_v59 = vsub.f32 %v360_v47, %v10405_v61  ;;  %v15766_v60 = vand.u32 4294901760, %v10385_v54  ;;  %v364_v47 = vld [vmem:[%s8920_s6 + $0x390] sm:$0xff]  ;;  %v15768_v35 = vand.u32 4294901760, %v10394_v28 }
 0x119   : > { %2475 = vmatprep.mubr.f32.mxu1 %v10280_v39  ;;  %v2088_v2 = vpop.f32.mrf.mxu1  ;;  %15763 = vst [vmem:[#allocation293_spill] sm:$0xff] %v10432_v43  ;;  %15764 = vst [vmem:[#allocation294_spill] sm:$0xff] %v10434_v29 }
 0x11a   : > { %15761 = vst [vmem:[#allocation291_spill] sm:$0xff] %v10425_v55  ;;  %15762 = vst [vmem:[#allocation292_spill] sm:$0xff] %v10429_v59  ;;  %v793_v41 = vpop.f32.mrf.mxu0  ;;  %1560 = vmatmul.mubr.f32.gmra.mxu0 %v1559_v44  ;;  %v10437_v36 = vadd.f32 %v2088_v2, %v763_v0  ;;  %v1590_v12 = vsub.f32 %v10385_v54, %v15766_v60  ;;  %v1585_v55 = vand.u32 4294901760, %v1584_v46  ;;  %v602_v60 = vsel %vm426_vm0, %v367_v48, 0 }
 0x11b   : > { %15767 = vst [vmem:[#allocation296_spill] sm:$0xff] %v10443_v14  ;;  %1570 = vmatprep.mubr.f32.mxu0 %v1569_v8  ;;  %v2094_v58 = vpop.f32.mrf.mxu1  ;;  %v1600_v0 = vsub.f32 %v10394_v28, %v15768_v35  ;;  %v10458_v46 = vsub.f32 %v362_v7, %v10434_v29  ;;  %v369_v35 = vld [vmem:[%s8920_s6 + $0x3b8] sm:$0xff]  ;;  %v10469_v8 = vsub.f32 %v599_v23, %v10443_v14  ;;  %v15775_v28 = vand.u32 4294901760, %v10422_v18 }
 0x11c   : > { %15765 = vst [vmem:[#allocation295_spill] sm:$0xff] %v10437_v36  ;;  %2477 = vmatmul.mubr.f32.gmra.mxu1 %v10288_v62  ;;  %v795_v2 = vpop.f32.mrf.mxu0  ;;  %v10451_v36 = vadd.f32 %v2094_v58, %v777_v34  ;;  %v10460_v62 = vand.u32 4294901760, %v364_v47  ;;  %v1591_v58 = vand.u32 4294901760, %v1590_v12 }
 0x11d   : > { %2483 = vmatprep.mubr.f32.mxu1 %v10303_v25  ;;  %v2096_v39 = vpop.f32.mrf.mxu1  ;;  %15770 = vst [vmem:[#allocation298_spill] sm:$0xff] %v10458_v46  ;;  %v15773_v25 = vand.u32 4294901760, %v10413_v53  ;;  %15774 = vst [vmem:[#allocation301_spill] sm:$0xff] %v10469_v8  ;;  %v1601_v7 = vand.u32 4294901760, %v1600_v0  ;;  %v15779_v0 = vand.u32 4294901760, %v10432_v43 }
 0x11e   : > { %15769 = vst [vmem:[#allocation297_spill] sm:$0xff] %v10451_v36  ;;  %15771 = vst [vmem:[#allocation299_spill] sm:$0xff] %v10460_v62  ;;  %v809_v44 = vpop.f32.mrf.mxu0  ;;  %1576 = vmatmul.mubr.f32.gmra.mxu0 %v1575_v20  ;;  %v10463_v34 = vadd.f32 %v2096_v39, %v779_v37  ;;  %v1616_v20 = vsub.f32 %v10422_v18, %v15775_v28  ;;  %v10475_v39 = vand.u32 4294901760, %v602_v60  ;;  %v366_v37 = vld [vmem:[%s8920_s6 + $0x3a0] sm:$0xff] }
 0x11f   : > { %v1606_v48 = vsub.f32 %v10413_v53, %v15773_v25  ;;  %1586 = vmatprep.mubr.f32.mxu0 %v1585_v55  ;;  %v605_v25 = vsel %vm426_vm0, %v369_v35, 0  ;;  %v15778_v55 = vand.u32 4294901760, %v10429_v59  ;;  %v1632_v53 = vsub.f32 %v10432_v43, %v15779_v0  ;;  %v368_v43 = vld [vmem:[%s8920_s6 + $0x3b0] sm:$0xff] }
 0x120   : > { %15772 = vst [vmem:[#allocation300_spill] sm:$0xff] %v10463_v34  ;;  %v2102_v54 = vpop.f32.mrf.mxu1  ;;  %2485 = vmatmul.mubr.f32.gmra.mxu1 %v10310_v63  ;;  %15776 = vst [vmem:[#allocation302_spill] sm:$0xff] %v10475_v39  ;;  %v811_v12 = vpop.f32.mrf.mxu0  ;;  %v10490_v18 = vsub.f32 %v364_v47, %v10460_v62  ;;  %v1617_v0 = vand.u32 4294901760, %v1616_v20  ;;  %v10500_v28 = vsub.f32 %v602_v60, %v10475_v39  ;;  %v10502_v47 = vand.u32 4294901760, %v605_v25 }
 0x121   : > { %v10478_v34 = vadd.f32 %v2102_v54, %v793_v41  ;;  %2491 = vmatprep.mubr.f32.mxu1 %v10317_v13  ;;  %v1622_v63 = vsub.f32 %v10429_v59, %v15778_v55  ;;  %v371_v54 = vld [vmem:[%s8920_s6 + $0x3c8] sm:$0xff]  ;;  %v1607_v13 = vand.u32 4294901760, %v1606_v48  ;;  %v10496_v55 = vand.u32 4294901760, %v366_v37 }
 0x122   : > { %v2104_v23 = vpop.f32.mrf.mxu1  ;;  %15780 = vst [vmem:[#allocation304_spill] sm:$0xff] %v10490_v18  ;;  %v825_v41 = vpop.f32.mrf.mxu0  ;;  %1592 = vmatmul.mubr.f32.gmra.mxu0 %v1591_v58  ;;  %15783 = vst [vmem:[#allocation307_spill] sm:$0xff] %v10500_v28  ;;  %v608_v48 = vsel %vm426_vm0, %v371_v54, 0  ;;  %v15785_v20 = vand.u32 4294901760, %v10458_v46 }
 0x123   : > { %15777 = vst [vmem:[#allocation303_spill] sm:$0xff] %v10478_v34  ;;  %v10493_v35 = vadd.f32 %v2104_v23, %v795_v2  ;;  %15782 = vst [vmem:[#allocation306_spill] sm:$0xff] %v10496_v55  ;;  %1602 = vmatprep.mubr.f32.mxu0 %v1601_v7  ;;  %v373_v23 = vld [vmem:[%s8920_s6 + $0x3d8] sm:$0xff]  ;;  %v1623_v34 = vand.u32 4294901760, %v1622_v63  ;;  %v10520_v54 = vsub.f32 %v366_v37, %v10496_v55  ;;  %v370_v63 = vld [vmem:[%s8920_s6 + $0x3c0] sm:$0xff] }
 0x124   : > { %v2110_v59 = vpop.f32.mrf.mxu1  ;;  %2493 = vmatmul.mubr.f32.gmra.mxu1 %v10334_v56  ;;  %15784 = vst [vmem:[#allocation308_spill] sm:$0xff] %v10502_v47  ;;  %v827_v58 = vpop.f32.mrf.mxu0  ;;  %v1638_v60 = vsub.f32 %v10458_v46, %v15785_v20  ;;  %v10539_v20 = vand.u32 4294901760, %v370_v63 }
 0x125   : > { %15781 = vst [vmem:[#allocation305_spill] sm:$0xff] %v10493_v35  ;;  %v10505_v2 = vadd.f32 %v2110_v59, %v809_v44  ;;  %2499 = vmatprep.mubr.f32.mxu1 %v10348_v26  ;;  %v1633_v35 = vand.u32 4294901760, %v1632_v53  ;;  %v15787_v59 = vand.u32 4294901760, %v10469_v8  ;;  %15788 = vst [vmem:[#allocation310_spill] sm:$0xff] %v10520_v54  ;;  %v10522_v26 = vand.u32 4294901760, %v368_v43 }
 0x126   : > { %v2112_v7 = vpop.f32.mrf.mxu1  ;;  %v841_v36 = vpop.f32.mrf.mxu0  ;;  %1608 = vmatmul.mubr.f32.gmra.mxu0 %v1607_v13  ;;  %v10528_v13 = vsub.f32 %v605_v25, %v10502_v47  ;;  %15794 = vst [vmem:[#allocation315_spill] sm:$0xff] %v10539_v20  ;;  %v375_v25 = vld [vmem:[%s8920_s6 + $0x3e8] sm:$0xff] }
 0x127   : > { %v10514_v6 = vadd.f32 %v2112_v7, %v811_v12  ;;  %v1648_v44 = vsub.f32 %v10469_v8, %v15787_v59  ;;  %15789 = vst [vmem:[#allocation311_spill] sm:$0xff] %v10522_v26  ;;  %1618 = vmatprep.mubr.f32.mxu0 %v1617_v0  ;;  %v10530_v12 = vand.u32 4294901760, %v608_v48  ;;  %v611_v7 = vsel %vm426_vm0, %v373_v23, 0 }
 0x128   : > { %v2118_v53 = vpop.f32.mrf.mxu1  ;;  %2501 = vmatmul.mubr.f32.gmra.mxu1 %v10362_v3  ;;  %15790 = vst [vmem:[#allocation312_spill] sm:$0xff] %v10528_v13  ;;  %v843_v37 = vpop.f32.mrf.mxu0  ;;  %v1639_v0 = vand.u32 4294901760, %v1638_v60  ;;  %v15793_v8 = vand.u32 4294901760, %v10490_v18 }
 0x129   : > { %15786 = vst [vmem:[#allocation309_spill] sm:$0xff] %v10514_v6  ;;  %15791 = vst [vmem:[#allocation313_spill] sm:$0xff] %v10530_v12  ;;  %v10533_v59 = vadd.f32 %v2118_v53, %v825_v41  ;;  %2507 = vmatprep.mubr.f32.mxu1 %v10371_v21  ;;  %v10546_v41 = vsub.f32 %v368_v43, %v10522_v26  ;;  %v10548_v53 = vand.u32 4294901760, %v611_v7  ;;  %v372_v21 = vld [vmem:[%s8920_s6 + $0x3d0] sm:$0xff] }
 0x12a   : > { %v2120_v56 = vpop.f32.mrf.mxu1  ;;  %v1654_v3 = vsub.f32 %v10490_v18, %v15793_v8  ;;  %v857_v46 = vpop.f32.mrf.mxu0  ;;  %1624 = vmatmul.mubr.f32.gmra.mxu0 %v1623_v34  ;;  %v1649_v8 = vand.u32 4294901760, %v1648_v44  ;;  %v15798_v18 = vand.u32 4294901760, %v10500_v28  ;;  %v10564_v44 = vsub.f32 %v370_v63, %v10539_v20 }
 0x12b   : > { %15792 = vst [vmem:[#allocation314_spill] sm:$0xff] %v10533_v59  ;;  %v10542_v6 = vadd.f32 %v2120_v56, %v827_v58  ;;  %15796 = vst [vmem:[#allocation317_spill] sm:$0xff] %v10546_v41  ;;  %1634 = vmatprep.mubr.f32.mxu0 %v1633_v35  ;;  %v10557_v58 = vsub.f32 %v608_v48, %v10530_v12  ;;  %v614_v35 = vsel %vm426_vm0, %v375_v25, 0  ;;  %v10566_v59 = vand.u32 4294901760, %v372_v21 }
 0x12c   : > { %15797 = vst [vmem:[#allocation318_spill] sm:$0xff] %v10548_v53  ;;  %v2126_v60 = vpop.f32.mrf.mxu1  ;;  %2509 = vmatmul.mubr.f32.gmra.mxu1 %v10387_v19  ;;  %v1664_v34 = vsub.f32 %v10500_v28, %v15798_v18  ;;  %v859_v43 = vpop.f32.mrf.mxu0  ;;  %v1655_v19 = vand.u32 4294901760, %v1654_v3  ;;  %15801 = vst [vmem:[#allocation321_spill] sm:$0xff] %v10564_v44  ;;  %v377_v18 = vld [vmem:[%s8920_s6 + $0x3f8] sm:$0xff]  ;;  %v15804_v28 = vand.u32 4294901760, %v10520_v54  ;;  %v10576_v25 = vsub.f32 %v611_v7, %v10548_v53  ;;  %v374_v3 = vld [vmem:[%s8920_s6 + $0x3e0] sm:$0xff] }
 0x12d   : > { %15795 = vst [vmem:[#allocation316_spill] sm:$0xff] %v10542_v6  ;;  %15799 = vst [vmem:[#allocation319_spill] sm:$0xff] %v10557_v58  ;;  %v10559_v23 = vadd.f32 %v2126_v60, %v841_v36  ;;  %2515 = vmatprep.mubr.f32.mxu1 %v10396_v52  ;;  %v617_v7 = vsel %vm426_vm0, %v377_v18, 0 }
 0x12e   : > { %v2128_v6 = vpop.f32.mrf.mxu1  ;;  %15802 = vst [vmem:[#allocation322_spill] sm:$0xff] %v10566_v59  ;;  %v873_v56 = vpop.f32.mrf.mxu0  ;;  %1640 = vmatmul.mubr.f32.gmra.mxu0 %v1639_v0  ;;  %v1670_v36 = vsub.f32 %v10520_v54, %v15804_v28  ;;  %15805 = vst [vmem:[#allocation324_spill] sm:$0xff] %v10576_v25  ;;  %v1665_v52 = vand.u32 4294901760, %v1664_v34  ;;  %v15806_v0 = vand.u32 4294901760, %v10528_v13  ;;  %v10592_v34 = vsub.f32 %v372_v21, %v10566_v59 }
 0x12f   : > { %15800 = vst [vmem:[#allocation320_spill] sm:$0xff] %v10559_v23  ;;  %v10569_v48 = vadd.f32 %v2128_v6, %v843_v37  ;;  %1650 = vmatprep.mubr.f32.mxu0 %v1649_v8 }
 0x130   : > { %v2134_v63 = vpop.f32.mrf.mxu1  ;;  %2517 = vmatmul.mubr.f32.gmra.mxu1 %v10405_v61  ;;  %v1680_v6 = vsub.f32 %v10528_v13, %v15806_v0  ;;  %v875_v28 = vpop.f32.mrf.mxu0  ;;  %15809 = vst [vmem:[#allocation327_spill] sm:$0xff] %v10592_v34  ;;  %v10594_v61 = vand.u32 4294901760, %v374_v3  ;;  %v379_v0 = vld [vmem:[%s8920_s6 + $0x408] sm:$0xff] }
 0x131   : > { %15803 = vst [vmem:[#allocation323_spill] sm:$0xff] %v10569_v48  ;;  %v10584_v48 = vand.u32 4294901760, %v614_v35  ;;  %v10586_v60 = vadd.f32 %v2134_v63, %v857_v46  ;;  %2523 = vmatprep.mubr.f32.mxu1 %v10407_v33  ;;  %v1671_v46 = vand.u32 4294901760, %v1670_v36  ;;  %v15812_v63 = vand.u32 4294901760, %v10546_v41  ;;  %v376_v36 = vld [vmem:[%s8920_s6 + $0x3f0] sm:$0xff] }
 0x132   : > { %v2136_v8 = vpop.f32.mrf.mxu1  ;;  %15810 = vst [vmem:[#allocation328_spill] sm:$0xff] %v10594_v61  ;;  %v889_v37 = vpop.f32.mrf.mxu0  ;;  %1656 = vmatmul.mubr.f32.gmra.mxu0 %v1655_v19  ;;  %v1681_v21 = vand.u32 4294901760, %v1680_v6  ;;  %v15817_v6 = vand.u32 4294901760, %v10564_v44 }
 0x133   : > { %15807 = vst [vmem:[#allocation325_spill] sm:$0xff] %v10584_v48  ;;  %15808 = vst [vmem:[#allocation326_spill] sm:$0xff] %v10586_v60  ;;  %v10597_v13 = vadd.f32 %v2136_v8, %v859_v43  ;;  %v1686_v33 = vsub.f32 %v10546_v41, %v15812_v63  ;;  %1666 = vmatprep.mubr.f32.mxu0 %v1665_v52  ;;  %v15813_v60 = vand.u32 4294901760, %v10557_v58  ;;  %v10610_v43 = vand.u32 4294901760, %v617_v7 }
 0x134   : > { %v2142_v54 = vpop.f32.mrf.mxu1  ;;  %2525 = vmatmul.mubr.f32.gmra.mxu1 %v10434_v29  ;;  %v10608_v19 = vsub.f32 %v614_v35, %v10584_v48  ;;  %v891_v8 = vpop.f32.mrf.mxu0  ;;  %v620_v52 = vsel %vm426_vm0, %v379_v0, 0  ;;  %v1702_v29 = vsub.f32 %v10564_v44, %v15817_v6  ;;  %v10622_v35 = vsub.f32 %v374_v3, %v10594_v61 }
 0x135   : > { %15811 = vst [vmem:[#allocation329_spill] sm:$0xff] %v10597_v13  ;;  %v1696_v23 = vsub.f32 %v10557_v58, %v15813_v60  ;;  %15815 = vst [vmem:[#allocation331_spill] sm:$0xff] %v10610_v43  ;;  %v10613_v63 = vadd.f32 %v2142_v54, %v873_v56  ;;  %2531 = vmatprep.mubr.f32.mxu1 %v10443_v14  ;;  %v381_v58 = vld [vmem:[%s8920_s6 + $0x418] sm:$0xff]  ;;  %v1687_v56 = vand.u32 4294901760, %v1686_v33  ;;  %v15819_v14 = vand.u32 4294901760, %v10576_v25 }
 0x136   : > { %15814 = vst [vmem:[#allocation330_spill] sm:$0xff] %v10608_v19  ;;  %v2144_v18 = vpop.f32.mrf.mxu1  ;;  %v905_v41 = vpop.f32.mrf.mxu0  ;;  %1672 = vmatmul.mubr.f32.gmra.mxu0 %v1671_v46  ;;  %v10635_v44 = vsub.f32 %v617_v7, %v10610_v43  ;;  %v10637_v46 = vand.u32 4294901760, %v620_v52 }
 0x137   : > { %15816 = vst [vmem:[#allocation332_spill] sm:$0xff] %v10613_v63  ;;  %v10625_v54 = vadd.f32 %v2144_v18, %v875_v28  ;;  %v1712_v0 = vsub.f32 %v10576_v25, %v15819_v14  ;;  %v10630_v63 = vand.u32 4294901760, %v376_v36  ;;  %1682 = vmatprep.mubr.f32.mxu0 %v1681_v21  ;;  %v1697_v60 = vand.u32 4294901760, %v1696_v23  ;;  %v378_v28 = vld [vmem:[%s8920_s6 + $0x400] sm:$0xff] }
 0x138   : > { %v2150_v6 = vpop.f32.mrf.mxu1  ;;  %2533 = vmatmul.mubr.f32.gmra.mxu1 %v10460_v62  ;;  %15821 = vst [vmem:[#allocation335_spill] sm:$0xff] %v10637_v46  ;;  %v907_v33 = vpop.f32.mrf.mxu0  ;;  %v623_v14 = vsel %vm426_vm0, %v381_v58, 0  ;;  %v1703_v25 = vand.u32 4294901760, %v1702_v29  ;;  %v15822_v62 = vand.u32 4294901760, %v10592_v34  ;;  %v15826_v29 = vand.u32 4294901760, %v10608_v19 }
 0x139   : > { %15818 = vst [vmem:[#allocation333_spill] sm:$0xff] %v10625_v54  ;;  %15820 = vst [vmem:[#allocation334_spill] sm:$0xff] %v10630_v63  ;;  %v10640_v18 = vadd.f32 %v2150_v6, %v889_v37  ;;  %2539 = vmatprep.mubr.f32.mxu1 %v10475_v39  ;;  %v1713_v13 = vand.u32 4294901760, %v1712_v0  ;;  %v10651_v37 = vsub.f32 %v376_v36, %v10630_v63  ;;  %v10653_v6 = vand.u32 4294901760, %v378_v28  ;;  %v380_v0 = vld [vmem:[%s8920_s6 + $0x410] sm:$0xff] }
 0x13a   : > { %v2152_v21 = vpop.f32.mrf.mxu1  ;;  %v1718_v23 = vsub.f32 %v10592_v34, %v15822_v62  ;;  %v921_v3 = vpop.f32.mrf.mxu0  ;;  %1688 = vmatmul.mubr.f32.gmra.mxu0 %v1687_v56  ;;  %v1728_v62 = vsub.f32 %v10608_v19, %v15826_v29  ;;  %v10661_v56 = vsub.f32 %v620_v52, %v10637_v46 }
 0x13b   : > { %v10648_v54 = vadd.f32 %v2152_v21, %v891_v8  ;;  %15824 = vst [vmem:[#allocation337_spill] sm:$0xff] %v10651_v37  ;;  %15825 = vst [vmem:[#allocation338_spill] sm:$0xff] %v10653_v6  ;;  %1698 = vmatprep.mubr.f32.mxu0 %v1697_v60  ;;  %v10663_v8 = vand.u32 4294901760, %v623_v14  ;;  %v10676_v19 = vsub.f32 %v378_v28, %v10653_v6 }
 0x13c   : > { %v2158_v58 = vpop.f32.mrf.mxu1  ;;  %2541 = vmatmul.mubr.f32.gmra.mxu1 %v10496_v55  ;;  %v923_v36 = vpop.f32.mrf.mxu0  ;;  %v1719_v39 = vand.u32 4294901760, %v1718_v23  ;;  %v15828_v55 = vand.u32 4294901760, %v10622_v35  ;;  %v1729_v23 = vand.u32 4294901760, %v1728_v62  ;;  %v15831_v62 = vand.u32 4294901760, %v10651_v37 }
 0x13d   : > { %15823 = vst [vmem:[#allocation336_spill] sm:$0xff] %v10648_v54  ;;  %15827 = vst [vmem:[#allocation339_spill] sm:$0xff] %v10663_v8  ;;  %v10666_v21 = vadd.f32 %v2158_v58, %v905_v41  ;;  %2547 = vmatprep.mubr.f32.mxu1 %v10502_v47  ;;  %v10678_v54 = vand.u32 4294901760, %v380_v0  ;;  %v15830_v58 = vand.u32 4294901760, %v10635_v44 }
 0x13e   : > { %v2160_v60 = vpop.f32.mrf.mxu1  ;;  %v1734_v34 = vsub.f32 %v10622_v35, %v15828_v55  ;;  %v937_v29 = vpop.f32.mrf.mxu0  ;;  %1704 = vmatmul.mubr.f32.gmra.mxu0 %v1703_v25 }
 0x13f   : > { %v10672_v7 = vadd.f32 %v2160_v60, %v907_v33  ;;  %15829 = vst [vmem:[#allocation340_spill] sm:$0xff] %v10678_v54  ;;  %1714 = vmatprep.mubr.f32.mxu0 %v1713_v13  ;;  %v1744_v55 = vsub.f32 %v10635_v44, %v15830_v58  ;;  %v10686_v33 = vsub.f32 %v623_v14, %v10663_v8 }
 0x140   : > { %v2166_v41 = vpop.f32.mrf.mxu1  ;;  %2549 = vmatmul.mubr.f32.gmra.mxu1 %v10522_v26  ;;  %v939_v60 = vpop.f32.mrf.mxu0  ;;  %v1735_v13 = vand.u32 4294901760, %v1734_v34  ;;  %v1750_v58 = vsub.f32 %v10651_v37, %v15831_v62  ;;  %v10698_v14 = vsub.f32 %v380_v0, %v10678_v54  ;;  %v15832_v34 = vand.u32 4294901760, %v10661_v56 }
 0x141   : > { %v10688_v52 = vadd.f32 %v2166_v41, %v921_v3  ;;  %2555 = vmatprep.mubr.f32.mxu1 %v10530_v12  ;;  %v1745_v41 = vand.u32 4294901760, %v1744_v55 }
 0x142   : > { %v2168_v28 = vpop.f32.mrf.mxu1  ;;  %v953_v47 = vpop.f32.mrf.mxu0  ;;  %1720 = vmatmul.mubr.f32.gmra.mxu0 %v1719_v39  ;;  %v1760_v39 = vsub.f32 %v10661_v56, %v15832_v34  ;;  %v15063_v37 = vand.u32 4294901760, %v10698_v14 }
 0x143   : > { %v10691_v26 = vadd.f32 %v2168_v28, %v923_v36  ;;  %1730 = vmatprep.mubr.f32.mxu0 %v1729_v23  ;;  %v15058_v36 = vand.u32 4294901760, %v10686_v33  ;;  %v1751_v23 = vand.u32 4294901760, %v1750_v58 }
 0x144   : > { %v2174_v3 = vpop.f32.mrf.mxu1  ;;  %2557 = vmatmul.mubr.f32.gmra.mxu1 %v10539_v20  ;;  %v955_v28 = vpop.f32.mrf.mxu0  ;;  %v15833_v20 = vand.u32 4294901760, %v10676_v19 }
 0x145   : > { %v10705_v12 = vadd.f32 %v2174_v3, %v937_v29  ;;  %2563 = vmatprep.mubr.f32.mxu1 %v10548_v53  ;;  %v1761_v29 = vand.u32 4294901760, %v1760_v39  ;;  %v1776_v3 = vsub.f32 %v10686_v33, %v15058_v36 }
 0x146   : > { %v2176_v62 = vpop.f32.mrf.mxu1  ;;  %v969_v25 = vpop.f32.mrf.mxu0  ;;  %1736 = vmatmul.mubr.f32.gmra.mxu0 %v1735_v13  ;;  %v1766_v55 = vsub.f32 %v10676_v19, %v15833_v20 }
 0x147   : > { %v10708_v0 = vadd.f32 %v2176_v62, %v939_v60  ;;  %1746 = vmatprep.mubr.f32.mxu0 %v1745_v41  ;;  %v1782_v41 = vsub.f32 %v10698_v14, %v15063_v37  ;;  %v1777_v36 = vand.u32 4294901760, %v1776_v3  ;;  %v15834_v37 = vld [vmem:[#allocation71_spill] sm:$0xff] }
 0x148   : > { %v2182_v34 = vpop.f32.mrf.mxu1  ;;  %2565 = vmatmul.mubr.f32.gmra.mxu1 %v10566_v59  ;;  %v971_v53 = vpop.f32.mrf.mxu0  ;;  %v1767_v62 = vand.u32 4294901760, %v1766_v55 }
 0x149   : > { %v10718_v13 = vadd.f32 %v2182_v34, %v953_v47  ;;  %2571 = vmatprep.mubr.f32.mxu1 %v10584_v48 }
 0x14a   : > { %v2184_v60 = vpop.f32.mrf.mxu1  ;;  %v985_v58 = vpop.f32.mrf.mxu0  ;;  %1752 = vmatmul.mubr.f32.gmra.mxu0 %v1751_v23  ;;  %v1783_v23 = vand.u32 4294901760, %v1782_v41 }
 0x14b   : > { %v10721_v20 = vadd.f32 %v2184_v60, %v955_v28  ;;  %1762 = vmatprep.mubr.f32.mxu0 %v1761_v29 }
 0x14c   : > { %v2190_v39 = vpop.f32.mrf.mxu1  ;;  %2573 = vmatmul.mubr.f32.gmra.mxu1 %v10594_v61  ;;  %v987_v59 = vpop.f32.mrf.mxu0 }
 0x14d   : > { %v10727_v47 = vadd.f32 %v2190_v39, %v969_v25  ;;  %2579 = vmatprep.mubr.f32.mxu1 %v10610_v43 }
 0x14e   : > { %v2192_v34 = vpop.f32.mrf.mxu1  ;;  %v1001_v48 = vpop.f32.mrf.mxu0  ;;  %1768 = vmatmul.mubr.f32.gmra.mxu0 %v1767_v62 }
 0x14f   : > { %v10730_v28 = vadd.f32 %v2192_v34, %v971_v53  ;;  %1778 = vmatprep.mubr.f32.mxu0 %v1777_v36  ;;  %v15835_v34 = vld [vmem:[#allocation73_spill] sm:$0xff] }
 0x150   : > { %v2198_v55 = vpop.f32.mrf.mxu1  ;;  %2581 = vmatmul.mubr.f32.gmra.mxu1 %v10630_v63  ;;  %v1003_v29 = vpop.f32.mrf.mxu0  ;;  %v15840_v63 = vld [vmem:[#allocation5_spill] sm:$0xff] }
 0x151   : > { %v10733_v60 = vadd.f32 %v2198_v55, %v985_v58  ;;  %2587 = vmatprep.mubr.f32.mxu1 %v10637_v46  ;;  %v15836_v46 = vld [vmem:[#allocation78_spill] sm:$0xff]  ;;  %v15841_v43 = vand.u32 4294901760, %v15840_v63  ;;  %v15845_v63 = vand.u32 4294901760, %v8436_v31  ;;  %v15847_v31 = vand.u32 4294901760, %v9117_v49 }
 0x152   : > { %v2200_v3 = vpop.f32.mrf.mxu1  ;;  %v1017_v25 = vpop.f32.mrf.mxu0  ;;  %1784 = vmatmul.mubr.f32.gmra.mxu0 %v1783_v23 }
 0x153   : > { %v10736_v39 = vadd.f32 %v2200_v3, %v987_v59  ;;  %2757 = vmatprep.mubr.f32.mxu0 %v15834_v37 }
 0x154   : > { %v2206_v62 = vpop.f32.mrf.mxu1  ;;  %2589 = vmatmul.mubr.f32.gmra.mxu1 %v10653_v6  ;;  %v1019_v53 = vpop.f32.mrf.mxu0  ;;  %v15837_v6 = vand.u32 4294901760, %v15834_v37 }
 0x155   : > { %v10740_v36 = vadd.f32 %v2206_v62, %v1001_v48  ;;  %2595 = vmatprep.mubr.f32.mxu1 %v10663_v8  ;;  %v15838_v48 = vld [vmem:[#allocation4_spill] sm:$0xff] }
 0x156   : > { %v2208_v41 = vpop.f32.mrf.mxu1  ;;  %v1033_v58 = vpop.f32.mrf.mxu0  ;;  %2760 = vmatmul.mubr.f32.vlgmr.msra.gmra.mxu0 %v15835_v34  ;;  %v15839_v62 = vand.u32 4294901760, %v15838_v48 }
 0x157   : > { %v10744_v55 = vadd.f32 %v2208_v41, %v1003_v29  ;;  %2767 = vmatprep.mubr.f32.mxu0 %v15836_v46  ;;  %v15842_v41 = vld [vmem:[#allocation79_spill] sm:$0xff] }
 0x158   : > { %v2214_v59 = vpop.f32.mrf.mxu1  ;;  %2597 = vmatmul.mubr.f32.gmra.mxu1 %v10678_v54  ;;  %v1035_v23 = vpop.f32.mrf.mxu0  ;;  %4324 = vmatpush1.msra.mxu0 %v15839_v62 }
 0x159   : > { %v10748_v3 = vadd.f32 %v2214_v59, %v1017_v25  ;;  %3527 = vmatprep.mubr.f32.mxu1 %v15837_v6  ;;  %4328 = vmatprep.subr.mxu0 %v15841_v43  ;;  %v15843_v25 = vand.u32 4294901760, %v15835_v34  ;;  %v15844_v59 = vand.u32 4294901760, %v15836_v46 }
 0x15a   : > { %v2216_v8 = vpop.f32.mrf.mxu1  ;;  %v1049_v29 = vpop.f32.mrf.mxu0  ;;  %2770 = vmatmul.mubr.f32.gmra.mxu0 %v15842_v41 }
 0x15b   : > { %v10757_v61 = vadd.f32 %v2216_v8, %v1019_v53  ;;  %2777 = vmatprep.mubr.f32.mxu0 %v9117_v49  ;;  %4332 = vmatpush1.msra.mxu0 %v15845_v63 }
 0x15c   : > { %v2222_v54 = vpop.f32.mrf.mxu1  ;;  %3531 = vmatmul.mubr.f32.vlgmr.msra.gmra.mxu1 %v15843_v25  ;;  %v1051_v37 = vpop.f32.mrf.mxu0  ;;  %v15852_v25 = vld [vmem:[#allocation89_spill] sm:$0xff] }
 0x15d   : > { %v10762_v6 = vadd.f32 %v2222_v54, %v1033_v58  ;;  %5045 = vmatpush1.msra.mxu1 %v8349_v4  ;;  %3539 = vmatprep.mubr.f32.mxu1 %v15844_v59  ;;  %v15846_v4 = vand.u32 4294901760, %v15842_v41  ;;  %v15854_v59 = vand.u32 4294901760, %v9135_v1 }
 0x15e   : > { %v2224_v43 = vpop.f32.mrf.mxu1  ;;  %5047 = vmatprep.subr.mxu1 %v8351_v5  ;;  %v1065_v8 = vpop.f32.mrf.mxu0  ;;  %2780 = vmatmul.mubr.f32.gmra.mxu0 %v9135_v1  ;;  %v15848_v5 = vld [vmem:[#allocation6_spill] sm:$0xff] }
 0x15f   : > { %v10771_v53 = vadd.f32 %v2224_v43, %v1035_v23  ;;  %5049 = vmatpush1.msra.mxu1 %v8362_v9  ;;  %2787 = vmatprep.mubr.f32.mxu0 %v9152_v40  ;;  %v15849_v34 = vand.u32 4294901760, %v15848_v5  ;;  %v15850_v23 = vld [vmem:[#allocation8_spill] sm:$0xff] }
 0x160   : > { %v2230_v54 = vpop.f32.mrf.mxu1  ;;  %3543 = vmatmul.mubr.f32.gmra.mxu1 %v15846_v4  ;;  %v1067_v46 = vpop.f32.mrf.mxu0  ;;  %v15851_v62 = vand.u32 4294901760, %v15850_v23  ;;  %5051 = vmatprep.subr.mxu1 %v8364_v10  ;;  %v15856_v10 = vld [vmem:[#allocation10_spill] sm:$0xff] }
 0x161   : > { %v10777_v58 = vadd.f32 %v2230_v54, %v1049_v29  ;;  %3551 = vmatprep.mubr.f32.mxu1 %v15847_v31  ;;  %4336 = vmatprep.subr.mxu0 %v15849_v34  ;;  %v15853_v29 = vld [vmem:[#allocation94_spill] sm:$0xff]  ;;  %v15855_v54 = vand.u32 4294901760, %v9152_v40  ;;  %v15857_v4 = vand.u32 4294901760, %v15856_v10  ;;  %v15860_v34 = vld [vmem:[#allocation91_spill] sm:$0xff] }
 0x162   : > { %v2232_v48 = vpop.f32.mrf.mxu1  ;;  %4340 = vmatpush1.msra.mxu0 %v15851_v62  ;;  %v1081_v9 = vpop.f32.mrf.mxu0  ;;  %5053 = vmatpush1.msra.mxu1 %v8366_v11 }
 0x163   : > { %2790 = vmatmul.mubr.f32.gmra.mxu0 %v15852_v25  ;;  %v10787_v41 = vadd.f32 %v2232_v48, %v1051_v37  ;;  %4344 = vmatprep.subr.mxu0 %v15857_v4  ;;  %v15858_v37 = vld [vmem:[#allocation12_spill] sm:$0xff]  ;;  %v15862_v48 = vand.u32 4294901760, %v15852_v25 }
 0x164   : > { %2797 = vmatprep.mubr.f32.mxu0 %v15853_v29  ;;  %v2238_v49 = vpop.f32.mrf.mxu1  ;;  %3555 = vmatmul.mubr.f32.gmra.mxu1 %v15854_v59  ;;  %v1083_v43 = vpop.f32.mrf.mxu0  ;;  %v15859_v5 = vand.u32 4294901760, %v15858_v37  ;;  %v15868_v4 = vld [vmem:[#allocation96_spill] sm:$0xff]  ;;  %v15871_v37 = vand.u32 4294901760, %v15860_v34 }
 0x165   : > { %v10793_v63 = vadd.f32 %v2238_v49, %v1065_v8  ;;  %3563 = vmatprep.mubr.f32.mxu1 %v15855_v54  ;;  %5055 = vmatprep.subr.mxu1 %v8378_v15  ;;  %v15861_v8 = vld [vmem:[#allocation95_spill] sm:$0xff]  ;;  %v15863_v49 = vand.u32 4294901760, %v15853_v29  ;;  %v15864_v15 = vld [vmem:[#allocation14_spill] sm:$0xff] }
 0x166   : > { %v2240_v31 = vpop.f32.mrf.mxu1  ;;  %4348 = vmatpush1.msra.mxu0 %v15859_v5  ;;  %v1097_v11 = vpop.f32.mrf.mxu0  ;;  %5057 = vmatpush1.msra.mxu1 %v8380_v16  ;;  %v15865_v59 = vand.u32 4294901760, %v15864_v15 }
 0x167   : > { %2800 = vmatmul.mubr.f32.gmra.mxu0 %v15860_v34  ;;  %v10803_v1 = vadd.f32 %v2240_v31, %v1067_v46  ;;  %v15866_v46 = vld [vmem:[#allocation16_spill] sm:$0xff]  ;;  %5059 = vmatprep.subr.mxu1 %v8382_v17  ;;  %v15869_v31 = vld [vmem:[#allocation3_spill] sm:$0xff]  ;;  %v15873_v17 = vld [vmem:[#allocation18_spill] sm:$0xff] }
 0x168   : > { %2807 = vmatprep.mubr.f32.mxu0 %v15861_v8  ;;  %v2246_v40 = vpop.f32.mrf.mxu1  ;;  %3567 = vmatmul.mubr.f32.gmra.mxu1 %v15862_v48  ;;  %v1099_v23 = vpop.f32.mrf.mxu0  ;;  %v15867_v10 = vand.u32 4294901760, %v15866_v46  ;;  %v15872_v48 = vand.u32 4294901760, %v15861_v8  ;;  %v15877_v46 = vld [vmem:[#allocation100_spill] sm:$0xff] }
 0x169   : > { %v10809_v62 = vadd.f32 %v2246_v40, %v1081_v9  ;;  %3575 = vmatprep.mubr.f32.mxu1 %v15863_v49  ;;  %4352 = vmatprep.subr.mxu0 %v15865_v59  ;;  %v15870_v9 = vld [vmem:[#allocation99_spill] sm:$0xff]  ;;  %v15874_v49 = vand.u32 4294901760, %v15873_v17 }
 0x16a   : > { %v2248_v54 = vpop.f32.mrf.mxu1  ;;  %4356 = vmatpush1.msra.mxu0 %v15867_v10  ;;  %v1113_v16 = vpop.f32.mrf.mxu0  ;;  %5061 = vmatpush1.msra.mxu1 %v15869_v31  ;;  %v15879_v10 = vand.u32 4294901760, %v15868_v4 }
 0x16b   : > { %2810 = vmatmul.mubr.f32.gmra.mxu0 %v15868_v4  ;;  %v10819_v25 = vadd.f32 %v2248_v54, %v1083_v43  ;;  %4360 = vmatprep.subr.mxu0 %v15874_v49  ;;  %v15875_v43 = vld [vmem:[#allocation20_spill] sm:$0xff] }
 0x16c   : > { %2817 = vmatprep.mubr.f32.mxu0 %v15870_v9  ;;  %v2254_v29 = vpop.f32.mrf.mxu1  ;;  %3579 = vmatmul.mubr.f32.gmra.mxu1 %v15871_v37  ;;  %v1115_v5 = vpop.f32.mrf.mxu0  ;;  %v15876_v59 = vand.u32 4294901760, %v15875_v43  ;;  %v15880_v37 = vand.u32 4294901760, %v15870_v9  ;;  %v15886_v43 = vld [vmem:[#allocation7_spill] sm:$0xff] }
 0x16d   : > { %v10825_v40 = vadd.f32 %v2254_v29, %v1097_v11  ;;  %3587 = vmatprep.mubr.f32.mxu1 %v15872_v48  ;;  %5063 = vmatprep.subr.mxu1 %v8410_v24  ;;  %v15878_v11 = vld [vmem:[#allocation104_spill] sm:$0xff]  ;;  %v15881_v24 = vld [vmem:[#allocation22_spill] sm:$0xff] }
 0x16e   : > { %v2256_v15 = vpop.f32.mrf.mxu1  ;;  %4364 = vmatpush1.msra.mxu0 %v15876_v59  ;;  %v1129_v54 = vpop.f32.mrf.mxu0  ;;  %5065 = vmatpush1.msra.mxu1 %v8433_v30  ;;  %v15882_v48 = vand.u32 4294901760, %v15881_v24  ;;  %v15888_v59 = vand.u32 4294901760, %v15877_v46 }
 0x16f   : > { %2820 = vmatmul.mubr.f32.gmra.mxu0 %v15877_v46  ;;  %v10835_v34 = vadd.f32 %v2256_v15, %v1099_v23  ;;  %v15883_v23 = vld [vmem:[#allocation24_spill] sm:$0xff]  ;;  %5067 = vmatprep.subr.mxu1 %v8439_v32  ;;  %v15885_v15 = vld [vmem:[#allocation103_spill] sm:$0xff]  ;;  %v15891_v32 = vld [vmem:[#allocation26_spill] sm:$0xff] }
 0x170   : > { %2827 = vmatprep.mubr.f32.mxu0 %v15878_v11  ;;  %v2262_v8 = vpop.f32.mrf.mxu1  ;;  %3591 = vmatmul.mubr.f32.gmra.mxu1 %v15879_v10  ;;  %v1131_v31 = vpop.f32.mrf.mxu0  ;;  %v15884_v49 = vand.u32 4294901760, %v15883_v23  ;;  %v15892_v24 = vand.u32 4294901760, %v15891_v32  ;;  %v15895_v23 = vld [vmem:[#allocation9_spill] sm:$0xff] }
 0x171   : > { %v10841_v29 = vadd.f32 %v2262_v8, %v1113_v16  ;;  %3599 = vmatprep.mubr.f32.mxu1 %v15880_v37  ;;  %4368 = vmatprep.subr.mxu0 %v15882_v48  ;;  %v15887_v16 = vld [vmem:[#allocation107_spill] sm:$0xff]  ;;  %v15890_v37 = vand.u32 4294901760, %v15878_v11 }
 0x172   : > { %v2264_v17 = vpop.f32.mrf.mxu1  ;;  %4372 = vmatpush1.msra.mxu0 %v15884_v49  ;;  %v1145_v30 = vpop.f32.mrf.mxu0  ;;  %5069 = vmatpush1.msra.mxu1 %v15886_v43  ;;  %v15896_v43 = vld [vmem:[#allocation108_spill] sm:$0xff] }
 0x173   : > { %2830 = vmatmul.mubr.f32.gmra.mxu0 %v15885_v15  ;;  %v10851_v4 = vadd.f32 %v2264_v17, %v1115_v5  ;;  %4376 = vmatprep.subr.mxu0 %v15892_v24  ;;  %v15893_v5 = vld [vmem:[#allocation28_spill] sm:$0xff]  ;;  %v15902_v24 = vand.u32 4294901760, %v15887_v16 }
 0x174   : > { %2837 = vmatprep.mubr.f32.mxu0 %v15887_v16  ;;  %v2270_v9 = vpop.f32.mrf.mxu1  ;;  %3603 = vmatmul.mubr.f32.gmra.mxu1 %v15888_v59  ;;  %v1147_v8 = vpop.f32.mrf.mxu0  ;;  %v15894_v17 = vand.u32 4294901760, %v15893_v5  ;;  %v15898_v59 = vld [vmem:[#allocation11_spill] sm:$0xff]  ;;  %v15903_v5 = vld [vmem:[#allocation30_spill] sm:$0xff] }
 0x175   : > { %v10857_v10 = vadd.f32 %v2270_v9, %v1129_v54  ;;  %3611 = vmatprep.mubr.f32.mxu1 %v15890_v37  ;;  %5071 = vmatprep.subr.mxu1 %v15895_v23  ;;  %v15899_v54 = vld [vmem:[#allocation111_spill] sm:$0xff]  ;;  %v15900_v9 = vand.u32 4294901760, %v15885_v15 }
 0x176   : > { %v2272_v48 = vpop.f32.mrf.mxu1  ;;  %4380 = vmatpush1.msra.mxu0 %v15894_v17  ;;  %v1161_v49 = vpop.f32.mrf.mxu0  ;;  %5073 = vmatpush1.msra.mxu1 %v15898_v59  ;;  %v15904_v17 = vand.u32 4294901760, %v15903_v5  ;;  %v15907_v59 = vld [vmem:[#allocation13_spill] sm:$0xff] }
 0x177   : > { %15889 = vst [vmem:[#allocation71_spill] sm:$0xff] %v10857_v10  ;;  %2840 = vmatmul.mubr.f32.gmra.mxu0 %v15896_v43  ;;  %v10867_v46 = vadd.f32 %v2272_v48, %v1131_v31  ;;  %v15905_v31 = vld [vmem:[#allocation32_spill] sm:$0xff]  ;;  %5075 = vmatprep.subr.mxu1 %v15907_v59  ;;  %v15908_v10 = vld [vmem:[#allocation114_spill] sm:$0xff] }
 0x178   : > { %2847 = vmatprep.mubr.f32.mxu0 %v15899_v54  ;;  %v2278_v11 = vpop.f32.mrf.mxu1  ;;  %3615 = vmatmul.mubr.f32.gmra.mxu1 %v15900_v9  ;;  %v1163_v37 = vpop.f32.mrf.mxu0  ;;  %v15906_v48 = vand.u32 4294901760, %v15905_v31  ;;  %v15910_v9 = vld [vmem:[#allocation15_spill] sm:$0xff]  ;;  %v15915_v31 = vld [vmem:[#allocation34_spill] sm:$0xff] }
 0x179   : > { %15897 = vst [vmem:[#allocation73_spill] sm:$0xff] %v10867_v46  ;;  %v10873_v32 = vadd.f32 %v2278_v11, %v1145_v30  ;;  %3623 = vmatprep.mubr.f32.mxu1 %v15902_v24  ;;  %4384 = vmatprep.subr.mxu0 %v15904_v17  ;;  %v15911_v30 = vld [vmem:[#allocation115_spill] sm:$0xff]  ;;  %v15912_v11 = vand.u32 4294901760, %v15896_v43  ;;  %v15914_v17 = vand.u32 4294901760, %v15899_v54 }
 0x17a   : > { %v2280_v23 = vpop.f32.mrf.mxu1  ;;  %4388 = vmatpush1.msra.mxu0 %v15906_v48  ;;  %v1177_v46 = vpop.f32.mrf.mxu0  ;;  %5077 = vmatpush1.msra.mxu1 %v15910_v9  ;;  %v15916_v48 = vand.u32 4294901760, %v15915_v31  ;;  %v15919_v9 = vld [vmem:[#allocation17_spill] sm:$0xff] }
 0x17b   : > { %15901 = vst [vmem:[#allocation78_spill] sm:$0xff] %v10873_v32  ;;  %2850 = vmatmul.mubr.f32.gmra.mxu0 %v15908_v10  ;;  %v10883_v15 = vadd.f32 %v2280_v23, %v1147_v8  ;;  %v15917_v8 = vld [vmem:[#allocation36_spill] sm:$0xff]  ;;  %5079 = vmatprep.subr.mxu1 %v15919_v9  ;;  %v15920_v32 = vld [vmem:[#allocation117_spill] sm:$0xff] }
 0x17c   : > { %2857 = vmatprep.mubr.f32.mxu0 %v15911_v30  ;;  %v2286_v16 = vpop.f32.mrf.mxu1  ;;  %3627 = vmatmul.mubr.f32.gmra.mxu1 %v15912_v11  ;;  %v1179_v24 = vpop.f32.mrf.mxu0  ;;  %v15918_v23 = vand.u32 4294901760, %v15917_v8  ;;  %v15922_v11 = vld [vmem:[#allocation19_spill] sm:$0xff]  ;;  %v15926_v8 = vld [vmem:[#allocation38_spill] sm:$0xff] }
 0x17d   : > { %15909 = vst [vmem:[#allocation4_spill] sm:$0xff] %v10883_v15  ;;  %v10889_v5 = vadd.f32 %v2286_v16, %v1161_v49  ;;  %3635 = vmatprep.mubr.f32.mxu1 %v15914_v17  ;;  %4392 = vmatprep.subr.mxu0 %v15916_v48  ;;  %v15923_v49 = vld [vmem:[#allocation120_spill] sm:$0xff]  ;;  %v15924_v16 = vand.u32 4294901760, %v15908_v10  ;;  %v15925_v48 = vand.u32 4294901760, %v15911_v30 }
 0x17e   : > { %v2288_v59 = vpop.f32.mrf.mxu1  ;;  %4396 = vmatpush1.msra.mxu0 %v15918_v23  ;;  %v1193_v15 = vpop.f32.mrf.mxu0  ;;  %5081 = vmatpush1.msra.mxu1 %v15922_v11  ;;  %v15927_v23 = vand.u32 4294901760, %v15926_v8  ;;  %v15930_v11 = vld [vmem:[#allocation21_spill] sm:$0xff]  ;;  %v15936_v8 = vand.u32 4294901760, %v15923_v49 }
 0x17f   : > { %15913 = vst [vmem:[#allocation5_spill] sm:$0xff] %v10889_v5  ;;  %2860 = vmatmul.mubr.f32.gmra.mxu0 %v15920_v32  ;;  %v10899_v43 = vadd.f32 %v2288_v59, %v1163_v37  ;;  %v15928_v37 = vld [vmem:[#allocation40_spill] sm:$0xff]  ;;  %5083 = vmatprep.subr.mxu1 %v15930_v11  ;;  %v15931_v5 = vld [vmem:[#allocation121_spill] sm:$0xff] }
 0x180   : > { %2867 = vmatprep.mubr.f32.mxu0 %v15923_v49  ;;  %v2294_v54 = vpop.f32.mrf.mxu1  ;;  %3639 = vmatmul.mubr.f32.gmra.mxu1 %v15924_v16  ;;  %v1195_v17 = vpop.f32.mrf.mxu0  ;;  %v15929_v59 = vand.u32 4294901760, %v15928_v37 }
 0x181   : > { %15921 = vst [vmem:[#allocation79_spill] sm:$0xff] %v10899_v43  ;;  %v10905_v31 = vadd.f32 %v2294_v54, %v1177_v46  ;;  %3647 = vmatprep.mubr.f32.mxu1 %v15925_v48  ;;  %4400 = vmatprep.subr.mxu0 %v15927_v23  ;;  %v15933_v46 = vld [vmem:[#allocation123_spill] sm:$0xff]  ;;  %v15934_v54 = vand.u32 4294901760, %v15920_v32  ;;  %v15937_v23 = vld [vmem:[#allocation42_spill] sm:$0xff] }
 0x182   : > { %v2296_v9 = vpop.f32.mrf.mxu1  ;;  %4404 = vmatpush1.msra.mxu0 %v15929_v59  ;;  %v1209_v43 = vpop.f32.mrf.mxu0  ;;  %5085 = vmatpush1.msra.mxu1 %v15485_v57  ;;  %v15938_v37 = vand.u32 4294901760, %v15937_v23  ;;  %v15941_v57 = vld [vmem:[#allocation25_spill] sm:$0xff] }
 0x183   : > { %2870 = vmatmul.mubr.f32.gmra.mxu0 %v15931_v5  ;;  %v10915_v10 = vadd.f32 %v2296_v9, %v1179_v24  ;;  %v15939_v24 = vld [vmem:[#allocation44_spill] sm:$0xff]  ;;  %5087 = vmatprep.subr.mxu1 %v15941_v57 }
 0x184   : > { %2877 = vmatprep.mubr.f32.mxu0 %v15933_v46  ;;  %v2302_v30 = vpop.f32.mrf.mxu1  ;;  %3651 = vmatmul.mubr.f32.gmra.mxu1 %v15934_v54  ;;  %v1211_v16 = vpop.f32.mrf.mxu0  ;;  %v15940_v9 = vand.u32 4294901760, %v15939_v24  ;;  %v15944_v54 = vld [vmem:[#allocation27_spill] sm:$0xff]  ;;  %v15949_v24 = vld [vmem:[#allocation46_spill] sm:$0xff] }
 0x185   : > { %15932 = vst [vmem:[#allocation6_spill] sm:$0xff] %v10915_v10  ;;  %v10921_v48 = vadd.f32 %v2302_v30, %v1193_v15  ;;  %3659 = vmatprep.mubr.f32.mxu1 %v15936_v8  ;;  %4408 = vmatprep.subr.mxu0 %v15938_v37  ;;  %v15942_v10 = vld [vmem:[#allocation125_spill] sm:$0xff]  ;;  %v15945_v15 = vld [vmem:[#allocation126_spill] sm:$0xff]  ;;  %v15946_v30 = vand.u32 4294901760, %v15931_v5  ;;  %v15948_v37 = vand.u32 4294901760, %v15933_v46 }
 0x186   : > { %v2304_v59 = vpop.f32.mrf.mxu1  ;;  %4412 = vmatpush1.msra.mxu0 %v15940_v9  ;;  %v1225_v11 = vpop.f32.mrf.mxu0  ;;  %5089 = vmatpush1.msra.mxu1 %v15944_v54  ;;  %v15950_v9 = vand.u32 4294901760, %v15949_v24  ;;  %v15953_v54 = vld [vmem:[#allocation29_spill] sm:$0xff] }
 0x187   : > { %15935 = vst [vmem:[#allocation8_spill] sm:$0xff] %v10921_v48  ;;  %2880 = vmatmul.mubr.f32.gmra.mxu0 %v15942_v10  ;;  %v10931_v32 = vadd.f32 %v2304_v59, %v1195_v17  ;;  %v15951_v17 = vld [vmem:[#allocation48_spill] sm:$0xff]  ;;  %5091 = vmatprep.subr.mxu1 %v15953_v54  ;;  %v15954_v48 = vld [vmem:[#allocation129_spill] sm:$0xff] }
 0x188   : > { %2887 = vmatprep.mubr.f32.mxu0 %v15945_v15  ;;  %v2310_v49 = vpop.f32.mrf.mxu1  ;;  %3663 = vmatmul.mubr.f32.gmra.mxu1 %v15946_v30  ;;  %v1227_v8 = vpop.f32.mrf.mxu0  ;;  %v15952_v59 = vand.u32 4294901760, %v15951_v17  ;;  %v15956_v30 = vld [vmem:[#allocation31_spill] sm:$0xff]  ;;  %v15961_v17 = vld [vmem:[#allocation50_spill] sm:$0xff] }
 0x189   : > { %15943 = vst [vmem:[#allocation89_spill] sm:$0xff] %v10931_v32  ;;  %v10937_v23 = vadd.f32 %v2310_v49, %v1209_v43  ;;  %3671 = vmatprep.mubr.f32.mxu1 %v15948_v37  ;;  %4416 = vmatprep.subr.mxu0 %v15950_v9  ;;  %v15957_v43 = vld [vmem:[#allocation131_spill] sm:$0xff]  ;;  %v15958_v49 = vand.u32 4294901760, %v15942_v10  ;;  %v15960_v9 = vand.u32 4294901760, %v15945_v15 }
 0x18a   : > { %v2312_v57 = vpop.f32.mrf.mxu1  ;;  %4420 = vmatpush1.msra.mxu0 %v15952_v59  ;;  %v1241_v32 = vpop.f32.mrf.mxu0  ;;  %5093 = vmatpush1.msra.mxu1 %v15956_v30  ;;  %v15962_v59 = vand.u32 4294901760, %v15961_v17  ;;  %v15965_v30 = vld [vmem:[#allocation33_spill] sm:$0xff] }
 0x18b   : > { %15947 = vst [vmem:[#allocation94_spill] sm:$0xff] %v10937_v23  ;;  %2890 = vmatmul.mubr.f32.gmra.mxu0 %v15954_v48  ;;  %v10947_v5 = vadd.f32 %v2312_v57, %v1211_v16  ;;  %v15963_v16 = vld [vmem:[#allocation52_spill] sm:$0xff]  ;;  %5095 = vmatprep.subr.mxu1 %v15965_v30  ;;  %v15966_v23 = vld [vmem:[#allocation23_spill] sm:$0xff] }
 0x18c   : > { %2897 = vmatprep.mubr.f32.mxu0 %v15957_v43  ;;  %v2318_v46 = vpop.f32.mrf.mxu1  ;;  %3675 = vmatmul.mubr.f32.gmra.mxu1 %v15958_v49  ;;  %v1243_v37 = vpop.f32.mrf.mxu0  ;;  %v15964_v57 = vand.u32 4294901760, %v15963_v16  ;;  %v15968_v49 = vld [vmem:[#allocation35_spill] sm:$0xff]  ;;  %v15973_v16 = vld [vmem:[#allocation54_spill] sm:$0xff] }
 0x18d   : > { %15955 = vst [vmem:[#allocation10_spill] sm:$0xff] %v10947_v5  ;;  %v10953_v24 = vadd.f32 %v2318_v46, %v1225_v11  ;;  %3683 = vmatprep.mubr.f32.mxu1 %v15960_v9  ;;  %4424 = vmatprep.subr.mxu0 %v15962_v59  ;;  %v15969_v11 = vld [vmem:[#allocation134_spill] sm:$0xff]  ;;  %v15970_v46 = vand.u32 4294901760, %v15954_v48  ;;  %v15972_v59 = vand.u32 4294901760, %v15957_v43 }
 0x18e   : > { %v2320_v54 = vpop.f32.mrf.mxu1  ;;  %4428 = vmatpush1.msra.mxu0 %v15964_v57  ;;  %v1257_v5 = vpop.f32.mrf.mxu0  ;;  %5097 = vmatpush1.msra.mxu1 %v15968_v49  ;;  %v15974_v57 = vand.u32 4294901760, %v15973_v16  ;;  %v15977_v49 = vld [vmem:[#allocation37_spill] sm:$0xff] }
 0x18f   : > { %15959 = vst [vmem:[#allocation12_spill] sm:$0xff] %v10953_v24  ;;  %2900 = vmatmul.mubr.f32.gmra.mxu0 %v15966_v23  ;;  %v10963_v10 = vadd.f32 %v2320_v54, %v1227_v8  ;;  %v15975_v8 = vld [vmem:[#allocation56_spill] sm:$0xff]  ;;  %5099 = vmatprep.subr.mxu1 %v15977_v49 }
 0x190   : > { %2907 = vmatprep.mubr.f32.mxu0 %v15969_v11  ;;  %v2326_v15 = vpop.f32.mrf.mxu1  ;;  %3687 = vmatmul.mubr.f32.gmra.mxu1 %v15970_v46  ;;  %v1259_v9 = vpop.f32.mrf.mxu0  ;;  %v15976_v54 = vand.u32 4294901760, %v15975_v8  ;;  %v15978_v24 = vld [vmem:[#allocation136_spill] sm:$0xff]  ;;  %v15982_v46 = vand.u32 4294901760, %v15966_v23  ;;  %v15984_v8 = vld [vmem:[#allocation58_spill] sm:$0xff] }
 0x191   : > { %15967 = vst [vmem:[#allocation91_spill] sm:$0xff] %v10963_v10  ;;  %v10969_v17 = vadd.f32 %v2326_v15, %v1241_v32  ;;  %3695 = vmatprep.mubr.f32.mxu1 %v15972_v59  ;;  %4432 = vmatprep.subr.mxu0 %v15974_v57  ;;  %v15980_v32 = vld [vmem:[#allocation39_spill] sm:$0xff]  ;;  %v15983_v57 = vand.u32 4294901760, %v15969_v11 }
 0x192   : > { %v2328_v30 = vpop.f32.mrf.mxu1  ;;  %4436 = vmatpush1.msra.mxu0 %v15976_v54  ;;  %v1273_v10 = vpop.f32.mrf.mxu0  ;;  %5101 = vmatpush1.msra.mxu1 %v15980_v32  ;;  %v15981_v15 = vld [vmem:[#allocation139_spill] sm:$0xff]  ;;  %v15985_v54 = vand.u32 4294901760, %v15984_v8  ;;  %v15988_v32 = vld [vmem:[#allocation41_spill] sm:$0xff]  ;;  %v8304_v8 = vmov 0  }
 0x193   : > { %15971 = vst [vmem:[#allocation95_spill] sm:$0xff] %v10969_v17  ;;  %2910 = vmatmul.mubr.f32.gmra.mxu0 %v15978_v24  ;;  %v10979_v48 = vadd.f32 %v2328_v30, %v1243_v37  ;;  %v15986_v30 = vld [vmem:[#allocation60_spill] sm:$0xff]  ;;  %5103 = vmatprep.subr.mxu1 %v15988_v32  ;;  %v15994_v32 = vand.u32 4294901760, %v8955_v27  ;;  %v15998_v27 = vld [vmem:[#allocation63_spill] sm:$0xff] }
 0x194   : > { %2917 = vmatprep.mubr.f32.mxu0 %v15981_v15  ;;  %v2334_v43 = vpop.f32.mrf.mxu1  ;;  %3699 = vmatmul.mubr.f32.gmra.mxu1 %v15982_v46  ;;  %v1275_v59 = vpop.f32.mrf.mxu0  ;;  %v15987_v49 = vand.u32 4294901760, %v15986_v30  ;;  %v15989_v17 = vld [vmem:[#allocation140_spill] sm:$0xff]  ;;  %v7397_v46 = vld [vmem:[%s11004_s14 + $0x8] sm:$0xff] }
 0x195   : > { %15979 = vst [vmem:[#allocation14_spill] sm:$0xff] %v10979_v48  ;;  %v10985_v16 = vadd.f32 %v2334_v43, %v1257_v5  ;;  %3707 = vmatprep.mubr.f32.mxu1 %v15983_v57  ;;  %4440 = vmatprep.subr.mxu0 %v15985_v54  ;;  %v15990_v5 = vld [vmem:[#allocation142_spill] sm:$0xff]  ;;  %v15991_v43 = vand.u32 4294901760, %v15978_v24  ;;  %v15993_v30 = vld [vmem:[#allocation144_spill] sm:$0xff] }
 0x196   : > { %v2336_v37 = vpop.f32.mrf.mxu1  ;;  %4444 = vmatpush1.msra.mxu0 %v15987_v49  ;;  %v1289_v48 = vpop.f32.mrf.mxu0  ;;  %5105 = vmatpush1.msra.mxu1 %v15533_v42  ;;  %v15992_v42 = vand.u32 4294901760, %v15981_v15  ;;  %v7396_v24 = vld [vmem:[%s11004_s14] sm:$0xff]  ;;  %v15995_v15 = vand.u32 4294901760, %v15989_v17 }
 0x197   : > { %2920 = vmatmul.mubr.f32.gmra.mxu0 %v15989_v17  ;;  %v10996_v23 = vadd.f32 %v2336_v37, %v1259_v9  ;;  %8163 = vset.pattern.permute.xlu0 %v8304_v8  ;;  %v16001_v17 = vld [vmem:[#allocation45_spill] sm:$0xff] }
 0x198   : > { %2927 = vmatprep.mubr.f32.mxu0 %v15990_v5  ;;  %v2342_v11 = vpop.f32.mrf.mxu1  ;;  %3711 = vmatmul.mubr.f32.gmra.mxu1 %v15991_v43  ;;  %v1291_v57 = vpop.f32.mrf.mxu0 }
 0x199   : > { %v11010_v9 = vadd.f32 %v2342_v11, %v1273_v10  ;;  %3719 = vmatprep.mubr.f32.mxu1 %v15992_v42  ;;  %7469 = vperm.xlu0 %8163, %v7397_v46   ;;  %v7399_v11 = vld [vmem:[%s11004_s14 + $0x18] sm:$0xff]  ;;  %v15997_v42 = vand.u32 4294901760, %v15990_v5  ;;  %v16003_v5 = vand.u32 4294901760, %v15993_v30 }
 0x19a   : > { %v2344_v54 = vpop.f32.mrf.mxu1  ;;  %8162 = vset.pattern.permute.xlu1 %v8304_v8  ;;  %v1305_v37 = vpop.f32.mrf.mxu0  ;;  %4468 = vmatprep.subr.mxu0 %v15994_v32  ;;  %v15999_v8 = vand.u32 4294901760, %v15998_v27  ;;  %v16004_v27 = vand.u32 4294901760, %v9524_v50 }
 0x19b   : > { %2930 = vmatmul.mubr.f32.gmra.mxu0 %v15993_v30  ;;  %v11015_v49 = vadd.f32 %v2344_v54, %v1275_v59  ;;  %7464 = vperm.xlu1 %8162, %v7396_v24   ;;  %v7401_v24 = vld [vmem:[%s11004_s14 + $0x28] sm:$0xff]  ;;  %v7400_v30 = vld [vmem:[%s11004_s14 + $0x20] sm:$0xff] }
 0x19c   : > { %2937 = vmatprep.mubr.f32.mxu0 %v9524_v50  ;;  %v2350_v10 = vpop.f32.mrf.mxu1  ;;  %3723 = vmatmul.mubr.f32.gmra.mxu1 %v15995_v15  ;;  %v1307_v43 = vpop.f32.mrf.mxu0  ;;  %v7398_v15 = vld [vmem:[%s11004_s14 + $0x10] sm:$0xff]  ;;  %v16010_v50 = vand.u32 4294901760, %v9551_v51 }
 0x19d   : > { %v11024_v46 = vadd.f32 %v2350_v10, %v1289_v48  ;;  %3731 = vmatprep.mubr.f32.mxu1 %v15997_v42  ;;  %7479 = vperm.xlu0 %8163, %v7399_v11   ;;  %v16002_v48 = vld [vmem:[#allocation148_spill] sm:$0xff] }
 0x19e   : > { %v2352_v59 = vpop.f32.mrf.mxu1  ;;  %4472 = vmatpush2.msra.mxu0 %v15999_v8  ;;  %v1321_v54 = vpop.f32.mrf.mxu0  ;;  %5127 = vmatprep.subr.mxu1 %v16001_v17  ;;  %v16006_v17 = vld [vmem:[#allocation43_spill] sm:$0xff] }
 0x19f   : > { %15996 = vst [vmem:[#allocation16_spill] sm:$0xff] %v11024_v46  ;;  %2940 = vmatmul.mubr.f32.gmra.mxu0 %v9551_v51  ;;  %v11031_v32 = vadd.f32 %v2352_v59, %v1291_v57  ;;  %v16005_v57 = vld [vmem:[#allocation47_spill] sm:$0xff]  ;;  %7474 = vperm.xlu1 %8162, %v7398_v15   ;;  %v7402_v51 = vld [vmem:[%s11004_s14 + $0x30] sm:$0xff] }
 0x1a0   : > { %2947 = vmatprep.mubr.f32.mxu0 %v16002_v48  ;;  %v2358_v10 = vpop.f32.mrf.mxu1  ;;  %3735 = vmatmul.mubr.f32.gmra.mxu1 %v16003_v5  ;;  %v1323_v11 = vpop.f32.mrf.mxu0  ;;  %v16008_v5 = vld [vmem:[#allocation65_spill] sm:$0xff] }
 0x1a1   : > { %16000 = vst [vmem:[#allocation96_spill] sm:$0xff] %v11031_v32  ;;  %v11039_v42 = vadd.f32 %v2358_v10, %v1305_v37  ;;  %3743 = vmatprep.mubr.f32.mxu1 %v16004_v27  ;;  %5129 = vmatpush2.msra.mxu1 %v16005_v57  ;;  %v16009_v46 = vand.u32 4294901760, %v16008_v5  ;;  %v7403_v10 = vld [vmem:[%s11004_s14 + $0x38] sm:$0xff]  ;;  %v16012_v27 = vand.u32 4294901760, %v16002_v48  ;;  %v16017_v48 = vand.u32 4294901760, %v16006_v17 }
 0x1a2   : > { %v2360_v59 = vpop.f32.mrf.mxu1  ;;  %7489 = vperm.xlu0 %8163, %v7401_v24   ;;  %v1337_v8 = vpop.f32.mrf.mxu0 }
 0x1a3   : > { %2950 = vmatmul.mubr.f32.gmra.mxu0 %v16006_v17  ;;  %v11045_v32 = vadd.f32 %v2360_v59, %v1307_v43  ;;  %4476 = vmatprep.subr.mxu0 %v16009_v46  ;;  %v16013_v43 = vld [vmem:[#allocation67_spill] sm:$0xff]  ;;  %v7404_v17 = vld [vmem:[%s11004_s14 + $0x40] sm:$0xff] }
 0x1a4   : > { %2957 = vmatprep.mubr.f32.mxu0 %v9586_v22  ;;  %v2366_v37 = vpop.f32.mrf.mxu1  ;;  %3747 = vmatmul.mubr.f32.gmra.mxu1 %v16010_v50  ;;  %v1339_v15 = vpop.f32.mrf.mxu0  ;;  %v16014_v57 = vand.u32 4294901760, %v16013_v43  ;;  %v16016_v50 = vld [vmem:[#allocation49_spill] sm:$0xff] }
 0x1a5   : > { %16007 = vst [vmem:[#allocation3_spill] sm:$0xff] %v11045_v32  ;;  %v11054_v24 = vadd.f32 %v2366_v37, %v1321_v54  ;;  %3755 = vmatprep.mubr.f32.mxu1 %v16012_v27  ;;  %7484 = vperm.xlu1 %8162, %v7400_v30   ;;  %v7405_v37 = vld [vmem:[%s11004_s14 + $0x48] sm:$0xff] }
 0x1a6   : > { %4480 = vmatpush2.msra.mxu0 %v16014_v57  ;;  %v2368_v59 = vpop.f32.mrf.mxu1  ;;  %7499 = vperm.xlu0 %8163, %v7403_v10   ;;  %v1353_v46 = vpop.f32.mrf.mxu0  ;;  %v16019_v10 = vand.u32 4294901760, %v9586_v22  ;;  %v16026_v22 = vand.u32 4294901760, %v9595_v45  ;;  %v16217_v32 = vld [vmem:[#allocation267_spill] sm:$0xff] }
 0x1a7   : > { %16011 = vst [vmem:[#allocation99_spill] sm:$0xff] %v11054_v24  ;;  %2960 = vmatmul.mubr.f32.gmra.mxu0 %v9595_v45  ;;  %v11061_v5 = vadd.f32 %v2368_v59, %v1323_v11  ;;  %5131 = vmatprep.subr.mxu1 %v16016_v50  ;;  %v16020_v11 = vld [vmem:[#allocation51_spill] sm:$0xff]  ;;  %v16021_v59 = vld [vmem:[#allocation154_spill] sm:$0xff]  ;;  %v7406_v45 = vld [vmem:[%s11004_s14 + $0x50] sm:$0xff] }
 0x1a8   : > { %2967 = vmatprep.mubr.f32.mxu0 %v9615_v38  ;;  %v2374_v54 = vpop.f32.mrf.mxu1  ;;  %3759 = vmatmul.mubr.f32.gmra.mxu1 %v16017_v48  ;;  %v1355_v27 = vpop.f32.mrf.mxu0  ;;  %v16023_v48 = vld [vmem:[#allocation70_spill] sm:$0xff] }
 0x1a9   : > { %16015 = vst [vmem:[#allocation18_spill] sm:$0xff] %v11061_v5  ;;  %v11069_v30 = vadd.f32 %v2374_v54, %v1337_v8  ;;  %3767 = vmatprep.mubr.f32.mxu1 %v16019_v10  ;;  %5133 = vmatpush2.msra.mxu1 %v16020_v11  ;;  %v16024_v5 = vand.u32 4294901760, %v16023_v48  ;;  %v16025_v8 = vld [vmem:[#allocation156_spill] sm:$0xff]  ;;  %v7407_v10 = vld [vmem:[%s11004_s14 + $0x58] sm:$0xff]  ;;  %v16028_v11 = vand.u32 4294901760, %v9615_v38  ;;  %v16035_v38 = vand.u32 4294901760, %v16021_v59 }
 0x1aa   : > { %v2376_v43 = vpop.f32.mrf.mxu1  ;;  %7494 = vperm.xlu1 %8162, %v7402_v51   ;;  %7509 = vperm.xlu0 %8163, %v7405_v37   ;;  %v1369_v57 = vpop.f32.mrf.mxu0 }
 0x1ab   : > { %16018 = vst [vmem:[#allocation20_spill] sm:$0xff] %v11069_v30  ;;  %2970 = vmatmul.mubr.f32.gmra.mxu0 %v16021_v59  ;;  %v11075_v50 = vadd.f32 %v2376_v43, %v1339_v15  ;;  %4484 = vmatprep.subr.mxu0 %v16024_v5  ;;  %v16029_v15 = vld [vmem:[#allocation72_spill] sm:$0xff]  ;;  %v7408_v59 = vld [vmem:[%s11004_s14 + $0x60] sm:$0xff] }
 0x1ac   : > { %2977 = vmatprep.mubr.f32.mxu0 %v16025_v8  ;;  %v2382_v54 = vpop.f32.mrf.mxu1  ;;  %3771 = vmatmul.mubr.f32.gmra.mxu1 %v16026_v22  ;;  %v1371_v51 = vpop.f32.mrf.mxu0  ;;  %v16030_v43 = vand.u32 4294901760, %v16029_v15  ;;  %v16033_v22 = vld [vmem:[#allocation53_spill] sm:$0xff] }
 0x1ad   : > { %16022 = vst [vmem:[#allocation100_spill] sm:$0xff] %v11075_v50  ;;  %v11084_v37 = vadd.f32 %v2382_v54, %v1353_v46  ;;  %3779 = vmatprep.mubr.f32.mxu1 %v16028_v11  ;;  %v16031_v50 = vld [vmem:[#allocation158_spill] sm:$0xff]  ;;  %5135 = vmatprep.subr.mxu1 %v16033_v22  ;;  %v16034_v46 = vld [vmem:[#allocation159_spill] sm:$0xff] }
 0x1ae   : > { %4488 = vmatpush2.msra.mxu0 %v16030_v43  ;;  %v2384_v48 = vpop.f32.mrf.mxu1  ;;  %7504 = vperm.xlu1 %8162, %v7404_v17   ;;  %v1385_v5 = vpop.f32.mrf.mxu0  ;;  %v7409_v11 = vld [vmem:[%s11004_s14 + $0x68] sm:$0xff]  ;;  %v16039_v22 = vld [vmem:[#allocation162_spill] sm:$0xff] }
 0x1af   : > { %16027 = vst [vmem:[#allocation104_spill] sm:$0xff] %v11084_v37  ;;  %7519 = vperm.xlu0 %8163, %v7407_v10   ;;  %2980 = vmatmul.mubr.f32.gmra.mxu0 %v16031_v50  ;;  %v11091_v30 = vadd.f32 %v2384_v48, %v1355_v27  ;;  %v16037_v10 = vand.u32 4294901760, %v16025_v8  ;;  %v16038_v27 = vld [vmem:[#allocation55_spill] sm:$0xff]  ;;  %v16044_v8 = vand.u32 4294901760, %v16031_v50  ;;  %v7410_v50 = vld [vmem:[%s11004_s14 + $0x70] sm:$0xff] }
 0x1b0   : > { %2987 = vmatprep.mubr.f32.mxu0 %v16034_v46  ;;  %v2390_v54 = vpop.f32.mrf.mxu1  ;;  %3783 = vmatmul.mubr.f32.gmra.mxu1 %v16035_v38  ;;  %v1387_v15 = vpop.f32.mrf.mxu0  ;;  %v16041_v38 = vld [vmem:[#allocation74_spill] sm:$0xff] }
 0x1b1   : > { %16032 = vst [vmem:[#allocation22_spill] sm:$0xff] %v11091_v30  ;;  %v11099_v17 = vadd.f32 %v2390_v54, %v1369_v57  ;;  %3791 = vmatprep.mubr.f32.mxu1 %v16037_v10  ;;  %5137 = vmatpush2.msra.mxu1 %v16038_v27  ;;  %v16042_v37 = vand.u32 4294901760, %v16041_v38  ;;  %v16043_v57 = vld [vmem:[#allocation164_spill] sm:$0xff]  ;;  %v7411_v10 = vld [vmem:[%s11004_s14 + $0x78] sm:$0xff]  ;;  %v16046_v27 = vand.u32 4294901760, %v16034_v46  ;;  %v16053_v46 = vand.u32 4294901760, %v16039_v22 }
 0x1b2   : > { %v2392_v43 = vpop.f32.mrf.mxu1  ;;  %7514 = vperm.xlu1 %8162, %v7406_v45   ;;  %v1401_v48 = vpop.f32.mrf.mxu0 }
 0x1b3   : > { %16036 = vst [vmem:[#allocation24_spill] sm:$0xff] %v11099_v17  ;;  %7529 = vperm.xlu0 %8163, %v7409_v11   ;;  %2990 = vmatmul.mubr.f32.gmra.mxu0 %v16039_v22  ;;  %v11105_v30 = vadd.f32 %v2392_v43, %v1371_v51  ;;  %v16047_v51 = vld [vmem:[#allocation76_spill] sm:$0xff]  ;;  %v7412_v22 = vld [vmem:[%s11004_s14 + $0x80] sm:$0xff] }
 0x1b4   : > { %4492 = vmatprep.subr.mxu0 %v16042_v37  ;;  %2997 = vmatprep.mubr.f32.mxu0 %v16043_v57  ;;  %v2398_v54 = vpop.f32.mrf.mxu1  ;;  %v1403_v45 = vpop.f32.mrf.mxu0  ;;  %v16048_v43 = vand.u32 4294901760, %v16047_v51 }
 0x1b5   : > { %16040 = vst [vmem:[#allocation103_spill] sm:$0xff] %v11105_v30  ;;  %3795 = vmatmul.mubr.f32.gmra.mxu1 %v16044_v8  ;;  %v11114_v11 = vadd.f32 %v2398_v54, %v1385_v5  ;;  %v16049_v30 = vld [vmem:[#allocation167_spill] sm:$0xff]  ;;  %v16051_v8 = vld [vmem:[#allocation57_spill] sm:$0xff]  ;;  %v16052_v5 = vld [vmem:[#allocation168_spill] sm:$0xff] }
 0x1b6   : > { %3803 = vmatprep.mubr.f32.mxu1 %v16046_v27  ;;  %4496 = vmatpush2.msra.mxu0 %v16048_v43  ;;  %v2400_v38 = vpop.f32.mrf.mxu1  ;;  %v1417_v37 = vpop.f32.mrf.mxu0  ;;  %v7413_v27 = vld [vmem:[%s11004_s14 + $0x88] sm:$0xff] }
 0x1b7   : > { %16045 = vst [vmem:[#allocation7_spill] sm:$0xff] %v11114_v11  ;;  %7524 = vperm.xlu1 %8162, %v7408_v59   ;;  %7539 = vperm.xlu0 %8163, %v7411_v10   ;;  %v11121_v17 = vadd.f32 %v2400_v38, %v1387_v15  ;;  %v16055_v10 = vand.u32 4294901760, %v16043_v57  ;;  %v16056_v15 = vld [vmem:[#allocation59_spill] sm:$0xff]  ;;  %v16062_v57 = vand.u32 4294901760, %v16049_v30 }
 0x1b8   : > { %3000 = vmatmul.mubr.f32.gmra.mxu0 %v16049_v30  ;;  %5139 = vmatprep.subr.mxu1 %v16051_v8  ;;  %v2406_v54 = vpop.f32.mrf.mxu1  ;;  %v1419_v51 = vpop.f32.mrf.mxu0  ;;  %v16057_v8 = vld [vmem:[#allocation170_spill] sm:$0xff]  ;;  %v7414_v30 = vld [vmem:[%s11004_s14 + $0x90] sm:$0xff] }
 0x1b9   : > { %16050 = vst [vmem:[#allocation107_spill] sm:$0xff] %v11121_v17  ;;  %3007 = vmatprep.mubr.f32.mxu0 %v16052_v5  ;;  %3807 = vmatmul.mubr.f32.gmra.mxu1 %v16053_v46  ;;  %v11129_v59 = vadd.f32 %v2406_v54, %v1401_v48  ;;  %v16059_v46 = vld [vmem:[#allocation80_spill] sm:$0xff] }
 0x1ba   : > { %3815 = vmatprep.mubr.f32.mxu1 %v16055_v10  ;;  %5141 = vmatpush2.msra.mxu1 %v16056_v15  ;;  %v2408_v43 = vpop.f32.mrf.mxu1  ;;  %v1433_v38 = vpop.f32.mrf.mxu0  ;;  %v16060_v11 = vand.u32 4294901760, %v16059_v46  ;;  %v16061_v48 = vld [vmem:[#allocation172_spill] sm:$0xff]  ;;  %v7415_v10 = vld [vmem:[%s11004_s14 + $0x98] sm:$0xff]  ;;  %v16064_v15 = vand.u32 4294901760, %v16052_v5  ;;  %v16071_v5 = vand.u32 4294901760, %v16057_v8 }
 0x1bb   : > { %16054 = vst [vmem:[#allocation26_spill] sm:$0xff] %v11129_v59  ;;  %7534 = vperm.xlu1 %8162, %v7410_v50   ;;  %7549 = vperm.xlu0 %8163, %v7413_v27   ;;  %v11135_v17 = vadd.f32 %v2408_v43, %v1403_v45  ;;  %v16065_v45 = vld [vmem:[#allocation81_spill] sm:$0xff] }
 0x1bc   : > { %3010 = vmatmul.mubr.f32.gmra.mxu0 %v16057_v8  ;;  %4500 = vmatprep.subr.mxu0 %v16060_v11  ;;  %v2414_v54 = vpop.f32.mrf.mxu1  ;;  %v1435_v50 = vpop.f32.mrf.mxu0  ;;  %v16066_v43 = vand.u32 4294901760, %v16065_v45  ;;  %v7416_v8 = vld [vmem:[%s11004_s14 + $0xa0] sm:$0xff] }
 0x1bd   : > { %16058 = vst [vmem:[#allocation28_spill] sm:$0xff] %v11135_v17  ;;  %3017 = vmatprep.mubr.f32.mxu0 %v16061_v48  ;;  %3819 = vmatmul.mubr.f32.gmra.mxu1 %v16062_v57  ;;  %v11144_v27 = vadd.f32 %v2414_v54, %v1417_v37  ;;  %v16067_v17 = vld [vmem:[#allocation173_spill] sm:$0xff]  ;;  %v16070_v37 = vld [vmem:[#allocation175_spill] sm:$0xff] }
 0x1be   : > { %3827 = vmatprep.mubr.f32.mxu1 %v16064_v15  ;;  %4504 = vmatpush2.msra.mxu0 %v16066_v43  ;;  %v2416_v46 = vpop.f32.mrf.mxu1  ;;  %v1449_v11 = vpop.f32.mrf.mxu0  ;;  %v16069_v57 = vld [vmem:[#allocation61_spill] sm:$0xff]  ;;  %v7417_v15 = vld [vmem:[%s11004_s14 + $0xa8] sm:$0xff] }
 0x1bf   : > { %16063 = vst [vmem:[#allocation9_spill] sm:$0xff] %v11144_v27  ;;  %7544 = vperm.xlu1 %8162, %v7412_v22   ;;  %7559 = vperm.xlu0 %8163, %v7415_v10   ;;  %v11151_v59 = vadd.f32 %v2416_v46, %v1419_v51  ;;  %v16073_v10 = vand.u32 4294901760, %v16061_v48  ;;  %v16074_v51 = vld [vmem:[#allocation62_spill] sm:$0xff]  ;;  %v16080_v48 = vand.u32 4294901760, %v16067_v17 }
 0x1c0   : > { %3020 = vmatmul.mubr.f32.gmra.mxu0 %v16067_v17  ;;  %5143 = vmatprep.subr.mxu1 %v16069_v57  ;;  %v2422_v54 = vpop.f32.mrf.mxu1  ;;  %v1451_v45 = vpop.f32.mrf.mxu0  ;;  %v16075_v57 = vld [vmem:[#allocation177_spill] sm:$0xff]  ;;  %v7418_v17 = vld [vmem:[%s11004_s14 + $0xb0] sm:$0xff] }
 0x1c1   : > { %16068 = vst [vmem:[#allocation108_spill] sm:$0xff] %v11151_v59  ;;  %3027 = vmatprep.mubr.f32.mxu0 %v16070_v37  ;;  %3831 = vmatmul.mubr.f32.gmra.mxu1 %v16071_v5  ;;  %v11159_v22 = vadd.f32 %v2422_v54, %v1433_v38  ;;  %v16077_v5 = vld [vmem:[#allocation82_spill] sm:$0xff] }
 0x1c2   : > { %3839 = vmatprep.mubr.f32.mxu1 %v16073_v10  ;;  %5145 = vmatpush2.msra.mxu1 %v16074_v51  ;;  %v2424_v43 = vpop.f32.mrf.mxu1  ;;  %v1465_v46 = vpop.f32.mrf.mxu0  ;;  %v16078_v27 = vand.u32 4294901760, %v16077_v5  ;;  %v16079_v38 = vld [vmem:[#allocation178_spill] sm:$0xff]  ;;  %v7419_v10 = vld [vmem:[%s11004_s14 + $0xb8] sm:$0xff]  ;;  %v16082_v51 = vand.u32 4294901760, %v16070_v37  ;;  %v16089_v37 = vand.u32 4294901760, %v16075_v57 }
 0x1c3   : > { %16072 = vst [vmem:[#allocation11_spill] sm:$0xff] %v11159_v22  ;;  %7554 = vperm.xlu1 %8162, %v7414_v30   ;;  %7569 = vperm.xlu0 %8163, %v7417_v15   ;;  %v11165_v59 = vadd.f32 %v2424_v43, %v1435_v50  ;;  %v16083_v50 = vld [vmem:[#allocation84_spill] sm:$0xff] }
 0x1c4   : > { %3030 = vmatmul.mubr.f32.gmra.mxu0 %v16075_v57  ;;  %4508 = vmatprep.subr.mxu0 %v16078_v27  ;;  %v2430_v54 = vpop.f32.mrf.mxu1  ;;  %v1467_v30 = vpop.f32.mrf.mxu0  ;;  %v16084_v43 = vand.u32 4294901760, %v16083_v50  ;;  %v7420_v57 = vld [vmem:[%s11004_s14 + $0xc0] sm:$0xff] }
 0x1c5   : > { %16076 = vst [vmem:[#allocation111_spill] sm:$0xff] %v11165_v59  ;;  %3037 = vmatprep.mubr.f32.mxu0 %v16079_v38  ;;  %3843 = vmatmul.mubr.f32.gmra.mxu1 %v16080_v48  ;;  %v11174_v15 = vadd.f32 %v2430_v54, %v1449_v11  ;;  %v16085_v59 = vld [vmem:[#allocation181_spill] sm:$0xff]  ;;  %v16087_v48 = vld [vmem:[#allocation64_spill] sm:$0xff]  ;;  %v16088_v11 = vld [vmem:[#allocation183_spill] sm:$0xff] }
 0x1c6   : > { %3851 = vmatprep.mubr.f32.mxu1 %v16082_v51  ;;  %4512 = vmatpush2.msra.mxu0 %v16084_v43  ;;  %v2432_v5 = vpop.f32.mrf.mxu1  ;;  %v1481_v27 = vpop.f32.mrf.mxu0  ;;  %v7421_v51 = vld [vmem:[%s11004_s14 + $0xc8] sm:$0xff] }
 0x1c7   : > { %16081 = vst [vmem:[#allocation30_spill] sm:$0xff] %v11174_v15  ;;  %7564 = vperm.xlu1 %8162, %v7416_v8   ;;  %7579 = vperm.xlu0 %8163, %v7419_v10   ;;  %v11181_v22 = vadd.f32 %v2432_v5, %v1451_v45  ;;  %v16091_v10 = vand.u32 4294901760, %v16079_v38  ;;  %v16092_v45 = vld [vmem:[#allocation66_spill] sm:$0xff]  ;;  %v7423_v38 = vld [vmem:[%s11004_s14 + $0xd8] sm:$0xff] }
 0x1c8   : > { %3040 = vmatmul.mubr.f32.gmra.mxu0 %v16085_v59  ;;  %5147 = vmatprep.subr.mxu1 %v16087_v48  ;;  %v2438_v54 = vpop.f32.mrf.mxu1  ;;  %v1483_v50 = vpop.f32.mrf.mxu0  ;;  %v16093_v48 = vld [vmem:[#allocation186_spill] sm:$0xff] }
 0x1c9   : > { %16086 = vst [vmem:[#allocation32_spill] sm:$0xff] %v11181_v22  ;;  %3047 = vmatprep.mubr.f32.mxu0 %v16088_v11  ;;  %3855 = vmatmul.mubr.f32.gmra.mxu1 %v16089_v37  ;;  %v11189_v8 = vadd.f32 %v2438_v54, %v1465_v46  ;;  %v16095_v37 = vld [vmem:[#allocation187_spill] sm:$0xff]  ;;  %v16096_v46 = vand.u32 4294901760, %v16085_v59  ;;  %v16101_v59 = vld [vmem:[#allocation192_spill] sm:$0xff] }
 0x1ca   : > { %3863 = vmatprep.mubr.f32.mxu1 %v16091_v10  ;;  %5149 = vmatpush2.msra.mxu1 %v16092_v45  ;;  %v2440_v43 = vpop.f32.mrf.mxu1  ;;  %v1497_v5 = vpop.f32.mrf.mxu0  ;;  %v16099_v45 = vld [vmem:[#allocation189_spill] sm:$0xff] }
 0x1cb   : > { %16090 = vst [vmem:[#allocation13_spill] sm:$0xff] %v11189_v8  ;;  %7574 = vperm.xlu1 %8162, %v7418_v17   ;;  %7589 = vperm.xlu0 %8163, %v7421_v51   ;;  %v11195_v22 = vadd.f32 %v2440_v43, %v1467_v30  ;;  %v16098_v17 = vand.u32 4294901760, %v16088_v11  ;;  %v16102_v8 = vand.u32 4294901760, %v16093_v48 }
 0x1cc   : > { %3050 = vmatmul.mubr.f32.gmra.mxu0 %v16093_v48  ;;  %v2446_v15 = vpop.f32.mrf.mxu1  ;;  %v1499_v54 = vpop.f32.mrf.mxu0  ;;  %v16107_v48 = vld [vmem:[#allocation195_spill] sm:$0xff] }
 0x1cd   : > { %16094 = vst [vmem:[#allocation114_spill] sm:$0xff] %v11195_v22  ;;  %3057 = vmatprep.mubr.f32.mxu0 %v16095_v37  ;;  %3867 = vmatmul.mubr.f32.gmra.mxu1 %v16096_v46  ;;  %v11202_v10 = vadd.f32 %v2446_v15, %v1481_v27  ;;  %v7422_v22 = vld [vmem:[%s11004_s14 + $0xd0] sm:$0xff]  ;;  %v7425_v15 = vld [vmem:[%s11004_s14 + $0xe8] sm:$0xff] }
 0x1ce   : > { %3875 = vmatprep.mubr.f32.mxu1 %v16098_v17  ;;  %v2448_v51 = vpop.f32.mrf.mxu1  ;;  %v1513_v30 = vpop.f32.mrf.mxu0  ;;  %v16105_v17 = vld [vmem:[#allocation193_spill] sm:$0xff] }
 0x1cf   : > { %16097 = vst [vmem:[#allocation15_spill] sm:$0xff] %v11202_v10  ;;  %7584 = vperm.xlu1 %8162, %v7420_v57   ;;  %7599 = vperm.xlu0 %8163, %v7423_v38   ;;  %v11207_v43 = vadd.f32 %v2448_v51, %v1483_v50  ;;  %v16104_v57 = vand.u32 4294901760, %v16095_v37  ;;  %v16108_v10 = vand.u32 4294901760, %v16099_v45 }
 0x1d0   : > { %3060 = vmatmul.mubr.f32.gmra.mxu0 %v16099_v45  ;;  %v2454_v46 = vpop.f32.mrf.mxu1  ;;  %v1515_v27 = vpop.f32.mrf.mxu0  ;;  %v16113_v45 = vld [vmem:[#allocation198_spill] sm:$0xff] }
 0x1d1   : > { %16100 = vst [vmem:[#allocation115_spill] sm:$0xff] %v11207_v43  ;;  %3067 = vmatprep.mubr.f32.mxu0 %v16101_v59  ;;  %3879 = vmatmul.mubr.f32.gmra.mxu1 %v16102_v8  ;;  %v11214_v11 = vadd.f32 %v2454_v46, %v1497_v5  ;;  %v7424_v43 = vld [vmem:[%s11004_s14 + $0xe0] sm:$0xff]  ;;  %v7427_v5 = vld [vmem:[%s11004_s14 + $0xf8] sm:$0xff] }
 0x1d2   : > { %3887 = vmatprep.mubr.f32.mxu1 %v16104_v57  ;;  %v2456_v38 = vpop.f32.mrf.mxu1  ;;  %v1529_v50 = vpop.f32.mrf.mxu0  ;;  %v16111_v57 = vld [vmem:[#allocation197_spill] sm:$0xff] }
 0x1d3   : > { %16103 = vst [vmem:[#allocation34_spill] sm:$0xff] %v11214_v11  ;;  %7594 = vperm.xlu1 %8162, %v7422_v22   ;;  %7609 = vperm.xlu0 %8163, %v7425_v15   ;;  %v11219_v51 = vadd.f32 %v2456_v38, %v1499_v54  ;;  %v16110_v22 = vand.u32 4294901760, %v16101_v59  ;;  %v16114_v11 = vand.u32 4294901760, %v16105_v17 }
 0x1d4   : > { %3070 = vmatmul.mubr.f32.gmra.mxu0 %v16105_v17  ;;  %v2462_v8 = vpop.f32.mrf.mxu1  ;;  %v1531_v37 = vpop.f32.mrf.mxu0  ;;  %v16119_v17 = vld [vmem:[#allocation203_spill] sm:$0xff] }
 0x1d5   : > { %16106 = vst [vmem:[#allocation36_spill] sm:$0xff] %v11219_v51  ;;  %3077 = vmatprep.mubr.f32.mxu0 %v16107_v48  ;;  %3891 = vmatmul.mubr.f32.gmra.mxu1 %v16108_v10  ;;  %v11226_v46 = vadd.f32 %v2462_v8, %v1513_v30  ;;  %v7426_v51 = vld [vmem:[%s11004_s14 + $0xf0] sm:$0xff]  ;;  %v7429_v30 = vld [vmem:[%s11004_s14 + $0x108] sm:$0xff] }
 0x1d6   : > { %3899 = vmatprep.mubr.f32.mxu1 %v16110_v22  ;;  %v2464_v15 = vpop.f32.mrf.mxu1  ;;  %v1545_v54 = vpop.f32.mrf.mxu0  ;;  %v16117_v22 = vld [vmem:[#allocation201_spill] sm:$0xff] }
 0x1d7   : > { %16109 = vst [vmem:[#allocation17_spill] sm:$0xff] %v11226_v46  ;;  %7604 = vperm.xlu1 %8162, %v7424_v43   ;;  %7619 = vperm.xlu0 %8163, %v7427_v5   ;;  %v11231_v38 = vadd.f32 %v2464_v15, %v1515_v27  ;;  %v16116_v43 = vand.u32 4294901760, %v16107_v48  ;;  %v16120_v46 = vand.u32 4294901760, %v16111_v57 }
 0x1d8   : > { %3080 = vmatmul.mubr.f32.gmra.mxu0 %v16111_v57  ;;  %v2470_v10 = vpop.f32.mrf.mxu1  ;;  %v1547_v59 = vpop.f32.mrf.mxu0  ;;  %v16125_v57 = vld [vmem:[#allocation207_spill] sm:$0xff] }
 0x1d9   : > { %16112 = vst [vmem:[#allocation117_spill] sm:$0xff] %v11231_v38  ;;  %3087 = vmatprep.mubr.f32.mxu0 %v16113_v45  ;;  %3903 = vmatmul.mubr.f32.gmra.mxu1 %v16114_v11  ;;  %v11238_v8 = vadd.f32 %v2470_v10, %v1529_v50  ;;  %v7428_v38 = vld [vmem:[%s11004_s14 + $0x100] sm:$0xff]  ;;  %v7431_v50 = vld [vmem:[%s11004_s14 + $0x118] sm:$0xff] }
 0x1da   : > { %3911 = vmatprep.mubr.f32.mxu1 %v16116_v43  ;;  %v2472_v5 = vpop.f32.mrf.mxu1  ;;  %v1561_v27 = vpop.f32.mrf.mxu0  ;;  %v16123_v43 = vld [vmem:[#allocation206_spill] sm:$0xff] }
 0x1db   : > { %16115 = vst [vmem:[#allocation19_spill] sm:$0xff] %v11238_v8  ;;  %7614 = vperm.xlu1 %8162, %v7426_v51   ;;  %7629 = vperm.xlu0 %8163, %v7429_v30   ;;  %v11243_v15 = vadd.f32 %v2472_v5, %v1531_v37  ;;  %v16122_v51 = vand.u32 4294901760, %v16113_v45  ;;  %v16126_v8 = vand.u32 4294901760, %v16117_v22 }
 0x1dc   : > { %3090 = vmatmul.mubr.f32.gmra.mxu0 %v16117_v22  ;;  %v2478_v11 = vpop.f32.mrf.mxu1  ;;  %v1563_v48 = vpop.f32.mrf.mxu0  ;;  %v16131_v22 = vld [vmem:[#allocation212_spill] sm:$0xff] }
 0x1dd   : > { %16118 = vst [vmem:[#allocation120_spill] sm:$0xff] %v11243_v15  ;;  %3097 = vmatprep.mubr.f32.mxu0 %v16119_v17  ;;  %3915 = vmatmul.mubr.f32.gmra.mxu1 %v16120_v46  ;;  %v11250_v10 = vadd.f32 %v2478_v11, %v1545_v54  ;;  %v7430_v15 = vld [vmem:[%s11004_s14 + $0x110] sm:$0xff]  ;;  %v7433_v54 = vld [vmem:[%s11004_s14 + $0x128] sm:$0xff] }
 0x1de   : > { %3923 = vmatprep.mubr.f32.mxu1 %v16122_v51  ;;  %v2480_v30 = vpop.f32.mrf.mxu1  ;;  %v1577_v37 = vpop.f32.mrf.mxu0  ;;  %v16129_v51 = vld [vmem:[#allocation209_spill] sm:$0xff] }
 0x1df   : > { %16121 = vst [vmem:[#allocation38_spill] sm:$0xff] %v11250_v10  ;;  %7624 = vperm.xlu1 %8162, %v7428_v38   ;;  %7639 = vperm.xlu0 %8163, %v7431_v50   ;;  %v11255_v5 = vadd.f32 %v2480_v30, %v1547_v59  ;;  %v16128_v38 = vand.u32 4294901760, %v16119_v17  ;;  %v16132_v10 = vand.u32 4294901760, %v16123_v43 }
 0x1e0   : > { %3100 = vmatmul.mubr.f32.gmra.mxu0 %v16123_v43  ;;  %v2486_v46 = vpop.f32.mrf.mxu1  ;;  %v1579_v45 = vpop.f32.mrf.mxu0  ;;  %v16137_v43 = vld [vmem:[#allocation215_spill] sm:$0xff] }
 0x1e1   : > { %16124 = vst [vmem:[#allocation40_spill] sm:$0xff] %v11255_v5  ;;  %3107 = vmatprep.mubr.f32.mxu0 %v16125_v57  ;;  %3927 = vmatmul.mubr.f32.gmra.mxu1 %v16126_v8  ;;  %v11262_v11 = vadd.f32 %v2486_v46, %v1561_v27  ;;  %v7432_v5 = vld [vmem:[%s11004_s14 + $0x120] sm:$0xff]  ;;  %v7435_v27 = vld [vmem:[%s11004_s14 + $0x138] sm:$0xff] }
 0x1e2   : > { %3935 = vmatprep.mubr.f32.mxu1 %v16128_v38  ;;  %v2488_v50 = vpop.f32.mrf.mxu1  ;;  %v1593_v59 = vpop.f32.mrf.mxu0  ;;  %v16135_v38 = vld [vmem:[#allocation213_spill] sm:$0xff] }
 0x1e3   : > { %16127 = vst [vmem:[#allocation21_spill] sm:$0xff] %v11262_v11  ;;  %7634 = vperm.xlu1 %8162, %v7430_v15   ;;  %7649 = vperm.xlu0 %8163, %v7433_v54   ;;  %v11267_v30 = vadd.f32 %v2488_v50, %v1563_v48  ;;  %v16134_v15 = vand.u32 4294901760, %v16125_v57  ;;  %v16138_v11 = vand.u32 4294901760, %v16129_v51 }
 0x1e4   : > { %3110 = vmatmul.mubr.f32.gmra.mxu0 %v16129_v51  ;;  %v2494_v8 = vpop.f32.mrf.mxu1  ;;  %v1595_v17 = vpop.f32.mrf.mxu0  ;;  %v16143_v51 = vld [vmem:[#allocation218_spill] sm:$0xff] }
 0x1e5   : > { %16130 = vst [vmem:[#allocation121_spill] sm:$0xff] %v11267_v30  ;;  %3117 = vmatprep.mubr.f32.mxu0 %v16131_v22  ;;  %3939 = vmatmul.mubr.f32.gmra.mxu1 %v16132_v10  ;;  %v11274_v46 = vadd.f32 %v2494_v8, %v1577_v37  ;;  %v7434_v30 = vld [vmem:[%s11004_s14 + $0x130] sm:$0xff]  ;;  %v7437_v37 = vld [vmem:[%s11004_s14 + $0x148] sm:$0xff] }
 0x1e6   : > { %3947 = vmatprep.mubr.f32.mxu1 %v16134_v15  ;;  %v2496_v54 = vpop.f32.mrf.mxu1  ;;  %v1609_v48 = vpop.f32.mrf.mxu0  ;;  %v16141_v15 = vld [vmem:[#allocation217_spill] sm:$0xff] }
 0x1e7   : > { %16133 = vst [vmem:[#allocation123_spill] sm:$0xff] %v11274_v46  ;;  %7644 = vperm.xlu1 %8162, %v7432_v5   ;;  %7659 = vperm.xlu0 %8163, %v7435_v27   ;;  %v11279_v50 = vadd.f32 %v2496_v54, %v1579_v45  ;;  %v16140_v5 = vand.u32 4294901760, %v16131_v22  ;;  %v16144_v46 = vand.u32 4294901760, %v16135_v38 }
 0x1e8   : > { %3120 = vmatmul.mubr.f32.gmra.mxu0 %v16135_v38  ;;  %v2502_v10 = vpop.f32.mrf.mxu1  ;;  %v1611_v57 = vpop.f32.mrf.mxu0  ;;  %v16149_v38 = vld [vmem:[#allocation223_spill] sm:$0xff] }
 0x1e9   : > { %16136 = vst [vmem:[#allocation42_spill] sm:$0xff] %v11279_v50  ;;  %3127 = vmatprep.mubr.f32.mxu0 %v16137_v43  ;;  %3951 = vmatmul.mubr.f32.gmra.mxu1 %v16138_v11  ;;  %v11286_v8 = vadd.f32 %v2502_v10, %v1593_v59  ;;  %v7436_v50 = vld [vmem:[%s11004_s14 + $0x140] sm:$0xff]  ;;  %v7439_v59 = vld [vmem:[%s11004_s14 + $0x158] sm:$0xff] }
 0x1ea   : > { %3959 = vmatprep.mubr.f32.mxu1 %v16140_v5  ;;  %v2504_v27 = vpop.f32.mrf.mxu1  ;;  %v1625_v45 = vpop.f32.mrf.mxu0  ;;  %v16147_v5 = vld [vmem:[#allocation221_spill] sm:$0xff] }
 0x1eb   : > { %16139 = vst [vmem:[#allocation44_spill] sm:$0xff] %v11286_v8  ;;  %7654 = vperm.xlu1 %8162, %v7434_v30   ;;  %7669 = vperm.xlu0 %8163, %v7437_v37   ;;  %v11291_v54 = vadd.f32 %v2504_v27, %v1595_v17  ;;  %v16146_v30 = vand.u32 4294901760, %v16137_v43  ;;  %v16150_v8 = vand.u32 4294901760, %v16141_v15 }
 0x1ec   : > { %3130 = vmatmul.mubr.f32.gmra.mxu0 %v16141_v15  ;;  %v2510_v11 = vpop.f32.mrf.mxu1  ;;  %v1627_v22 = vpop.f32.mrf.mxu0  ;;  %v16155_v15 = vld [vmem:[#allocation227_spill] sm:$0xff] }
 0x1ed   : > { %16142 = vst [vmem:[#allocation25_spill] sm:$0xff] %v11291_v54  ;;  %3137 = vmatprep.mubr.f32.mxu0 %v16143_v51  ;;  %3963 = vmatmul.mubr.f32.gmra.mxu1 %v16144_v46  ;;  %v11298_v10 = vadd.f32 %v2510_v11, %v1609_v48  ;;  %v7438_v54 = vld [vmem:[%s11004_s14 + $0x150] sm:$0xff]  ;;  %v7441_v48 = vld [vmem:[%s11004_s14 + $0x168] sm:$0xff] }
 0x1ee   : > { %3971 = vmatprep.mubr.f32.mxu1 %v16146_v30  ;;  %v2512_v37 = vpop.f32.mrf.mxu1  ;;  %v1641_v17 = vpop.f32.mrf.mxu0  ;;  %v16153_v30 = vld [vmem:[#allocation226_spill] sm:$0xff] }
 0x1ef   : > { %16145 = vst [vmem:[#allocation125_spill] sm:$0xff] %v11298_v10  ;;  %7664 = vperm.xlu1 %8162, %v7436_v50   ;;  %7679 = vperm.xlu0 %8163, %v7439_v59   ;;  %v11303_v27 = vadd.f32 %v2512_v37, %v1611_v57  ;;  %v16152_v50 = vand.u32 4294901760, %v16143_v51  ;;  %v16156_v10 = vand.u32 4294901760, %v16147_v5 }
 0x1f0   : > { %3140 = vmatmul.mubr.f32.gmra.mxu0 %v16147_v5  ;;  %v2518_v46 = vpop.f32.mrf.mxu1  ;;  %v1643_v43 = vpop.f32.mrf.mxu0  ;;  %v16161_v5 = vld [vmem:[#allocation232_spill] sm:$0xff] }
 0x1f1   : > { %16148 = vst [vmem:[#allocation27_spill] sm:$0xff] %v11303_v27  ;;  %3147 = vmatprep.mubr.f32.mxu0 %v16149_v38  ;;  %3975 = vmatmul.mubr.f32.gmra.mxu1 %v16150_v8  ;;  %v11310_v11 = vadd.f32 %v2518_v46, %v1625_v45  ;;  %v7440_v27 = vld [vmem:[%s11004_s14 + $0x160] sm:$0xff]  ;;  %v7443_v45 = vld [vmem:[%s11004_s14 + $0x178] sm:$0xff] }
 0x1f2   : > { %3983 = vmatprep.mubr.f32.mxu1 %v16152_v50  ;;  %v2520_v59 = vpop.f32.mrf.mxu1  ;;  %v1657_v57 = vpop.f32.mrf.mxu0  ;;  %v16159_v50 = vld [vmem:[#allocation229_spill] sm:$0xff] }
 0x1f3   : > { %16151 = vst [vmem:[#allocation126_spill] sm:$0xff] %v11310_v11  ;;  %7674 = vperm.xlu1 %8162, %v7438_v54   ;;  %7689 = vperm.xlu0 %8163, %v7441_v48   ;;  %v11315_v37 = vadd.f32 %v2520_v59, %v1627_v22  ;;  %v16158_v54 = vand.u32 4294901760, %v16149_v38  ;;  %v16162_v11 = vand.u32 4294901760, %v16153_v30 }
 0x1f4   : > { %3150 = vmatmul.mubr.f32.gmra.mxu0 %v16153_v30  ;;  %v2526_v8 = vpop.f32.mrf.mxu1  ;;  %v1659_v51 = vpop.f32.mrf.mxu0  ;;  %v16167_v30 = vld [vmem:[#allocation235_spill] sm:$0xff] }
 0x1f5   : > { %16154 = vst [vmem:[#allocation46_spill] sm:$0xff] %v11315_v37  ;;  %3157 = vmatprep.mubr.f32.mxu0 %v16155_v15  ;;  %3987 = vmatmul.mubr.f32.gmra.mxu1 %v16156_v10  ;;  %v11322_v46 = vadd.f32 %v2526_v8, %v1641_v17  ;;  %v7442_v37 = vld [vmem:[%s11004_s14 + $0x170] sm:$0xff]  ;;  %v7445_v17 = vld [vmem:[%s11004_s14 + $0x188] sm:$0xff] }
 0x1f6   : > { %3995 = vmatprep.mubr.f32.mxu1 %v16158_v54  ;;  %v2528_v48 = vpop.f32.mrf.mxu1  ;;  %v1673_v22 = vpop.f32.mrf.mxu0  ;;  %v16165_v54 = vld [vmem:[#allocation233_spill] sm:$0xff] }
 0x1f7   : > { %16157 = vst [vmem:[#allocation48_spill] sm:$0xff] %v11322_v46  ;;  %7684 = vperm.xlu1 %8162, %v7440_v27   ;;  %7699 = vperm.xlu0 %8163, %v7443_v45   ;;  %v11327_v59 = vadd.f32 %v2528_v48, %v1643_v43  ;;  %v16164_v27 = vand.u32 4294901760, %v16155_v15  ;;  %v16168_v46 = vand.u32 4294901760, %v16159_v50 }
 0x1f8   : > { %3160 = vmatmul.mubr.f32.gmra.mxu0 %v16159_v50  ;;  %v2534_v10 = vpop.f32.mrf.mxu1  ;;  %v1675_v38 = vpop.f32.mrf.mxu0  ;;  %v16173_v50 = vld [vmem:[#allocation238_spill] sm:$0xff] }
 0x1f9   : > { %16160 = vst [vmem:[#allocation29_spill] sm:$0xff] %v11327_v59  ;;  %3167 = vmatprep.mubr.f32.mxu0 %v16161_v5  ;;  %3999 = vmatmul.mubr.f32.gmra.mxu1 %v16162_v11  ;;  %v11334_v8 = vadd.f32 %v2534_v10, %v1657_v57  ;;  %v7444_v59 = vld [vmem:[%s11004_s14 + $0x180] sm:$0xff]  ;;  %v7447_v57 = vld [vmem:[%s11004_s14 + $0x198] sm:$0xff] }
 0x1fa   : > { %4007 = vmatprep.mubr.f32.mxu1 %v16164_v27  ;;  %v2536_v45 = vpop.f32.mrf.mxu1  ;;  %v1689_v43 = vpop.f32.mrf.mxu0  ;;  %v16171_v27 = vld [vmem:[#allocation237_spill] sm:$0xff] }
 0x1fb   : > { %16163 = vst [vmem:[#allocation129_spill] sm:$0xff] %v11334_v8  ;;  %7694 = vperm.xlu1 %8162, %v7442_v37   ;;  %7709 = vperm.xlu0 %8163, %v7445_v17   ;;  %v11339_v48 = vadd.f32 %v2536_v45, %v1659_v51  ;;  %v16170_v37 = vand.u32 4294901760, %v16161_v5  ;;  %v16174_v8 = vand.u32 4294901760, %v16165_v54 }
 0x1fc   : > { %3170 = vmatmul.mubr.f32.gmra.mxu0 %v16165_v54  ;;  %v2542_v11 = vpop.f32.mrf.mxu1  ;;  %v1691_v15 = vpop.f32.mrf.mxu0  ;;  %v16179_v54 = vld [vmem:[#allocation243_spill] sm:$0xff] }
 0x1fd   : > { %16166 = vst [vmem:[#allocation31_spill] sm:$0xff] %v11339_v48  ;;  %3177 = vmatprep.mubr.f32.mxu0 %v16167_v30  ;;  %4011 = vmatmul.mubr.f32.gmra.mxu1 %v16168_v46  ;;  %v11346_v10 = vadd.f32 %v2542_v11, %v1673_v22  ;;  %v7446_v48 = vld [vmem:[%s11004_s14 + $0x190] sm:$0xff]  ;;  %v7449_v22 = vld [vmem:[%s11004_s14 + $0x1a8] sm:$0xff] }
 0x1fe   : > { %4019 = vmatprep.mubr.f32.mxu1 %v16170_v37  ;;  %v2544_v17 = vpop.f32.mrf.mxu1  ;;  %v1705_v51 = vpop.f32.mrf.mxu0  ;;  %v16177_v37 = vld [vmem:[#allocation241_spill] sm:$0xff] }
 0x1ff   : > { %16169 = vst [vmem:[#allocation131_spill] sm:$0xff] %v11346_v10  ;;  %7704 = vperm.xlu1 %8162, %v7444_v59   ;;  %7719 = vperm.xlu0 %8163, %v7447_v57   ;;  %v11351_v45 = vadd.f32 %v2544_v17, %v1675_v38  ;;  %v16176_v59 = vand.u32 4294901760, %v16167_v30  ;;  %v16180_v10 = vand.u32 4294901760, %v16171_v27 }
 0x200   : > { %3180 = vmatmul.mubr.f32.gmra.mxu0 %v16171_v27  ;;  %v2550_v46 = vpop.f32.mrf.mxu1  ;;  %v1707_v5 = vpop.f32.mrf.mxu0  ;;  %v16185_v27 = vld [vmem:[#allocation247_spill] sm:$0xff] }
 0x201   : > { %16172 = vst [vmem:[#allocation50_spill] sm:$0xff] %v11351_v45  ;;  %3187 = vmatprep.mubr.f32.mxu0 %v16173_v50  ;;  %4023 = vmatmul.mubr.f32.gmra.mxu1 %v16174_v8  ;;  %v11358_v11 = vadd.f32 %v2550_v46, %v1689_v43  ;;  %v7448_v45 = vld [vmem:[%s11004_s14 + $0x1a0] sm:$0xff]  ;;  %v7451_v43 = vld [vmem:[%s11004_s14 + $0x1b8] sm:$0xff] }
 0x202   : > { %4031 = vmatprep.mubr.f32.mxu1 %v16176_v59  ;;  %v2552_v57 = vpop.f32.mrf.mxu1  ;;  %v1721_v38 = vpop.f32.mrf.mxu0  ;;  %v16183_v59 = vld [vmem:[#allocation246_spill] sm:$0xff] }
 0x203   : > { %16175 = vst [vmem:[#allocation52_spill] sm:$0xff] %v11358_v11  ;;  %7714 = vperm.xlu1 %8162, %v7446_v48   ;;  %7729 = vperm.xlu0 %8163, %v7449_v22   ;;  %v11363_v17 = vadd.f32 %v2552_v57, %v1691_v15  ;;  %v16182_v48 = vand.u32 4294901760, %v16173_v50  ;;  %v16186_v11 = vand.u32 4294901760, %v16177_v37 }
 0x204   : > { %3190 = vmatmul.mubr.f32.gmra.mxu0 %v16177_v37  ;;  %v2558_v8 = vpop.f32.mrf.mxu1  ;;  %v1723_v30 = vpop.f32.mrf.mxu0  ;;  %v16191_v37 = vld [vmem:[#allocation252_spill] sm:$0xff] }
 0x205   : > { %16178 = vst [vmem:[#allocation33_spill] sm:$0xff] %v11363_v17  ;;  %3197 = vmatprep.mubr.f32.mxu0 %v16179_v54  ;;  %4035 = vmatmul.mubr.f32.gmra.mxu1 %v16180_v10  ;;  %v11370_v46 = vadd.f32 %v2558_v8, %v1705_v51  ;;  %v7450_v17 = vld [vmem:[%s11004_s14 + $0x1b0] sm:$0xff]  ;;  %v7453_v51 = vld [vmem:[%s11004_s14 + $0x1c8] sm:$0xff] }
 0x206   : > { %4043 = vmatprep.mubr.f32.mxu1 %v16182_v48  ;;  %v2560_v22 = vpop.f32.mrf.mxu1  ;;  %v1737_v15 = vpop.f32.mrf.mxu0  ;;  %v16189_v48 = vld [vmem:[#allocation249_spill] sm:$0xff] }
 0x207   : > { %16181 = vst [vmem:[#allocation23_spill] sm:$0xff] %v11370_v46  ;;  %7724 = vperm.xlu1 %8162, %v7448_v45   ;;  %7739 = vperm.xlu0 %8163, %v7451_v43   ;;  %v11375_v57 = vadd.f32 %v2560_v22, %v1707_v5  ;;  %v16188_v45 = vand.u32 4294901760, %v16179_v54  ;;  %v16192_v46 = vand.u32 4294901760, %v16183_v59 }
 0x208   : > { %3200 = vmatmul.mubr.f32.gmra.mxu0 %v16183_v59  ;;  %v2566_v10 = vpop.f32.mrf.mxu1  ;;  %v1739_v50 = vpop.f32.mrf.mxu0  ;;  %v16197_v59 = vld [vmem:[#allocation255_spill] sm:$0xff] }
 0x209   : > { %16184 = vst [vmem:[#allocation35_spill] sm:$0xff] %v11375_v57  ;;  %3207 = vmatprep.mubr.f32.mxu0 %v16185_v27  ;;  %4047 = vmatmul.mubr.f32.gmra.mxu1 %v16186_v11  ;;  %v11382_v8 = vadd.f32 %v2566_v10, %v1721_v38  ;;  %v7452_v57 = vld [vmem:[%s11004_s14 + $0x1c0] sm:$0xff]  ;;  %v7455_v38 = vld [vmem:[%s11004_s14 + $0x1d8] sm:$0xff] }
 0x20a   : > { %4055 = vmatprep.mubr.f32.mxu1 %v16188_v45  ;;  %v2568_v43 = vpop.f32.mrf.mxu1  ;;  %v1753_v5 = vpop.f32.mrf.mxu0  ;;  %v16195_v45 = vld [vmem:[#allocation253_spill] sm:$0xff] }
 0x20b   : > { %16187 = vst [vmem:[#allocation134_spill] sm:$0xff] %v11382_v8  ;;  %7734 = vperm.xlu1 %8162, %v7450_v17   ;;  %7749 = vperm.xlu0 %8163, %v7453_v51   ;;  %v11387_v22 = vadd.f32 %v2568_v43, %v1723_v30  ;;  %v16194_v17 = vand.u32 4294901760, %v16185_v27  ;;  %v16198_v8 = vand.u32 4294901760, %v16189_v48 }
 0x20c   : > { %3210 = vmatmul.mubr.f32.gmra.mxu0 %v16189_v48  ;;  %v2574_v11 = vpop.f32.mrf.mxu1  ;;  %v1755_v54 = vpop.f32.mrf.mxu0  ;;  %v16203_v48 = vld [vmem:[#allocation258_spill] sm:$0xff] }
 0x20d   : > { %16190 = vst [vmem:[#allocation54_spill] sm:$0xff] %v11387_v22  ;;  %3217 = vmatprep.mubr.f32.mxu0 %v16191_v37  ;;  %4059 = vmatmul.mubr.f32.gmra.mxu1 %v16192_v46  ;;  %v11394_v10 = vadd.f32 %v2574_v11, %v1737_v15  ;;  %v7454_v22 = vld [vmem:[%s11004_s14 + $0x1d0] sm:$0xff]  ;;  %v7457_v15 = vld [vmem:[%s11004_s14 + $0x1e8] sm:$0xff] }
 0x20e   : > { %4067 = vmatprep.mubr.f32.mxu1 %v16194_v17  ;;  %v2576_v51 = vpop.f32.mrf.mxu1  ;;  %v1769_v30 = vpop.f32.mrf.mxu0  ;;  %v16201_v17 = vld [vmem:[#allocation257_spill] sm:$0xff] }
 0x20f   : > { %16193 = vst [vmem:[#allocation56_spill] sm:$0xff] %v11394_v10  ;;  %7744 = vperm.xlu1 %8162, %v7452_v57   ;;  %7759 = vperm.xlu0 %8163, %v7455_v38   ;;  %v11399_v43 = vadd.f32 %v2576_v51, %v1739_v50  ;;  %v16200_v57 = vand.u32 4294901760, %v16191_v37  ;;  %v16204_v10 = vand.u32 4294901760, %v16195_v45 }
 0x210   : > { %3220 = vmatmul.mubr.f32.gmra.mxu0 %v16195_v45  ;;  %v2582_v46 = vpop.f32.mrf.mxu1  ;;  %v1771_v27 = vpop.f32.mrf.mxu0  ;;  %v16210_v45 = vld [vmem:[#allocation263_spill] sm:$0xff] }
 0x211   : > { %16196 = vst [vmem:[#allocation37_spill] sm:$0xff] %v11399_v43  ;;  %3227 = vmatprep.mubr.f32.mxu0 %v16197_v59  ;;  %4071 = vmatmul.mubr.f32.gmra.mxu1 %v16198_v8  ;;  %v11406_v11 = vadd.f32 %v2582_v46, %v1753_v5  ;;  %v7456_v43 = vld [vmem:[%s11004_s14 + $0x1e0] sm:$0xff]  ;;  %v7459_v5 = vld [vmem:[%s11004_s14 + $0x1f8] sm:$0xff] }
 0x212   : > { %4079 = vmatprep.mubr.f32.mxu1 %v16200_v57  ;;  %v2584_v38 = vpop.f32.mrf.mxu1  ;;  %v1785_v50 = vpop.f32.mrf.mxu0 }
 0x213   : > { %16199 = vst [vmem:[#allocation136_spill] sm:$0xff] %v11406_v11  ;;  %7754 = vperm.xlu1 %8162, %v7454_v22   ;;  %7769 = vperm.xlu0 %8163, %v7457_v15   ;;  %v11411_v51 = vadd.f32 %v2584_v38, %v1755_v54  ;;  %v16206_v22 = vand.u32 4294901760, %v16197_v59  ;;  %v16207_v54 = vld [vmem:[#allocation261_spill] sm:$0xff] }
 0x214   : > { %3230 = vmatmul.mubr.f32.gmra.mxu0 %v16201_v17  ;;  %v2590_v8 = vpop.f32.mrf.mxu1  ;;  %v1787_v46 = vpop.f32.mrf.mxu0  ;;  %v16209_v11 = vld [vmem:[#allocation285_spill] sm:$0xff] }
 0x215   : > { %16202 = vst [vmem:[#allocation39_spill] sm:$0xff] %v11411_v51  ;;  %3237 = vmatprep.mubr.f32.mxu0 %v16203_v48  ;;  %4083 = vmatmul.mubr.f32.gmra.mxu1 %v16204_v10  ;;  %v11418_v37 = vadd.f32 %v2590_v8, %v1769_v30  ;;  %v7458_v51 = vld [vmem:[%s11004_s14 + $0x1f0] sm:$0xff]  ;;  %v16211_v30 = vand.u32 4294901760, %v16201_v17 }
 0x216   : > { %4091 = vmatprep.mubr.f32.mxu1 %v16206_v22  ;;  %v2592_v15 = vpop.f32.mrf.mxu1  ;;  %v2761_v57 = vpop.f32.mrf.mxu0 }
 0x217   : > { %16205 = vst [vmem:[#allocation139_spill] sm:$0xff] %v11418_v37  ;;  %7764 = vperm.xlu1 %8162, %v7456_v43   ;;  %7779 = vperm.xlu0 %8163, %v7459_v5   ;;  %v11423_v38 = vadd.f32 %v2592_v15, %v1771_v27  ;;  %v2762_v24 = vadd.f32 %v2761_v57, %v16209_v11  ;;  %v16212_v43 = vand.u32 4294901760, %v16203_v48  ;;  %v16213_v5 = vld [vmem:[#allocation288_spill] sm:$0xff]  ;;  %v16214_v15 = vld [vmem:[#allocation266_spill] sm:$0xff]  ;;  %v16216_v57 = vld [vmem:[#allocation291_spill] sm:$0xff] }
 0x218   : > { %3240 = vmatmul.mubr.f32.gmra.mxu0 %v16207_v54  ;;  %v2598_v10 = vpop.f32.mrf.mxu1  ;;  %v2763_v8 = vpop.f32.mrf.mxu0 }
 0x219   : > { %16208 = vst [vmem:[#allocation58_spill] sm:$0xff] %v11423_v38  ;;  %3247 = vmatprep.mubr.f32.mxu0 %v16210_v45  ;;  %4095 = vmatmul.mubr.f32.gmra.mxu1 %v16211_v30  ;;  %v11430_v59 = vadd.f32 %v2598_v10, %v1785_v50  ;;  %v2764_v22 = vadd.f32 %v2763_v8, %v16213_v5  ;;  %v16218_v50 = vand.u32 4294901760, %v16207_v54  ;;  %v16220_v30 = vand.u32 4294901760, %v16210_v45 }
 0x21a   : > { %4103 = vmatprep.mubr.f32.mxu1 %v16212_v43  ;;  %v2600_v37 = vpop.f32.mrf.mxu1  ;;  %v2771_v27 = vpop.f32.mrf.mxu0  ;;  %v16228_v45 = vand.u32 4294901760, %v16217_v32 }
 0x21b   : > { %7774 = vperm.xlu1 %8162, %v7458_v51   ;;  %v11436_v11 = vadd.f32 %v2600_v37, %v1787_v46  ;;  %v2772_v38 = vadd.f32 %v2771_v27, %v16216_v57  ;;  %v16221_v51 = vld [vmem:[#allocation295_spill] sm:$0xff]  ;;  %v16222_v46 = vld [vmem:[#allocation269_spill] sm:$0xff] }
 0x21c   : > { %3250 = vmatmul.mubr.f32.gmra.mxu0 %v16214_v15  ;;  %v3532_v17 = vpop.f32.mrf.mxu1  ;;  %v2773_v10 = vpop.f32.mrf.mxu0  ;;  %v16224_v27 = vld [vmem:[#allocation297_spill] sm:$0xff] }
 0x21d   : > { %16215 = vst [vmem:[#allocation60_spill] sm:$0xff] %v11436_v11  ;;  %3257 = vmatprep.mubr.f32.mxu0 %v16217_v32  ;;  %4107 = vmatmul.mubr.f32.gmra.mxu1 %v16218_v50  ;;  %v11442_v48 = vadd.f32 %v3532_v17, %v2762_v24  ;;  %v2774_v8 = vadd.f32 %v2773_v10, %v16221_v51  ;;  %v16225_v11 = vld [vmem:[#allocation272_spill] sm:$0xff]  ;;  %v16226_v50 = vand.u32 4294901760, %v16214_v15 }
 0x21e   : > { %4115 = vmatprep.mubr.f32.mxu1 %v16220_v30  ;;  %v3534_v43 = vpop.f32.mrf.mxu1  ;;  %v2781_v5 = vpop.f32.mrf.mxu0  ;;  %v16229_v10 = vld [vmem:[#allocation300_spill] sm:$0xff]  ;;  %v16235_v32 = vand.u32 4294901760, %v16225_v11 }
 0x21f   : > { %16219 = vst [vmem:[#allocation41_spill] sm:$0xff] %v11442_v48  ;;  %v11448_v37 = vadd.f32 %v3534_v43, %v2764_v22  ;;  %v2782_v57 = vadd.f32 %v2781_v5, %v16224_v27  ;;  %v16230_v22 = vld [vmem:[#allocation273_spill] sm:$0xff]  ;;  %v16231_v5 = vld [vmem:[#allocation303_spill] sm:$0xff] }
 0x220   : > { %3260 = vmatmul.mubr.f32.gmra.mxu0 %v16222_v46  ;;  %v3544_v54 = vpop.f32.mrf.mxu1  ;;  %v2783_v24 = vpop.f32.mrf.mxu0 }
 0x221   : > { %16223 = vst [vmem:[#allocation140_spill] sm:$0xff] %v11448_v37  ;;  %3267 = vmatprep.mubr.f32.mxu0 %v16225_v11  ;;  %4119 = vmatmul.mubr.f32.gmra.mxu1 %v16226_v50  ;;  %v11454_v17 = vadd.f32 %v3544_v54, %v2772_v38  ;;  %v2784_v30 = vadd.f32 %v2783_v24, %v16229_v10  ;;  %v16232_v37 = vld [vmem:[#allocation275_spill] sm:$0xff]  ;;  %v16233_v50 = vand.u32 4294901760, %v16222_v46  ;;  %v16236_v24 = vld [vmem:[#allocation305_spill] sm:$0xff] }
 0x222   : > { %4127 = vmatprep.mubr.f32.mxu1 %v16228_v45  ;;  %v3546_v51 = vpop.f32.mrf.mxu1  ;;  %v16242_v11 = vand.u32 4294901760, %v16232_v37 }
 0x223   : > { %16227 = vst [vmem:[#allocation142_spill] sm:$0xff] %v11454_v17  ;;  %v2791_v48 = vpop.f32.mrf.mxu0  ;;  %v11460_v43 = vadd.f32 %v3546_v51, %v2774_v8  ;;  %v16237_v8 = vld [vmem:[#allocation277_spill] sm:$0xff] }
 0x224   : > { %3270 = vmatmul.mubr.f32.gmra.mxu0 %v16230_v22  ;;  %v2792_v27 = vadd.f32 %v2791_v48, %v16231_v5  ;;  %v3556_v15 = vpop.f32.mrf.mxu1  ;;  %v16239_v5 = vld [vmem:[#allocation279_spill] sm:$0xff] }
 0x225   : > { %3277 = vmatprep.mubr.f32.mxu0 %v16232_v37  ;;  %4131 = vmatmul.mubr.f32.gmra.mxu1 %v16233_v50  ;;  %v2793_v38 = vpop.f32.mrf.mxu0  ;;  %v11466_v54 = vadd.f32 %v3556_v15, %v2782_v57  ;;  %v16240_v50 = vand.u32 4294901760, %v16230_v22  ;;  %v16250_v37 = vand.u32 4294901760, %v16239_v5 }
 0x226   : > { %4139 = vmatprep.mubr.f32.mxu1 %v16235_v32  ;;  %v2794_v45 = vadd.f32 %v2793_v38, %v16236_v24  ;;  %v3558_v10 = vpop.f32.mrf.mxu1  ;;  %v16243_v38 = vld [vmem:[#allocation309_spill] sm:$0xff] }
 0x227   : > { %16234 = vst [vmem:[#allocation144_spill] sm:$0xff] %v11466_v54  ;;  %v2801_v17 = vpop.f32.mrf.mxu0  ;;  %v11472_v51 = vadd.f32 %v3558_v10, %v2784_v30  ;;  %v16244_v30 = vld [vmem:[#allocation281_spill] sm:$0xff] }
 0x228   : > { %3280 = vmatmul.mubr.f32.gmra.mxu0 %v16237_v8  ;;  %v2802_v48 = vadd.f32 %v2801_v17, %v10505_v2  ;;  %v3568_v46 = vpop.f32.mrf.mxu1  ;;  %v16246_v2 = vld [vmem:[#allocation314_spill] sm:$0xff] }
 0x229   : > { %16238 = vst [vmem:[#allocation63_spill] sm:$0xff] %v11472_v51  ;;  %3287 = vmatprep.mubr.f32.mxu0 %v16239_v5  ;;  %4143 = vmatmul.mubr.f32.gmra.mxu1 %v16240_v50  ;;  %v2803_v57 = vpop.f32.mrf.mxu0  ;;  %v11478_v15 = vadd.f32 %v3568_v46, %v2792_v27  ;;  %v16247_v51 = vld [vmem:[#allocation283_spill] sm:$0xff]  ;;  %v16248_v50 = vand.u32 4294901760, %v16237_v8 }
 0x22a   : > { %4151 = vmatprep.mubr.f32.mxu1 %v16242_v11  ;;  %v2804_v32 = vadd.f32 %v2803_v57, %v16243_v38  ;;  %v3570_v24 = vpop.f32.mrf.mxu1  ;;  %v16251_v57 = vld [vmem:[#allocation316_spill] sm:$0xff]  ;;  %v16258_v5 = vand.u32 4294901760, %v16247_v51 }
 0x22b   : > { %16241 = vst [vmem:[#allocation45_spill] sm:$0xff] %v11478_v15  ;;  %v2811_v54 = vpop.f32.mrf.mxu0  ;;  %v11484_v10 = vadd.f32 %v3570_v24, %v2794_v45  ;;  %v16252_v45 = vld [vmem:[#allocation289_spill] sm:$0xff] }
 0x22c   : > { %3290 = vmatmul.mubr.f32.gmra.mxu0 %v16244_v30  ;;  %v2812_v17 = vadd.f32 %v2811_v54, %v16246_v2  ;;  %v3580_v22 = vpop.f32.mrf.mxu1  ;;  %v16254_v54 = vld [vmem:[#allocation320_spill] sm:$0xff] }
 0x22d   : > { %16245 = vst [vmem:[#allocation148_spill] sm:$0xff] %v11484_v10  ;;  %3297 = vmatprep.mubr.f32.mxu0 %v16247_v51  ;;  %4155 = vmatmul.mubr.f32.gmra.mxu1 %v16248_v50  ;;  %v2813_v27 = vpop.f32.mrf.mxu0  ;;  %v11490_v46 = vadd.f32 %v3580_v22, %v2802_v48  ;;  %v16255_v10 = vld [vmem:[#allocation290_spill] sm:$0xff]  ;;  %v16256_v50 = vand.u32 4294901760, %v16244_v30 }
 0x22e   : > { %4163 = vmatprep.mubr.f32.mxu1 %v16250_v37  ;;  %v2814_v11 = vadd.f32 %v2813_v27, %v16251_v57  ;;  %v3582_v38 = vpop.f32.mrf.mxu1  ;;  %v16259_v27 = vld [vmem:[#allocation323_spill] sm:$0xff]  ;;  %v16266_v51 = vand.u32 4294901760, %v16255_v10 }
 0x22f   : > { %16249 = vst [vmem:[#allocation47_spill] sm:$0xff] %v11490_v46  ;;  %v2821_v15 = vpop.f32.mrf.mxu0  ;;  %v11496_v24 = vadd.f32 %v3582_v38, %v2804_v32  ;;  %v16260_v32 = vld [vmem:[#allocation292_spill] sm:$0xff] }
 0x230   : > { %3300 = vmatmul.mubr.f32.gmra.mxu0 %v16252_v45  ;;  %v2822_v2 = vadd.f32 %v2821_v15, %v16254_v54  ;;  %v3592_v8 = vpop.f32.mrf.mxu1  ;;  %v16262_v15 = vld [vmem:[#allocation326_spill] sm:$0xff] }
 0x231   : > { %16253 = vst [vmem:[#allocation43_spill] sm:$0xff] %v11496_v24  ;;  %3307 = vmatprep.mubr.f32.mxu0 %v16255_v10  ;;  %4167 = vmatmul.mubr.f32.gmra.mxu1 %v16256_v50  ;;  %v2823_v48 = vpop.f32.mrf.mxu0  ;;  %v11502_v22 = vadd.f32 %v3592_v8, %v2812_v17  ;;  %v16263_v24 = vld [vmem:[#allocation293_spill] sm:$0xff]  ;;  %v16264_v50 = vand.u32 4294901760, %v16252_v45 }
 0x232   : > { %4175 = vmatprep.mubr.f32.mxu1 %v16258_v5  ;;  %v2824_v37 = vadd.f32 %v2823_v48, %v16259_v27  ;;  %v3594_v57 = vpop.f32.mrf.mxu1  ;;  %v16267_v48 = vld [vmem:[#allocation329_spill] sm:$0xff]  ;;  %v16273_v10 = vand.u32 4294901760, %v16263_v24 }
 0x233   : > { %16257 = vst [vmem:[#allocation65_spill] sm:$0xff] %v11502_v22  ;;  %v2831_v46 = vpop.f32.mrf.mxu0  ;;  %v11508_v38 = vadd.f32 %v3594_v57, %v2814_v11  ;;  %v16268_v11 = vld [vmem:[#allocation298_spill] sm:$0xff] }
 0x234   : > { %3310 = vmatmul.mubr.f32.gmra.mxu0 %v16260_v32  ;;  %v2832_v54 = vadd.f32 %v2831_v46, %v16262_v15  ;;  %v3604_v30 = vpop.f32.mrf.mxu1  ;;  %v16269_v46 = vld [vmem:[#allocation332_spill] sm:$0xff] }
 0x235   : > { %16261 = vst [vmem:[#allocation67_spill] sm:$0xff] %v11508_v38  ;;  %3317 = vmatprep.mubr.f32.mxu0 %v16263_v24  ;;  %4179 = vmatmul.mubr.f32.gmra.mxu1 %v16264_v50  ;;  %v2833_v17 = vpop.f32.mrf.mxu0  ;;  %v11514_v8 = vadd.f32 %v3604_v30, %v2822_v2  ;;  %v16270_v38 = vld [vmem:[#allocation301_spill] sm:$0xff]  ;;  %v16271_v50 = vand.u32 4294901760, %v16260_v32 }
 0x236   : > { %4187 = vmatprep.mubr.f32.mxu1 %v16266_v51  ;;  %v2834_v5 = vadd.f32 %v2833_v17, %v16267_v48  ;;  %v3606_v27 = vpop.f32.mrf.mxu1  ;;  %v16274_v17 = vld [vmem:[#allocation333_spill] sm:$0xff]  ;;  %v16278_v24 = vand.u32 4294901760, %v16270_v38 }
 0x237   : > { %16265 = vst [vmem:[#allocation49_spill] sm:$0xff] %v11514_v8  ;;  %v2841_v22 = vpop.f32.mrf.mxu0  ;;  %v11520_v57 = vadd.f32 %v3606_v27, %v2824_v37  ;;  %v16275_v37 = vld [vmem:[#allocation304_spill] sm:$0xff] }
 0x238   : > { %3320 = vmatmul.mubr.f32.gmra.mxu0 %v16268_v11  ;;  %v2842_v15 = vadd.f32 %v2841_v22, %v16269_v46  ;;  %v3616_v45 = vpop.f32.mrf.mxu1  ;;  %v16276_v46 = vld [vmem:[#allocation307_spill] sm:$0xff] }
 0x239   : > { %3327 = vmatprep.mubr.f32.mxu0 %v16270_v38  ;;  %4191 = vmatmul.mubr.f32.gmra.mxu1 %v16271_v50  ;;  %v2843_v2 = vpop.f32.mrf.mxu0  ;;  %v11526_v30 = vadd.f32 %v3616_v45, %v2832_v54  ;;  %v16277_v50 = vand.u32 4294901760, %v16268_v11  ;;  %v16283_v38 = vand.u32 4294901760, %v16276_v46 }
 0x23a   : > { %4199 = vmatprep.mubr.f32.mxu1 %v16273_v10  ;;  %v2844_v51 = vadd.f32 %v2843_v2, %v16274_v17  ;;  %v3618_v48 = vpop.f32.mrf.mxu1  ;;  %v16279_v2 = vld [vmem:[#allocation336_spill] sm:$0xff] }
 0x23b   : > { %16272 = vst [vmem:[#allocation51_spill] sm:$0xff] %v11526_v30  ;;  %v2851_v8 = vpop.f32.mrf.mxu0  ;;  %v11532_v27 = vadd.f32 %v3618_v48, %v2834_v5  ;;  %v16280_v5 = vld [vmem:[#allocation310_spill] sm:$0xff] }
 0x23c   : > { %3330 = vmatmul.mubr.f32.gmra.mxu0 %v16275_v37  ;;  %v2852_v22 = vadd.f32 %v2851_v8, %v10640_v18  ;;  %v3628_v32 = vpop.f32.mrf.mxu1  ;;  %v16281_v8 = vld [vmem:[#allocation312_spill] sm:$0xff] }
 0x23d   : > { %3337 = vmatprep.mubr.f32.mxu0 %v16276_v46  ;;  %4203 = vmatmul.mubr.f32.gmra.mxu1 %v16277_v50  ;;  %v2853_v54 = vpop.f32.mrf.mxu0  ;;  %v11538_v45 = vadd.f32 %v3628_v32, %v2842_v15  ;;  %v16282_v50 = vand.u32 4294901760, %v16275_v37  ;;  %v16287_v46 = vand.u32 4294901760, %v16281_v8 }
 0x23e   : > { %4211 = vmatprep.mubr.f32.mxu1 %v16278_v24  ;;  %v2854_v10 = vadd.f32 %v2853_v54, %v16279_v2  ;;  %v3630_v17 = vpop.f32.mrf.mxu1 }
 0x23f   : > { %v2861_v30 = vpop.f32.mrf.mxu0  ;;  %v11544_v48 = vadd.f32 %v3630_v17, %v2844_v51  ;;  %v16284_v51 = vld [vmem:[#allocation317_spill] sm:$0xff] }
 0x240   : > { %3340 = vmatmul.mubr.f32.gmra.mxu0 %v16280_v5  ;;  %v2862_v18 = vadd.f32 %v2861_v30, %v10666_v21  ;;  %v3640_v11 = vpop.f32.mrf.mxu1  ;;  %v16285_v30 = vld [vmem:[#allocation319_spill] sm:$0xff] }
 0x241   : > { %3347 = vmatprep.mubr.f32.mxu0 %v16281_v8  ;;  %4215 = vmatmul.mubr.f32.gmra.mxu1 %v16282_v50  ;;  %v2863_v15 = vpop.f32.mrf.mxu0  ;;  %v11550_v32 = vadd.f32 %v3640_v11, %v2852_v22  ;;  %v16286_v50 = vand.u32 4294901760, %v16280_v5  ;;  %v16291_v8 = vand.u32 4294901760, %v16285_v30 }
 0x242   : > { %4223 = vmatprep.mubr.f32.mxu1 %v16283_v38  ;;  %v2864_v54 = vadd.f32 %v2863_v15, %v10672_v7  ;;  %v3642_v24 = vpop.f32.mrf.mxu1 }
 0x243   : > { %v2871_v2 = vpop.f32.mrf.mxu0  ;;  %v11556_v17 = vadd.f32 %v3642_v24, %v2854_v10  ;;  %v16288_v10 = vld [vmem:[#allocation321_spill] sm:$0xff] }
 0x244   : > { %3350 = vmatmul.mubr.f32.gmra.mxu0 %v16284_v51  ;;  %v2872_v21 = vadd.f32 %v2871_v2, %v10688_v52  ;;  %v3652_v37 = vpop.f32.mrf.mxu1  ;;  %v16289_v2 = vld [vmem:[#allocation324_spill] sm:$0xff] }
 0x245   : > { %3357 = vmatprep.mubr.f32.mxu0 %v16285_v30  ;;  %4227 = vmatmul.mubr.f32.gmra.mxu1 %v16286_v50  ;;  %v2873_v22 = vpop.f32.mrf.mxu0  ;;  %v11562_v11 = vadd.f32 %v3652_v37, %v2862_v18  ;;  %v16290_v50 = vand.u32 4294901760, %v16284_v51  ;;  %v16295_v30 = vand.u32 4294901760, %v16289_v2 }
 0x246   : > { %4235 = vmatprep.mubr.f32.mxu1 %v16287_v46  ;;  %v2874_v7 = vadd.f32 %v2873_v22, %v10691_v26  ;;  %v3654_v15 = vpop.f32.mrf.mxu1 }
 0x247   : > { %v2881_v38 = vpop.f32.mrf.mxu0  ;;  %v11568_v24 = vadd.f32 %v3654_v15, %v2864_v54  ;;  %v16292_v54 = vld [vmem:[#allocation327_spill] sm:$0xff] }
 0x248   : > { %3360 = vmatmul.mubr.f32.gmra.mxu0 %v16288_v10  ;;  %v2882_v52 = vadd.f32 %v2881_v38, %v10705_v12  ;;  %v3664_v5 = vpop.f32.mrf.mxu1  ;;  %v16293_v38 = vld [vmem:[#allocation330_spill] sm:$0xff] }
 0x249   : > { %3367 = vmatprep.mubr.f32.mxu0 %v16289_v2  ;;  %4239 = vmatmul.mubr.f32.gmra.mxu1 %v16290_v50  ;;  %v2883_v18 = vpop.f32.mrf.mxu0  ;;  %v11574_v37 = vadd.f32 %v3664_v5, %v2872_v21  ;;  %v16294_v50 = vand.u32 4294901760, %v16288_v10  ;;  %v16297_v2 = vand.u32 4294901760, %v16293_v38 }
 0x24a   : > { %4247 = vmatprep.mubr.f32.mxu1 %v16291_v8  ;;  %v2884_v26 = vadd.f32 %v2883_v18, %v10708_v0  ;;  %v3666_v22 = vpop.f32.mrf.mxu1 }
 0x24b   : > { %v2891_v46 = vpop.f32.mrf.mxu0  ;;  %v11580_v15 = vadd.f32 %v3666_v22, %v2874_v7  ;;  %v16296_v22 = vand.u32 4294901760, %v16292_v54 }
 0x24c   : > { %3370 = vmatmul.mubr.f32.gmra.mxu0 %v16292_v54  ;;  %v2892_v12 = vadd.f32 %v2891_v46, %v10718_v13  ;;  %v3676_v51 = vpop.f32.mrf.mxu1 }
 0x24d   : > { %3377 = vmatprep.mubr.f32.mxu0 %v16293_v38  ;;  %4251 = vmatmul.mubr.f32.gmra.mxu1 %v16294_v50  ;;  %v2893_v21 = vpop.f32.mrf.mxu0  ;;  %v11586_v5 = vadd.f32 %v3676_v51, %v2882_v52  ;;  %v16300_v38 = vand.u32 4294901760, %v10635_v44 }
 0x24e   : > { %4259 = vmatprep.mubr.f32.mxu1 %v16295_v30  ;;  %v2894_v0 = vadd.f32 %v2893_v21, %v10721_v20  ;;  %v3678_v18 = vpop.f32.mrf.mxu1  ;;  %v16299_v30 = vand.u32 4294901760, %v10622_v35 }
 0x24f   : > { %v2901_v8 = vpop.f32.mrf.mxu0  ;;  %v11592_v7 = vadd.f32 %v3678_v18, %v2884_v26  ;;  %v16298_v26 = vld [vmem:[#allocation337_spill] sm:$0xff] }
 0x250   : > { %3380 = vmatmul.mubr.f32.gmra.mxu0 %v10622_v35  ;;  %v2902_v13 = vadd.f32 %v2901_v8, %v10727_v47  ;;  %v3688_v10 = vpop.f32.mrf.mxu1 }
 0x251   : > { %3387 = vmatprep.mubr.f32.mxu0 %v10635_v44  ;;  %4263 = vmatmul.mubr.f32.gmra.mxu1 %v16296_v22  ;;  %v2903_v52 = vpop.f32.mrf.mxu0  ;;  %v11598_v46 = vadd.f32 %v3688_v10, %v2892_v12  ;;  %v16301_v22 = vand.u32 4294901760, %v16298_v26  ;;  %v16302_v44 = vand.u32 4294901760, %v10661_v56 }
 0x252   : > { %4271 = vmatprep.mubr.f32.mxu1 %v16297_v2  ;;  %v2904_v20 = vadd.f32 %v2903_v52, %v10730_v28  ;;  %v3690_v51 = vpop.f32.mrf.mxu1 }
 0x253   : > { %v2911_v50 = vpop.f32.mrf.mxu0  ;;  %v11604_v21 = vadd.f32 %v3690_v51, %v2894_v0 }
 0x254   : > { %3390 = vmatmul.mubr.f32.gmra.mxu0 %v16298_v26  ;;  %v2912_v47 = vadd.f32 %v2911_v50, %v10733_v60  ;;  %v3700_v54 = vpop.f32.mrf.mxu1  ;;  %v16303_v50 = vld [vmem:[#allocation68_spill] sm:$0xff] }
 0x255   : > { %3397 = vmatprep.mubr.f32.mxu0 %v10661_v56  ;;  %4275 = vmatmul.mubr.f32.gmra.mxu1 %v16299_v30  ;;  %v2913_v12 = vpop.f32.mrf.mxu0  ;;  %v11610_v18 = vadd.f32 %v3700_v54, %v2902_v13  ;;  %v16304_v54 = vand.u32 4294901760, %v10676_v19  ;;  %v16305_v56 = vand.u32 4294901760, %v10686_v33 }
 0x256   : > { %4283 = vmatprep.mubr.f32.mxu1 %v16300_v38  ;;  %v2914_v28 = vadd.f32 %v2913_v12, %v10736_v39  ;;  %v3702_v8 = vpop.f32.mrf.mxu1 }
 0x257   : > { %v2921_v10 = vpop.f32.mrf.mxu0  ;;  %v11616_v0 = vadd.f32 %v3702_v8, %v2904_v20 }
 0x258   : > { %3400 = vmatmul.mubr.f32.gmra.mxu0 %v10676_v19  ;;  %v2922_v60 = vadd.f32 %v2921_v10, %v10740_v36  ;;  %v3712_v35 = vpop.f32.mrf.mxu1  ;;  %v16307_v10 = vld [vmem:[#allocation75_spill] sm:$0xff] }
 0x259   : > { %3407 = vmatprep.mubr.f32.mxu0 %v10686_v33  ;;  %4287 = vmatmul.mubr.f32.gmra.mxu1 %v16301_v22  ;;  %v2923_v13 = vpop.f32.mrf.mxu0  ;;  %v11622_v52 = vadd.f32 %v3712_v35, %v2912_v47  ;;  %v16308_v35 = vand.u32 4294901760, %v10698_v14 }
 0x25a   : > { %4295 = vmatprep.mubr.f32.mxu1 %v16302_v44  ;;  %v2924_v39 = vadd.f32 %v2923_v13, %v10744_v55  ;;  %v3714_v2 = vpop.f32.mrf.mxu1  ;;  %v16309_v44 = vld [vmem:[#allocation77_spill] sm:$0xff] }
 0x25b   : > { %v2931_v51 = vpop.f32.mrf.mxu0  ;;  %v11628_v20 = vadd.f32 %v3714_v2, %v2914_v28  ;;  %v16306_v28 = vld [vmem:[#allocation69_spill] sm:$0xff]  ;;  %v16310_v2 = vld [vmem:[#allocation83_spill] sm:$0xff] }
 0x25c   : > { %3410 = vmatmul.mubr.f32.gmra.mxu0 %v10698_v14  ;;  %v2932_v36 = vadd.f32 %v2931_v51, %v10748_v3  ;;  %v3724_v26 = vpop.f32.mrf.mxu1 }
 0x25d   : > { %4514 = vmatprep.mubr.f32.mxu0 %v16303_v50  ;;  %4299 = vmatmul.mubr.f32.gmra.mxu1 %v16304_v54  ;;  %v2933_v47 = vpop.f32.mrf.mxu0  ;;  %v11634_v30 = vadd.f32 %v3724_v26, %v2922_v60  ;;  %v16311_v54 = vld [vmem:[#allocation85_spill] sm:$0xff] }
 0x25e   : > { %4307 = vmatprep.mubr.f32.mxu1 %v16305_v56  ;;  %v2934_v55 = vadd.f32 %v2933_v47, %v10757_v61  ;;  %v3726_v12 = vpop.f32.mrf.mxu1  ;;  %v16312_v56 = vld [vmem:[#allocation86_spill] sm:$0xff] }
 0x25f   : > { %v2941_v38 = vpop.f32.mrf.mxu0  ;;  %v11640_v8 = vadd.f32 %v3726_v12, %v2924_v39 }
 0x260   : > { %4516 = vmatmul.mubr.f32.vlgmr.msra.gmra.mxu0 %v16306_v28  ;;  %v2942_v3 = vadd.f32 %v2941_v38, %v10762_v6  ;;  %v3736_v19 = vpop.f32.mrf.mxu1 }
 0x261   : > { %4522 = vmatprep.mubr.f32.mxu0 %v16307_v10  ;;  %4311 = vmatmul.mubr.f32.gmra.mxu1 %v16308_v35  ;;  %v2943_v60 = vpop.f32.mrf.mxu0  ;;  %v11646_v22 = vadd.f32 %v3736_v19, %v2932_v36  ;;  %v16314_v35 = vld [vmem:[#allocation90_spill] sm:$0xff] }
 0x262   : > { %5151 = vmatprep.mubr.f32.mxu1 %v16303_v50  ;;  %v2944_v61 = vadd.f32 %v2943_v60, %v10771_v53  ;;  %v3738_v33 = vpop.f32.mrf.mxu1 }
 0x263   : > { %v2951_v13 = vpop.f32.mrf.mxu0  ;;  %v11651_v39 = vadd.f32 %v3738_v33, %v2934_v55 }
 0x264   : > { %4524 = vmatmul.mubr.f32.gmra.mxu0 %v16309_v44  ;;  %v2952_v6 = vadd.f32 %v2951_v13, %v10777_v58  ;;  %v3748_v51 = vpop.f32.mrf.mxu1 }
 0x265   : > { %4530 = vmatprep.mubr.f32.mxu0 %v16310_v2  ;;  %5153 = vmatmul.mubr.f32.vlgmr.msra.gmra.mxu1 %v16306_v28  ;;  %v2953_v14 = vpop.f32.mrf.mxu0  ;;  %v11656_v36 = vadd.f32 %v3748_v51, %v2942_v3  ;;  %v16316_v51 = vld [vmem:[#allocation92_spill] sm:$0xff] }
 0x266   : > { %5159 = vmatprep.mubr.f32.mxu1 %v16307_v10  ;;  %v2954_v53 = vadd.f32 %v2953_v14, %v10787_v41  ;;  %v3750_v50 = vpop.f32.mrf.mxu1  ;;  %v16313_v10 = vld [vmem:[#allocation87_spill] sm:$0xff] }
 0x267   : > { %v2961_v26 = vpop.f32.mrf.mxu0  ;;  %v11661_v47 = vadd.f32 %v3750_v50, %v2944_v61 }
 0x268   : > { %4532 = vmatmul.mubr.f32.gmra.mxu0 %v16311_v54  ;;  %v2962_v58 = vadd.f32 %v2961_v26, %v10793_v63  ;;  %v3760_v55 = vpop.f32.mrf.mxu1 }
 0x269   : > { %4538 = vmatprep.mubr.f32.mxu0 %v16312_v56  ;;  %5161 = vmatmul.mubr.f32.gmra.mxu1 %v16309_v44  ;;  %v2963_v12 = vpop.f32.mrf.mxu0  ;;  %v11666_v38 = vadd.f32 %v3760_v55, %v2952_v6  ;;  %v16315_v6 = vld [vmem:[#allocation88_spill] sm:$0xff]  ;;  %v16318_v55 = vld [vmem:[#allocation97_spill] sm:$0xff] }
 0x26a   : > { %5167 = vmatprep.mubr.f32.mxu1 %v16310_v2  ;;  %v2964_v41 = vadd.f32 %v2963_v12, %v10803_v1  ;;  %v3762_v28 = vpop.f32.mrf.mxu1 }
 0x26b   : > { %v2971_v3 = vpop.f32.mrf.mxu0  ;;  %v11671_v19 = vadd.f32 %v3762_v28, %v2954_v53 }
 0x26c   : > { %4540 = vmatmul.mubr.f32.gmra.mxu0 %v16313_v10  ;;  %v2972_v63 = vadd.f32 %v2971_v3, %v10809_v62  ;;  %v3772_v60 = vpop.f32.mrf.mxu1 }
 0x26d   : > { %4546 = vmatprep.mubr.f32.mxu0 %v16314_v35  ;;  %5169 = vmatmul.mubr.f32.gmra.mxu1 %v16311_v54  ;;  %v2973_v61 = vpop.f32.mrf.mxu0  ;;  %v11676_v33 = vadd.f32 %v3772_v60, %v2962_v58  ;;  %v16317_v58 = vld [vmem:[#allocation93_spill] sm:$0xff]  ;;  %v16320_v60 = vld [vmem:[#allocation71_spill] sm:$0xff] }
 0x26e   : > { %5175 = vmatprep.mubr.f32.mxu1 %v16312_v56  ;;  %v2974_v1 = vadd.f32 %v2973_v61, %v10819_v25  ;;  %v3774_v13 = vpop.f32.mrf.mxu1  ;;  %v16321_v61 = vld [vmem:[#allocation102_spill] sm:$0xff] }
 0x26f   : > { %v2981_v44 = vpop.f32.mrf.mxu0  ;;  %v11681_v2 = vadd.f32 %v3774_v13, %v2964_v41 }
 0x270   : > { %4548 = vmatmul.mubr.f32.gmra.mxu0 %v16315_v6  ;;  %v2982_v62 = vadd.f32 %v2981_v44, %v10825_v40  ;;  %v3784_v14 = vpop.f32.mrf.mxu1 }
 0x271   : > { %4554 = vmatprep.mubr.f32.mxu0 %v16316_v51  ;;  %5177 = vmatmul.mubr.f32.gmra.mxu1 %v16313_v10  ;;  %v2983_v53 = vpop.f32.mrf.mxu0  ;;  %v11686_v50 = vadd.f32 %v3784_v14, %v2972_v63  ;;  %v16319_v63 = vld [vmem:[#allocation98_spill] sm:$0xff]  ;;  %v16323_v14 = vld [vmem:[#allocation101_spill] sm:$0xff] }
 0x272   : > { %5183 = vmatprep.mubr.f32.mxu1 %v16314_v35  ;;  %v2984_v25 = vadd.f32 %v2983_v53, %v10835_v34  ;;  %v3786_v26 = vpop.f32.mrf.mxu1 }
 0x273   : > { %v2991_v54 = vpop.f32.mrf.mxu0  ;;  %v11691_v56 = vadd.f32 %v3786_v26, %v2974_v1 }
 0x274   : > { %4556 = vmatmul.mubr.f32.gmra.mxu0 %v16317_v58  ;;  %v2992_v40 = vadd.f32 %v2991_v54, %v10841_v29  ;;  %v16325_v54 = vld [vmem:[#allocation105_spill] sm:$0xff] }
 0x275   : > { %4562 = vmatprep.mubr.f32.mxu0 %v16318_v55  ;;  %v3796_v12 = vpop.f32.mrf.mxu1  ;;  %5185 = vmatmul.mubr.f32.gmra.mxu1 %v16315_v6  ;;  %v2993_v41 = vpop.f32.mrf.mxu0  ;;  %v16322_v6 = vld [vmem:[#allocation73_spill] sm:$0xff] }
 0x276   : > { %v11696_v28 = vadd.f32 %v3796_v12, %v2982_v62  ;;  %5191 = vmatprep.mubr.f32.mxu1 %v16316_v51  ;;  %v2994_v34 = vadd.f32 %v2993_v41, %v10851_v4 }
 0x277   : > { %v3798_v3 = vpop.f32.mrf.mxu1 }
 0x278   : > { %v3001_v10 = vpop.f32.mrf.mxu0  ;;  %4564 = vmatmul.mubr.f32.gmra.mxu0 %v16319_v63  ;;  %v11701_v35 = vadd.f32 %v3798_v3, %v2984_v25  ;;  %v16324_v25 = vld [vmem:[#allocation78_spill] sm:$0xff] }
 0x279   : > { %v3002_v29 = vadd.f32 %v3001_v10, %v16320_v60  ;;  %4570 = vmatprep.mubr.f32.mxu0 %v16321_v61  ;;  %v3808_v1 = vpop.f32.mrf.mxu1  ;;  %5193 = vmatmul.mubr.f32.gmra.mxu1 %v16317_v58  ;;  %v16327_v60 = vld [vmem:[#allocation106_spill] sm:$0xff] }
 0x27a   : > { %v3003_v13 = vpop.f32.mrf.mxu0  ;;  %v11706_v44 = vadd.f32 %v3808_v1, %v2992_v40  ;;  %5199 = vmatprep.mubr.f32.mxu1 %v16318_v55  ;;  %v16326_v55 = vld [vmem:[#allocation4_spill] sm:$0xff]  ;;  %v16328_v1 = vld [vmem:[#allocation5_spill] sm:$0xff] }
 0x27b   : > { %v3004_v4 = vadd.f32 %v3003_v13, %v16322_v6  ;;  %v3810_v62 = vpop.f32.mrf.mxu1  ;;  %v16329_v6 = vld [vmem:[#allocation109_spill] sm:$0xff] }
 0x27c   : > { %v3011_v51 = vpop.f32.mrf.mxu0  ;;  %4572 = vmatmul.mubr.f32.gmra.mxu0 %v16323_v14  ;;  %v11711_v53 = vadd.f32 %v3810_v62, %v2994_v34 }
 0x27d   : > { %v3012_v26 = vadd.f32 %v3011_v51, %v16324_v25  ;;  %4578 = vmatprep.mubr.f32.mxu0 %v16325_v54  ;;  %v3820_v12 = vpop.f32.mrf.mxu1  ;;  %5201 = vmatmul.mubr.f32.gmra.mxu1 %v16319_v63 }
 0x27e   : > { %v3013_v58 = vpop.f32.mrf.mxu0  ;;  %v11716_v40 = vadd.f32 %v3820_v12, %v3002_v29  ;;  %5207 = vmatprep.mubr.f32.mxu1 %v16321_v61  ;;  %v16331_v61 = vld [vmem:[#allocation79_spill] sm:$0xff] }
 0x27f   : > { %v3014_v41 = vadd.f32 %v3013_v58, %v16326_v55  ;;  %v3822_v3 = vpop.f32.mrf.mxu1  ;;  %v16332_v58 = vld [vmem:[#allocation110_spill] sm:$0xff] }
 0x280   : > { %v3021_v10 = vpop.f32.mrf.mxu0  ;;  %4580 = vmatmul.mubr.f32.gmra.mxu0 %v16327_v60  ;;  %v11721_v34 = vadd.f32 %v3822_v3, %v3004_v4  ;;  %v16333_v3 = vld [vmem:[#allocation112_spill] sm:$0xff] }
 0x281   : > { %v3022_v13 = vadd.f32 %v3021_v10, %v16328_v1  ;;  %4586 = vmatprep.mubr.f32.mxu0 %v16329_v6  ;;  %v3832_v62 = vpop.f32.mrf.mxu1  ;;  %5209 = vmatmul.mubr.f32.gmra.mxu1 %v16323_v14 }
 0x282   : > { %v3023_v63 = vpop.f32.mrf.mxu0  ;;  %v11726_v29 = vadd.f32 %v3832_v62, %v3012_v26  ;;  %5215 = vmatprep.mubr.f32.mxu1 %v16325_v54  ;;  %v16335_v54 = vld [vmem:[#allocation6_spill] sm:$0xff] }
 0x283   : > { %v3024_v51 = vadd.f32 %v3023_v63, %v16331_v61  ;;  %v3834_v25 = vpop.f32.mrf.mxu1  ;;  %v16336_v61 = vld [vmem:[#allocation113_spill] sm:$0xff] }
 0x284   : > { %16330 = vst [vmem:[#allocation154_spill] sm:$0xff] %v11726_v29  ;;  %v3031_v12 = vpop.f32.mrf.mxu0  ;;  %4588 = vmatmul.mubr.f32.gmra.mxu0 %v16332_v58  ;;  %v11731_v4 = vadd.f32 %v3834_v25, %v3014_v41  ;;  %v16338_v25 = vld [vmem:[#allocation8_spill] sm:$0xff] }
 0x285   : > { %v3032_v55 = vadd.f32 %v3031_v12, %v10905_v31  ;;  %4594 = vmatprep.mubr.f32.mxu0 %v16333_v3  ;;  %v3844_v10 = vpop.f32.mrf.mxu1  ;;  %5217 = vmatmul.mubr.f32.gmra.mxu1 %v16327_v60  ;;  %v16339_v12 = vld [vmem:[#allocation116_spill] sm:$0xff] }
 0x286   : > { %v3033_v14 = vpop.f32.mrf.mxu0  ;;  %v11736_v26 = vadd.f32 %v3844_v10, %v3022_v13  ;;  %5223 = vmatprep.mubr.f32.mxu1 %v16329_v6  ;;  %v16341_v6 = vld [vmem:[#allocation89_spill] sm:$0xff] }
 0x287   : > { %v3034_v1 = vadd.f32 %v3033_v14, %v16335_v54  ;;  %v3846_v62 = vpop.f32.mrf.mxu1 }
 0x288   : > { %16334 = vst [vmem:[#allocation70_spill] sm:$0xff] %v11736_v26  ;;  %v3041_v63 = vpop.f32.mrf.mxu0  ;;  %4596 = vmatmul.mubr.f32.gmra.mxu0 %v16336_v61  ;;  %v11741_v41 = vadd.f32 %v3846_v62, %v3024_v51  ;;  %v16342_v26 = vld [vmem:[#allocation118_spill] sm:$0xff] }
 0x289   : > { %v3042_v31 = vadd.f32 %v3041_v63, %v16338_v25  ;;  %4602 = vmatprep.mubr.f32.mxu0 %v16339_v12  ;;  %v3856_v29 = vpop.f32.mrf.mxu1  ;;  %5225 = vmatmul.mubr.f32.gmra.mxu1 %v16332_v58  ;;  %v16344_v62 = vld [vmem:[#allocation94_spill] sm:$0xff]  ;;  %v16345_v25 = vld [vmem:[#allocation119_spill] sm:$0xff] }
 0x28a   : > { %16337 = vst [vmem:[#allocation156_spill] sm:$0xff] %v11741_v41  ;;  %v3043_v60 = vpop.f32.mrf.mxu0  ;;  %v11746_v13 = vadd.f32 %v3856_v29, %v3032_v55  ;;  %5231 = vmatprep.mubr.f32.mxu1 %v16333_v3  ;;  %v16347_v55 = vld [vmem:[#allocation10_spill] sm:$0xff] }
 0x28b   : > { %v3044_v10 = vadd.f32 %v3043_v60, %v16341_v6  ;;  %v3858_v14 = vpop.f32.mrf.mxu1 }
 0x28c   : > { %16340 = vst [vmem:[#allocation72_spill] sm:$0xff] %v11746_v13  ;;  %v3051_v54 = vpop.f32.mrf.mxu0  ;;  %4604 = vmatmul.mubr.f32.gmra.mxu0 %v16342_v26  ;;  %v11751_v51 = vadd.f32 %v3858_v14, %v3034_v1  ;;  %v16348_v13 = vld [vmem:[#allocation122_spill] sm:$0xff]  ;;  %v16350_v14 = vld [vmem:[#allocation12_spill] sm:$0xff] }
 0x28d   : > { %v3052_v63 = vadd.f32 %v3051_v54, %v16344_v62  ;;  %4610 = vmatprep.mubr.f32.mxu0 %v16345_v25  ;;  %v3868_v41 = vpop.f32.mrf.mxu1  ;;  %5233 = vmatmul.mubr.f32.gmra.mxu1 %v16336_v61  ;;  %v16351_v62 = vld [vmem:[#allocation124_spill] sm:$0xff] }
 0x28e   : > { %16343 = vst [vmem:[#allocation158_spill] sm:$0xff] %v11751_v51  ;;  %v3053_v58 = vpop.f32.mrf.mxu0  ;;  %v11756_v29 = vadd.f32 %v3868_v41, %v3042_v31  ;;  %5239 = vmatprep.mubr.f32.mxu1 %v16339_v12  ;;  %v16353_v31 = vld [vmem:[#allocation91_spill] sm:$0xff] }
 0x28f   : > { %v3054_v3 = vadd.f32 %v3053_v58, %v16347_v55  ;;  %v3870_v60 = vpop.f32.mrf.mxu1 }
 0x290   : > { %16346 = vst [vmem:[#allocation53_spill] sm:$0xff] %v11756_v29  ;;  %v3061_v6 = vpop.f32.mrf.mxu0  ;;  %4612 = vmatmul.mubr.f32.gmra.mxu0 %v16348_v13  ;;  %v11761_v1 = vadd.f32 %v3870_v60, %v3044_v10  ;;  %v16354_v29 = vld [vmem:[#allocation127_spill] sm:$0xff] }
 0x291   : > { %v3062_v54 = vadd.f32 %v3061_v6, %v16350_v14  ;;  %4618 = vmatprep.mubr.f32.mxu0 %v16351_v62  ;;  %v3880_v51 = vpop.f32.mrf.mxu1  ;;  %5241 = vmatmul.mubr.f32.gmra.mxu1 %v16342_v26  ;;  %v16355_v60 = vld [vmem:[#allocation95_spill] sm:$0xff]  ;;  %v16356_v14 = vld [vmem:[#allocation128_spill] sm:$0xff] }
 0x292   : > { %16349 = vst [vmem:[#allocation159_spill] sm:$0xff] %v11761_v1  ;;  %v3063_v61 = vpop.f32.mrf.mxu0  ;;  %v11766_v41 = vadd.f32 %v3880_v51, %v3052_v63  ;;  %5247 = vmatprep.mubr.f32.mxu1 %v16345_v25  ;;  %v16357_v63 = vld [vmem:[#allocation14_spill] sm:$0xff] }
 0x293   : > { %v3064_v12 = vadd.f32 %v3063_v61, %v16353_v31  ;;  %v3882_v58 = vpop.f32.mrf.mxu1 }
 0x294   : > { %16352 = vst [vmem:[#allocation55_spill] sm:$0xff] %v11766_v41  ;;  %v3071_v55 = vpop.f32.mrf.mxu0  ;;  %4620 = vmatmul.mubr.f32.gmra.mxu0 %v16354_v29  ;;  %v11771_v10 = vadd.f32 %v3882_v58, %v3054_v3  ;;  %v16358_v41 = vld [vmem:[#allocation130_spill] sm:$0xff] }
 0x295   : > { %v3072_v6 = vadd.f32 %v3071_v55, %v16355_v60  ;;  %4626 = vmatprep.mubr.f32.mxu0 %v16356_v14  ;;  %v3892_v1 = vpop.f32.mrf.mxu1  ;;  %5249 = vmatmul.mubr.f32.gmra.mxu1 %v16348_v13  ;;  %v16359_v55 = vld [vmem:[#allocation132_spill] sm:$0xff] }
 0x296   : > { %v3073_v26 = vpop.f32.mrf.mxu0  ;;  %v11776_v51 = vadd.f32 %v3892_v1, %v3062_v54  ;;  %5255 = vmatprep.mubr.f32.mxu1 %v16351_v62 }
 0x297   : > { %v3074_v25 = vadd.f32 %v3073_v26, %v16357_v63  ;;  %v3894_v61 = vpop.f32.mrf.mxu1  ;;  %v16361_v63 = vld [vmem:[#allocation133_spill] sm:$0xff] }
 0x298   : > { %v3081_v31 = vpop.f32.mrf.mxu0  ;;  %4628 = vmatmul.mubr.f32.gmra.mxu0 %v16358_v41  ;;  %v11781_v3 = vadd.f32 %v3894_v61, %v3064_v12  ;;  %v16362_v61 = vld [vmem:[#allocation135_spill] sm:$0xff] }
 0x299   : > { %v3082_v58 = vadd.f32 %v3081_v31, %v10985_v16  ;;  %4634 = vmatprep.mubr.f32.mxu0 %v16359_v55  ;;  %v3904_v60 = vpop.f32.mrf.mxu1  ;;  %5257 = vmatmul.mubr.f32.gmra.mxu1 %v16354_v29 }
 0x29a   : > { %v3083_v13 = vpop.f32.mrf.mxu0  ;;  %v11786_v1 = vadd.f32 %v3904_v60, %v3072_v6  ;;  %5263 = vmatprep.mubr.f32.mxu1 %v16356_v14 }
 0x29b   : > { %v3084_v54 = vadd.f32 %v3083_v13, %v10996_v23  ;;  %v3906_v62 = vpop.f32.mrf.mxu1  ;;  %v16364_v13 = vld [vmem:[#allocation137_spill] sm:$0xff] }
 0x29c   : > { %16360 = vst [vmem:[#allocation162_spill] sm:$0xff] %v11786_v1  ;;  %v3091_v26 = vpop.f32.mrf.mxu0  ;;  %4636 = vmatmul.mubr.f32.gmra.mxu0 %v16361_v63  ;;  %v11791_v12 = vadd.f32 %v3906_v62, %v3074_v25  ;;  %v16365_v62 = vld [vmem:[#allocation16_spill] sm:$0xff] }
 0x29d   : > { %v3092_v16 = vadd.f32 %v3091_v26, %v11010_v9  ;;  %4642 = vmatprep.mubr.f32.mxu0 %v16362_v61  ;;  %v3916_v31 = vpop.f32.mrf.mxu1  ;;  %5265 = vmatmul.mubr.f32.gmra.mxu1 %v16358_v41  ;;  %v16366_v26 = vld [vmem:[#allocation138_spill] sm:$0xff] }
 0x29e   : > { %v3093_v29 = vpop.f32.mrf.mxu0  ;;  %v11796_v6 = vadd.f32 %v3916_v31, %v3082_v58  ;;  %5271 = vmatprep.mubr.f32.mxu1 %v16359_v55  ;;  %v16368_v55 = vld [vmem:[#allocation96_spill] sm:$0xff] }
 0x29f   : > { %v3094_v23 = vadd.f32 %v3093_v29, %v11015_v49  ;;  %v3918_v14 = vpop.f32.mrf.mxu1 }
 0x2a0   : > { %16363 = vst [vmem:[#allocation74_spill] sm:$0xff] %v11796_v6  ;;  %v3101_v60 = vpop.f32.mrf.mxu0  ;;  %4644 = vmatmul.mubr.f32.gmra.mxu0 %v16364_v13  ;;  %v11801_v25 = vadd.f32 %v3918_v14, %v3084_v54  ;;  %v16369_v6 = vld [vmem:[#allocation141_spill] sm:$0xff] }
 0x2a1   : > { %v3102_v9 = vadd.f32 %v3101_v60, %v16365_v62  ;;  %4650 = vmatprep.mubr.f32.mxu0 %v16366_v26  ;;  %v3928_v1 = vpop.f32.mrf.mxu1  ;;  %5273 = vmatmul.mubr.f32.gmra.mxu1 %v16361_v63  ;;  %v16371_v60 = vld [vmem:[#allocation143_spill] sm:$0xff] }
 0x2a2   : > { %v3103_v41 = vpop.f32.mrf.mxu0  ;;  %v11806_v58 = vadd.f32 %v3928_v1, %v3092_v16  ;;  %5279 = vmatprep.mubr.f32.mxu1 %v16362_v61  ;;  %v16373_v16 = vld [vmem:[#allocation3_spill] sm:$0xff] }
 0x2a3   : > { %v3104_v49 = vadd.f32 %v3103_v41, %v16368_v55  ;;  %v3930_v31 = vpop.f32.mrf.mxu1 }
 0x2a4   : > { %16367 = vst [vmem:[#allocation164_spill] sm:$0xff] %v11806_v58  ;;  %v3111_v29 = vpop.f32.mrf.mxu0  ;;  %4652 = vmatmul.mubr.f32.gmra.mxu0 %v16369_v6  ;;  %v11811_v54 = vadd.f32 %v3930_v31, %v3094_v23  ;;  %v16374_v58 = vld [vmem:[#allocation145_spill] sm:$0xff]  ;;  %v16376_v31 = vld [vmem:[#allocation99_spill] sm:$0xff] }
 0x2a5   : > { %v3112_v14 = vadd.f32 %v3111_v29, %v11039_v42  ;;  %4658 = vmatprep.mubr.f32.mxu0 %v16371_v60  ;;  %v3940_v62 = vpop.f32.mrf.mxu1  ;;  %5281 = vmatmul.mubr.f32.gmra.mxu1 %v16364_v13  ;;  %v16377_v29 = vld [vmem:[#allocation146_spill] sm:$0xff] }
 0x2a6   : > { %16370 = vst [vmem:[#allocation76_spill] sm:$0xff] %v11811_v54  ;;  %v3113_v63 = vpop.f32.mrf.mxu0  ;;  %v11816_v1 = vadd.f32 %v3940_v62, %v3102_v9  ;;  %5287 = vmatprep.mubr.f32.mxu1 %v16366_v26  ;;  %v16379_v26 = vld [vmem:[#allocation18_spill] sm:$0xff] }
 0x2a7   : > { %v3114_v61 = vadd.f32 %v3113_v63, %v16373_v16  ;;  %v3942_v41 = vpop.f32.mrf.mxu1 }
 0x2a8   : > { %16372 = vst [vmem:[#allocation167_spill] sm:$0xff] %v11816_v1  ;;  %v3121_v55 = vpop.f32.mrf.mxu0  ;;  %4660 = vmatmul.mubr.f32.gmra.mxu0 %v16374_v58  ;;  %v11821_v23 = vadd.f32 %v3942_v41, %v3104_v49  ;;  %v16380_v1 = vld [vmem:[#allocation147_spill] sm:$0xff]  ;;  %v16382_v41 = vld [vmem:[#allocation20_spill] sm:$0xff] }
 0x2a9   : > { %v3122_v42 = vadd.f32 %v3121_v55, %v16376_v31  ;;  %4666 = vmatprep.mubr.f32.mxu0 %v16377_v29  ;;  %v3952_v54 = vpop.f32.mrf.mxu1  ;;  %5289 = vmatmul.mubr.f32.gmra.mxu1 %v16369_v6  ;;  %v16383_v31 = vld [vmem:[#allocation149_spill] sm:$0xff] }
 0x2aa   : > { %16375 = vst [vmem:[#allocation57_spill] sm:$0xff] %v11821_v23  ;;  %v3123_v13 = vpop.f32.mrf.mxu0  ;;  %v11826_v9 = vadd.f32 %v3952_v54, %v3112_v14  ;;  %5295 = vmatprep.mubr.f32.mxu1 %v16371_v60  ;;  %v16385_v14 = vld [vmem:[#allocation100_spill] sm:$0xff] }
 0x2ab   : > { %v3124_v62 = vadd.f32 %v3123_v13, %v16379_v26  ;;  %v3954_v63 = vpop.f32.mrf.mxu1 }
 0x2ac   : > { %16378 = vst [vmem:[#allocation168_spill] sm:$0xff] %v11826_v9  ;;  %v3131_v16 = vpop.f32.mrf.mxu0  ;;  %4668 = vmatmul.mubr.f32.gmra.mxu0 %v16380_v1  ;;  %v11831_v49 = vadd.f32 %v3954_v63, %v3114_v61  ;;  %v16386_v9 = vld [vmem:[#allocation150_spill] sm:$0xff]  ;;  %v16388_v63 = vld [vmem:[#allocation104_spill] sm:$0xff] }
 0x2ad   : > { %v3132_v55 = vadd.f32 %v3131_v16, %v16382_v41  ;;  %4674 = vmatprep.mubr.f32.mxu0 %v16383_v31  ;;  %v3964_v23 = vpop.f32.mrf.mxu1  ;;  %5297 = vmatmul.mubr.f32.gmra.mxu1 %v16374_v58  ;;  %v16389_v41 = vld [vmem:[#allocation151_spill] sm:$0xff] }
 0x2ae   : > { %16381 = vst [vmem:[#allocation59_spill] sm:$0xff] %v11831_v49  ;;  %v3133_v6 = vpop.f32.mrf.mxu0  ;;  %v11836_v54 = vadd.f32 %v3964_v23, %v3122_v42  ;;  %5303 = vmatprep.mubr.f32.mxu1 %v16377_v29  ;;  %v16391_v42 = vld [vmem:[#allocation22_spill] sm:$0xff] }
 0x2af   : > { %v3134_v60 = vadd.f32 %v3133_v6, %v16385_v14  ;;  %v3966_v13 = vpop.f32.mrf.mxu1 }
 0x2b0   : > { %16384 = vst [vmem:[#allocation170_spill] sm:$0xff] %v11836_v54  ;;  %v3141_v26 = vpop.f32.mrf.mxu0  ;;  %4676 = vmatmul.mubr.f32.gmra.mxu0 %v16386_v9  ;;  %v11841_v61 = vadd.f32 %v3966_v13, %v3124_v62  ;;  %v16392_v54 = vld [vmem:[#allocation152_spill] sm:$0xff] }
 0x2b1   : > { %v3142_v16 = vadd.f32 %v3141_v26, %v16388_v63  ;;  %4682 = vmatprep.mubr.f32.mxu0 %v16389_v41  ;;  %v3976_v49 = vpop.f32.mrf.mxu1  ;;  %5305 = vmatmul.mubr.f32.gmra.mxu1 %v16380_v1  ;;  %v16394_v13 = vld [vmem:[#allocation24_spill] sm:$0xff]  ;;  %v16395_v63 = vld [vmem:[#allocation153_spill] sm:$0xff] }
 0x2b2   : > { %16387 = vst [vmem:[#allocation80_spill] sm:$0xff] %v11841_v61  ;;  %v3143_v58 = vpop.f32.mrf.mxu0  ;;  %v11846_v23 = vadd.f32 %v3976_v49, %v3132_v55  ;;  %5311 = vmatprep.mubr.f32.mxu1 %v16383_v31  ;;  %v16397_v55 = vld [vmem:[#allocation103_spill] sm:$0xff] }
 0x2b3   : > { %v3144_v29 = vadd.f32 %v3143_v58, %v16391_v42  ;;  %v3978_v6 = vpop.f32.mrf.mxu1 }
 0x2b4   : > { %16390 = vst [vmem:[#allocation172_spill] sm:$0xff] %v11846_v23  ;;  %v3151_v14 = vpop.f32.mrf.mxu0  ;;  %4684 = vmatmul.mubr.f32.gmra.mxu0 %v16392_v54  ;;  %v11851_v62 = vadd.f32 %v3978_v6, %v3134_v60  ;;  %v16398_v23 = vld [vmem:[#allocation155_spill] sm:$0xff] }
 0x2b5   : > { %v3152_v26 = vadd.f32 %v3151_v14, %v16394_v13  ;;  %4690 = vmatprep.mubr.f32.mxu0 %v16395_v63  ;;  %v3988_v61 = vpop.f32.mrf.mxu1  ;;  %5313 = vmatmul.mubr.f32.gmra.mxu1 %v16386_v9  ;;  %v16400_v6 = vld [vmem:[#allocation7_spill] sm:$0xff]  ;;  %v16401_v13 = vld [vmem:[#allocation157_spill] sm:$0xff] }
 0x2b6   : > { %16393 = vst [vmem:[#allocation81_spill] sm:$0xff] %v11851_v62  ;;  %v3153_v1 = vpop.f32.mrf.mxu0  ;;  %v11856_v49 = vadd.f32 %v3988_v61, %v3142_v16  ;;  %5319 = vmatprep.mubr.f32.mxu1 %v16389_v41  ;;  %v16403_v16 = vld [vmem:[#allocation107_spill] sm:$0xff] }
 0x2b7   : > { %v3154_v31 = vadd.f32 %v3153_v1, %v16397_v55  ;;  %v3990_v58 = vpop.f32.mrf.mxu1 }
 0x2b8   : > { %16396 = vst [vmem:[#allocation173_spill] sm:$0xff] %v11856_v49  ;;  %v3161_v42 = vpop.f32.mrf.mxu0  ;;  %4692 = vmatmul.mubr.f32.gmra.mxu0 %v16398_v23  ;;  %v11861_v60 = vadd.f32 %v3990_v58, %v3144_v29  ;;  %v16404_v49 = vld [vmem:[#allocation160_spill] sm:$0xff]  ;;  %v16406_v58 = vld [vmem:[#allocation26_spill] sm:$0xff] }
 0x2b9   : > { %v3162_v14 = vadd.f32 %v3161_v42, %v16400_v6  ;;  %4698 = vmatprep.mubr.f32.mxu0 %v16401_v13  ;;  %v4000_v62 = vpop.f32.mrf.mxu1  ;;  %5321 = vmatmul.mubr.f32.gmra.mxu1 %v16392_v54  ;;  %v16407_v6 = vld [vmem:[#allocation161_spill] sm:$0xff] }
 0x2ba   : > { %16399 = vst [vmem:[#allocation61_spill] sm:$0xff] %v11861_v60  ;;  %v3163_v9 = vpop.f32.mrf.mxu0  ;;  %v11866_v61 = vadd.f32 %v4000_v62, %v3152_v26  ;;  %5327 = vmatprep.mubr.f32.mxu1 %v16395_v63  ;;  %v16409_v26 = vld [vmem:[#allocation28_spill] sm:$0xff] }
 0x2bb   : > { %v3164_v41 = vadd.f32 %v3163_v9, %v16403_v16  ;;  %v4002_v1 = vpop.f32.mrf.mxu1 }
 0x2bc   : > { %16402 = vst [vmem:[#allocation175_spill] sm:$0xff] %v11866_v61  ;;  %v3171_v55 = vpop.f32.mrf.mxu0  ;;  %4700 = vmatmul.mubr.f32.gmra.mxu0 %v16404_v49  ;;  %v11871_v29 = vadd.f32 %v4002_v1, %v3154_v31  ;;  %v16410_v61 = vld [vmem:[#allocation163_spill] sm:$0xff]  ;;  %v16412_v1 = vld [vmem:[#allocation9_spill] sm:$0xff] }
 0x2bd   : > { %v3172_v42 = vadd.f32 %v3171_v55, %v16406_v58  ;;  %4706 = vmatprep.mubr.f32.mxu0 %v16407_v6  ;;  %v4012_v60 = vpop.f32.mrf.mxu1  ;;  %5329 = vmatmul.mubr.f32.gmra.mxu1 %v16398_v23  ;;  %v16413_v58 = vld [vmem:[#allocation165_spill] sm:$0xff] }
 0x2be   : > { %16405 = vst [vmem:[#allocation62_spill] sm:$0xff] %v11871_v29  ;;  %v3173_v54 = vpop.f32.mrf.mxu0  ;;  %v11876_v62 = vadd.f32 %v4012_v60, %v3162_v14  ;;  %5335 = vmatprep.mubr.f32.mxu1 %v16401_v13  ;;  %v16415_v14 = vld [vmem:[#allocation108_spill] sm:$0xff] }
 0x2bf   : > { %v3174_v63 = vadd.f32 %v3173_v54, %v16409_v26  ;;  %v4014_v9 = vpop.f32.mrf.mxu1 }
 0x2c0   : > { %16408 = vst [vmem:[#allocation177_spill] sm:$0xff] %v11876_v62  ;;  %v3181_v16 = vpop.f32.mrf.mxu0  ;;  %4708 = vmatmul.mubr.f32.gmra.mxu0 %v16410_v61  ;;  %v11881_v31 = vadd.f32 %v4014_v9, %v3164_v41  ;;  %v16416_v62 = vld [vmem:[#allocation166_spill] sm:$0xff]  ;;  %v16418_v9 = vld [vmem:[#allocation11_spill] sm:$0xff] }
 0x2c1   : > { %v3182_v55 = vadd.f32 %v3181_v16, %v16412_v1  ;;  %4714 = vmatprep.mubr.f32.mxu0 %v16413_v58  ;;  %v4024_v29 = vpop.f32.mrf.mxu1  ;;  %5337 = vmatmul.mubr.f32.gmra.mxu1 %v16404_v49  ;;  %v16419_v1 = vld [vmem:[#allocation169_spill] sm:$0xff] }
 0x2c2   : > { %16411 = vst [vmem:[#allocation82_spill] sm:$0xff] %v11881_v31  ;;  %v3183_v23 = vpop.f32.mrf.mxu0  ;;  %v11886_v60 = vadd.f32 %v4024_v29, %v3172_v42  ;;  %5343 = vmatprep.mubr.f32.mxu1 %v16407_v6  ;;  %v16421_v42 = vld [vmem:[#allocation111_spill] sm:$0xff] }
 0x2c3   : > { %v3184_v13 = vadd.f32 %v3183_v23, %v16415_v14  ;;  %v4026_v54 = vpop.f32.mrf.mxu1 }
 0x2c4   : > { %16414 = vst [vmem:[#allocation178_spill] sm:$0xff] %v11886_v60  ;;  %v3191_v26 = vpop.f32.mrf.mxu0  ;;  %4716 = vmatmul.mubr.f32.gmra.mxu0 %v16416_v62  ;;  %v11891_v41 = vadd.f32 %v4026_v54, %v3174_v63  ;;  %v16422_v60 = vld [vmem:[#allocation171_spill] sm:$0xff]  ;;  %v16424_v54 = vld [vmem:[#allocation30_spill] sm:$0xff] }
 0x2c5   : > { %v3192_v16 = vadd.f32 %v3191_v26, %v16418_v9  ;;  %4722 = vmatprep.mubr.f32.mxu0 %v16419_v1  ;;  %v4036_v31 = vpop.f32.mrf.mxu1  ;;  %5345 = vmatmul.mubr.f32.gmra.mxu1 %v16410_v61  ;;  %v16425_v9 = vld [vmem:[#allocation2_spill] sm:$0xff] }
 0x2c6   : > { %16417 = vst [vmem:[#allocation84_spill] sm:$0xff] %v11891_v41  ;;  %v3193_v49 = vpop.f32.mrf.mxu0  ;;  %v11896_v29 = vadd.f32 %v4036_v31, %v3182_v55  ;;  %5351 = vmatprep.mubr.f32.mxu1 %v16413_v58  ;;  %v16427_v55 = vld [vmem:[#allocation32_spill] sm:$0xff] }
 0x2c7   : > { %v3194_v6 = vadd.f32 %v3193_v49, %v16421_v42  ;;  %v4038_v23 = vpop.f32.mrf.mxu1 }
 0x2c8   : > { %16420 = vst [vmem:[#allocation181_spill] sm:$0xff] %v11896_v29  ;;  %v3201_v14 = vpop.f32.mrf.mxu0  ;;  %4724 = vmatmul.mubr.f32.gmra.mxu0 %v16422_v60  ;;  %v11901_v63 = vadd.f32 %v4038_v23, %v3184_v13  ;;  %v16428_v29 = vld [vmem:[#allocation174_spill] sm:$0xff]  ;;  %v16430_v23 = vld [vmem:[#allocation13_spill] sm:$0xff] }
 0x2c9   : > { %v3202_v26 = vadd.f32 %v3201_v14, %v16424_v54  ;;  %4730 = vmatprep.mubr.f32.mxu0 %v16425_v9  ;;  %v4048_v41 = vpop.f32.mrf.mxu1  ;;  %5353 = vmatmul.mubr.f32.gmra.mxu1 %v16416_v62  ;;  %v16431_v54 = vld [vmem:[#allocation176_spill] sm:$0xff] }
 0x2ca   : > { %16423 = vst [vmem:[#allocation64_spill] sm:$0xff] %v11901_v63  ;;  %v3203_v61 = vpop.f32.mrf.mxu0  ;;  %v11906_v31 = vadd.f32 %v4048_v41, %v3192_v16  ;;  %5359 = vmatprep.mubr.f32.mxu1 %v16419_v1  ;;  %v16433_v16 = vld [vmem:[#allocation114_spill] sm:$0xff] }
 0x2cb   : > { %v3204_v58 = vadd.f32 %v3203_v61, %v16427_v55  ;;  %v4050_v49 = vpop.f32.mrf.mxu1 }
 0x2cc   : > { %16426 = vst [vmem:[#allocation183_spill] sm:$0xff] %v11906_v31  ;;  %v3211_v42 = vpop.f32.mrf.mxu0  ;;  %4732 = vmatmul.mubr.f32.gmra.mxu0 %v16428_v29  ;;  %v11911_v13 = vadd.f32 %v4050_v49, %v3194_v6  ;;  %v16434_v31 = vld [vmem:[#allocation179_spill] sm:$0xff] }
 0x2cd   : > { %v3212_v14 = vadd.f32 %v3211_v42, %v16430_v23  ;;  %4738 = vmatprep.mubr.f32.mxu0 %v16431_v54  ;;  %v4060_v63 = vpop.f32.mrf.mxu1  ;;  %5361 = vmatmul.mubr.f32.gmra.mxu1 %v16422_v60  ;;  %v16436_v49 = vld [vmem:[#allocation15_spill] sm:$0xff]  ;;  %v16437_v23 = vld [vmem:[#allocation180_spill] sm:$0xff] }
 0x2ce   : > { %16429 = vst [vmem:[#allocation66_spill] sm:$0xff] %v11911_v13  ;;  %v3213_v62 = vpop.f32.mrf.mxu0  ;;  %v11916_v41 = vadd.f32 %v4060_v63, %v3202_v26  ;;  %5367 = vmatprep.mubr.f32.mxu1 %v16425_v9  ;;  %v16439_v26 = vld [vmem:[#allocation115_spill] sm:$0xff] }
 0x2cf   : > { %v3214_v1 = vadd.f32 %v3213_v62, %v16433_v16  ;;  %v4062_v61 = vpop.f32.mrf.mxu1 }
 0x2d0   : > { %16432 = vst [vmem:[#allocation186_spill] sm:$0xff] %v11916_v41  ;;  %v3221_v55 = vpop.f32.mrf.mxu0  ;;  %4740 = vmatmul.mubr.f32.gmra.mxu0 %v16434_v31  ;;  %v11921_v6 = vadd.f32 %v4062_v61, %v3204_v58  ;;  %v16440_v41 = vld [vmem:[#allocation182_spill] sm:$0xff] }
 0x2d1   : > { %v3222_v42 = vadd.f32 %v3221_v55, %v16436_v49  ;;  %4746 = vmatprep.mubr.f32.mxu0 %v16437_v23  ;;  %v4072_v13 = vpop.f32.mrf.mxu1  ;;  %5369 = vmatmul.mubr.f32.gmra.mxu1 %v16428_v29  ;;  %v16442_v61 = vld [vmem:[#allocation34_spill] sm:$0xff]  ;;  %v16443_v49 = vld [vmem:[#allocation184_spill] sm:$0xff] }
 0x2d2   : > { %16435 = vst [vmem:[#allocation187_spill] sm:$0xff] %v11921_v6  ;;  %v3223_v60 = vpop.f32.mrf.mxu0  ;;  %v11926_v63 = vadd.f32 %v4072_v13, %v3212_v14  ;;  %5375 = vmatprep.mubr.f32.mxu1 %v16431_v54  ;;  %v16445_v14 = vld [vmem:[#allocation36_spill] sm:$0xff] }
 0x2d3   : > { %v3224_v9 = vadd.f32 %v3223_v60, %v16439_v26  ;;  %v4074_v62 = vpop.f32.mrf.mxu1 }
 0x2d4   : > { %16438 = vst [vmem:[#allocation189_spill] sm:$0xff] %v11926_v63  ;;  %v3231_v16 = vpop.f32.mrf.mxu0  ;;  %4748 = vmatmul.mubr.f32.gmra.mxu0 %v16440_v41  ;;  %v11931_v58 = vadd.f32 %v4074_v62, %v3214_v1  ;;  %v16446_v63 = vld [vmem:[#allocation185_spill] sm:$0xff] }
 0x2d5   : > { %v3232_v55 = vadd.f32 %v3231_v16, %v16442_v61  ;;  %4754 = vmatprep.mubr.f32.mxu0 %v16443_v49  ;;  %v4084_v6 = vpop.f32.mrf.mxu1  ;;  %5377 = vmatmul.mubr.f32.gmra.mxu1 %v16434_v31  ;;  %v16448_v62 = vld [vmem:[#allocation17_spill] sm:$0xff]  ;;  %v16449_v61 = vld [vmem:[#allocation188_spill] sm:$0xff] }
 0x2d6   : > { %16441 = vst [vmem:[#allocation192_spill] sm:$0xff] %v11931_v58  ;;  %v3233_v29 = vpop.f32.mrf.mxu0  ;;  %v11936_v13 = vadd.f32 %v4084_v6, %v3222_v42  ;;  %5383 = vmatprep.mubr.f32.mxu1 %v16437_v23  ;;  %v16451_v42 = vld [vmem:[#allocation117_spill] sm:$0xff] }
 0x2d7   : > { %v3234_v54 = vadd.f32 %v3233_v29, %v16445_v14  ;;  %v4086_v60 = vpop.f32.mrf.mxu1 }
 0x2d8   : > { %16444 = vst [vmem:[#allocation193_spill] sm:$0xff] %v11936_v13  ;;  %v3241_v26 = vpop.f32.mrf.mxu0  ;;  %4756 = vmatmul.mubr.f32.gmra.mxu0 %v16446_v63  ;;  %v11941_v1 = vadd.f32 %v4086_v60, %v3224_v9  ;;  %v16452_v13 = vld [vmem:[#allocation190_spill] sm:$0xff]  ;;  %v16454_v60 = vld [vmem:[#allocation19_spill] sm:$0xff] }
 0x2d9   : > { %v3242_v16 = vadd.f32 %v3241_v26, %v16448_v62  ;;  %4762 = vmatprep.mubr.f32.mxu0 %v16449_v61  ;;  %v4096_v58 = vpop.f32.mrf.mxu1  ;;  %5385 = vmatmul.mubr.f32.gmra.mxu1 %v16440_v41  ;;  %v16455_v62 = vld [vmem:[#allocation191_spill] sm:$0xff] }
 0x2da   : > { %16447 = vst [vmem:[#allocation195_spill] sm:$0xff] %v11941_v1  ;;  %v3243_v31 = vpop.f32.mrf.mxu0  ;;  %v11946_v6 = vadd.f32 %v4096_v58, %v3232_v55  ;;  %5391 = vmatprep.mubr.f32.mxu1 %v16443_v49  ;;  %v16457_v55 = vld [vmem:[#allocation120_spill] sm:$0xff] }
 0x2db   : > { %v3244_v23 = vadd.f32 %v3243_v31, %v16451_v42  ;;  %v4098_v29 = vpop.f32.mrf.mxu1 }
 0x2dc   : > { %16450 = vst [vmem:[#allocation197_spill] sm:$0xff] %v11946_v6  ;;  %v3251_v14 = vpop.f32.mrf.mxu0  ;;  %4764 = vmatmul.mubr.f32.gmra.mxu0 %v16452_v13  ;;  %v11951_v9 = vadd.f32 %v4098_v29, %v3234_v54  ;;  %v16458_v6 = vld [vmem:[#allocation194_spill] sm:$0xff] }
 0x2dd   : > { %v3252_v26 = vadd.f32 %v3251_v14, %v16454_v60  ;;  %4770 = vmatprep.mubr.f32.mxu0 %v16455_v62  ;;  %v4108_v1 = vpop.f32.mrf.mxu1  ;;  %5393 = vmatmul.mubr.f32.gmra.mxu1 %v16446_v63  ;;  %v16460_v29 = vld [vmem:[#allocation38_spill] sm:$0xff]  ;;  %v16461_v60 = vld [vmem:[#allocation196_spill] sm:$0xff] }
 0x2de   : > { %16453 = vst [vmem:[#allocation198_spill] sm:$0xff] %v11951_v9  ;;  %v3253_v41 = vpop.f32.mrf.mxu0  ;;  %v11956_v58 = vadd.f32 %v4108_v1, %v3242_v16  ;;  %5399 = vmatprep.mubr.f32.mxu1 %v16449_v61  ;;  %v16463_v16 = vld [vmem:[#allocation40_spill] sm:$0xff] }
 0x2df   : > { %v3254_v49 = vadd.f32 %v3253_v41, %v16457_v55  ;;  %v4110_v31 = vpop.f32.mrf.mxu1 }
 0x2e0   : > { %16456 = vst [vmem:[#allocation201_spill] sm:$0xff] %v11956_v58  ;;  %v3261_v42 = vpop.f32.mrf.mxu0  ;;  %4772 = vmatmul.mubr.f32.gmra.mxu0 %v16458_v6  ;;  %v11961_v54 = vadd.f32 %v4110_v31, %v3244_v23  ;;  %v16464_v58 = vld [vmem:[#allocation199_spill] sm:$0xff]  ;;  %v16466_v31 = vld [vmem:[#allocation21_spill] sm:$0xff] }
 0x2e1   : > { %v3262_v14 = vadd.f32 %v3261_v42, %v16460_v29  ;;  %4778 = vmatprep.mubr.f32.mxu0 %v16461_v60  ;;  %v4120_v9 = vpop.f32.mrf.mxu1  ;;  %5401 = vmatmul.mubr.f32.gmra.mxu1 %v16452_v13  ;;  %v16467_v29 = vld [vmem:[#allocation200_spill] sm:$0xff] }
 0x2e2   : > { %16459 = vst [vmem:[#allocation203_spill] sm:$0xff] %v11961_v54  ;;  %v3263_v63 = vpop.f32.mrf.mxu0  ;;  %v11966_v1 = vadd.f32 %v4120_v9, %v3252_v26  ;;  %5407 = vmatprep.mubr.f32.mxu1 %v16455_v62  ;;  %v16469_v26 = vld [vmem:[#allocation121_spill] sm:$0xff] }
 0x2e3   : > { %v3264_v61 = vadd.f32 %v3263_v63, %v16463_v16  ;;  %v4122_v41 = vpop.f32.mrf.mxu1 }
 0x2e4   : > { %16462 = vst [vmem:[#allocation206_spill] sm:$0xff] %v11966_v1  ;;  %v3271_v55 = vpop.f32.mrf.mxu0  ;;  %4780 = vmatmul.mubr.f32.gmra.mxu0 %v16464_v58  ;;  %v11971_v23 = vadd.f32 %v4122_v41, %v3254_v49  ;;  %v16470_v1 = vld [vmem:[#allocation202_spill] sm:$0xff]  ;;  %v16472_v41 = vld [vmem:[#allocation123_spill] sm:$0xff] }
 0x2e5   : > { %v3272_v42 = vadd.f32 %v3271_v55, %v16466_v31  ;;  %4786 = vmatprep.mubr.f32.mxu0 %v16467_v29  ;;  %v4132_v54 = vpop.f32.mrf.mxu1  ;;  %5409 = vmatmul.mubr.f32.gmra.mxu1 %v16458_v6  ;;  %v16473_v31 = vld [vmem:[#allocation204_spill] sm:$0xff] }
 0x2e6   : > { %16465 = vst [vmem:[#allocation207_spill] sm:$0xff] %v11971_v23  ;;  %v3273_v13 = vpop.f32.mrf.mxu0  ;;  %v11976_v9 = vadd.f32 %v4132_v54, %v3262_v14  ;;  %5415 = vmatprep.mubr.f32.mxu1 %v16461_v60  ;;  %v16475_v14 = vld [vmem:[#allocation42_spill] sm:$0xff] }
 0x2e7   : > { %v3274_v62 = vadd.f32 %v3273_v13, %v16469_v26  ;;  %v4134_v63 = vpop.f32.mrf.mxu1 }
 0x2e8   : > { %16468 = vst [vmem:[#allocation209_spill] sm:$0xff] %v11976_v9  ;;  %v3281_v16 = vpop.f32.mrf.mxu0  ;;  %4788 = vmatmul.mubr.f32.gmra.mxu0 %v16470_v1  ;;  %v11981_v49 = vadd.f32 %v4134_v63, %v3264_v61  ;;  %v16476_v9 = vld [vmem:[#allocation205_spill] sm:$0xff]  ;;  %v16478_v63 = vld [vmem:[#allocation44_spill] sm:$0xff] }
 0x2e9   : > { %v3282_v55 = vadd.f32 %v3281_v16, %v16472_v41  ;;  %4794 = vmatprep.mubr.f32.mxu0 %v16473_v31  ;;  %v4144_v23 = vpop.f32.mrf.mxu1  ;;  %5417 = vmatmul.mubr.f32.gmra.mxu1 %v16464_v58  ;;  %v16479_v41 = vld [vmem:[#allocation208_spill] sm:$0xff] }
 0x2ea   : > { %16471 = vst [vmem:[#allocation212_spill] sm:$0xff] %v11981_v49  ;;  %v3283_v6 = vpop.f32.mrf.mxu0  ;;  %v11986_v54 = vadd.f32 %v4144_v23, %v3272_v42  ;;  %5423 = vmatprep.mubr.f32.mxu1 %v16467_v29  ;;  %v16481_v42 = vld [vmem:[#allocation25_spill] sm:$0xff] }
 0x2eb   : > { %v3284_v60 = vadd.f32 %v3283_v6, %v16475_v14  ;;  %v4146_v13 = vpop.f32.mrf.mxu1 }
 0x2ec   : > { %16474 = vst [vmem:[#allocation213_spill] sm:$0xff] %v11986_v54  ;;  %v3291_v26 = vpop.f32.mrf.mxu0  ;;  %4796 = vmatmul.mubr.f32.gmra.mxu0 %v16476_v9  ;;  %v11991_v61 = vadd.f32 %v4146_v13, %v3274_v62  ;;  %v16482_v54 = vld [vmem:[#allocation210_spill] sm:$0xff]  ;;  %v16484_v13 = vld [vmem:[#allocation125_spill] sm:$0xff] }
 0x2ed   : > { %v3292_v16 = vadd.f32 %v3291_v26, %v16478_v63  ;;  %4802 = vmatprep.mubr.f32.mxu0 %v16479_v41  ;;  %v4156_v49 = vpop.f32.mrf.mxu1  ;;  %5425 = vmatmul.mubr.f32.gmra.mxu1 %v16470_v1  ;;  %v16485_v63 = vld [vmem:[#allocation211_spill] sm:$0xff] }
 0x2ee   : > { %16477 = vst [vmem:[#allocation215_spill] sm:$0xff] %v11991_v61  ;;  %v3293_v58 = vpop.f32.mrf.mxu0  ;;  %v11996_v23 = vadd.f32 %v4156_v49, %v3282_v55  ;;  %5431 = vmatprep.mubr.f32.mxu1 %v16473_v31  ;;  %v16487_v55 = vld [vmem:[#allocation27_spill] sm:$0xff] }
 0x2ef   : > { %v3294_v29 = vadd.f32 %v3293_v58, %v16481_v42  ;;  %v4158_v6 = vpop.f32.mrf.mxu1 }
 0x2f0   : > { %16480 = vst [vmem:[#allocation217_spill] sm:$0xff] %v11996_v23  ;;  %v3301_v14 = vpop.f32.mrf.mxu0  ;;  %4804 = vmatmul.mubr.f32.gmra.mxu0 %v16482_v54  ;;  %v12001_v62 = vadd.f32 %v4158_v6, %v3284_v60  ;;  %v16488_v23 = vld [vmem:[#allocation214_spill] sm:$0xff] }
 0x2f1   : > { %v3302_v26 = vadd.f32 %v3301_v14, %v16484_v13  ;;  %4810 = vmatprep.mubr.f32.mxu0 %v16485_v63  ;;  %v4168_v61 = vpop.f32.mrf.mxu1  ;;  %5433 = vmatmul.mubr.f32.gmra.mxu1 %v16476_v9  ;;  %v16490_v6 = vld [vmem:[#allocation126_spill] sm:$0xff]  ;;  %v16491_v13 = vld [vmem:[#allocation216_spill] sm:$0xff] }
 0x2f2   : > { %16483 = vst [vmem:[#allocation218_spill] sm:$0xff] %v12001_v62  ;;  %v3303_v1 = vpop.f32.mrf.mxu0  ;;  %v12006_v49 = vadd.f32 %v4168_v61, %v3292_v16  ;;  %5439 = vmatprep.mubr.f32.mxu1 %v16479_v41  ;;  %v16493_v16 = vld [vmem:[#allocation46_spill] sm:$0xff] }
 0x2f3   : > { %v3304_v31 = vadd.f32 %v3303_v1, %v16487_v55  ;;  %v4170_v58 = vpop.f32.mrf.mxu1 }
 0x2f4   : > { %16486 = vst [vmem:[#allocation221_spill] sm:$0xff] %v12006_v49  ;;  %v3311_v42 = vpop.f32.mrf.mxu0  ;;  %4812 = vmatmul.mubr.f32.gmra.mxu0 %v16488_v23  ;;  %v12011_v60 = vadd.f32 %v4170_v58, %v3294_v29  ;;  %v16494_v49 = vld [vmem:[#allocation219_spill] sm:$0xff]  ;;  %v12023_v58 = vpop.permute.xlu0 %7469 }
 0x2f5   : > { %v3312_v14 = vadd.f32 %v3311_v42, %v16490_v6  ;;  %4818 = vmatprep.mubr.f32.mxu0 %v16491_v13  ;;  %v4180_v62 = vpop.f32.mrf.mxu1  ;;  %5441 = vmatmul.mubr.f32.gmra.mxu1 %v16482_v54  ;;  %16496 = vst [vmem:[#allocation229_spill] sm:$0xff] %v12023_v58  ;;  %v16497_v42 = vld [vmem:[#allocation48_spill] sm:$0xff]  ;;  %v16503_v58 = vld [vmem:[#allocation129_spill] sm:$0xff] }
 0x2f6   : > { %16489 = vst [vmem:[#allocation223_spill] sm:$0xff] %v12011_v60  ;;  %v3313_v9 = vpop.f32.mrf.mxu0  ;;  %v12016_v61 = vadd.f32 %v4180_v62, %v3302_v26  ;;  %5447 = vmatprep.mubr.f32.mxu1 %v16485_v63  ;;  %v16498_v60 = vld [vmem:[#allocation220_spill] sm:$0xff]  ;;  %v16500_v63 = vld [vmem:[#allocation29_spill] sm:$0xff] }
 0x2f7   : > { %v3314_v41 = vadd.f32 %v3313_v9, %v16493_v16  ;;  %v4182_v1 = vpop.f32.mrf.mxu1 }
 0x2f8   : > { %16492 = vst [vmem:[#allocation226_spill] sm:$0xff] %v12016_v61  ;;  %v3321_v55 = vpop.f32.mrf.mxu0  ;;  %4820 = vmatmul.mubr.f32.gmra.mxu0 %v16494_v49  ;;  %v12021_v29 = vadd.f32 %v4182_v1, %v3304_v31  ;;  %v16501_v31 = vld [vmem:[#allocation222_spill] sm:$0xff] }
 0x2f9   : > { %v3322_v6 = vadd.f32 %v3321_v55, %v16497_v42  ;;  %4826 = vmatprep.mubr.f32.mxu0 %v16498_v60  ;;  %v4192_v54 = vpop.f32.mrf.mxu1  ;;  %5449 = vmatmul.mubr.f32.gmra.mxu1 %v16488_v23  ;;  %v16504_v42 = vld [vmem:[#allocation224_spill] sm:$0xff] }
 0x2fa   : > { %16495 = vst [vmem:[#allocation227_spill] sm:$0xff] %v12021_v29  ;;  %v3323_v62 = vpop.f32.mrf.mxu0  ;;  %v12028_v26 = vadd.f32 %v4192_v54, %v3312_v14  ;;  %5455 = vmatprep.mubr.f32.mxu1 %v16491_v13  ;;  %v12041_v13 = vpop.permute.xlu0 %7479  ;;  %v16507_v54 = vld [vmem:[#allocation31_spill] sm:$0xff] }
 0x2fb   : > { %v3324_v9 = vadd.f32 %v3323_v62, %v16500_v63  ;;  %v4194_v16 = vpop.f32.mrf.mxu1  ;;  %16506 = vst [vmem:[#allocation237_spill] sm:$0xff] %v12041_v13 }
 0x2fc   : > { %16499 = vst [vmem:[#allocation232_spill] sm:$0xff] %v12028_v26  ;;  %v3331_v61 = vpop.f32.mrf.mxu0  ;;  %4828 = vmatmul.mubr.f32.gmra.mxu0 %v16501_v31  ;;  %v12033_v1 = vadd.f32 %v4194_v16, %v3314_v41  ;;  %v12044_v26 = vpop.permute.xlu1 %7464  ;;  %v16509_v16 = vld [vmem:[#allocation225_spill] sm:$0xff] }
 0x2fd   : > { %v3332_v55 = vadd.f32 %v3331_v61, %v16503_v58  ;;  %4834 = vmatprep.mubr.f32.mxu0 %v16504_v42  ;;  %v4204_v29 = vpop.f32.mrf.mxu1  ;;  %5457 = vmatmul.mubr.f32.gmra.mxu1 %v16494_v49  ;;  %16508 = vst [vmem:[#allocation238_spill] sm:$0xff] %v12044_v26  ;;  %v16511_v58 = vld [vmem:[#allocation131_spill] sm:$0xff]  ;;  %v16512_v49 = vld [vmem:[#allocation228_spill] sm:$0xff] }
 0x2fe   : > { %16502 = vst [vmem:[#allocation233_spill] sm:$0xff] %v12033_v1  ;;  %v3333_v23 = vpop.f32.mrf.mxu0  ;;  %v12038_v14 = vadd.f32 %v4204_v29, %v3322_v6  ;;  %5463 = vmatprep.mubr.f32.mxu1 %v16498_v60 }
 0x2ff   : > { %v3334_v62 = vadd.f32 %v3333_v23, %v16507_v54  ;;  %v4206_v63 = vpop.f32.mrf.mxu1  ;;  %v16514_v23 = vld [vmem:[#allocation50_spill] sm:$0xff] }
 0x300   : > { %16505 = vst [vmem:[#allocation235_spill] sm:$0xff] %v12038_v14  ;;  %v3341_v41 = vpop.f32.mrf.mxu0  ;;  %4836 = vmatmul.mubr.f32.gmra.mxu0 %v16509_v16  ;;  %v12047_v61 = vadd.f32 %v4206_v63, %v3324_v9  ;;  %v16515_v14 = vld [vmem:[#allocation230_spill] sm:$0xff]  ;;  %v12059_v63 = vpop.permute.xlu0 %7489 }
 0x301   : > { %v3342_v1 = vadd.f32 %v3341_v41, %v16511_v58  ;;  %4842 = vmatprep.mubr.f32.mxu0 %v16512_v49  ;;  %v4216_v29 = vpop.f32.mrf.mxu1  ;;  %5465 = vmatmul.mubr.f32.gmra.mxu1 %v16501_v31  ;;  %16517 = vst [vmem:[#allocation247_spill] sm:$0xff] %v12059_v63  ;;  %v16518_v41 = vld [vmem:[#allocation52_spill] sm:$0xff] }
 0x302   : > { %16510 = vst [vmem:[#allocation241_spill] sm:$0xff] %v12047_v61  ;;  %v3343_v60 = vpop.f32.mrf.mxu0  ;;  %v12052_v6 = vadd.f32 %v4216_v29, %v3332_v55  ;;  %5471 = vmatprep.mubr.f32.mxu1 %v16504_v42  ;;  %v16519_v61 = vld [vmem:[#allocation231_spill] sm:$0xff]  ;;  %v12064_v55 = vpop.permute.xlu1 %7474 }
 0x303   : > { %v3344_v54 = vadd.f32 %v3343_v60, %v16514_v23  ;;  %v4218_v13 = vpop.f32.mrf.mxu1  ;;  %16520 = vst [vmem:[#allocation249_spill] sm:$0xff] %v12064_v55  ;;  %v16522_v60 = vld [vmem:[#allocation33_spill] sm:$0xff] }
 0x304   : > { %16513 = vst [vmem:[#allocation243_spill] sm:$0xff] %v12052_v6  ;;  %v3351_v26 = vpop.f32.mrf.mxu0  ;;  %4844 = vmatmul.mubr.f32.gmra.mxu0 %v16515_v14  ;;  %v12057_v9 = vadd.f32 %v4218_v13, %v3334_v62  ;;  %v16523_v6 = vld [vmem:[#allocation234_spill] sm:$0xff] }
 0x305   : > { %v3352_v58 = vadd.f32 %v3351_v26, %v16518_v41  ;;  %4850 = vmatprep.mubr.f32.mxu0 %v16519_v61  ;;  %v4228_v31 = vpop.f32.mrf.mxu1  ;;  %5473 = vmatmul.mubr.f32.gmra.mxu1 %v16509_v16  ;;  %v16525_v26 = vld [vmem:[#allocation23_spill] sm:$0xff] }
 0x306   : > { %16516 = vst [vmem:[#allocation246_spill] sm:$0xff] %v12057_v9  ;;  %v3353_v42 = vpop.f32.mrf.mxu0  ;;  %v12066_v29 = vadd.f32 %v4228_v31, %v3342_v1  ;;  %5479 = vmatprep.mubr.f32.mxu1 %v16512_v49  ;;  %v16526_v9 = vld [vmem:[#allocation236_spill] sm:$0xff]  ;;  %v12079_v49 = vpop.permute.xlu0 %7499  ;;  %v16529_v31 = vld [vmem:[#allocation35_spill] sm:$0xff] }
 0x307   : > { %v3354_v23 = vadd.f32 %v3353_v42, %v16522_v60  ;;  %v4230_v13 = vpop.f32.mrf.mxu1  ;;  %16528 = vst [vmem:[#allocation257_spill] sm:$0xff] %v12079_v49 }
 0x308   : > { %16521 = vst [vmem:[#allocation252_spill] sm:$0xff] %v12066_v29  ;;  %v3361_v62 = vpop.f32.mrf.mxu0  ;;  %4852 = vmatmul.mubr.f32.gmra.mxu0 %v16523_v6  ;;  %v12071_v63 = vadd.f32 %v4230_v13, %v3344_v54  ;;  %v12082_v29 = vpop.permute.xlu1 %7484  ;;  %v16531_v13 = vld [vmem:[#allocation239_spill] sm:$0xff] }
 0x309   : > { %v3362_v41 = vadd.f32 %v3361_v62, %v16525_v26  ;;  %4858 = vmatprep.mubr.f32.mxu0 %v16526_v9  ;;  %v4240_v16 = vpop.f32.mrf.mxu1  ;;  %5481 = vmatmul.mubr.f32.gmra.mxu1 %v16515_v14  ;;  %16530 = vst [vmem:[#allocation258_spill] sm:$0xff] %v12082_v29  ;;  %v16533_v26 = vld [vmem:[#allocation134_spill] sm:$0xff]  ;;  %v16534_v14 = vld [vmem:[#allocation240_spill] sm:$0xff] }
 0x30a   : > { %16524 = vst [vmem:[#allocation253_spill] sm:$0xff] %v12071_v63  ;;  %v3363_v55 = vpop.f32.mrf.mxu0  ;;  %v12076_v1 = vadd.f32 %v4240_v16, %v3352_v58  ;;  %5487 = vmatprep.mubr.f32.mxu1 %v16519_v61 }
 0x30b   : > { %v3364_v42 = vadd.f32 %v3363_v55, %v16529_v31  ;;  %v4242_v60 = vpop.f32.mrf.mxu1  ;;  %v16536_v55 = vld [vmem:[#allocation54_spill] sm:$0xff] }
 0x30c   : > { %16527 = vst [vmem:[#allocation255_spill] sm:$0xff] %v12076_v1  ;;  %v3371_v54 = vpop.f32.mrf.mxu0  ;;  %4860 = vmatmul.mubr.f32.gmra.mxu0 %v16531_v13  ;;  %v12085_v62 = vadd.f32 %v4242_v60, %v3354_v23  ;;  %v16537_v1 = vld [vmem:[#allocation242_spill] sm:$0xff]  ;;  %v12097_v60 = vpop.permute.xlu0 %7509 }
 0x30d   : > { %v3372_v63 = vadd.f32 %v3371_v54, %v16533_v26  ;;  %4866 = vmatprep.mubr.f32.mxu0 %v16534_v14  ;;  %v4252_v58 = vpop.f32.mrf.mxu1  ;;  %5489 = vmatmul.mubr.f32.gmra.mxu1 %v16523_v6  ;;  %16539 = vst [vmem:[#allocation288_spill] sm:$0xff] %v12097_v60  ;;  %v16540_v54 = vld [vmem:[#allocation56_spill] sm:$0xff] }
 0x30e   : > { %16532 = vst [vmem:[#allocation261_spill] sm:$0xff] %v12085_v62  ;;  %v3373_v61 = vpop.f32.mrf.mxu0  ;;  %v12090_v16 = vadd.f32 %v4252_v58, %v3362_v41  ;;  %5495 = vmatprep.mubr.f32.mxu1 %v16526_v9  ;;  %v16541_v62 = vld [vmem:[#allocation244_spill] sm:$0xff]  ;;  %v12102_v41 = vpop.permute.xlu1 %7494 }
 0x30f   : > { %v3374_v31 = vadd.f32 %v3373_v61, %v16536_v55  ;;  %v4254_v49 = vpop.f32.mrf.mxu1  ;;  %16542 = vst [vmem:[#allocation266_spill] sm:$0xff] %v12102_v41  ;;  %v16544_v61 = vld [vmem:[#allocation37_spill] sm:$0xff] }
 0x310   : > { %16535 = vst [vmem:[#allocation285_spill] sm:$0xff] %v12090_v16  ;;  %v3381_v29 = vpop.f32.mrf.mxu0  ;;  %4868 = vmatmul.mubr.f32.gmra.mxu0 %v16537_v1  ;;  %v12095_v23 = vadd.f32 %v4254_v49, %v3364_v42  ;;  %v16545_v16 = vld [vmem:[#allocation245_spill] sm:$0xff] }
 0x311   : > { %v3382_v26 = vadd.f32 %v3381_v29, %v16540_v54  ;;  %4874 = vmatprep.mubr.f32.mxu0 %v16541_v62  ;;  %v4264_v6 = vpop.f32.mrf.mxu1  ;;  %5497 = vmatmul.mubr.f32.gmra.mxu1 %v16531_v13  ;;  %v16547_v29 = vld [vmem:[#allocation136_spill] sm:$0xff] }
 0x312   : > { %16538 = vst [vmem:[#allocation263_spill] sm:$0xff] %v12095_v23  ;;  %v3383_v9 = vpop.f32.mrf.mxu0  ;;  %v12104_v58 = vadd.f32 %v4264_v6, %v3372_v63  ;;  %5503 = vmatprep.mubr.f32.mxu1 %v16534_v14  ;;  %v16548_v23 = vld [vmem:[#allocation248_spill] sm:$0xff]  ;;  %v12117_v14 = vpop.permute.xlu0 %7519  ;;  %v16551_v6 = vld [vmem:[#allocation39_spill] sm:$0xff] }
 0x313   : > { %v3384_v55 = vadd.f32 %v3383_v9, %v16544_v61  ;;  %v4266_v49 = vpop.f32.mrf.mxu1  ;;  %16550 = vst [vmem:[#allocation269_spill] sm:$0xff] %v12117_v14 }
 0x314   : > { %16543 = vst [vmem:[#allocation291_spill] sm:$0xff] %v12104_v58  ;;  %v3391_v42 = vpop.f32.mrf.mxu0  ;;  %4876 = vmatmul.mubr.f32.gmra.mxu0 %v16545_v16  ;;  %v12109_v60 = vadd.f32 %v4266_v49, %v3374_v31  ;;  %v12120_v58 = vpop.permute.xlu1 %7504  ;;  %v16553_v49 = vld [vmem:[#allocation250_spill] sm:$0xff] }
 0x315   : > { %v3392_v54 = vadd.f32 %v3391_v42, %v16547_v29  ;;  %4882 = vmatprep.mubr.f32.mxu0 %v16548_v23  ;;  %v4276_v13 = vpop.f32.mrf.mxu1  ;;  %5505 = vmatmul.mubr.f32.gmra.mxu1 %v16537_v1  ;;  %16552 = vst [vmem:[#allocation297_spill] sm:$0xff] %v12120_v58  ;;  %v16555_v29 = vld [vmem:[#allocation139_spill] sm:$0xff] }
 0x316   : > { %16546 = vst [vmem:[#allocation267_spill] sm:$0xff] %v12109_v60  ;;  %v3393_v41 = vpop.f32.mrf.mxu0  ;;  %v12114_v63 = vadd.f32 %v4276_v13, %v3382_v26  ;;  %5511 = vmatprep.mubr.f32.mxu1 %v16541_v62  ;;  %v16556_v1 = vld [vmem:[#allocation251_spill] sm:$0xff] }
 0x317   : > { %v3394_v9 = vadd.f32 %v3393_v41, %v16551_v6  ;;  %v4278_v61 = vpop.f32.mrf.mxu1  ;;  %v16558_v41 = vld [vmem:[#allocation58_spill] sm:$0xff] }
 0x318   : > { %16549 = vst [vmem:[#allocation295_spill] sm:$0xff] %v12114_v63  ;;  %v3401_v31 = vpop.f32.mrf.mxu0  ;;  %4884 = vmatmul.mubr.f32.gmra.mxu0 %v16553_v49  ;;  %v12123_v42 = vadd.f32 %v4278_v61, %v3384_v55  ;;  %v16559_v63 = vld [vmem:[#allocation254_spill] sm:$0xff]  ;;  %v12135_v61 = vpop.permute.xlu0 %7529 }
 0x319   : > { %v3402_v60 = vadd.f32 %v3401_v31, %v16555_v29  ;;  %4890 = vmatprep.mubr.f32.mxu0 %v16556_v1  ;;  %v4288_v26 = vpop.f32.mrf.mxu1  ;;  %5513 = vmatmul.mubr.f32.gmra.mxu1 %v16545_v16  ;;  %16561 = vst [vmem:[#allocation303_spill] sm:$0xff] %v12135_v61  ;;  %v16562_v29 = vld [vmem:[#allocation256_spill] sm:$0xff] }
 0x31a   : > { %16554 = vst [vmem:[#allocation272_spill] sm:$0xff] %v12123_v42  ;;  %v3403_v62 = vpop.f32.mrf.mxu0  ;;  %v12128_v13 = vadd.f32 %v4288_v26, %v3392_v54  ;;  %5519 = vmatprep.mubr.f32.mxu1 %v16548_v23  ;;  %v12140_v54 = vpop.permute.xlu1 %7514 }
 0x31b   : > { %v3404_v6 = vadd.f32 %v3403_v62, %v16558_v41  ;;  %v4290_v58 = vpop.f32.mrf.mxu1  ;;  %16563 = vst [vmem:[#allocation275_spill] sm:$0xff] %v12140_v54  ;;  %v16565_v62 = vld [vmem:[#allocation60_spill] sm:$0xff] }
 0x31c   : > { %16557 = vst [vmem:[#allocation300_spill] sm:$0xff] %v12128_v13  ;;  %v3411_v14 = vpop.f32.mrf.mxu0  ;;  %4892 = vmatmul.mubr.f32.gmra.mxu0 %v16559_v63  ;;  %v12133_v55 = vadd.f32 %v4290_v58, %v3394_v9  ;;  %v16566_v13 = vld [vmem:[#allocation259_spill] sm:$0xff] }
 0x31d   : > { %v3412_v31 = vadd.f32 %v3411_v14, %v11430_v59  ;;  %4898 = vmatprep.mubr.f32.mxu0 %v16562_v29  ;;  %v4300_v16 = vpop.f32.mrf.mxu1  ;;  %5521 = vmatmul.mubr.f32.gmra.mxu1 %v16553_v49  ;;  %v16568_v59 = vld [vmem:[#allocation260_spill] sm:$0xff] }
 0x31e   : > { %16560 = vst [vmem:[#allocation273_spill] sm:$0xff] %v12133_v55  ;;  %v3413_v23 = vpop.f32.mrf.mxu0  ;;  %v12142_v26 = vadd.f32 %v4300_v16, %v3402_v60  ;;  %5527 = vmatprep.mubr.f32.mxu1 %v16556_v1  ;;  %v12154_v60 = vpop.permute.xlu0 %7539 }
 0x31f   : > { %v3414_v41 = vadd.f32 %v3413_v23, %v16565_v62  ;;  %v4302_v58 = vpop.f32.mrf.mxu1  ;;  %16570 = vst [vmem:[#allocation309_spill] sm:$0xff] %v12154_v60  ;;  %v12156_v16 = vpop.permute.xlu1 %7524  ;;  %v16572_v62 = vld [vmem:[#allocation262_spill] sm:$0xff] }
 0x320   : > { %16564 = vst [vmem:[#allocation305_spill] sm:$0xff] %v12142_v26  ;;  %v4517_v9 = vpop.f32.mrf.mxu0  ;;  %4900 = vmatmul.mubr.f32.gmra.mxu0 %v16566_v13  ;;  %v12147_v61 = vadd.f32 %v4302_v58, %v3404_v6  ;;  %16571 = vst [vmem:[#allocation281_spill] sm:$0xff] %v12156_v16  ;;  %v16574_v58 = vld [vmem:[#allocation264_spill] sm:$0xff] }
 0x321   : > { %4906 = vmatprep.mubr.f32.mxu0 %v16568_v59  ;;  %v4312_v14 = vpop.f32.mrf.mxu1  ;;  %5529 = vmatmul.mubr.f32.gmra.mxu1 %v16559_v63  ;;  %v16575_v63 = vld [vmem:[#allocation140_spill] sm:$0xff] }
 0x322   : > { %16567 = vst [vmem:[#allocation277_spill] sm:$0xff] %v12147_v61  ;;  %v4519_v49 = vpop.f32.mrf.mxu0  ;;  %v12151_v54 = vadd.f32 %v4312_v14, %v3412_v31  ;;  %5535 = vmatprep.mubr.f32.mxu1 %v16562_v29  ;;  %v16576_v29 = vld [vmem:[#allocation41_spill] sm:$0xff] }
 0x323   : > { %v4314_v1 = vpop.f32.mrf.mxu1  ;;  %v4520_v31 = vadd.f32 %v4519_v49, %v16575_v63  ;;  %v4518_v60 = vadd.f32 %v4517_v9, %v16576_v29  ;;  %v16577_v61 = vld [vmem:[#allocation265_spill] sm:$0xff]  ;;  %v12175_v49 = vpop.permute.xlu1 %7534  ;;  %v16583_v63 = vld [vmem:[#allocation142_spill] sm:$0xff] }
 0x324   : > { %16569 = vst [vmem:[#allocation279_spill] sm:$0xff] %v12151_v54  ;;  %v4525_v23 = vpop.f32.mrf.mxu0  ;;  %4908 = vmatmul.mubr.f32.gmra.mxu0 %v16572_v62  ;;  %v12159_v6 = vadd.f32 %v4314_v1, %v3414_v41  ;;  %v12169_v41 = vpop.permute.xlu0 %7549  ;;  %16582 = vst [vmem:[#allocation320_spill] sm:$0xff] %v12175_v49  ;;  %v16587_v49 = vld [vmem:[#allocation271_spill] sm:$0xff] }
 0x325   : > { %4914 = vmatprep.mubr.f32.mxu0 %v16574_v58  ;;  %v5154_v26 = vpop.f32.mrf.mxu1  ;;  %5537 = vmatmul.mubr.f32.gmra.mxu1 %v16566_v13  ;;  %16579 = vst [vmem:[#allocation316_spill] sm:$0xff] %v12169_v41  ;;  %v16584_v41 = vld [vmem:[#allocation270_spill] sm:$0xff] }
 0x326   : > { %16573 = vst [vmem:[#allocation314_spill] sm:$0xff] %v12159_v6  ;;  %v4527_v14 = vpop.f32.mrf.mxu0  ;;  %5543 = vmatprep.mubr.f32.mxu1 %v16568_v59  ;;  %v12171_v1 = vadd.f32 %v5154_v26, %v4518_v60  ;;  %v16581_v6 = vld [vmem:[#allocation268_spill] sm:$0xff] }
 0x327   : > { %v5156_v54 = vpop.f32.mrf.mxu1  ;;  %v4528_v9 = vadd.f32 %v4527_v14, %v11460_v43 }
 0x328   : > { %v4533_v16 = vpop.f32.mrf.mxu0  ;;  %4916 = vmatmul.mubr.f32.gmra.mxu0 %v16577_v61  ;;  %v12167_v55 = vadd.f32 %v5156_v54, %v4520_v31  ;;  %16580 = vst [vmem:[#allocation289_spill] sm:$0xff] %v12171_v1  ;;  %v4526_v31 = vadd.f32 %v4525_v23, %v16583_v63 }
 0x329   : > { %4922 = vmatprep.mubr.f32.mxu0 %v16581_v6  ;;  %v5162_v13 = vpop.f32.mrf.mxu1  ;;  %5545 = vmatmul.mubr.f32.gmra.mxu1 %v16572_v62 }
 0x32a   : > { %16578 = vst [vmem:[#allocation283_spill] sm:$0xff] %v12167_v55  ;;  %v4535_v59 = vpop.f32.mrf.mxu0  ;;  %5551 = vmatprep.mubr.f32.mxu1 %v16574_v58  ;;  %v5680_v54 = vsel %vm5679_vm1, %v12167_v55, 0.0  ;;  %v12186_v62 = vadd.f32 %v5162_v13, %v4526_v31  ;;  %v16588_v58 = vld [vmem:[#allocation63_spill] sm:$0xff] }
 0x32b   : > { %v5164_v29 = vpop.f32.mrf.mxu1  ;;  %v5681_v26 = vadd.f32 %v5680_v54, %v12171_v1  ;;  %v4536_v14 = vadd.f32 %v4535_v59, %v16588_v58  ;;  %v12194_v54 = vpop.permute.xlu0 %7559 }
 0x32c   : > { %v4541_v60 = vpop.f32.mrf.mxu0  ;;  %4924 = vmatmul.mubr.f32.gmra.mxu0 %v16584_v41  ;;  %v12184_v42 = vadd.f32 %v5164_v29, %v4528_v9  ;;  %16586 = vst [vmem:[#allocation323_spill] sm:$0xff] %v12186_v62  ;;  %16589 = vst [vmem:[#allocation292_spill] sm:$0xff] %v12194_v54  ;;  %v16590_v9 = vld [vmem:[#allocation144_spill] sm:$0xff]  ;;  %v12198_v29 = vpop.permute.xlu1 %7544 }
 0x32d   : > { %4930 = vmatprep.mubr.f32.mxu0 %v16587_v49  ;;  %v5170_v43 = vpop.f32.mrf.mxu1  ;;  %5553 = vmatmul.mubr.f32.gmra.mxu1 %v16577_v61  ;;  %v4534_v63 = vadd.f32 %v4533_v16, %v16590_v9  ;;  %16591 = vst [vmem:[#allocation326_spill] sm:$0xff] %v12198_v29  ;;  %v16592_v61 = vld [vmem:[#allocation274_spill] sm:$0xff]  ;;  %v16596_v54 = vld [vmem:[#allocation148_spill] sm:$0xff]  ;;  %v16597_v9 = vld [vmem:[#allocation45_spill] sm:$0xff] }
 0x32e   : > { %16585 = vst [vmem:[#allocation290_spill] sm:$0xff] %v12184_v42  ;;  %v4543_v55 = vpop.f32.mrf.mxu0  ;;  %5682 = vadd.xlane.f32.xlu0 %v5681_v26  ;;  %5559 = vmatprep.mubr.f32.mxu1 %v16581_v6  ;;  %v5684_v23 = vsel %vm5679_vm1, %v12184_v42, 0.0  ;;  %v16595_v6 = vld [vmem:[#allocation276_spill] sm:$0xff]  ;;  %v4542_v29 = vadd.f32 %v4541_v60, %v16597_v9  ;;  %v16604_v60 = vld [vmem:[#allocation43_spill] sm:$0xff] }
 0x32f   : > { %v5172_v13 = vpop.f32.mrf.mxu1  ;;  %v5685_v31 = vadd.f32 %v5684_v23, %v12186_v62  ;;  %v12203_v26 = vadd.f32 %v5170_v43, %v4534_v63  ;;  %v4544_v42 = vadd.f32 %v4543_v55, %v16596_v54  ;;  %v16602_v54 = vld [vmem:[#allocation280_spill] sm:$0xff] }
 0x330   : > { %v4549_v1 = vpop.f32.mrf.mxu0  ;;  %4932 = vmatmul.mubr.f32.gmra.mxu0 %v16592_v61  ;;  %v12201_v59 = vadd.f32 %v5172_v13, %v4536_v14  ;;  %v16598_v13 = vld [vmem:[#allocation278_spill] sm:$0xff] }
 0x331   : > { %16594 = vst [vmem:[#allocation329_spill] sm:$0xff] %v12203_v26  ;;  %4938 = vmatprep.mubr.f32.mxu0 %v16595_v6  ;;  %v5178_v58 = vpop.f32.mrf.mxu1  ;;  %5561 = vmatmul.mubr.f32.gmra.mxu1 %v16584_v41  ;;  %v12216_v41 = vpop.permute.xlu0 %7569 }
 0x332   : > { %16593 = vst [vmem:[#allocation293_spill] sm:$0xff] %v12201_v59  ;;  %v4551_v16 = vpop.f32.mrf.mxu0  ;;  %5686 = vadd.xlane.f32.xlu0 %v5685_v31  ;;  %5567 = vmatprep.mubr.f32.mxu1 %v16587_v49  ;;  %v5688_v23 = vsel %vm5679_vm1, %v12201_v59, 0.0  ;;  %16600 = vst [vmem:[#allocation332_spill] sm:$0xff] %v12216_v41  ;;  %v12218_v55 = vadd.f32 %v5178_v58, %v4542_v29  ;;  %v12222_v31 = vpop.permute.xlu1 %7554 }
 0x333   : > { %v5180_v14 = vpop.f32.mrf.mxu1  ;;  %v5689_v43 = vadd.f32 %v5688_v23, %v12203_v26  ;;  %16603 = vst [vmem:[#allocation333_spill] sm:$0xff] %v12222_v31  ;;  %v4552_v9 = vadd.f32 %v4551_v16, %v16604_v60  ;;  %v16605_v23 = vld [vmem:[#allocation47_spill] sm:$0xff]  ;;  %v16606_v26 = vld [vmem:[#allocation282_spill] sm:$0xff]  ;;  %v16608_v16 = vld [vmem:[#allocation284_spill] sm:$0xff] }
 0x334   : > { %v4557_v63 = vpop.f32.mrf.mxu0  ;;  %4940 = vmatmul.mubr.f32.gmra.mxu0 %v16598_v13  ;;  %v12214_v62 = vadd.f32 %v5180_v14, %v4544_v42  ;;  %16601 = vst [vmem:[#allocation301_spill] sm:$0xff] %v12218_v55  ;;  %v4550_v14 = vadd.f32 %v4549_v1, %v16605_v23 }
 0x335   : > { %4946 = vmatprep.mubr.f32.mxu0 %v16602_v54  ;;  %v5186_v49 = vpop.f32.mrf.mxu1  ;;  %5569 = vmatmul.mubr.f32.gmra.mxu1 %v16592_v61 }
 0x336   : > { %16599 = vst [vmem:[#allocation298_spill] sm:$0xff] %v12214_v62  ;;  %v4559_v59 = vpop.f32.mrf.mxu0  ;;  %5690 = vadd.xlane.f32.xlu1 %v5689_v43  ;;  %5575 = vmatprep.mubr.f32.mxu1 %v16595_v6  ;;  %v5692_v42 = vsel %vm5679_vm1, %v12214_v62, 0.0  ;;  %v12233_v31 = vadd.f32 %v5186_v49, %v4550_v14  ;;  %v16609_v6 = vld [vmem:[#allocation67_spill] sm:$0xff] }
 0x337   : > { %v5188_v29 = vpop.f32.mrf.mxu1  ;;  %v5693_v58 = vadd.f32 %v5692_v42, %v12218_v55  ;;  %v4560_v60 = vadd.f32 %v4559_v59, %v16609_v6  ;;  %v12241_v42 = vpop.permute.xlu0 %7579 }
 0x338   : > { %v4565_v41 = vpop.f32.mrf.mxu0  ;;  %4948 = vmatmul.mubr.f32.gmra.mxu0 %v16606_v26  ;;  %v12231_v61 = vadd.f32 %v5188_v29, %v4552_v9  ;;  %16610 = vst [vmem:[#allocation307_spill] sm:$0xff] %v12241_v42  ;;  %v16611_v9 = vld [vmem:[#allocation65_spill] sm:$0xff]  ;;  %v12245_v29 = vpop.permute.xlu1 %7564 }
 0x339   : > { %4954 = vmatprep.mubr.f32.mxu0 %v16608_v16  ;;  %v5194_v43 = vpop.f32.mrf.mxu1  ;;  %5577 = vmatmul.mubr.f32.gmra.mxu1 %v16598_v13  ;;  %v4558_v23 = vadd.f32 %v4557_v63, %v16611_v9  ;;  %16612 = vst [vmem:[#allocation336_spill] sm:$0xff] %v12245_v29  ;;  %v16613_v13 = vld [vmem:[#allocation286_spill] sm:$0xff]  ;;  %v16616_v9 = vld [vmem:[#allocation49_spill] sm:$0xff] }
 0x33a   : > { %16607 = vst [vmem:[#allocation304_spill] sm:$0xff] %v12231_v61  ;;  %v4567_v62 = vpop.f32.mrf.mxu0  ;;  %5694 = vadd.xlane.f32.xlu1 %v5693_v58  ;;  %5583 = vmatprep.mubr.f32.mxu1 %v16602_v54  ;;  %v5696_v1 = vsel %vm5679_vm1, %v12231_v61, 0.0  ;;  %v16615_v54 = vld [vmem:[#allocation287_spill] sm:$0xff]  ;;  %v4566_v29 = vadd.f32 %v4565_v41, %v16616_v9 }
 0x33b   : > { %v5196_v49 = vpop.f32.mrf.mxu1  ;;  %v5697_v14 = vadd.f32 %v5696_v1, %v12233_v31  ;;  %v12250_v58 = vadd.f32 %v5194_v43, %v4558_v23  ;;  %v4568_v42 = vadd.f32 %v4567_v62, %v11520_v57  ;;  %v16619_v62 = vld [vmem:[#allocation296_spill] sm:$0xff] }
 0x33c   : > { %v4573_v55 = vpop.f32.mrf.mxu0  ;;  %4956 = vmatmul.mubr.f32.gmra.mxu0 %v16613_v13  ;;  %v12248_v59 = vadd.f32 %v5196_v49, %v4560_v60  ;;  %v16617_v49 = vld [vmem:[#allocation294_spill] sm:$0xff] }
 0x33d   : > { %4962 = vmatprep.mubr.f32.mxu0 %v16615_v54  ;;  %v5202_v6 = vpop.f32.mrf.mxu1  ;;  %5585 = vmatmul.mubr.f32.gmra.mxu1 %v16606_v26  ;;  %v12263_v26 = vpop.permute.xlu0 %7589 }
 0x33e   : > { %16614 = vst [vmem:[#allocation310_spill] sm:$0xff] %v12248_v59  ;;  %v4575_v63 = vpop.f32.mrf.mxu0  ;;  %5698 = vadd.xlane.f32.xlu0 %v5697_v14  ;;  %5591 = vmatprep.mubr.f32.mxu1 %v16608_v16  ;;  %v5700_v1 = vsel %vm5679_vm1, %v12248_v59, 0.0  ;;  %16618 = vst [vmem:[#allocation312_spill] sm:$0xff] %v12263_v26  ;;  %v12265_v57 = vadd.f32 %v5202_v6, %v4566_v29  ;;  %v12269_v14 = vpop.permute.xlu1 %7574  ;;  %v16622_v59 = vld [vmem:[#allocation299_spill] sm:$0xff] }
 0x33f   : > { %v5204_v60 = vpop.f32.mrf.mxu1  ;;  %v5701_v43 = vadd.f32 %v5700_v1, %v12250_v58  ;;  %16620 = vst [vmem:[#allocation317_spill] sm:$0xff] %v12269_v14  ;;  %v4576_v41 = vadd.f32 %v4575_v63, %v11532_v27  ;;  %v16621_v1 = vld [vmem:[#allocation51_spill] sm:$0xff]  ;;  %v16623_v27 = vld [vmem:[#allocation302_spill] sm:$0xff] }
 0x340   : > { %v4581_v23 = vpop.f32.mrf.mxu0  ;;  %4964 = vmatmul.mubr.f32.gmra.mxu0 %v16617_v49  ;;  %v12261_v61 = vadd.f32 %v5204_v60, %v4568_v42  ;;  %v4574_v60 = vadd.f32 %v4573_v55, %v16621_v1 }
 0x341   : > { %4970 = vmatprep.mubr.f32.mxu0 %v16619_v62  ;;  %v5210_v16 = vpop.f32.mrf.mxu1  ;;  %5593 = vmatmul.mubr.f32.gmra.mxu1 %v16613_v13 }
 0x342   : > { %v4583_v9 = vpop.f32.mrf.mxu0  ;;  %5702 = vadd.xlane.f32.xlu1 %v5701_v43  ;;  %5599 = vmatprep.mubr.f32.mxu1 %v16615_v54  ;;  %v5704_v42 = vsel %vm5679_vm1, %v12261_v61, 0.0  ;;  %v12280_v14 = vadd.f32 %v5210_v16, %v4574_v60  ;;  %v12292_v60 = vpop.permute.xlu1 %7584 }
 0x343   : > { %v5212_v29 = vpop.f32.mrf.mxu1  ;;  %v5705_v6 = vadd.f32 %v5704_v42, %v12265_v57  ;;  %v4584_v54 = vadd.f32 %v4583_v9, %v11544_v48  ;;  %v12288_v42 = vpop.permute.xlu0 %7599  ;;  %16625 = vst [vmem:[#allocation321_spill] sm:$0xff] %v12292_v60 }
 0x344   : > { %v4589_v26 = vpop.f32.mrf.mxu0  ;;  %4972 = vmatmul.mubr.f32.gmra.mxu0 %v16622_v59  ;;  %v12278_v13 = vadd.f32 %v5212_v29, %v4576_v41  ;;  %16624 = vst [vmem:[#allocation319_spill] sm:$0xff] %v12288_v42  ;;  %v4582_v41 = vadd.f32 %v4581_v23, %v11538_v45 }
 0x345   : > { %4978 = vmatprep.mubr.f32.mxu0 %v16623_v27  ;;  %v5218_v63 = vpop.f32.mrf.mxu1  ;;  %5601 = vmatmul.mubr.f32.gmra.mxu1 %v16617_v49  ;;  %v16626_v49 = vld [vmem:[#allocation306_spill] sm:$0xff] }
 0x346   : > { %v4591_v43 = vpop.f32.mrf.mxu0  ;;  %5706 = vadd.xlane.f32.xlu0 %v5705_v6  ;;  %5607 = vmatprep.mubr.f32.mxu1 %v16619_v62  ;;  %v5708_v55 = vsel %vm5679_vm1, %v12278_v13, 0.0  ;;  %v12297_v9 = vadd.f32 %v5218_v63, %v4582_v41  ;;  %v16627_v62 = vld [vmem:[#allocation308_spill] sm:$0xff] }
 0x347   : > { %v5220_v16 = vpop.f32.mrf.mxu1  ;;  %v5709_v1 = vadd.f32 %v5708_v55, %v12280_v14  ;;  %v4592_v42 = vadd.f32 %v4591_v43, %v11556_v17  ;;  %v4590_v55 = vadd.f32 %v4589_v26, %v11550_v32  ;;  %v16630_v43 = vld [vmem:[#allocation313_spill] sm:$0xff] }
 0x348   : > { %v4597_v29 = vpop.f32.mrf.mxu0  ;;  %4980 = vmatmul.mubr.f32.gmra.mxu0 %v16626_v49  ;;  %v12295_v48 = vadd.f32 %v5220_v16, %v4584_v54  ;;  %v16628_v16 = vld [vmem:[#allocation311_spill] sm:$0xff] }
 0x349   : > { %4986 = vmatprep.mubr.f32.mxu0 %v16627_v62  ;;  %v5226_v6 = vpop.f32.mrf.mxu1  ;;  %5609 = vmatmul.mubr.f32.gmra.mxu1 %v16622_v59  ;;  %v12310_v59 = vpop.permute.xlu0 %7609 }
 0x34a   : > { %v4599_v45 = vpop.f32.mrf.mxu0  ;;  %5710 = vadd.xlane.f32.xlu1 %v5709_v1  ;;  %5615 = vmatprep.mubr.f32.mxu1 %v16623_v27  ;;  %v5712_v23 = vsel %vm5679_vm1, %v12295_v48, 0.0  ;;  %16629 = vst [vmem:[#allocation324_spill] sm:$0xff] %v12310_v59  ;;  %v12312_v17 = vadd.f32 %v5226_v6, %v4590_v55  ;;  %v12316_v1 = vpop.permute.xlu1 %7594  ;;  %v16632_v59 = vld [vmem:[#allocation315_spill] sm:$0xff] }
 0x34b   : > { %v5228_v54 = vpop.f32.mrf.mxu1  ;;  %v5713_v63 = vadd.f32 %v5712_v23, %v12297_v9  ;;  %16631 = vst [vmem:[#allocation327_spill] sm:$0xff] %v12316_v1  ;;  %v4600_v32 = vadd.f32 %v4599_v45, %v11568_v24  ;;  %v4598_v23 = vadd.f32 %v4597_v29, %v11562_v11  ;;  %v16633_v24 = vld [vmem:[#allocation318_spill] sm:$0xff] }
 0x34c   : > { %v4605_v41 = vpop.f32.mrf.mxu0  ;;  %4988 = vmatmul.mubr.f32.gmra.mxu0 %v16628_v16  ;;  %v12308_v60 = vadd.f32 %v5228_v54, %v4592_v42 }
 0x34d   : > { %4994 = vmatprep.mubr.f32.mxu0 %v16630_v43  ;;  %v5234_v27 = vpop.f32.mrf.mxu1  ;;  %5617 = vmatmul.mubr.f32.gmra.mxu1 %v16626_v49  ;;  %v12335_v29 = vpop.permute.xlu0 %7619 }
 0x34e   : > { %v4607_v26 = vpop.f32.mrf.mxu0  ;;  %5714 = vadd.xlane.f32.xlu0 %v5713_v63  ;;  %5623 = vmatprep.mubr.f32.mxu1 %v16627_v62  ;;  %v5716_v42 = vsel %vm5679_vm1, %v12308_v60, 0.0  ;;  %v12327_v1 = vadd.f32 %v5234_v27, %v4598_v23  ;;  %16634 = vst [vmem:[#allocation330_spill] sm:$0xff] %v12335_v29  ;;  %v12339_v23 = vpop.permute.xlu1 %7604 }
 0x34f   : > { %v5236_v6 = vpop.f32.mrf.mxu1  ;;  %v5717_v55 = vadd.f32 %v5716_v42, %v12312_v17  ;;  %v4608_v62 = vadd.f32 %v4607_v26, %v11580_v15  ;;  %16635 = vst [vmem:[#allocation337_spill] sm:$0xff] %v12339_v23 }
 0x350   : > { %v4613_v54 = vpop.f32.mrf.mxu0  ;;  %4996 = vmatmul.mubr.f32.gmra.mxu0 %v16632_v59  ;;  %v12325_v49 = vadd.f32 %v5236_v6, %v4600_v32  ;;  %v4606_v32 = vadd.f32 %v4605_v41, %v11574_v37 }
 0x351   : > { %5002 = vmatprep.mubr.f32.mxu0 %v16633_v24  ;;  %v5242_v45 = vpop.f32.mrf.mxu1  ;;  %5625 = vmatmul.mubr.f32.gmra.mxu1 %v16628_v16  ;;  %v16636_v16 = vld [vmem:[#allocation322_spill] sm:$0xff] }
 0x352   : > { %v4615_v63 = vpop.f32.mrf.mxu0  ;;  %5718 = vadd.xlane.f32.xlu1 %v5717_v55  ;;  %5631 = vmatprep.mubr.f32.mxu1 %v16630_v43  ;;  %v5720_v11 = vsel %vm5679_vm1, %v12325_v49, 0.0  ;;  %v12344_v26 = vadd.f32 %v5242_v45, %v4606_v32  ;;  %v16637_v43 = vld [vmem:[#allocation325_spill] sm:$0xff] }
 0x353   : > { %v5244_v27 = vpop.f32.mrf.mxu1  ;;  %v5721_v42 = vadd.f32 %v5720_v11, %v12327_v1  ;;  %v4616_v29 = vadd.f32 %v4615_v63, %v11592_v7  ;;  %v4614_v11 = vadd.f32 %v4613_v54, %v11586_v5  ;;  %v16640_v63 = vld [vmem:[#allocation331_spill] sm:$0xff] }
 0x354   : > { %v4621_v6 = vpop.f32.mrf.mxu0  ;;  %5004 = vmatmul.mubr.f32.gmra.mxu0 %v16636_v16  ;;  %v12342_v15 = vadd.f32 %v5244_v27, %v4608_v62  ;;  %v16638_v27 = vld [vmem:[#allocation328_spill] sm:$0xff] }
 0x355   : > { %5010 = vmatprep.mubr.f32.mxu0 %v16637_v43  ;;  %v5250_v55 = vpop.f32.mrf.mxu1  ;;  %5633 = vmatmul.mubr.f32.gmra.mxu1 %v16632_v59  ;;  %v12357_v59 = vpop.permute.xlu0 %7629 }
 0x356   : > { %v4623_v37 = vpop.f32.mrf.mxu0  ;;  %5722 = vadd.xlane.f32.xlu0 %v5721_v42  ;;  %5639 = vmatprep.mubr.f32.mxu1 %v16633_v24  ;;  %v5724_v41 = vsel %vm5679_vm1, %v12342_v15, 0.0  ;;  %16639 = vst [vmem:[#allocation68_spill] sm:$0xff] %v12357_v59  ;;  %v12359_v7 = vadd.f32 %v5250_v55, %v4614_v11  ;;  %v12363_v42 = vpop.permute.xlu1 %7614  ;;  %v16642_v59 = vld [vmem:[#allocation334_spill] sm:$0xff] }
 0x357   : > { %v5252_v62 = vpop.f32.mrf.mxu1  ;;  %v5725_v45 = vadd.f32 %v5724_v41, %v12344_v26  ;;  %16641 = vst [vmem:[#allocation69_spill] sm:$0xff] %v12363_v42  ;;  %v4624_v5 = vadd.f32 %v4623_v37, %v11604_v21  ;;  %v4622_v41 = vadd.f32 %v4621_v6, %v11598_v46  ;;  %v16643_v21 = vld [vmem:[#allocation335_spill] sm:$0xff] }
 0x358   : > { %v4629_v32 = vpop.f32.mrf.mxu0  ;;  %5012 = vmatmul.mubr.f32.gmra.mxu0 %v16638_v27  ;;  %v12355_v23 = vadd.f32 %v5252_v62, %v4616_v29 }
 0x359   : > { %5018 = vmatprep.mubr.f32.mxu0 %v16640_v63  ;;  %v5258_v24 = vpop.f32.mrf.mxu1  ;;  %5641 = vmatmul.mubr.f32.gmra.mxu1 %v16636_v16  ;;  %v12382_v6 = vpop.permute.xlu0 %7639 }
 0x35a   : > { %v4631_v54 = vpop.f32.mrf.mxu0  ;;  %5726 = vadd.xlane.f32.xlu1 %v5725_v45  ;;  %5647 = vmatprep.mubr.f32.mxu1 %v16637_v43  ;;  %v5728_v29 = vsel %vm5679_vm1, %v12355_v23, 0.0  ;;  %v12374_v42 = vadd.f32 %v5258_v24, %v4622_v41  ;;  %16644 = vst [vmem:[#allocation75_spill] sm:$0xff] %v12382_v6  ;;  %v12386_v41 = vpop.permute.xlu1 %7624 }
 0x35b   : > { %v5260_v55 = vpop.f32.mrf.mxu1  ;;  %v5729_v11 = vadd.f32 %v5728_v29, %v12359_v7  ;;  %v4632_v43 = vadd.f32 %v4631_v54, %v11616_v0  ;;  %16645 = vst [vmem:[#allocation77_spill] sm:$0xff] %v12386_v41 }
 0x35c   : > { %v4637_v62 = vpop.f32.mrf.mxu0  ;;  %5020 = vmatmul.mubr.f32.gmra.mxu0 %v16642_v59  ;;  %v12372_v16 = vadd.f32 %v5260_v55, %v4624_v5  ;;  %v4630_v5 = vadd.f32 %v4629_v32, %v11610_v18 }
 0x35d   : > { %5026 = vmatprep.mubr.f32.mxu0 %v16643_v21  ;;  %v5266_v37 = vpop.f32.mrf.mxu1  ;;  %5649 = vmatmul.mubr.f32.gmra.mxu1 %v16638_v27  ;;  %v16646_v27 = vld [vmem:[#allocation338_spill] sm:$0xff] }
 0x35e   : > { %v4639_v45 = vpop.f32.mrf.mxu0  ;;  %5730 = vadd.xlane.f32.xlu0 %v5729_v11  ;;  %5655 = vmatprep.mubr.f32.mxu1 %v16640_v63  ;;  %v5732_v46 = vsel %vm5679_vm1, %v12372_v16, 0.0  ;;  %v12391_v54 = vadd.f32 %v5266_v37, %v4630_v5  ;;  %v16647_v63 = vld [vmem:[#allocation339_spill] sm:$0xff] }
 0x35f   : > { %v5268_v24 = vpop.f32.mrf.mxu1  ;;  %v5733_v29 = vadd.f32 %v5732_v46, %v12374_v42  ;;  %v4640_v6 = vadd.f32 %v4639_v45, %v11628_v20  ;;  %v4638_v46 = vadd.f32 %v4637_v62, %v11622_v52 }
 0x360   : > { %v4645_v55 = vpop.f32.mrf.mxu0  ;;  %5028 = vmatmul.mubr.f32.gmra.mxu0 %v16646_v27  ;;  %v12389_v0 = vadd.f32 %v5268_v24, %v4632_v43  ;;  %v16648_v24 = vld [vmem:[#allocation340_spill] sm:$0xff] }
 0x361   : > { %5034 = vmatprep.mubr.f32.mxu0 %v16647_v63  ;;  %v5274_v11 = vpop.f32.mrf.mxu1  ;;  %5657 = vmatmul.mubr.f32.gmra.mxu1 %v16642_v59  ;;  %v12404_v59 = vpop.permute.xlu0 %7649 }
 0x362   : > { %v4647_v18 = vpop.f32.mrf.mxu0  ;;  %5734 = vadd.xlane.f32.xlu1 %v5733_v29  ;;  %5663 = vmatprep.mubr.f32.mxu1 %v16643_v21  ;;  %v5736_v32 = vsel %vm5679_vm1, %v12389_v0, 0.0  ;;  %16649 = vst [vmem:[#allocation83_spill] sm:$0xff] %v12404_v59  ;;  %v12406_v20 = vadd.f32 %v5274_v11, %v4638_v46  ;;  %v12409_v21 = vpop.permute.xlu1 %7634 }
 0x363   : > { %v5276_v43 = vpop.f32.mrf.mxu1  ;;  %v5737_v37 = vadd.f32 %v5736_v32, %v12391_v54  ;;  %16650 = vst [vmem:[#allocation85_spill] sm:$0xff] %v12409_v21  ;;  %v4648_v52 = vadd.f32 %v4647_v18, %v11640_v8 }
 0x364   : > { %v4653_v5 = vpop.f32.mrf.mxu0  ;;  %5036 = vmatmul.mubr.f32.gmra.mxu0 %v16648_v24  ;;  %v12402_v41 = vadd.f32 %v5276_v43, %v4640_v6  ;;  %v4646_v6 = vadd.f32 %v4645_v55, %v11634_v30 }
 0x365   : > { %v5282_v45 = vpop.f32.mrf.mxu1  ;;  %5665 = vmatmul.mubr.f32.gmra.mxu1 %v16646_v27  ;;  %5738 = vadd.xlane.f32.xlu0 %v5737_v37  ;;  %v12425_v21 = vpop.permute.xlu0 %7659  ;;  %v4654_v30 = vadd.f32 %v4653_v5, %v11646_v22 }
 0x366   : > { %v4655_v62 = vpop.f32.mrf.mxu0  ;;  %5671 = vmatprep.mubr.f32.mxu1 %v16647_v63  ;;  %v5740_v29 = vsel %vm5679_vm1, %v12402_v41, 0.0  ;;  %v12419_v27 = vadd.f32 %v5282_v45, %v4646_v6  ;;  %16651 = vst [vmem:[#allocation86_spill] sm:$0xff] %v12425_v21 }
 0x367   : > { %v5284_v32 = vpop.f32.mrf.mxu1  ;;  %v5741_v11 = vadd.f32 %v5740_v29, %v12406_v20  ;;  %v4656_v8 = vadd.f32 %v4655_v62, %v11651_v39  ;;  %v12429_v29 = vpop.permute.xlu1 %7644 }
 0x368   : > { %v4661_v46 = vpop.f32.mrf.mxu0  ;;  %v12417_v43 = vadd.f32 %v5284_v32, %v4648_v52  ;;  %16652 = vst [vmem:[#allocation87_spill] sm:$0xff] %v12429_v29 }
 0x369   : > { %v5290_v37 = vpop.f32.mrf.mxu1  ;;  %5673 = vmatmul.mubr.f32.gmra.mxu1 %v16648_v24  ;;  %5742 = vadd.xlane.f32.xlu1 %v5741_v11  ;;  %v4662_v22 = vadd.f32 %v4661_v46, %v11656_v36 }
 0x36a   : > { %v4663_v63 = vpop.f32.mrf.mxu0  ;;  %v5744_v18 = vsel %vm5679_vm1, %v12417_v43, 0.0  ;;  %v12433_v24 = vadd.f32 %v5290_v37, %v4654_v30 }
 0x36b   : > { %v5292_v55 = vpop.f32.mrf.mxu1  ;;  %v5745_v52 = vadd.f32 %v5744_v18, %v12419_v27  ;;  %v4664_v39 = vadd.f32 %v4663_v63, %v11661_v47 }
 0x36c   : > { %v4669_v45 = vpop.f32.mrf.mxu0  ;;  %v12431_v6 = vadd.f32 %v5292_v55, %v4656_v8  ;;  %v12442_v8 = vpop.permute.xlu0 %7669 }
 0x36d   : > { %v5298_v32 = vpop.f32.mrf.mxu1  ;;  %5746 = vadd.xlane.f32.xlu0 %v5745_v52  ;;  %16653 = vst [vmem:[#allocation90_spill] sm:$0xff] %v12442_v8  ;;  %v12446_v55 = vpop.permute.xlu1 %7654  ;;  %v4670_v46 = vadd.f32 %v4669_v45, %v11666_v38 }
 0x36e   : > { %v4671_v62 = vpop.f32.mrf.mxu0  ;;  %v5748_v11 = vsel %vm5679_vm1, %v12431_v6, 0.0  ;;  %v12444_v37 = vadd.f32 %v5298_v32, %v4662_v22  ;;  %16654 = vst [vmem:[#allocation88_spill] sm:$0xff] %v12446_v55 }
 0x36f   : > { %v5300_v5 = vpop.f32.mrf.mxu1  ;;  %v5749_v18 = vadd.f32 %v5748_v11, %v12433_v24  ;;  %v4672_v47 = vadd.f32 %v4671_v62, %v11671_v19 }
 0x370   : > { %v4677_v21 = vpop.f32.mrf.mxu0  ;;  %v12440_v29 = vadd.f32 %v5300_v5, %v4664_v39  ;;  %v12460_v62 = vpop.permute.xlu0 %7679 }
 0x371   : > { %v5306_v30 = vpop.f32.mrf.mxu1  ;;  %5750 = vadd.xlane.f32.xlu1 %v5749_v18  ;;  %16655 = vst [vmem:[#allocation92_spill] sm:$0xff] %v12460_v62  ;;  %v4678_v38 = vadd.f32 %v4677_v21, %v11676_v33  ;;  %v12464_v8 = vpop.permute.xlu1 %7664 }
 0x372   : > { %v4679_v63 = vpop.f32.mrf.mxu0  ;;  %v5752_v36 = vsel %vm5679_vm1, %v12440_v29, 0.0  ;;  %v12455_v32 = vadd.f32 %v5306_v30, %v4670_v46  ;;  %16656 = vst [vmem:[#allocation93_spill] sm:$0xff] %v12464_v8 }
 0x373   : > { %v5308_v52 = vpop.f32.mrf.mxu1  ;;  %v5753_v39 = vadd.f32 %v5752_v36, %v12444_v37  ;;  %v4680_v18 = vadd.f32 %v4679_v63, %v11681_v2 }
 0x374   : > { %v4685_v11 = vpop.f32.mrf.mxu0  ;;  %v12453_v5 = vadd.f32 %v5308_v52, %v4672_v47 }
 0x375   : > { %v5314_v22 = vpop.f32.mrf.mxu1  ;;  %5754 = vadd.xlane.f32.xlu0 %v5753_v39  ;;  %v4686_v33 = vadd.f32 %v4685_v11, %v11686_v50 }
 0x376   : > { %v4687_v55 = vpop.f32.mrf.mxu0  ;;  %v5756_v19 = vsel %vm5679_vm1, %v12453_v5, 0.0  ;;  %v12468_v46 = vadd.f32 %v5314_v22, %v4678_v38 }
 0x377   : > { %v5316_v45 = vpop.f32.mrf.mxu1  ;;  %v5757_v36 = vadd.f32 %v5756_v19, %v12455_v32  ;;  %v4688_v2 = vadd.f32 %v4687_v55, %v11691_v56 }
 0x378   : > { %v4693_v47 = vpop.f32.mrf.mxu0  ;;  %v12466_v30 = vadd.f32 %v5316_v45, %v4680_v18  ;;  %v12477_v18 = vpop.permute.xlu0 %7689 }
 0x379   : > { %v5322_v52 = vpop.f32.mrf.mxu1  ;;  %5758 = vadd.xlane.f32.xlu1 %v5757_v36  ;;  %16657 = vst [vmem:[#allocation97_spill] sm:$0xff] %v12477_v18  ;;  %v12481_v45 = vpop.permute.xlu1 %7674  ;;  %v4694_v11 = vadd.f32 %v4693_v47, %v11696_v28 }
 0x37a   : > { %v4695_v63 = vpop.f32.mrf.mxu0  ;;  %v5760_v39 = vsel %vm5679_vm1, %v12466_v30, 0.0  ;;  %v12479_v22 = vadd.f32 %v5322_v52, %v4686_v33  ;;  %16658 = vst [vmem:[#allocation98_spill] sm:$0xff] %v12481_v45 }
 0x37b   : > { %v5324_v21 = vpop.f32.mrf.mxu1  ;;  %v5761_v19 = vadd.f32 %v5760_v39, %v12468_v46  ;;  %v4696_v56 = vadd.f32 %v4695_v63, %v11701_v35 }
 0x37c   : > { %v4701_v62 = vpop.f32.mrf.mxu0  ;;  %v12475_v8 = vadd.f32 %v5324_v21, %v4688_v2  ;;  %v12495_v63 = vpop.permute.xlu0 %7699 }
 0x37d   : > { %v5330_v38 = vpop.f32.mrf.mxu1  ;;  %5762 = vadd.xlane.f32.xlu0 %v5761_v19  ;;  %16659 = vst [vmem:[#allocation71_spill] sm:$0xff] %v12495_v63  ;;  %v4702_v28 = vadd.f32 %v4701_v62, %v11706_v44  ;;  %v12499_v18 = vpop.permute.xlu1 %7684 }
 0x37e   : > { %v4703_v55 = vpop.f32.mrf.mxu0  ;;  %v5764_v50 = vsel %vm5679_vm1, %v12475_v8, 0.0  ;;  %v12490_v52 = vadd.f32 %v5330_v38, %v4694_v11  ;;  %16660 = vst [vmem:[#allocation102_spill] sm:$0xff] %v12499_v18 }
 0x37f   : > { %v5332_v36 = vpop.f32.mrf.mxu1  ;;  %v5765_v2 = vadd.f32 %v5764_v50, %v12479_v22  ;;  %v4704_v19 = vadd.f32 %v4703_v55, %v11711_v53 }
 0x380   : > { %v4709_v39 = vpop.f32.mrf.mxu0  ;;  %v12488_v21 = vadd.f32 %v5332_v36, %v4696_v56 }
 0x381   : > { %v5338_v33 = vpop.f32.mrf.mxu1  ;;  %5766 = vadd.xlane.f32.xlu1 %v5765_v2  ;;  %v4710_v44 = vadd.f32 %v4709_v39, %v11716_v40  ;;  %v16665_v39 = vld [vmem:[#allocation154_spill] sm:$0xff] }
 0x382   : > { %v4711_v45 = vpop.f32.mrf.mxu0  ;;  %v5768_v35 = vsel %vm5679_vm1, %v12488_v21, 0.0  ;;  %v12503_v11 = vadd.f32 %v5338_v33, %v4702_v28 }
 0x383   : > { %v5340_v47 = vpop.f32.mrf.mxu1  ;;  %v5769_v50 = vadd.f32 %v5768_v35, %v12490_v52  ;;  %v4712_v53 = vadd.f32 %v4711_v45, %v11721_v34 }
 0x384   : > { %v4717_v56 = vpop.f32.mrf.mxu0  ;;  %v12501_v38 = vadd.f32 %v5340_v47, %v4704_v19  ;;  %v12512_v19 = vpop.permute.xlu0 %7709 }
 0x385   : > { %v5346_v36 = vpop.f32.mrf.mxu1  ;;  %5770 = vadd.xlane.f32.xlu0 %v5769_v50  ;;  %16662 = vst [vmem:[#allocation101_spill] sm:$0xff] %v12512_v19  ;;  %v12516_v47 = vpop.permute.xlu1 %7694  ;;  %v4718_v50 = vadd.f32 %v4717_v56, %v16665_v39 }
 0x386   : > { %v4719_v55 = vpop.f32.mrf.mxu0  ;;  %v5772_v2 = vsel %vm5679_vm1, %v12501_v38, 0.0  ;;  %v12514_v33 = vadd.f32 %v5346_v36, %v4710_v44  ;;  %16664 = vst [vmem:[#allocation105_spill] sm:$0xff] %v12516_v47 }
 0x387   : > { %v5348_v62 = vpop.f32.mrf.mxu1  ;;  %v5773_v35 = vadd.f32 %v5772_v2, %v12503_v11  ;;  %v4720_v34 = vadd.f32 %v4719_v55, %v11731_v4 }
 0x388   : > { %v4725_v63 = vpop.f32.mrf.mxu0  ;;  %v12510_v18 = vadd.f32 %v5348_v62, %v4712_v53  ;;  %16663 = vst [vmem:[#allocation78_spill] sm:$0xff] %v12514_v33  ;;  %v12530_v55 = vpop.permute.xlu0 %7719 }
 0x389   : > { %v5354_v28 = vpop.f32.mrf.mxu1  ;;  %5774 = vadd.xlane.f32.xlu1 %v5773_v35  ;;  %v16668_v35 = vld [vmem:[#allocation156_spill] sm:$0xff]  ;;  %16669 = vst [vmem:[#allocation5_spill] sm:$0xff] %v12530_v55 }
 0x38a   : > { %16661 = vst [vmem:[#allocation73_spill] sm:$0xff] %v12510_v18  ;;  %v4727_v45 = vpop.f32.mrf.mxu0  ;;  %v5776_v40 = vsel %vm5679_vm1, %v12510_v18, 0.0  ;;  %v12525_v36 = vadd.f32 %v5354_v28, %v4718_v50  ;;  %v16670_v18 = vld [vmem:[#allocation70_spill] sm:$0xff] }
 0x38b   : > { %v5356_v2 = vpop.f32.mrf.mxu1  ;;  %v5777_v53 = vadd.f32 %v5776_v40, %v12514_v33  ;;  %v4728_v47 = vadd.f32 %v4727_v45, %v16668_v35  ;;  %v4726_v56 = vadd.f32 %v4725_v63, %v16670_v18  ;;  %v12534_v33 = vpop.permute.xlu1 %7704  ;;  %v16674_v45 = vld [vmem:[#allocation158_spill] sm:$0xff] }
 0x38c   : > { %v4733_v62 = vpop.f32.mrf.mxu0  ;;  %v12523_v59 = vadd.f32 %v5356_v2, %v4720_v34  ;;  %16667 = vst [vmem:[#allocation106_spill] sm:$0xff] %v12525_v36  ;;  %16671 = vst [vmem:[#allocation109_spill] sm:$0xff] %v12534_v33 }
 0x38d   : > { %v5362_v44 = vpop.f32.mrf.mxu1  ;;  %5778 = vadd.xlane.f32.xlu0 %v5777_v53 }
 0x38e   : > { %16666 = vst [vmem:[#allocation4_spill] sm:$0xff] %v12523_v59  ;;  %v4735_v19 = vpop.f32.mrf.mxu0  ;;  %v5780_v4 = vsel %vm5679_vm1, %v12523_v59, 0.0  ;;  %v12538_v50 = vadd.f32 %v5362_v44, %v4726_v56  ;;  %v16675_v59 = vld [vmem:[#allocation72_spill] sm:$0xff] }
 0x38f   : > { %v5364_v39 = vpop.f32.mrf.mxu1  ;;  %v5781_v40 = vadd.f32 %v5780_v4, %v12525_v36  ;;  %v4736_v53 = vadd.f32 %v4735_v19, %v16674_v45  ;;  %v4734_v18 = vadd.f32 %v4733_v62, %v16675_v59  ;;  %v16680_v19 = vld [vmem:[#allocation159_spill] sm:$0xff]  ;;  %v16681_v62 = vld [vmem:[#allocation53_spill] sm:$0xff] }
 0x390   : > { %v4741_v34 = vpop.f32.mrf.mxu0  ;;  %v12536_v28 = vadd.f32 %v5364_v39, %v4728_v47  ;;  %16673 = vst [vmem:[#allocation110_spill] sm:$0xff] %v12538_v50  ;;  %v12547_v47 = vpop.permute.xlu0 %7729 }
 0x391   : > { %v5370_v2 = vpop.f32.mrf.mxu1  ;;  %5782 = vadd.xlane.f32.xlu1 %v5781_v40  ;;  %16677 = vst [vmem:[#allocation6_spill] sm:$0xff] %v12547_v47  ;;  %v12551_v39 = vpop.permute.xlu1 %7714  ;;  %v16685_v47 = vld [vmem:[#allocation55_spill] sm:$0xff] }
 0x392   : > { %16672 = vst [vmem:[#allocation79_spill] sm:$0xff] %v12536_v28  ;;  %v4743_v35 = vpop.f32.mrf.mxu0  ;;  %v5784_v55 = vsel %vm5679_vm1, %v12536_v28, 0.0  ;;  %v12549_v44 = vadd.f32 %v5370_v2, %v4734_v18  ;;  %16679 = vst [vmem:[#allocation8_spill] sm:$0xff] %v12551_v39  ;;  %v4742_v28 = vadd.f32 %v4741_v34, %v16681_v62 }
 0x393   : > { %v5372_v63 = vpop.f32.mrf.mxu1  ;;  %v5785_v4 = vadd.f32 %v5784_v55, %v12538_v50  ;;  %v4744_v40 = vadd.f32 %v4743_v35, %v16680_v19 }
 0x394   : > { %v4749_v36 = vpop.f32.mrf.mxu0  ;;  %v12545_v33 = vadd.f32 %v5372_v63, %v4736_v53  ;;  %16678 = vst [vmem:[#allocation113_spill] sm:$0xff] %v12549_v44  ;;  %v12565_v19 = vpop.permute.xlu0 %7739 }
 0x395   : > { %v5378_v56 = vpop.f32.mrf.mxu1  ;;  %5786 = vadd.xlane.f32.xlu0 %v5785_v4  ;;  %16684 = vst [vmem:[#allocation118_spill] sm:$0xff] %v12565_v19  ;;  %v4750_v34 = vadd.f32 %v4749_v36, %v16685_v47 }
 0x396   : > { %16676 = vst [vmem:[#allocation112_spill] sm:$0xff] %v12545_v33  ;;  %v4751_v45 = vpop.f32.mrf.mxu0  ;;  %v5788_v59 = vsel %vm5679_vm1, %v12545_v33, 0.0  ;;  %v12560_v2 = vadd.f32 %v5378_v56, %v4742_v28  ;;  %v12569_v33 = vpop.permute.xlu1 %7724 }
 0x397   : > { %v5380_v55 = vpop.f32.mrf.mxu1  ;;  %v5789_v53 = vadd.f32 %v5788_v59, %v12549_v44  ;;  %v4752_v4 = vadd.f32 %v4751_v45, %v11771_v10  ;;  %16686 = vst [vmem:[#allocation94_spill] sm:$0xff] %v12569_v33 }
 0x398   : > { %v4757_v63 = vpop.f32.mrf.mxu0  ;;  %v12558_v50 = vadd.f32 %v5380_v55, %v4744_v40  ;;  %16683 = vst [vmem:[#allocation89_spill] sm:$0xff] %v12560_v2 }
 0x399   : > { %v5386_v18 = vpop.f32.mrf.mxu1  ;;  %5790 = vadd.xlane.f32.xlu1 %v5789_v53  ;;  %v4758_v36 = vadd.f32 %v4757_v63, %v11776_v51  ;;  %v16693_v63 = vld [vmem:[#allocation162_spill] sm:$0xff] }
 0x39a   : > { %16682 = vst [vmem:[#allocation116_spill] sm:$0xff] %v12558_v50  ;;  %v4759_v39 = vpop.f32.mrf.mxu0  ;;  %v5792_v35 = vsel %vm5679_vm1, %v12558_v50, 0.0  ;;  %v12573_v56 = vadd.f32 %v5386_v18, %v4750_v34 }
 0x39b   : > { %v5388_v62 = vpop.f32.mrf.mxu1  ;;  %v5793_v59 = vadd.f32 %v5792_v35, %v12560_v2  ;;  %v4760_v10 = vadd.f32 %v4759_v39, %v11781_v3 }
 0x39c   : > { %v4765_v40 = vpop.f32.mrf.mxu0  ;;  %v12571_v28 = vadd.f32 %v5388_v62, %v4752_v4  ;;  %16688 = vst [vmem:[#allocation10_spill] sm:$0xff] %v12573_v56  ;;  %v12582_v4 = vpop.permute.xlu0 %7749 }
 0x39d   : > { %v5394_v55 = vpop.f32.mrf.mxu1  ;;  %5794 = vadd.xlane.f32.xlu0 %v5793_v59  ;;  %16690 = vst [vmem:[#allocation12_spill] sm:$0xff] %v12582_v4  ;;  %v12586_v62 = vpop.permute.xlu1 %7734  ;;  %v4766_v59 = vadd.f32 %v4765_v40, %v16693_v63  ;;  %v16697_v4 = vld [vmem:[#allocation74_spill] sm:$0xff] }
 0x39e   : > { %16687 = vst [vmem:[#allocation119_spill] sm:$0xff] %v12571_v28  ;;  %v4767_v45 = vpop.f32.mrf.mxu0  ;;  %v5796_v53 = vsel %vm5679_vm1, %v12571_v28, 0.0  ;;  %v12584_v18 = vadd.f32 %v5394_v55, %v4758_v36  ;;  %16692 = vst [vmem:[#allocation91_spill] sm:$0xff] %v12586_v62 }
 0x39f   : > { %v5396_v47 = vpop.f32.mrf.mxu1  ;;  %v5797_v35 = vadd.f32 %v5796_v53, %v12573_v56  ;;  %v4768_v3 = vadd.f32 %v4767_v45, %v11791_v12 }
 0x3a0   : > { %v4773_v19 = vpop.f32.mrf.mxu0  ;;  %v12580_v33 = vadd.f32 %v5396_v47, %v4760_v10  ;;  %16691 = vst [vmem:[#allocation124_spill] sm:$0xff] %v12584_v18  ;;  %v12600_v45 = vpop.permute.xlu0 %7759 }
 0x3a1   : > { %v5402_v34 = vpop.f32.mrf.mxu1  ;;  %5798 = vadd.xlane.f32.xlu1 %v5797_v35  ;;  %16696 = vst [vmem:[#allocation128_spill] sm:$0xff] %v12600_v45  ;;  %v4774_v40 = vadd.f32 %v4773_v19, %v16697_v4 }
 0x3a2   : > { %16689 = vst [vmem:[#allocation122_spill] sm:$0xff] %v12580_v33  ;;  %v4775_v39 = vpop.f32.mrf.mxu0  ;;  %v5800_v51 = vsel %vm5679_vm1, %v12580_v33, 0.0  ;;  %v12595_v55 = vadd.f32 %v5402_v34, %v4766_v59  ;;  %v12604_v33 = vpop.permute.xlu1 %7744 }
 0x3a3   : > { %v5404_v53 = vpop.f32.mrf.mxu1  ;;  %v5801_v10 = vadd.f32 %v5800_v51, %v12584_v18  ;;  %v4776_v35 = vadd.f32 %v4775_v39, %v11801_v25  ;;  %16698 = vst [vmem:[#allocation14_spill] sm:$0xff] %v12604_v33  ;;  %v16701_v25 = vld [vmem:[#allocation76_spill] sm:$0xff] }
 0x3a4   : > { %v4781_v47 = vpop.f32.mrf.mxu0  ;;  %v12593_v28 = vadd.f32 %v5404_v53, %v4768_v3  ;;  %16695 = vst [vmem:[#allocation95_spill] sm:$0xff] %v12595_v55 }
 0x3a5   : > { %v5410_v36 = vpop.f32.mrf.mxu1  ;;  %5802 = vadd.xlane.f32.xlu0 %v5801_v10 }
 0x3a6   : > { %16694 = vst [vmem:[#allocation127_spill] sm:$0xff] %v12593_v28  ;;  %v4783_v62 = vpop.f32.mrf.mxu0  ;;  %v5804_v12 = vsel %vm5679_vm1, %v12593_v28, 0.0  ;;  %v12608_v59 = vadd.f32 %v5410_v36, %v4774_v40  ;;  %v16702_v28 = vld [vmem:[#allocation164_spill] sm:$0xff] }
 0x3a7   : > { %v5412_v63 = vpop.f32.mrf.mxu1  ;;  %v5805_v51 = vadd.f32 %v5804_v12, %v12595_v55  ;;  %v4784_v39 = vadd.f32 %v4783_v62, %v16701_v25  ;;  %v4782_v19 = vadd.f32 %v4781_v47, %v16702_v28  ;;  %v16707_v62 = vld [vmem:[#allocation57_spill] sm:$0xff]  ;;  %v16708_v47 = vld [vmem:[#allocation167_spill] sm:$0xff] }
 0x3a8   : > { %v4789_v3 = vpop.f32.mrf.mxu0  ;;  %v12606_v34 = vadd.f32 %v5412_v63, %v4776_v35  ;;  %16700 = vst [vmem:[#allocation132_spill] sm:$0xff] %v12608_v59  ;;  %v12617_v35 = vpop.permute.xlu0 %7769 }
 0x3a9   : > { %v5418_v53 = vpop.f32.mrf.mxu1  ;;  %5806 = vadd.xlane.f32.xlu1 %v5805_v51  ;;  %16704 = vst [vmem:[#allocation135_spill] sm:$0xff] %v12617_v35  ;;  %v12621_v63 = vpop.permute.xlu1 %7754 }
 0x3aa   : > { %16699 = vst [vmem:[#allocation130_spill] sm:$0xff] %v12606_v34  ;;  %v4791_v10 = vpop.f32.mrf.mxu0  ;;  %v5808_v45 = vsel %vm5679_vm1, %v12606_v34, 0.0  ;;  %v12619_v36 = vadd.f32 %v5418_v53, %v4782_v19  ;;  %16706 = vst [vmem:[#allocation16_spill] sm:$0xff] %v12621_v63  ;;  %v4790_v34 = vadd.f32 %v4789_v3, %v16708_v47 }
 0x3ab   : > { %v5420_v4 = vpop.f32.mrf.mxu1  ;;  %v5809_v12 = vadd.f32 %v5808_v45, %v12608_v59  ;;  %v4792_v51 = vadd.f32 %v4791_v10, %v16707_v62 }
 0x3ac   : > { %v4797_v55 = vpop.f32.mrf.mxu0  ;;  %v12615_v33 = vadd.f32 %v5420_v4, %v4784_v39  ;;  %16705 = vst [vmem:[#allocation137_spill] sm:$0xff] %v12619_v36  ;;  %v12635_v62 = vpop.permute.xlu0 %7779 }
 0x3ad   : > { %v5426_v40 = vpop.f32.mrf.mxu1  ;;  %5810 = vadd.xlane.f32.xlu0 %v5809_v12  ;;  %v16711_v12 = vld [vmem:[#allocation59_spill] sm:$0xff]  ;;  %16712 = vst [vmem:[#allocation141_spill] sm:$0xff] %v12635_v62 }
 0x3ae   : > { %16703 = vst [vmem:[#allocation133_spill] sm:$0xff] %v12615_v33  ;;  %v4799_v25 = vpop.f32.mrf.mxu0  ;;  %v5812_v28 = vsel %vm5679_vm1, %v12615_v33, 0.0  ;;  %v12630_v53 = vadd.f32 %v5426_v40, %v4790_v34  ;;  %v16713_v33 = vld [vmem:[#allocation168_spill] sm:$0xff] }
 0x3af   : > { %v5428_v45 = vpop.f32.mrf.mxu1  ;;  %v5813_v39 = vadd.f32 %v5812_v28, %v12619_v36  ;;  %v4800_v63 = vadd.f32 %v4799_v25, %v16711_v12  ;;  %v4798_v3 = vadd.f32 %v4797_v55, %v16713_v33  ;;  %v12639_v36 = vpop.permute.xlu1 %7764  ;;  %v16717_v25 = vld [vmem:[#allocation80_spill] sm:$0xff] }
 0x3b0   : > { %v4805_v4 = vpop.f32.mrf.mxu0  ;;  %v12628_v59 = vadd.f32 %v5428_v45, %v4792_v51  ;;  %16710 = vst [vmem:[#allocation96_spill] sm:$0xff] %v12630_v53  ;;  %16714 = vst [vmem:[#allocation143_spill] sm:$0xff] %v12639_v36 }
 0x3b1   : > { %v5434_v19 = vpop.f32.mrf.mxu1  ;;  %5814 = vadd.xlane.f32.xlu1 %v5813_v39 }
 0x3b2   : > { %16709 = vst [vmem:[#allocation138_spill] sm:$0xff] %v12628_v59  ;;  %v4807_v35 = vpop.f32.mrf.mxu0  ;;  %v5816_v10 = vsel %vm5679_vm1, %v12628_v59, 0.0  ;;  %v12643_v40 = vadd.f32 %v5434_v19, %v4798_v3  ;;  %v16718_v59 = vld [vmem:[#allocation170_spill] sm:$0xff] }
 0x3b3   : > { %v5817_v47 = vadd.f32 %v5816_v10, %v12630_v53  ;;  %v5436_v28 = vpop.f32.mrf.mxu1  ;;  %v4808_v39 = vadd.f32 %v4807_v35, %v16717_v25  ;;  %v4806_v33 = vadd.f32 %v4805_v4, %v16718_v59  ;;  %v16722_v35 = vld [vmem:[#allocation81_spill] sm:$0xff]  ;;  %v16725_v59 = vld [vmem:[#allocation283_spill] sm:$0xff] }
 0x3b4   : > { %v4813_v51 = vpop.f32.mrf.mxu0  ;;  %v12641_v34 = vadd.f32 %v5436_v28, %v4800_v63  ;;  %16716 = vst [vmem:[#allocation145_spill] sm:$0xff] %v12643_v40  ;;  %v16723_v25 = vld [vmem:[#allocation289_spill] sm:$0xff] }
 0x3b5   : > { %v5442_v45 = vpop.f32.mrf.mxu1  ;;  %5818 = vadd.xlane.f32.xlu0 %v5817_v47  ;;  %v12654_v47 = vpop.permute.xlu1 %7774 }
 0x3b6   : > { %16715 = vst [vmem:[#allocation3_spill] sm:$0xff] %v12641_v34  ;;  %v4815_v12 = vpop.f32.mrf.mxu0  ;;  %v5820_v62 = vsel %vm5679_vm1, %v12641_v34, 0.0  ;;  %v12652_v19 = vadd.f32 %v5442_v45, %v4806_v33  ;;  %16721 = vst [vmem:[#allocation18_spill] sm:$0xff] %v12654_v47 }
 0x3b7   : > { %v5821_v55 = vadd.f32 %v5820_v62, %v12643_v40  ;;  %v5683_v10 = vpop.xlane.xlu0 %5682  ;;  %v5444_v53 = vpop.f32.mrf.mxu1  ;;  %v4816_v28 = vadd.f32 %v4815_v12, %v16722_v35 }
 0x3b8   : > { %v4821_v36 = vpop.f32.mrf.mxu0  ;;  %v5944_v18 = vmul.f32 0.0051020407, %v5683_v10  ;;  %v12650_v63 = vadd.f32 %v5444_v53, %v4808_v39  ;;  %16720 = vst [vmem:[#allocation146_spill] sm:$0xff] %v12652_v19  ;;  %v16727_v53 = vld [vmem:[#allocation172_spill] sm:$0xff] }
 0x3b9   : > { %v5450_v3 = vpop.f32.mrf.mxu1  ;;  %5822 = vadd.xlane.f32.xlu1 %v5821_v55  ;;  %v4814_v39 = vadd.f32 %v4813_v51, %v16727_v53  ;;  %v16731_v53 = vld [vmem:[#allocation323_spill] sm:$0xff] }
 0x3ba   : > { %16719 = vst [vmem:[#allocation99_spill] sm:$0xff] %v12650_v63  ;;  %v12658_v34 = vsub.f32 %v16723_v25, %v5944_v18  ;;  %v12661_v4 = vsub.f32 %v16725_v59, %v5944_v18  ;;  %v4823_v62 = vpop.f32.mrf.mxu0  ;;  %v5824_v10 = vsel %vm5679_vm1, %v12650_v63, 0.0  ;;  %v16730_v63 = vld [vmem:[#allocation61_spill] sm:$0xff] }
 0x3bb   : > { %v5825_v45 = vadd.f32 %v5824_v10, %v12652_v19  ;;  %v5687_v33 = vpop.xlane.xlu0 %5686  ;;  %v5452_v55 = vpop.f32.mrf.mxu1  ;;  %v12673_v59 = vadd.f32 %v5450_v3, %v4814_v39  ;;  %v4824_v51 = vadd.f32 %v4823_v62, %v16730_v63  ;;  %v16733_v19 = vld [vmem:[#allocation290_spill] sm:$0xff] }
 0x3bc   : > { %16724 = vst [vmem:[#allocation147_spill] sm:$0xff] %v12658_v34  ;;  %16726 = vst [vmem:[#allocation20_spill] sm:$0xff] %v12661_v4  ;;  %v6143_v47 = vmul.f32 %v12661_v4, %v12661_v4  ;;  %v4829_v12 = vpop.f32.mrf.mxu0  ;;  %v5945_v35 = vmul.f32 0.0051020407, %v5687_v33  ;;  %v12669_v25 = vadd.f32 %v5452_v55, %v4816_v28  ;;  %v6142_v18 = vmul.f32 %v12658_v34, %v12658_v34  ;;  %v16735_v33 = vld [vmem:[#allocation173_spill] sm:$0xff] }
 0x3bd   : > { %16729 = vst [vmem:[#allocation100_spill] sm:$0xff] %v12673_v59  ;;  %v5458_v40 = vpop.f32.mrf.mxu1  ;;  %5826 = vadd.xlane.f32.xlu0 %v5825_v45  ;;  %v4822_v55 = vadd.f32 %v4821_v36, %v16735_v33 }
 0x3be   : > { %16728 = vst [vmem:[#allocation149_spill] sm:$0xff] %v12669_v25  ;;  %v12677_v10 = vsub.f32 %v16731_v53, %v5945_v35  ;;  %v12680_v56 = vsub.f32 %v16733_v19, %v5945_v35  ;;  %v4831_v4 = vpop.f32.mrf.mxu0  ;;  %v5828_v28 = vsel %vm5679_vm1, %v12669_v25, 0.0  ;;  %v6274_v45 = vsel %vm5679_vm1, %v6143_v47, 0.0  ;;  %v16741_v47 = vld [vmem:[#allocation293_spill] sm:$0xff] }
 0x3bf   : > { %v5829_v34 = vadd.f32 %v5828_v28, %v12673_v59  ;;  %v5691_v3 = vpop.xlane.xlu1 %5690  ;;  %v5460_v39 = vpop.f32.mrf.mxu1  ;;  %v12693_v35 = vadd.f32 %v5458_v40, %v4822_v55  ;;  %v6275_v36 = vadd.f32 %v6274_v45, %v6142_v18  ;;  %v16738_v28 = vld [vmem:[#allocation62_spill] sm:$0xff]  ;;  %v16739_v59 = vld [vmem:[#allocation329_spill] sm:$0xff] }
 0x3c0   : > { %16732 = vst [vmem:[#allocation150_spill] sm:$0xff] %v12677_v10  ;;  %16734 = vst [vmem:[#allocation104_spill] sm:$0xff] %v12680_v56  ;;  %v6145_v63 = vmul.f32 %v12680_v56, %v12680_v56  ;;  %v4837_v62 = vpop.f32.mrf.mxu0  ;;  %v5946_v53 = vmul.f32 0.0051020407, %v5691_v3  ;;  %v12689_v50 = vadd.f32 %v5460_v39, %v4824_v51  ;;  %v6144_v19 = vmul.f32 %v12677_v10, %v12677_v10  ;;  %v16743_v3 = vld [vmem:[#allocation175_spill] sm:$0xff]  ;;  %v16746_v10 = vld [vmem:[#allocation301_spill] sm:$0xff] }
 0x3c1   : > { %16737 = vst [vmem:[#allocation22_spill] sm:$0xff] %v12693_v35  ;;  %v5466_v25 = vpop.f32.mrf.mxu1  ;;  %5830 = vadd.xlane.f32.xlu1 %v5829_v34  ;;  %v4832_v33 = vadd.f32 %v4831_v4, %v16738_v28  ;;  %v4830_v39 = vadd.f32 %v4829_v12, %v16743_v3  ;;  %6276 = vadd.xlane.f32.xlu0 %v6275_v36 }
 0x3c2   : > { %16736 = vst [vmem:[#allocation151_spill] sm:$0xff] %v12689_v50  ;;  %v12697_v2 = vsub.f32 %v16739_v59, %v5946_v53  ;;  %v12700_v44 = vsub.f32 %v16741_v47, %v5946_v53  ;;  %v4839_v56 = vpop.f32.mrf.mxu0  ;;  %v5832_v51 = vsel %vm5679_vm1, %v12689_v50, 0.0  ;;  %v6278_v18 = vsel %vm5679_vm1, %v6145_v63, 0.0  ;;  %v16748_v63 = vld [vmem:[#allocation298_spill] sm:$0xff] }
 0x3c3   : > { %v5833_v40 = vadd.f32 %v5832_v51, %v12693_v35  ;;  %v5695_v55 = vpop.xlane.xlu1 %5694  ;;  %v5468_v34 = vpop.f32.mrf.mxu1  ;;  %v12713_v47 = vadd.f32 %v5466_v25, %v4830_v39  ;;  %v6279_v3 = vadd.f32 %v6278_v18, %v6144_v19  ;;  %v16745_v51 = vld [vmem:[#allocation82_spill] sm:$0xff] }
 0x3c4   : > { %16740 = vst [vmem:[#allocation152_spill] sm:$0xff] %v12697_v2  ;;  %16742 = vst [vmem:[#allocation24_spill] sm:$0xff] %v12700_v44  ;;  %v6147_v4 = vmul.f32 %v12700_v44, %v12700_v44  ;;  %v4845_v59 = vpop.f32.mrf.mxu0  ;;  %v5947_v45 = vmul.f32 0.0051020407, %v5695_v55  ;;  %v12709_v53 = vadd.f32 %v5468_v34, %v4832_v33  ;;  %v6146_v28 = vmul.f32 %v12697_v2, %v12697_v2  ;;  %v16750_v55 = vld [vmem:[#allocation177_spill] sm:$0xff] }
 0x3c5   : > { %v5474_v12 = vpop.f32.mrf.mxu1  ;;  %v4840_v36 = vadd.f32 %v4839_v56, %v16745_v51  ;;  %v4838_v34 = vadd.f32 %v4837_v62, %v16750_v55  ;;  %5834 = vadd.xlane.f32.xlu0 %v5833_v40  ;;  %6280 = vadd.xlane.f32.xlu1 %v6279_v3  ;;  %v16752_v40 = vld [vmem:[#allocation84_spill] sm:$0xff] }
 0x3c6   : > { %16744 = vst [vmem:[#allocation153_spill] sm:$0xff] %v12709_v53  ;;  %v12717_v50 = vsub.f32 %v16746_v10, %v5947_v45  ;;  %v12720_v35 = vsub.f32 %v16748_v63, %v5947_v45  ;;  %v4847_v44 = vpop.f32.mrf.mxu0  ;;  %v5836_v33 = vsel %vm5679_vm1, %v12709_v53, 0.0  ;;  %v6282_v56 = vsel %vm5679_vm1, %v6147_v4, 0.0  ;;  %v16754_v4 = vld [vmem:[#allocation304_spill] sm:$0xff] }
 0x3c7   : > { %v5837_v2 = vadd.f32 %v5836_v33, %v12713_v47  ;;  %v5699_v25 = vpop.xlane.xlu0 %5698  ;;  %v5476_v19 = vpop.f32.mrf.mxu1  ;;  %v12733_v63 = vadd.f32 %v5474_v12, %v4838_v34  ;;  %v6283_v33 = vadd.f32 %v6282_v56, %v6146_v28  ;;  %v4848_v3 = vadd.f32 %v4847_v44, %v16752_v40 }
 0x3c8   : > { %16747 = vst [vmem:[#allocation103_spill] sm:$0xff] %v12717_v50  ;;  %16749 = vst [vmem:[#allocation155_spill] sm:$0xff] %v12720_v35  ;;  %v6149_v10 = vmul.f32 %v12720_v35, %v12720_v35  ;;  %v4853_v39 = vpop.f32.mrf.mxu0  ;;  %v5948_v18 = vmul.f32 0.0051020407, %v5699_v25  ;;  %v12729_v45 = vadd.f32 %v5476_v19, %v4840_v36  ;;  %v6148_v51 = vmul.f32 %v12717_v50, %v12717_v50  ;;  %v16756_v25 = vld [vmem:[#allocation178_spill] sm:$0xff] }
 0x3c9   : > { %v5482_v62 = vpop.f32.mrf.mxu1  ;;  %v4846_v19 = vadd.f32 %v4845_v59, %v16756_v25  ;;  %6284 = vadd.xlane.f32.xlu0 %v6283_v33  ;;  %5838 = vadd.xlane.f32.xlu1 %v5837_v2  ;;  %v16757_v33 = vld [vmem:[#allocation64_spill] sm:$0xff] }
 0x3ca   : > { %16751 = vst [vmem:[#allocation7_spill] sm:$0xff] %v12729_v45  ;;  %v12737_v55 = vsub.f32 %v12233_v31, %v5948_v18  ;;  %v12740_v53 = vsub.f32 %v16754_v4, %v5948_v18  ;;  %v4855_v35 = vpop.f32.mrf.mxu0  ;;  %v5840_v36 = vsel %vm5679_vm1, %v12729_v45, 0.0  ;;  %v6286_v44 = vsel %vm5679_vm1, %v6149_v10, 0.0  ;;  %v16759_v10 = vld [vmem:[#allocation310_spill] sm:$0xff] }
 0x3cb   : > { %v5841_v50 = vadd.f32 %v5840_v36, %v12733_v63  ;;  %v5703_v12 = vpop.xlane.xlu1 %5702  ;;  %v5484_v28 = vpop.f32.mrf.mxu1  ;;  %v12753_v4 = vadd.f32 %v5482_v62, %v4846_v19  ;;  %v6287_v36 = vadd.f32 %v6286_v44, %v6148_v51  ;;  %v4856_v2 = vadd.f32 %v4855_v35, %v16757_v33 }
 0x3cc   : > { %16753 = vst [vmem:[#allocation157_spill] sm:$0xff] %v12737_v55  ;;  %16755 = vst [vmem:[#allocation107_spill] sm:$0xff] %v12740_v53  ;;  %v6151_v31 = vmul.f32 %v12740_v53, %v12740_v53  ;;  %v4861_v34 = vpop.f32.mrf.mxu0  ;;  %v5949_v56 = vmul.f32 0.0051020407, %v5703_v12  ;;  %v12749_v18 = vadd.f32 %v5484_v28, %v4848_v3  ;;  %v6150_v40 = vmul.f32 %v12737_v55, %v12737_v55  ;;  %v16761_v12 = vld [vmem:[#allocation181_spill] sm:$0xff] }
 0x3cd   : > { %v5490_v59 = vpop.f32.mrf.mxu1  ;;  %v4854_v28 = vadd.f32 %v4853_v39, %v16761_v12  ;;  %5842 = vadd.xlane.f32.xlu0 %v5841_v50  ;;  %6288 = vadd.xlane.f32.xlu1 %v6287_v36  ;;  %v16762_v50 = vld [vmem:[#allocation66_spill] sm:$0xff] }
 0x3ce   : > { %v12757_v25 = vsub.f32 %v12250_v58, %v5949_v56  ;;  %v12760_v45 = vsub.f32 %v16759_v10, %v5949_v56  ;;  %v4863_v53 = vpop.f32.mrf.mxu0  ;;  %v5844_v3 = vsel %vm5679_vm1, %v12749_v18, 0.0  ;;  %v6290_v35 = vsel %vm5679_vm1, %v6151_v31, 0.0 }
 0x3cf   : > { %v5845_v55 = vadd.f32 %v5844_v3, %v12753_v4  ;;  %v5707_v62 = vpop.xlane.xlu0 %5706  ;;  %v5492_v51 = vpop.f32.mrf.mxu1  ;;  %v12773_v10 = vadd.f32 %v5490_v59, %v4854_v28  ;;  %v6291_v3 = vadd.f32 %v6290_v35, %v6150_v40  ;;  %v4864_v36 = vadd.f32 %v4863_v53, %v16762_v50 }
 0x3d0   : > { %16758 = vst [vmem:[#allocation160_spill] sm:$0xff] %v12757_v25  ;;  %16760 = vst [vmem:[#allocation26_spill] sm:$0xff] %v12760_v45  ;;  %v6153_v58 = vmul.f32 %v12760_v45, %v12760_v45  ;;  %v4869_v19 = vpop.f32.mrf.mxu0  ;;  %v5950_v44 = vmul.f32 0.0051020407, %v5707_v62  ;;  %v12769_v56 = vadd.f32 %v5492_v51, %v4856_v2  ;;  %v6152_v33 = vmul.f32 %v12757_v25, %v12757_v25  ;;  %v16765_v62 = vld [vmem:[#allocation183_spill] sm:$0xff] }
 0x3d1   : > { %v5498_v39 = vpop.f32.mrf.mxu1  ;;  %v4862_v51 = vadd.f32 %v4861_v34, %v16765_v62  ;;  %5846 = vadd.xlane.f32.xlu1 %v5845_v55  ;;  %6292 = vadd.xlane.f32.xlu0 %v6291_v3  ;;  %v16766_v55 = vld [vmem:[#allocation187_spill] sm:$0xff] }
 0x3d2   : > { %v12777_v12 = vsub.f32 %v12265_v57, %v5950_v44  ;;  %v12780_v31 = vsub.f32 %v12261_v61, %v5950_v44  ;;  %v4871_v45 = vpop.f32.mrf.mxu0  ;;  %v5848_v2 = vsel %vm5679_vm1, %v12769_v56, 0.0  ;;  %v6294_v53 = vsel %vm5679_vm1, %v6153_v58, 0.0 }
 0x3d3   : > { %v5849_v25 = vadd.f32 %v5848_v2, %v12773_v10  ;;  %v5711_v59 = vpop.xlane.xlu1 %5710  ;;  %v5500_v40 = vpop.f32.mrf.mxu1  ;;  %v12793_v50 = vadd.f32 %v5498_v39, %v4862_v51  ;;  %v6295_v2 = vadd.f32 %v6294_v53, %v6152_v33  ;;  %v4872_v3 = vadd.f32 %v4871_v45, %v16766_v55 }
 0x3d4   : > { %16763 = vst [vmem:[#allocation161_spill] sm:$0xff] %v12777_v12  ;;  %16764 = vst [vmem:[#allocation28_spill] sm:$0xff] %v12780_v31  ;;  %v6155_v57 = vmul.f32 %v12780_v31, %v12780_v31  ;;  %v4877_v28 = vpop.f32.mrf.mxu0  ;;  %v5951_v61 = vmul.f32 0.0051020407, %v5711_v59  ;;  %v12789_v35 = vadd.f32 %v5500_v40, %v4864_v36  ;;  %v6154_v44 = vmul.f32 %v12777_v12, %v12777_v12  ;;  %v16769_v59 = vld [vmem:[#allocation186_spill] sm:$0xff] }
 0x3d5   : > { %v5506_v34 = vpop.f32.mrf.mxu1  ;;  %v4870_v40 = vadd.f32 %v4869_v19, %v16769_v59  ;;  %6296 = vadd.xlane.f32.xlu1 %v6295_v2  ;;  %5850 = vadd.xlane.f32.xlu0 %v5849_v25  ;;  %v16770_v2 = vld [vmem:[#allocation192_spill] sm:$0xff] }
 0x3d6   : > { %v12797_v62 = vsub.f32 %v12280_v14, %v5951_v61  ;;  %v12800_v58 = vsub.f32 %v12278_v13, %v5951_v61  ;;  %v4879_v31 = vpop.f32.mrf.mxu0  ;;  %v5852_v36 = vsel %vm5679_vm1, %v12789_v35, 0.0  ;;  %v6298_v45 = vsel %vm5679_vm1, %v6155_v57, 0.0 }
 0x3d7   : > { %v5853_v12 = vadd.f32 %v5852_v36, %v12793_v50  ;;  %v5715_v39 = vpop.xlane.xlu0 %5714  ;;  %v5508_v33 = vpop.f32.mrf.mxu1  ;;  %v12813_v55 = vadd.f32 %v5506_v34, %v4870_v40  ;;  %v6299_v36 = vadd.f32 %v6298_v45, %v6154_v44  ;;  %v4880_v25 = vadd.f32 %v4879_v31, %v16770_v2 }
 0x3d8   : > { %16767 = vst [vmem:[#allocation163_spill] sm:$0xff] %v12797_v62  ;;  %16768 = vst [vmem:[#allocation9_spill] sm:$0xff] %v12800_v58  ;;  %v6157_v14 = vmul.f32 %v12800_v58, %v12800_v58  ;;  %v4885_v51 = vpop.f32.mrf.mxu0  ;;  %v5952_v13 = vmul.f32 0.0051020407, %v5715_v39  ;;  %v12809_v53 = vadd.f32 %v5508_v33, %v4872_v3  ;;  %v6156_v61 = vmul.f32 %v12797_v62, %v12797_v62  ;;  %v16773_v39 = vld [vmem:[#allocation189_spill] sm:$0xff] }
 0x3d9   : > { %v5514_v19 = vpop.f32.mrf.mxu1  ;;  %v4878_v33 = vadd.f32 %v4877_v28, %v16773_v39  ;;  %5854 = vadd.xlane.f32.xlu1 %v5853_v12  ;;  %6300 = vadd.xlane.f32.xlu0 %v6299_v36  ;;  %v16774_v12 = vld [vmem:[#allocation195_spill] sm:$0xff] }
 0x3da   : > { %v12817_v59 = vsub.f32 %v12297_v9, %v5952_v13  ;;  %v12820_v57 = vsub.f32 %v12295_v48, %v5952_v13  ;;  %v4887_v58 = vpop.f32.mrf.mxu0  ;;  %v5856_v3 = vsel %vm5679_vm1, %v12809_v53, 0.0  ;;  %v6302_v31 = vsel %vm5679_vm1, %v6157_v14, 0.0 }
 0x3db   : > { %v5857_v62 = vadd.f32 %v5856_v3, %v12813_v55  ;;  %v5719_v34 = vpop.xlane.xlu1 %5718  ;;  %v5516_v44 = vpop.f32.mrf.mxu1  ;;  %v12833_v2 = vadd.f32 %v5514_v19, %v4878_v33  ;;  %v6303_v3 = vadd.f32 %v6302_v31, %v6156_v61  ;;  %v4888_v36 = vadd.f32 %v4887_v58, %v16774_v12 }
 0x3dc   : > { %16771 = vst [vmem:[#allocation165_spill] sm:$0xff] %v12817_v59  ;;  %16772 = vst [vmem:[#allocation108_spill] sm:$0xff] %v12820_v57  ;;  %v6159_v9 = vmul.f32 %v12820_v57, %v12820_v57  ;;  %v4893_v40 = vpop.f32.mrf.mxu0  ;;  %v5953_v48 = vmul.f32 0.0051020407, %v5719_v34  ;;  %v12829_v45 = vadd.f32 %v5516_v44, %v4880_v25  ;;  %v6158_v13 = vmul.f32 %v12817_v59, %v12817_v59  ;;  %v16777_v34 = vld [vmem:[#allocation193_spill] sm:$0xff] }
 0x3dd   : > { %v5522_v28 = vpop.f32.mrf.mxu1  ;;  %v4886_v44 = vadd.f32 %v4885_v51, %v16777_v34  ;;  %6304 = vadd.xlane.f32.xlu1 %v6303_v3  ;;  %5858 = vadd.xlane.f32.xlu0 %v5857_v62  ;;  %v16778_v3 = vld [vmem:[#allocation198_spill] sm:$0xff] }
 0x3de   : > { %v12837_v39 = vsub.f32 %v12312_v17, %v5953_v48  ;;  %v12840_v14 = vsub.f32 %v12308_v60, %v5953_v48  ;;  %v4895_v57 = vpop.f32.mrf.mxu0  ;;  %v5860_v25 = vsel %vm5679_vm1, %v12829_v45, 0.0  ;;  %v6306_v58 = vsel %vm5679_vm1, %v6159_v9, 0.0 }
 0x3df   : > { %v5861_v59 = vadd.f32 %v5860_v25, %v12833_v2  ;;  %v5723_v19 = vpop.xlane.xlu0 %5722  ;;  %v5524_v61 = vpop.f32.mrf.mxu1  ;;  %v12853_v12 = vadd.f32 %v5522_v28, %v4886_v44  ;;  %v6307_v25 = vadd.f32 %v6306_v58, %v6158_v13  ;;  %v4896_v62 = vadd.f32 %v4895_v57, %v16778_v3 }
 0x3e0   : > { %16775 = vst [vmem:[#allocation166_spill] sm:$0xff] %v12837_v39  ;;  %16776 = vst [vmem:[#allocation11_spill] sm:$0xff] %v12840_v14  ;;  %v6161_v17 = vmul.f32 %v12840_v14, %v12840_v14  ;;  %v4901_v33 = vpop.f32.mrf.mxu0  ;;  %v5954_v60 = vmul.f32 0.0051020407, %v5723_v19  ;;  %v12849_v31 = vadd.f32 %v5524_v61, %v4888_v36  ;;  %v6160_v48 = vmul.f32 %v12837_v39, %v12837_v39  ;;  %v16781_v19 = vld [vmem:[#allocation197_spill] sm:$0xff] }
 0x3e1   : > { %v5530_v51 = vpop.f32.mrf.mxu1  ;;  %v4894_v61 = vadd.f32 %v4893_v40, %v16781_v19  ;;  %5862 = vadd.xlane.f32.xlu1 %v5861_v59  ;;  %6308 = vadd.xlane.f32.xlu0 %v6307_v25  ;;  %v16783_v59 = vld [vmem:[#allocation203_spill] sm:$0xff] }
 0x3e2   : > { %v12857_v34 = vsub.f32 %v12327_v1, %v5954_v60  ;;  %v12860_v9 = vsub.f32 %v12325_v49, %v5954_v60  ;;  %v4903_v14 = vpop.f32.mrf.mxu0  ;;  %v5864_v36 = vsel %vm5679_vm1, %v12849_v31, 0.0  ;;  %v6310_v57 = vsel %vm5679_vm1, %v6161_v17, 0.0 }
 0x3e3   : > { %v5865_v39 = vadd.f32 %v5864_v36, %v12853_v12  ;;  %v5727_v28 = vpop.xlane.xlu1 %5726  ;;  %v5532_v13 = vpop.f32.mrf.mxu1  ;;  %v12873_v3 = vadd.f32 %v5530_v51, %v4894_v61  ;;  %v6311_v36 = vadd.f32 %v6310_v57, %v6160_v48  ;;  %v4904_v25 = vadd.f32 %v4903_v14, %v16783_v59 }
 0x3e4   : > { %16779 = vst [vmem:[#allocation169_spill] sm:$0xff] %v12857_v34  ;;  %16780 = vst [vmem:[#allocation111_spill] sm:$0xff] %v12860_v9  ;;  %v6163_v1 = vmul.f32 %v12860_v9, %v12860_v9  ;;  %v4909_v44 = vpop.f32.mrf.mxu0  ;;  %v5955_v49 = vmul.f32 0.0051020407, %v5727_v28  ;;  %v12869_v58 = vadd.f32 %v5532_v13, %v4896_v62  ;;  %v6162_v60 = vmul.f32 %v12857_v34, %v12857_v34  ;;  %v16786_v28 = vld [vmem:[#allocation201_spill] sm:$0xff] }
 0x3e5   : > { %16782 = vst [vmem:[#allocation171_spill] sm:$0xff] %v12873_v3  ;;  %v5538_v40 = vpop.f32.mrf.mxu1  ;;  %v4902_v13 = vadd.f32 %v4901_v33, %v16786_v28  ;;  %6312 = vadd.xlane.f32.xlu1 %v6311_v36  ;;  %5866 = vadd.xlane.f32.xlu0 %v5865_v39  ;;  %v16787_v36 = vld [vmem:[#allocation207_spill] sm:$0xff] }
 0x3e6   : > { %v12877_v19 = vsub.f32 %v12344_v26, %v5955_v49  ;;  %v12880_v17 = vsub.f32 %v12342_v15, %v5955_v49  ;;  %v4911_v9 = vpop.f32.mrf.mxu0  ;;  %v5868_v62 = vsel %vm5679_vm1, %v12869_v58, 0.0  ;;  %v6314_v14 = vsel %vm5679_vm1, %v6163_v1, 0.0 }
 0x3e7   : > { %v5869_v34 = vadd.f32 %v5868_v62, %v12873_v3  ;;  %v5731_v51 = vpop.xlane.xlu0 %5730  ;;  %v5540_v48 = vpop.f32.mrf.mxu1  ;;  %v12893_v59 = vadd.f32 %v5538_v40, %v4902_v13  ;;  %v6315_v62 = vadd.f32 %v6314_v14, %v6162_v60  ;;  %v4912_v39 = vadd.f32 %v4911_v9, %v16787_v36 }
 0x3e8   : > { %16784 = vst [vmem:[#allocation30_spill] sm:$0xff] %v12877_v19  ;;  %16785 = vst [vmem:[#allocation2_spill] sm:$0xff] %v12880_v17  ;;  %v6165_v26 = vmul.f32 %v12880_v17, %v12880_v17  ;;  %v4917_v61 = vpop.f32.mrf.mxu0  ;;  %v5956_v15 = vmul.f32 0.0051020407, %v5731_v51  ;;  %v12889_v57 = vadd.f32 %v5540_v48, %v4904_v25  ;;  %v6164_v49 = vmul.f32 %v12877_v19, %v12877_v19  ;;  %v16790_v51 = vld [vmem:[#allocation206_spill] sm:$0xff] }
 0x3e9   : > { %v5546_v33 = vpop.f32.mrf.mxu1  ;;  %v4910_v48 = vadd.f32 %v4909_v44, %v16790_v51  ;;  %5870 = vadd.xlane.f32.xlu1 %v5869_v34  ;;  %6316 = vadd.xlane.f32.xlu0 %v6315_v62  ;;  %v16792_v34 = vld [vmem:[#allocation212_spill] sm:$0xff] }
 0x3ea   : > { %v12897_v28 = vsub.f32 %v12359_v7, %v5956_v15  ;;  %v12900_v1 = vsub.f32 %v12355_v23, %v5956_v15  ;;  %v4919_v17 = vpop.f32.mrf.mxu0  ;;  %v5872_v25 = vsel %vm5679_vm1, %v12889_v57, 0.0  ;;  %v6318_v9 = vsel %vm5679_vm1, %v6165_v26, 0.0 }
 0x3eb   : > { %v5873_v19 = vadd.f32 %v5872_v25, %v12893_v59  ;;  %v5735_v40 = vpop.xlane.xlu1 %5734  ;;  %v5548_v60 = vpop.f32.mrf.mxu1  ;;  %v12913_v36 = vadd.f32 %v5546_v33, %v4910_v48  ;;  %v6319_v25 = vadd.f32 %v6318_v9, %v6164_v49  ;;  %v4920_v62 = vadd.f32 %v4919_v17, %v16792_v34 }
 0x3ec   : > { %16788 = vst [vmem:[#allocation32_spill] sm:$0xff] %v12897_v28  ;;  %16789 = vst [vmem:[#allocation174_spill] sm:$0xff] %v12900_v1  ;;  %v6166_v7 = vmul.f32 %v12897_v28, %v12897_v28  ;;  %v6167_v23 = vmul.f32 %v12900_v1, %v12900_v1  ;;  %v4925_v13 = vpop.f32.mrf.mxu0  ;;  %v5957_v14 = vmul.f32 0.0051020407, %v5735_v40  ;;  %v12911_v15 = vadd.f32 %v5548_v60, %v4912_v39  ;;  %v16795_v40 = vld [vmem:[#allocation209_spill] sm:$0xff] }
 0x3ed   : > { %16791 = vst [vmem:[#allocation13_spill] sm:$0xff] %v12913_v36  ;;  %v5554_v44 = vpop.f32.mrf.mxu1  ;;  %v4918_v39 = vadd.f32 %v4917_v61, %v16795_v40  ;;  %6320 = vadd.xlane.f32.xlu1 %v6319_v25  ;;  %5874 = vadd.xlane.f32.xlu0 %v5873_v19  ;;  %v16798_v19 = vld [vmem:[#allocation215_spill] sm:$0xff] }
 0x3ee   : > { %v12917_v51 = vsub.f32 %v12374_v42, %v5957_v14  ;;  %v12920_v26 = vsub.f32 %v12372_v16, %v5957_v14  ;;  %v4927_v28 = vpop.f32.mrf.mxu0  ;;  %v5876_v1 = vsel %vm5679_vm1, %v12911_v15, 0.0  ;;  %v5739_v3 = vpop.xlane.xlu0 %5738  ;;  %v6322_v17 = vsel %vm5679_vm1, %v6167_v23, 0.0 }
 0x3ef   : > { %v5877_v33 = vadd.f32 %v5876_v1, %v12913_v36  ;;  %v5958_v49 = vmul.f32 0.0051020407, %v5739_v3  ;;  %v5556_v48 = vpop.f32.mrf.mxu1  ;;  %v6323_v14 = vadd.f32 %v6322_v17, %v6166_v7  ;;  %v4928_v25 = vadd.f32 %v4927_v28, %v16798_v19 }
 0x3f0   : > { %16793 = vst [vmem:[#allocation176_spill] sm:$0xff] %v12917_v51  ;;  %16794 = vst [vmem:[#allocation114_spill] sm:$0xff] %v12920_v26  ;;  %v6168_v42 = vmul.f32 %v12917_v51, %v12917_v51  ;;  %v6169_v16 = vmul.f32 %v12920_v26, %v12920_v26  ;;  %v4933_v60 = vpop.f32.mrf.mxu0  ;;  %v12931_v9 = vadd.f32 %v5556_v48, %v4920_v62  ;;  %v16799_v48 = vld [vmem:[#allocation213_spill] sm:$0xff] }
 0x3f1   : > { %v12934_v61 = vsub.f32 %v12391_v54, %v5958_v49  ;;  %v12937_v1 = vsub.f32 %v12389_v0, %v5958_v49  ;;  %v5562_v3 = vpop.f32.mrf.mxu1  ;;  %v12940_v23 = vadd.f32 %v5554_v44, %v4918_v39  ;;  %v4926_v7 = vadd.f32 %v4925_v13, %v16799_v48  ;;  %5878 = vadd.xlane.f32.xlu1 %v5877_v33  ;;  %v16800_v48 = vld [vmem:[#allocation218_spill] sm:$0xff] }
 0x3f2   : > { %v4935_v34 = vpop.f32.mrf.mxu0  ;;  %v5880_v40 = vsel %vm5679_vm1, %v12931_v9, 0.0  ;;  %v5743_v26 = vpop.xlane.xlu1 %5742  ;;  %v6326_v62 = vsel %vm5679_vm1, %v6169_v16, 0.0  ;;  %6324 = vadd.xlane.f32.xlu0 %v6323_v14 }
 0x3f3   : > { %16796 = vst [vmem:[#allocation179_spill] sm:$0xff] %v12934_v61  ;;  %16797 = vst [vmem:[#allocation15_spill] sm:$0xff] %v12937_v1  ;;  %v6170_v54 = vmul.f32 %v12934_v61, %v12934_v61  ;;  %v6171_v0 = vmul.f32 %v12937_v1, %v12937_v1  ;;  %v5564_v49 = vpop.f32.mrf.mxu1  ;;  %v5881_v28 = vadd.f32 %v5880_v40, %v12940_v23  ;;  %v5959_v39 = vmul.f32 0.0051020407, %v5743_v26 }
 0x3f4   : > { %v4941_v44 = vpop.f32.mrf.mxu0  ;;  %v12951_v17 = vadd.f32 %v5564_v49, %v4928_v25  ;;  %v6327_v19 = vadd.f32 %v6326_v62, %v6168_v42  ;;  %v12953_v51 = vadd.f32 %v5562_v3, %v4926_v7  ;;  %v4936_v61 = vadd.f32 %v4935_v34, %v16800_v48  ;;  %v16803_v25 = vld [vmem:[#allocation217_spill] sm:$0xff]  ;;  %v16806_v48 = vld [vmem:[#allocation223_spill] sm:$0xff] }
 0x3f5   : > { %v5570_v16 = vpop.f32.mrf.mxu1  ;;  %v6330_v13 = vsel %vm5679_vm1, %v6171_v0, 0.0  ;;  %v12958_v36 = vsub.f32 %v12406_v20, %v5959_v39  ;;  %v12961_v33 = vsub.f32 %v12402_v41, %v5959_v39  ;;  %v4934_v42 = vadd.f32 %v4933_v60, %v16803_v25 }
 0x3f6   : > { %v4943_v40 = vpop.f32.mrf.mxu0  ;;  %v5884_v26 = vsel %vm5679_vm1, %v12951_v17, 0.0  ;;  %v5747_v14 = vpop.xlane.xlu0 %5746  ;;  %6328 = vadd.xlane.f32.xlu1 %v6327_v19  ;;  %5882 = vadd.xlane.f32.xlu0 %v5881_v28  ;;  %v6331_v49 = vadd.f32 %v6330_v13, %v6170_v54  ;;  %v16807_v28 = vld [vmem:[#allocation221_spill] sm:$0xff] }
 0x3f7   : > { %16801 = vst [vmem:[#allocation180_spill] sm:$0xff] %v12958_v36  ;;  %16802 = vst [vmem:[#allocation115_spill] sm:$0xff] %v12961_v33  ;;  %v5885_v3 = vadd.f32 %v5884_v26, %v12953_v51  ;;  %v5960_v62 = vmul.f32 0.0051020407, %v5747_v14  ;;  %v5572_v7 = vpop.f32.mrf.mxu1  ;;  %v6172_v34 = vmul.f32 %v12958_v36, %v12958_v36  ;;  %v6173_v20 = vmul.f32 %v12961_v33, %v12961_v33 }
 0x3f8   : > { %v4949_v41 = vpop.f32.mrf.mxu0  ;;  %v12971_v0 = vadd.f32 %v5572_v7, %v4936_v61  ;;  %v4944_v26 = vadd.f32 %v4943_v40, %v16806_v48  ;;  %v12980_v14 = vadd.f32 %v5570_v16, %v4934_v42  ;;  %v4942_v54 = vadd.f32 %v4941_v44, %v16807_v28  ;;  %v16808_v28 = vld [vmem:[#allocation227_spill] sm:$0xff] }
 0x3f9   : > { %v12974_v39 = vsub.f32 %v12419_v27, %v5960_v62  ;;  %v12977_v60 = vsub.f32 %v12417_v43, %v5960_v62  ;;  %v5578_v19 = vpop.f32.mrf.mxu1  ;;  %v6334_v61 = vsel %vm5679_vm1, %v6173_v20, 0.0 }
 0x3fa   : > { %v4951_v25 = vpop.f32.mrf.mxu0  ;;  %v5888_v1 = vsel %vm5679_vm1, %v12971_v0, 0.0  ;;  %v5751_v33 = vpop.xlane.xlu1 %5750  ;;  %5886 = vadd.xlane.f32.xlu1 %v5885_v3  ;;  %6332 = vadd.xlane.f32.xlu0 %v6331_v49  ;;  %v6335_v7 = vadd.f32 %v6334_v61, %v6172_v34  ;;  %v12993_v48 = vadd.f32 %v5578_v19, %v4942_v54 }
 0x3fb   : > { %16804 = vst [vmem:[#allocation182_spill] sm:$0xff] %v12974_v39  ;;  %16805 = vst [vmem:[#allocation34_spill] sm:$0xff] %v12977_v60  ;;  %v6174_v27 = vmul.f32 %v12974_v39, %v12974_v39  ;;  %v6175_v43 = vmul.f32 %v12977_v60, %v12977_v60  ;;  %v5580_v13 = vpop.f32.mrf.mxu1  ;;  %v5889_v16 = vadd.f32 %v5888_v1, %v12980_v14  ;;  %v5961_v42 = vmul.f32 0.0051020407, %v5751_v33 }
 0x3fc   : > { %v4957_v40 = vpop.f32.mrf.mxu0  ;;  %v12991_v62 = vadd.f32 %v5580_v13, %v4944_v26  ;;  %v4952_v39 = vadd.f32 %v4951_v25, %v16808_v28  ;;  %v16811_v26 = vld [vmem:[#allocation226_spill] sm:$0xff]  ;;  %v16814_v28 = vld [vmem:[#allocation233_spill] sm:$0xff] }
 0x3fd   : > { %v5586_v20 = vpop.f32.mrf.mxu1  ;;  %v6338_v44 = vsel %vm5679_vm1, %v6175_v43, 0.0  ;;  %v12998_v36 = vsub.f32 %v12433_v24, %v5961_v42  ;;  %v13001_v3 = vsub.f32 %v12431_v6, %v5961_v42  ;;  %v4950_v34 = vadd.f32 %v4949_v41, %v16811_v26 }
 0x3fe   : > { %v4959_v1 = vpop.f32.mrf.mxu0  ;;  %v5892_v33 = vsel %vm5679_vm1, %v12991_v62, 0.0  ;;  %v5755_v49 = vpop.xlane.xlu0 %5754  ;;  %6336 = vadd.xlane.f32.xlu1 %v6335_v7  ;;  %5890 = vadd.xlane.f32.xlu0 %v5889_v16  ;;  %v6339_v13 = vadd.f32 %v6338_v44, %v6174_v27  ;;  %v16815_v16 = vld [vmem:[#allocation232_spill] sm:$0xff] }
 0x3ff   : > { %16809 = vst [vmem:[#allocation184_spill] sm:$0xff] %v12998_v36  ;;  %16810 = vst [vmem:[#allocation36_spill] sm:$0xff] %v13001_v3  ;;  %v5893_v19 = vadd.f32 %v5892_v33, %v12993_v48  ;;  %v5962_v61 = vmul.f32 0.0051020407, %v5755_v49  ;;  %v5588_v54 = vpop.f32.mrf.mxu1  ;;  %v6176_v25 = vmul.f32 %v12998_v36, %v12998_v36  ;;  %v6177_v24 = vmul.f32 %v13001_v3, %v13001_v3 }
 0x400   : > { %v4965_v6 = vpop.f32.mrf.mxu0  ;;  %v13011_v43 = vadd.f32 %v5588_v54, %v4952_v39  ;;  %v4960_v33 = vadd.f32 %v4959_v1, %v16814_v28  ;;  %v13020_v49 = vadd.f32 %v5586_v20, %v4950_v34  ;;  %v4958_v27 = vadd.f32 %v4957_v40, %v16815_v16  ;;  %v16818_v16 = vld [vmem:[#allocation241_spill] sm:$0xff] }
 0x401   : > { %v13014_v42 = vsub.f32 %v12444_v37, %v5962_v61  ;;  %v13017_v41 = vsub.f32 %v12440_v29, %v5962_v61  ;;  %v5594_v7 = vpop.f32.mrf.mxu1  ;;  %v6342_v39 = vsel %vm5679_vm1, %v6177_v24, 0.0 }
 0x402   : > { %v4967_v26 = vpop.f32.mrf.mxu0  ;;  %v5896_v60 = vsel %vm5679_vm1, %v13011_v43, 0.0  ;;  %v5759_v3 = vpop.xlane.xlu1 %5758  ;;  %5894 = vadd.xlane.f32.xlu1 %v5893_v19  ;;  %6340 = vadd.xlane.f32.xlu0 %v6339_v13  ;;  %v6343_v54 = vadd.f32 %v6342_v39, %v6176_v25  ;;  %v13033_v28 = vadd.f32 %v5594_v7, %v4958_v27 }
 0x403   : > { %16812 = vst [vmem:[#allocation185_spill] sm:$0xff] %v13014_v42  ;;  %16813 = vst [vmem:[#allocation17_spill] sm:$0xff] %v13017_v41  ;;  %v6178_v37 = vmul.f32 %v13014_v42, %v13014_v42  ;;  %v6179_v29 = vmul.f32 %v13017_v41, %v13017_v41  ;;  %v5596_v44 = vpop.f32.mrf.mxu1  ;;  %v5897_v20 = vadd.f32 %v5896_v60, %v13020_v49  ;;  %v5963_v34 = vmul.f32 0.0051020407, %v5759_v3 }
 0x404   : > { %v4973_v1 = vpop.f32.mrf.mxu0  ;;  %v13031_v61 = vadd.f32 %v5596_v44, %v4960_v33  ;;  %16817 = vst [vmem:[#allocation117_spill] sm:$0xff] %v13033_v28  ;;  %v4968_v42 = vadd.f32 %v4967_v26, %v16818_v16  ;;  %v16821_v33 = vld [vmem:[#allocation235_spill] sm:$0xff]  ;;  %v16824_v16 = vld [vmem:[#allocation246_spill] sm:$0xff] }
 0x405   : > { %v5602_v24 = vpop.f32.mrf.mxu1  ;;  %v6346_v40 = vsel %vm5679_vm1, %v6179_v29, 0.0  ;;  %v13038_v36 = vsub.f32 %v12455_v32, %v5963_v34  ;;  %v13041_v19 = vsub.f32 %v12453_v5, %v5963_v34  ;;  %v4966_v25 = vadd.f32 %v4965_v6, %v16821_v33 }
 0x406   : > { %16816 = vst [vmem:[#allocation188_spill] sm:$0xff] %v13031_v61  ;;  %v4975_v60 = vpop.f32.mrf.mxu0  ;;  %v5900_v3 = vsel %vm5679_vm1, %v13031_v61, 0.0  ;;  %v5763_v13 = vpop.xlane.xlu0 %5762  ;;  %6344 = vadd.xlane.f32.xlu1 %v6343_v54  ;;  %5898 = vadd.xlane.f32.xlu0 %v5897_v20  ;;  %v6347_v44 = vadd.f32 %v6346_v40, %v6178_v37  ;;  %v16825_v20 = vld [vmem:[#allocation243_spill] sm:$0xff] }
 0x407   : > { %16819 = vst [vmem:[#allocation190_spill] sm:$0xff] %v13038_v36  ;;  %16820 = vst [vmem:[#allocation19_spill] sm:$0xff] %v13041_v19  ;;  %v5901_v7 = vadd.f32 %v5900_v3, %v13033_v28  ;;  %v5964_v39 = vmul.f32 0.0051020407, %v5763_v13  ;;  %v5604_v27 = vpop.f32.mrf.mxu1  ;;  %v6180_v26 = vmul.f32 %v13038_v36, %v13038_v36  ;;  %v6181_v32 = vmul.f32 %v13041_v19, %v13041_v19 }
 0x408   : > { %v4981_v5 = vpop.f32.mrf.mxu0  ;;  %v13051_v29 = vadd.f32 %v5604_v27, %v4968_v42  ;;  %v4976_v3 = vadd.f32 %v4975_v60, %v16824_v16  ;;  %v13060_v13 = vadd.f32 %v5602_v24, %v4966_v25  ;;  %v4974_v37 = vadd.f32 %v4973_v1, %v16825_v20  ;;  %v16828_v20 = vld [vmem:[#allocation253_spill] sm:$0xff] }
 0x409   : > { %v13054_v34 = vsub.f32 %v12468_v46, %v5964_v39  ;;  %v13057_v6 = vsub.f32 %v12466_v30, %v5964_v39  ;;  %v5610_v54 = vpop.f32.mrf.mxu1  ;;  %v6350_v42 = vsel %vm5679_vm1, %v6181_v32, 0.0 }
 0x40a   : > { %v4983_v33 = vpop.f32.mrf.mxu0  ;;  %v5904_v41 = vsel %vm5679_vm1, %v13051_v29, 0.0  ;;  %v5767_v19 = vpop.xlane.xlu1 %5766  ;;  %5902 = vadd.xlane.f32.xlu1 %v5901_v7  ;;  %6348 = vadd.xlane.f32.xlu0 %v6347_v44  ;;  %v6351_v27 = vadd.f32 %v6350_v42, %v6180_v26  ;;  %v13073_v16 = vadd.f32 %v5610_v54, %v4974_v37 }
 0x40b   : > { %16822 = vst [vmem:[#allocation191_spill] sm:$0xff] %v13054_v34  ;;  %16823 = vst [vmem:[#allocation120_spill] sm:$0xff] %v13057_v6  ;;  %v6182_v46 = vmul.f32 %v13054_v34, %v13054_v34  ;;  %v6183_v30 = vmul.f32 %v13057_v6, %v13057_v6  ;;  %v5612_v40 = vpop.f32.mrf.mxu1  ;;  %v5905_v24 = vadd.f32 %v5904_v41, %v13060_v13  ;;  %v5965_v25 = vmul.f32 0.0051020407, %v5767_v19 }
 0x40c   : > { %v4989_v60 = vpop.f32.mrf.mxu0  ;;  %v13071_v39 = vadd.f32 %v5612_v40, %v4976_v3  ;;  %16827 = vst [vmem:[#allocation38_spill] sm:$0xff] %v13073_v16  ;;  %v4984_v34 = vadd.f32 %v4983_v33, %v16828_v20  ;;  %v16831_v3 = vld [vmem:[#allocation252_spill] sm:$0xff]  ;;  %v16834_v20 = vld [vmem:[#allocation261_spill] sm:$0xff] }
 0x40d   : > { %v5618_v32 = vpop.f32.mrf.mxu1  ;;  %v6354_v1 = vsel %vm5679_vm1, %v6183_v30, 0.0  ;;  %v13078_v36 = vsub.f32 %v12479_v22, %v5965_v25  ;;  %v13081_v7 = vsub.f32 %v12475_v8, %v5965_v25  ;;  %v4982_v26 = vadd.f32 %v4981_v5, %v16831_v3 }
 0x40e   : > { %16826 = vst [vmem:[#allocation194_spill] sm:$0xff] %v13071_v39  ;;  %v4991_v41 = vpop.f32.mrf.mxu0  ;;  %v5908_v19 = vsel %vm5679_vm1, %v13071_v39, 0.0  ;;  %v5771_v44 = vpop.xlane.xlu0 %5770  ;;  %6352 = vadd.xlane.f32.xlu1 %v6351_v27  ;;  %5906 = vadd.xlane.f32.xlu0 %v5905_v24  ;;  %v6355_v40 = vadd.f32 %v6354_v1, %v6182_v46  ;;  %v16835_v24 = vld [vmem:[#allocation255_spill] sm:$0xff]  ;;  %v16867_v39 = vld [vmem:[#allocation113_spill] sm:$0xff] }
 0x40f   : > { %16829 = vst [vmem:[#allocation196_spill] sm:$0xff] %v13078_v36  ;;  %16830 = vst [vmem:[#allocation40_spill] sm:$0xff] %v13081_v7  ;;  %v5909_v54 = vadd.f32 %v5908_v19, %v13073_v16  ;;  %v5966_v42 = vmul.f32 0.0051020407, %v5771_v44  ;;  %v5620_v37 = vpop.f32.mrf.mxu1  ;;  %v6184_v33 = vmul.f32 %v13078_v36, %v13078_v36  ;;  %v6185_v22 = vmul.f32 %v13081_v7, %v13081_v7 }
 0x410   : > { %v4997_v8 = vpop.f32.mrf.mxu0  ;;  %v13091_v30 = vadd.f32 %v5620_v37, %v4984_v34  ;;  %v4992_v19 = vadd.f32 %v4991_v41, %v16834_v20  ;;  %v13100_v44 = vadd.f32 %v5618_v32, %v4982_v26  ;;  %v4990_v46 = vadd.f32 %v4989_v60, %v16835_v24  ;;  %v16838_v24 = vld [vmem:[#allocation263_spill] sm:$0xff] }
 0x411   : > { %v13094_v25 = vsub.f32 %v12490_v52, %v5966_v42  ;;  %v13097_v5 = vsub.f32 %v12488_v21, %v5966_v42  ;;  %v5626_v27 = vpop.f32.mrf.mxu1  ;;  %v6358_v34 = vsel %vm5679_vm1, %v6185_v22, 0.0 }
 0x412   : > { %v4999_v3 = vpop.f32.mrf.mxu0  ;;  %v5912_v6 = vsel %vm5679_vm1, %v13091_v30, 0.0  ;;  %v5775_v7 = vpop.xlane.xlu1 %5774  ;;  %5910 = vadd.xlane.f32.xlu1 %v5909_v54  ;;  %6356 = vadd.xlane.f32.xlu0 %v6355_v40  ;;  %v6359_v37 = vadd.f32 %v6358_v34, %v6184_v33  ;;  %v13113_v20 = vadd.f32 %v5626_v27, %v4990_v46 }
 0x413   : > { %16832 = vst [vmem:[#allocation199_spill] sm:$0xff] %v13094_v25  ;;  %16833 = vst [vmem:[#allocation21_spill] sm:$0xff] %v13097_v5  ;;  %v6186_v52 = vmul.f32 %v13094_v25, %v13094_v25  ;;  %v6187_v21 = vmul.f32 %v13097_v5, %v13097_v5  ;;  %v5628_v1 = vpop.f32.mrf.mxu1  ;;  %v5913_v32 = vadd.f32 %v5912_v6, %v13100_v44  ;;  %v5967_v26 = vmul.f32 0.0051020407, %v5775_v7 }
 0x414   : > { %v5005_v41 = vpop.f32.mrf.mxu0  ;;  %v13111_v42 = vadd.f32 %v5628_v1, %v4992_v19  ;;  %16837 = vst [vmem:[#allocation121_spill] sm:$0xff] %v13113_v20  ;;  %v5000_v25 = vadd.f32 %v4999_v3, %v16838_v24  ;;  %v16841_v19 = vld [vmem:[#allocation285_spill] sm:$0xff] }
 0x415   : > { %v5634_v22 = vpop.f32.mrf.mxu1  ;;  %v6362_v60 = vsel %vm5679_vm1, %v6187_v21, 0.0  ;;  %v13118_v36 = vsub.f32 %v12503_v11, %v5967_v26  ;;  %v13121_v54 = vsub.f32 %v12501_v38, %v5967_v26  ;;  %v4998_v33 = vadd.f32 %v4997_v8, %v16841_v19  ;;  %v16842_v26 = vld [vmem:[#allocation78_spill] sm:$0xff]  ;;  %v16844_v8 = vld [vmem:[#allocation73_spill] sm:$0xff] }
 0x416   : > { %16836 = vst [vmem:[#allocation200_spill] sm:$0xff] %v13111_v42  ;;  %v5007_v6 = vpop.f32.mrf.mxu0  ;;  %v5916_v7 = vsel %vm5679_vm1, %v13111_v42, 0.0  ;;  %v5779_v40 = vpop.xlane.xlu0 %5778  ;;  %6360 = vadd.xlane.f32.xlu1 %v6359_v37  ;;  %5914 = vadd.xlane.f32.xlu0 %v5913_v32  ;;  %v6363_v1 = vadd.f32 %v6362_v60, %v6186_v52  ;;  %v16847_v32 = vld [vmem:[#allocation291_spill] sm:$0xff]  ;;  %v16851_v42 = vld [vmem:[#allocation106_spill] sm:$0xff] }
 0x417   : > { %16839 = vst [vmem:[#allocation202_spill] sm:$0xff] %v13118_v36  ;;  %16840 = vst [vmem:[#allocation123_spill] sm:$0xff] %v13121_v54  ;;  %v5917_v27 = vadd.f32 %v5916_v7, %v13113_v20  ;;  %v5968_v34 = vmul.f32 0.0051020407, %v5779_v40  ;;  %v5636_v46 = vpop.f32.mrf.mxu1  ;;  %v6188_v3 = vmul.f32 %v13118_v36, %v13118_v36  ;;  %v6189_v11 = vmul.f32 %v13121_v54, %v13121_v54  ;;  %v16846_v7 = vld [vmem:[#allocation267_spill] sm:$0xff] }
 0x418   : > { %v5013_v38 = vpop.f32.mrf.mxu0  ;;  %v13131_v21 = vadd.f32 %v5636_v46, %v5000_v25  ;;  %v5008_v40 = vadd.f32 %v5007_v6, %v16846_v7  ;;  %v13140_v5 = vadd.f32 %v5634_v22, %v4998_v33  ;;  %v5006_v52 = vadd.f32 %v5005_v41, %v16847_v32  ;;  %v16850_v32 = vld [vmem:[#allocation272_spill] sm:$0xff] }
 0x419   : > { %v13134_v24 = vsub.f32 %v16842_v26, %v5968_v34  ;;  %v13137_v19 = vsub.f32 %v16844_v8, %v5968_v34  ;;  %v5642_v37 = vpop.f32.mrf.mxu1  ;;  %v6366_v25 = vsel %vm5679_vm1, %v6189_v11, 0.0 }
 0x41a   : > { %v5015_v36 = vpop.f32.mrf.mxu0  ;;  %v5920_v54 = vsel %vm5679_vm1, %v13131_v21, 0.0  ;;  %v5783_v20 = vpop.xlane.xlu1 %5782  ;;  %5918 = vadd.xlane.f32.xlu1 %v5917_v27  ;;  %6364 = vadd.xlane.f32.xlu0 %v6363_v1  ;;  %v6367_v8 = vadd.f32 %v6366_v25, %v6188_v3  ;;  %v13153_v7 = vadd.f32 %v5642_v37, %v5006_v52  ;;  %v16853_v27 = vld [vmem:[#allocation4_spill] sm:$0xff] }
 0x41b   : > { %16843 = vst [vmem:[#allocation204_spill] sm:$0xff] %v13134_v24  ;;  %16845 = vst [vmem:[#allocation42_spill] sm:$0xff] %v13137_v19  ;;  %v6190_v60 = vmul.f32 %v13134_v24, %v13134_v24  ;;  %v6191_v34 = vmul.f32 %v13137_v19, %v13137_v19  ;;  %v5644_v46 = vpop.f32.mrf.mxu1  ;;  %v5921_v22 = vadd.f32 %v5920_v54, %v13140_v5  ;;  %v5969_v33 = vmul.f32 0.0051020407, %v5783_v20 }
 0x41c   : > { %v5021_v6 = vpop.f32.mrf.mxu0  ;;  %v13151_v26 = vadd.f32 %v5644_v46, %v5008_v40  ;;  %16849 = vst [vmem:[#allocation44_spill] sm:$0xff] %v13153_v7  ;;  %v5016_v24 = vadd.f32 %v5015_v36, %v16850_v32  ;;  %v16855_v40 = vld [vmem:[#allocation295_spill] sm:$0xff]  ;;  %v16857_v32 = vld [vmem:[#allocation110_spill] sm:$0xff] }
 0x41d   : > { %v5650_v11 = vpop.f32.mrf.mxu1  ;;  %v6370_v41 = vsel %vm5679_vm1, %v6191_v34, 0.0  ;;  %v13158_v16 = vsub.f32 %v16851_v42, %v5969_v33  ;;  %v13161_v19 = vsub.f32 %v16853_v27, %v5969_v33  ;;  %v5014_v3 = vadd.f32 %v5013_v38, %v16855_v40  ;;  %v16859_v38 = vld [vmem:[#allocation79_spill] sm:$0xff] }
 0x41e   : > { %16848 = vst [vmem:[#allocation205_spill] sm:$0xff] %v13151_v26  ;;  %v5023_v54 = vpop.f32.mrf.mxu0  ;;  %v5924_v20 = vsel %vm5679_vm1, %v13151_v26, 0.0  ;;  %v5787_v1 = vpop.xlane.xlu0 %5786  ;;  %6368 = vadd.xlane.f32.xlu1 %v6367_v8  ;;  %5922 = vadd.xlane.f32.xlu0 %v5921_v22  ;;  %v6371_v33 = vadd.f32 %v6370_v41, %v6190_v60  ;;  %v16863_v22 = vld [vmem:[#allocation300_spill] sm:$0xff] }
 0x41f   : > { %16852 = vst [vmem:[#allocation208_spill] sm:$0xff] %v13158_v16  ;;  %16854 = vst [vmem:[#allocation25_spill] sm:$0xff] %v13161_v19  ;;  %v5925_v37 = vadd.f32 %v5924_v20, %v13153_v7  ;;  %v5970_v25 = vmul.f32 0.0051020407, %v5787_v1  ;;  %v5652_v52 = vpop.f32.mrf.mxu1  ;;  %v6192_v36 = vmul.f32 %v13158_v16, %v13158_v16  ;;  %v6193_v42 = vmul.f32 %v13161_v19, %v13161_v19  ;;  %v16861_v20 = vld [vmem:[#allocation273_spill] sm:$0xff] }
 0x420   : > { %v5029_v34 = vpop.f32.mrf.mxu0  ;;  %v13171_v46 = vadd.f32 %v5652_v52, %v5016_v24  ;;  %v5024_v1 = vadd.f32 %v5023_v54, %v16861_v20  ;;  %v13180_v7 = vadd.f32 %v5650_v11, %v5014_v3  ;;  %v5022_v60 = vadd.f32 %v5021_v6, %v16863_v22  ;;  %v16866_v22 = vld [vmem:[#allocation277_spill] sm:$0xff] }
 0x421   : > { %v13174_v27 = vsub.f32 %v16857_v32, %v5970_v25  ;;  %v13177_v40 = vsub.f32 %v16859_v38, %v5970_v25  ;;  %v5658_v8 = vpop.f32.mrf.mxu1  ;;  %v6374_v24 = vsel %vm5679_vm1, %v6193_v42, 0.0 }
 0x422   : > { %16856 = vst [vmem:[#allocation210_spill] sm:$0xff] %v13171_v46  ;;  %16862 = vst [vmem:[#allocation27_spill] sm:$0xff] %v13180_v7  ;;  %v5031_v16 = vpop.f32.mrf.mxu0  ;;  %v5928_v19 = vsel %vm5679_vm1, %v13171_v46, 0.0  ;;  %v5791_v26 = vpop.xlane.xlu1 %5790  ;;  %5926 = vadd.xlane.f32.xlu1 %v5925_v37  ;;  %6372 = vadd.xlane.f32.xlu0 %v6371_v33  ;;  %v6375_v38 = vadd.f32 %v6374_v24, %v6192_v36  ;;  %v13193_v20 = vadd.f32 %v5658_v8, %v5022_v60  ;;  %v16869_v37 = vld [vmem:[#allocation112_spill] sm:$0xff]  ;;  %v16871_v33 = vld [vmem:[#allocation305_spill] sm:$0xff] }
 0x423   : > { %16858 = vst [vmem:[#allocation125_spill] sm:$0xff] %v13174_v27  ;;  %16860 = vst [vmem:[#allocation211_spill] sm:$0xff] %v13177_v40  ;;  %v6194_v41 = vmul.f32 %v13174_v27, %v13174_v27  ;;  %v6195_v25 = vmul.f32 %v13177_v40, %v13177_v40  ;;  %v5660_v52 = vpop.f32.mrf.mxu1  ;;  %v5929_v11 = vadd.f32 %v5928_v19, %v13180_v7  ;;  %v5971_v3 = vmul.f32 0.0051020407, %v5791_v26 }
 0x424   : > { %v5037_v54 = vpop.f32.mrf.mxu0  ;;  %v13191_v32 = vadd.f32 %v5660_v52, %v5024_v1  ;;  %16865 = vst [vmem:[#allocation126_spill] sm:$0xff] %v13193_v20  ;;  %v5032_v27 = vadd.f32 %v5031_v16, %v16866_v22  ;;  %v5030_v1 = vadd.f32 %v5029_v34, %v16871_v33  ;;  %v16875_v34 = vld [vmem:[#allocation116_spill] sm:$0xff] }
 0x425   : > { %v5666_v42 = vpop.f32.mrf.mxu1  ;;  %v6378_v6 = vsel %vm5679_vm1, %v6195_v25, 0.0  ;;  %v13198_v46 = vsub.f32 %v16867_v39, %v5971_v3  ;;  %v13201_v40 = vsub.f32 %v16869_v37, %v5971_v3  ;;  %v16873_v3 = vld [vmem:[#allocation89_spill] sm:$0xff] }
 0x426   : > { %16864 = vst [vmem:[#allocation214_spill] sm:$0xff] %v13191_v32  ;;  %v5932_v19 = vsel %vm5679_vm1, %v13191_v32, 0.0  ;;  %v5795_v26 = vpop.xlane.xlu0 %5794  ;;  %v5039_v36 = vpop.f32.mrf.mxu0  ;;  %6376 = vadd.xlane.f32.xlu1 %v6375_v38  ;;  %5930 = vadd.xlane.f32.xlu0 %v5929_v11  ;;  %v6379_v52 = vadd.f32 %v6378_v6, %v6194_v41  ;;  %v16877_v38 = vld [vmem:[#allocation314_spill] sm:$0xff]  ;;  %v13220_v33 = vadd.f32 %v5666_v42, %v5030_v1 }
 0x427   : > { %16868 = vst [vmem:[#allocation216_spill] sm:$0xff] %v13198_v46  ;;  %16870 = vst [vmem:[#allocation46_spill] sm:$0xff] %v13201_v40  ;;  %v5933_v8 = vadd.f32 %v5932_v19, %v13193_v20  ;;  %v5972_v24 = vmul.f32 0.0051020407, %v5795_v26  ;;  %v5668_v60 = vpop.f32.mrf.mxu1  ;;  %v6196_v16 = vmul.f32 %v13198_v46, %v13198_v46  ;;  %v6197_v39 = vmul.f32 %v13201_v40, %v13201_v40 }
 0x428   : > { %v13211_v25 = vadd.f32 %v5668_v60, %v5032_v27  ;;  %v5040_v26 = vadd.f32 %v5039_v36, %v16877_v38  ;;  %16878 = vst [vmem:[#allocation29_spill] sm:$0xff] %v13220_v33  ;;  %v16879_v27 = vld [vmem:[#allocation279_spill] sm:$0xff] }
 0x429   : > { %v13214_v22 = vsub.f32 %v16873_v3, %v5972_v24  ;;  %v13217_v37 = vsub.f32 %v16875_v34, %v5972_v24  ;;  %v5674_v19 = vpop.f32.mrf.mxu1  ;;  %v6382_v11 = vsel %vm5679_vm1, %v6197_v39, 0.0  ;;  %v5038_v60 = vadd.f32 %v5037_v54, %v16879_v27  ;;  %v16882_v39 = vld [vmem:[#allocation10_spill] sm:$0xff]  ;;  %v16884_v54 = vld [vmem:[#allocation119_spill] sm:$0xff] }
 0x42a   : > { %16872 = vst [vmem:[#allocation219_spill] sm:$0xff] %v13211_v25  ;;  %v5936_v46 = vsel %vm5679_vm1, %v13211_v25, 0.0  ;;  %v5799_v20 = vpop.xlane.xlu1 %5798  ;;  %5934 = vadd.xlane.f32.xlu1 %v5933_v8  ;;  %6380 = vadd.xlane.f32.xlu0 %v6379_v52  ;;  %v6383_v36 = vadd.f32 %v6382_v11, %v6196_v16  ;;  %v16886_v11 = vld [vmem:[#allocation124_spill] sm:$0xff] }
 0x42b   : > { %16874 = vst [vmem:[#allocation48_spill] sm:$0xff] %v13214_v22  ;;  %16876 = vst [vmem:[#allocation220_spill] sm:$0xff] %v13217_v37  ;;  %v6199_v41 = vmul.f32 %v13217_v37, %v13217_v37  ;;  %v5973_v6 = vmul.f32 0.0051020407, %v5799_v20  ;;  %v5676_v24 = vpop.f32.mrf.mxu1  ;;  %v6198_v3 = vmul.f32 %v13214_v22, %v13214_v22  ;;  %v5937_v42 = vadd.f32 %v5936_v46, %v13220_v33 }
 0x42c   : > { %v13231_v1 = vadd.f32 %v5676_v24, %v5040_v26  ;;  %v13233_v34 = vadd.f32 %v5674_v19, %v5038_v60 }
 0x42d   : > { %v13236_v38 = vsub.f32 %v16882_v39, %v5973_v6  ;;  %v13239_v27 = vsub.f32 %v16884_v54, %v5973_v6  ;;  %v6386_v20 = vsel %vm5679_vm1, %v6199_v41, 0.0  ;;  %v16888_v41 = vld [vmem:[#allocation122_spill] sm:$0xff] }
 0x42e   : > { %16880 = vst [vmem:[#allocation222_spill] sm:$0xff] %v13231_v1  ;;  %16881 = vst [vmem:[#allocation129_spill] sm:$0xff] %v13233_v34  ;;  %v5940_v8 = vsel %vm5679_vm1, %v13231_v1, 0.0  ;;  %v5803_v37 = vpop.xlane.xlu0 %5802  ;;  %6384 = vadd.xlane.f32.xlu1 %v6383_v36  ;;  %5938 = vadd.xlane.f32.xlu0 %v5937_v42  ;;  %v6387_v26 = vadd.f32 %v6386_v20, %v6198_v3  ;;  %v16890_v3 = vld [vmem:[#allocation95_spill] sm:$0xff] }
 0x42f   : > { %16883 = vst [vmem:[#allocation224_spill] sm:$0xff] %v13236_v38  ;;  %16885 = vst [vmem:[#allocation31_spill] sm:$0xff] %v13239_v27  ;;  %v6200_v46 = vmul.f32 %v13236_v38, %v13236_v38  ;;  %v6201_v16 = vmul.f32 %v13239_v27, %v13239_v27  ;;  %v5941_v52 = vadd.f32 %v5940_v8, %v13233_v34  ;;  %v5974_v19 = vmul.f32 0.0051020407, %v5803_v37  ;;  %v16892_v20 = vld [vmem:[#allocation127_spill] sm:$0xff] }
 0x431   : > { %v13250_v60 = vsub.f32 %v16886_v11, %v5974_v19  ;;  %v13253_v6 = vsub.f32 %v16888_v41, %v5974_v19  ;;  %v6390_v24 = vsel %vm5679_vm1, %v6201_v16, 0.0 }
 0x432   : > { %v5807_v39 = vpop.xlane.xlu1 %5806  ;;  %5942 = vadd.xlane.f32.xlu1 %v5941_v52  ;;  %v6391_v37 = vadd.f32 %v6390_v24, %v6200_v46  ;;  %6388 = vadd.xlane.f32.xlu0 %v6387_v26  ;;  %v16894_v46 = vld [vmem:[#allocation132_spill] sm:$0xff]  ;;  %v16896_v24 = vld [vmem:[#allocation130_spill] sm:$0xff] }
 0x433   : > { %16887 = vst [vmem:[#allocation225_spill] sm:$0xff] %v13250_v60  ;;  %16889 = vst [vmem:[#allocation131_spill] sm:$0xff] %v13253_v6  ;;  %v6202_v54 = vmul.f32 %v13250_v60, %v13250_v60  ;;  %v6203_v22 = vmul.f32 %v13253_v6, %v13253_v6  ;;  %v5975_v36 = vmul.f32 0.0051020407, %v5807_v39 }
 0x435   : > { %v13261_v42 = vsub.f32 %v16890_v3, %v5975_v36  ;;  %v13264_v8 = vsub.f32 %v16892_v20, %v5975_v36  ;;  %v6394_v19 = vsel %vm5679_vm1, %v6203_v22, 0.0 }
 0x436   : > { %v5811_v16 = vpop.xlane.xlu0 %5810  ;;  %v6395_v11 = vadd.f32 %v6394_v19, %v6202_v54  ;;  %6392 = vadd.xlane.f32.xlu1 %v6391_v37  ;;  %v16898_v37 = vld [vmem:[#allocation137_spill] sm:$0xff] }
 0x437   : > { %16891 = vst [vmem:[#allocation228_spill] sm:$0xff] %v13261_v42  ;;  %16893 = vst [vmem:[#allocation50_spill] sm:$0xff] %v13264_v8  ;;  %v6204_v41 = vmul.f32 %v13261_v42, %v13261_v42  ;;  %v6205_v6 = vmul.f32 %v13264_v8, %v13264_v8  ;;  %v5976_v52 = vmul.f32 0.0051020407, %v5811_v16 }
 0x438   : > { %6396 = vadd.xlane.f32.xlu0 %v6395_v11  ;;  %v16900_v11 = vld [vmem:[#allocation133_spill] sm:$0xff] }
 0x439   : > { %v13272_v26 = vsub.f32 %v16894_v46, %v5976_v52  ;;  %v13275_v39 = vsub.f32 %v16896_v24, %v5976_v52  ;;  %v6398_v36 = vsel %vm5679_vm1, %v6205_v6, 0.0 }
 0x43a   : > { %v5815_v22 = vpop.xlane.xlu1 %5814  ;;  %v6399_v3 = vadd.f32 %v6398_v36, %v6204_v41 }
 0x43b   : > { %16895 = vst [vmem:[#allocation230_spill] sm:$0xff] %v13272_v26  ;;  %16897 = vst [vmem:[#allocation52_spill] sm:$0xff] %v13275_v39  ;;  %v6206_v54 = vmul.f32 %v13272_v26, %v13272_v26  ;;  %v6207_v20 = vmul.f32 %v13275_v39, %v13275_v39  ;;  %v5977_v19 = vmul.f32 0.0051020407, %v5815_v22  ;;  %v16902_v22 = vld [vmem:[#allocation96_spill] sm:$0xff] }
 0x43c   : > { %6400 = vadd.xlane.f32.xlu1 %v6399_v3 }
 0x43d   : > { %v13283_v16 = vsub.f32 %v16898_v37, %v5977_v19  ;;  %v13286_v46 = vsub.f32 %v16900_v11, %v5977_v19  ;;  %v6402_v52 = vsel %vm5679_vm1, %v6207_v20, 0.0  ;;  %v16904_v37 = vld [vmem:[#allocation138_spill] sm:$0xff] }
 0x43e   : > { %v5819_v24 = vpop.xlane.xlu0 %5818  ;;  %v6403_v6 = vadd.f32 %v6402_v52, %v6206_v54 }
 0x43f   : > { %16899 = vst [vmem:[#allocation231_spill] sm:$0xff] %v13283_v16  ;;  %16901 = vst [vmem:[#allocation33_spill] sm:$0xff] %v13286_v46  ;;  %v6208_v41 = vmul.f32 %v13283_v16, %v13283_v16  ;;  %v6209_v36 = vmul.f32 %v13286_v46, %v13286_v46  ;;  %v5978_v26 = vmul.f32 0.0051020407, %v5819_v24  ;;  %v16906_v24 = vld [vmem:[#allocation145_spill] sm:$0xff] }
 0x440   : > { %6404 = vadd.xlane.f32.xlu0 %v6403_v6 }
 0x441   : > { %v13294_v3 = vsub.f32 %v16902_v22, %v5978_v26  ;;  %v13297_v39 = vsub.f32 %v16904_v37, %v5978_v26  ;;  %v6406_v19 = vsel %vm5679_vm1, %v6209_v36, 0.0  ;;  %v16908_v22 = vld [vmem:[#allocation3_spill] sm:$0xff] }
 0x442   : > { %v5823_v11 = vpop.xlane.xlu1 %5822  ;;  %v6407_v20 = vadd.f32 %v6406_v19, %v6208_v41 }
 0x443   : > { %16903 = vst [vmem:[#allocation234_spill] sm:$0xff] %v13294_v3  ;;  %16905 = vst [vmem:[#allocation23_spill] sm:$0xff] %v13297_v39  ;;  %v6210_v54 = vmul.f32 %v13294_v3, %v13294_v3  ;;  %v6211_v52 = vmul.f32 %v13297_v39, %v13297_v39  ;;  %v5979_v60 = vmul.f32 0.0051020407, %v5823_v11  ;;  %v16910_v11 = vld [vmem:[#allocation146_spill] sm:$0xff] }
 0x444   : > { %6408 = vadd.xlane.f32.xlu1 %v6407_v20 }
 0x445   : > { %v13305_v6 = vsub.f32 %v16906_v24, %v5979_v60  ;;  %v13308_v46 = vsub.f32 %v16908_v22, %v5979_v60  ;;  %v6410_v26 = vsel %vm5679_vm1, %v6211_v52, 0.0  ;;  %v16912_v24 = vld [vmem:[#allocation99_spill] sm:$0xff] }
 0x446   : > { %v5827_v37 = vpop.xlane.xlu0 %5826  ;;  %v6411_v36 = vadd.f32 %v6410_v26, %v6210_v54 }
 0x447   : > { %16907 = vst [vmem:[#allocation236_spill] sm:$0xff] %v13305_v6  ;;  %16909 = vst [vmem:[#allocation35_spill] sm:$0xff] %v13308_v46  ;;  %v6212_v41 = vmul.f32 %v13305_v6, %v13305_v6  ;;  %v6213_v19 = vmul.f32 %v13308_v46, %v13308_v46  ;;  %v5980_v3 = vmul.f32 0.0051020407, %v5827_v37  ;;  %v16914_v37 = vld [vmem:[#allocation100_spill] sm:$0xff] }
 0x448   : > { %6412 = vadd.xlane.f32.xlu0 %v6411_v36 }
 0x449   : > { %v13316_v20 = vsub.f32 %v16910_v11, %v5980_v3  ;;  %v13319_v39 = vsub.f32 %v16912_v24, %v5980_v3  ;;  %v6414_v60 = vsel %vm5679_vm1, %v6213_v19, 0.0  ;;  %v16916_v11 = vld [vmem:[#allocation149_spill] sm:$0xff] }
 0x44a   : > { %v5831_v22 = vpop.xlane.xlu1 %5830  ;;  %v6415_v52 = vadd.f32 %v6414_v60, %v6212_v41  ;;  %v6277_v46 = vpop.xlane.xlu0 %6276 }
 0x44b   : > { %16911 = vst [vmem:[#allocation239_spill] sm:$0xff] %v13316_v20  ;;  %16913 = vst [vmem:[#allocation134_spill] sm:$0xff] %v13319_v39  ;;  %v6214_v54 = vmul.f32 %v13316_v20, %v13316_v20  ;;  %v6215_v26 = vmul.f32 %v13319_v39, %v13319_v39  ;;  %v5981_v6 = vmul.f32 0.0051020407, %v5831_v22 }
 0x44c   : > { %6416 = vadd.xlane.f32.xlu1 %v6415_v52 }
 0x44d   : > { %v13327_v36 = vsub.f32 %v16914_v37, %v5981_v6  ;;  %v13330_v16 = vsub.f32 %v16916_v11, %v5981_v6  ;;  %v6418_v3 = vsel %vm5679_vm1, %v6215_v26, 0.0  ;;  %v16918_v37 = vld [vmem:[#allocation22_spill] sm:$0xff]  ;;  %v16920_v6 = vld [vmem:[#allocation151_spill] sm:$0xff] }
 0x44e   : > { %v6419_v19 = vadd.f32 %v6418_v3, %v6214_v54  ;;  %v6281_v60 = vpop.xlane.xlu1 %6280  ;;  %v5835_v39 = vpop.xlane.xlu0 %5834 }
 0x44f   : > { %16915 = vst [vmem:[#allocation240_spill] sm:$0xff] %v13327_v36  ;;  %16917 = vst [vmem:[#allocation54_spill] sm:$0xff] %v13330_v16  ;;  %v6217_v41 = vmul.f32 %v13330_v16, %v13330_v16  ;;  %v6216_v24 = vmul.f32 %v13327_v36, %v13327_v36  ;;  %v5982_v22 = vmul.f32 0.0051020407, %v5835_v39 }
 0x450   : > { %6420 = vadd.xlane.f32.xlu0 %v6419_v19  ;;  %v16923_v19 = vld [vmem:[#allocation153_spill] sm:$0xff] }
 0x451   : > { %v6422_v52 = vsel %vm5679_vm1, %v6217_v41, 0.0  ;;  %v13339_v20 = vsub.f32 %v16918_v37, %v5982_v22  ;;  %v13342_v11 = vsub.f32 %v16920_v6, %v5982_v22  ;;  %v6539_v37 = vmul.f32 0.0051020407, %v6281_v60 }
 0x452   : > { %v5839_v26 = vpop.xlane.xlu1 %5838  ;;  %v6285_v54 = vpop.xlane.xlu0 %6284  ;;  %v6423_v3 = vadd.f32 %v6422_v52, %v6216_v24 }
 0x453   : > { %16919 = vst [vmem:[#allocation242_spill] sm:$0xff] %v13339_v20  ;;  %16921 = vst [vmem:[#allocation56_spill] sm:$0xff] %v13342_v11  ;;  %v6218_v16 = vmul.f32 %v13339_v20, %v13339_v20  ;;  %v6219_v36 = vmul.f32 %v13342_v11, %v13342_v11  ;;  %v5983_v8 = vmul.f32 0.0051020407, %v5839_v26  ;;  %v6538_v11 = vmul.f32 0.0051020407, %v6277_v46 }
 0x454   : > { %6424 = vadd.xlane.f32.xlu1 %v6423_v3  ;;  %v6605_v60 = vmax.f32 %v6539_v37, 0.0 }
 0x455   : > { %v13349_v39 = vsub.f32 %v12713_v47, %v5983_v8  ;;  %v13352_v41 = vsub.f32 %v16923_v19, %v5983_v8  ;;  %v6426_v22 = vsel %vm5679_vm1, %v6219_v36, 0.0  ;;  %v16926_v8 = vld [vmem:[#allocation7_spill] sm:$0xff] }
 0x456   : > { %v13355_v6 = vpop.xlane.xlu1 %6288  ;;  %v5843_v24 = vpop.xlane.xlu0 %5842  ;;  %v6427_v52 = vadd.f32 %v6426_v22, %v6218_v16 }
 0x457   : > { %16922 = vst [vmem:[#allocation244_spill] sm:$0xff] %v13349_v39  ;;  %16924 = vst [vmem:[#allocation37_spill] sm:$0xff] %v13352_v41  ;;  %v6220_v20 = vmul.f32 %v13349_v39, %v13349_v39  ;;  %v6221_v26 = vmul.f32 %v13352_v41, %v13352_v41  ;;  %v5984_v3 = vmul.f32 0.0051020407, %v5843_v24  ;;  %v6540_v39 = vmul.f32 0.0051020407, %v6285_v54 }
 0x458   : > { %6428 = vadd.xlane.f32.xlu0 %v6427_v52  ;;  %v6541_v61 = vmul.f32 0.0051020407, %v13355_v6 }
 0x459   : > { %v13362_v47 = vsub.f32 %v12733_v63, %v5984_v3  ;;  %v13365_v19 = vsub.f32 %v16926_v8, %v5984_v3  ;;  %v6430_v36 = vsel %vm5679_vm1, %v6221_v26, 0.0  ;;  %v6604_v63 = vmax.f32 %v6538_v11, 0.0 }
 0x45a   : > { %v5847_v42 = vpop.xlane.xlu1 %5846  ;;  %v13368_v16 = vpop.xlane.xlu0 %6292  ;;  %v6431_v22 = vadd.f32 %v6430_v36, %v6220_v20  ;;  %v6671_v8 = vadd.f32 1e-05, %v6605_v60  ;;  %v6606_v36 = vmax.f32 %v6540_v39, 0.0 }
 0x45b   : > { %16925 = vst [vmem:[#allocation245_spill] sm:$0xff] %v13362_v47  ;;  %16927 = vst [vmem:[#allocation136_spill] sm:$0xff] %v13365_v19  ;;  %v6222_v41 = vmul.f32 %v13362_v47, %v13362_v47  ;;  %v6223_v46 = vmul.f32 %v13365_v19, %v13365_v19  ;;  %v5985_v24 = vmul.f32 0.0051020407, %v5847_v42 }
 0x45c   : > { %6432 = vadd.xlane.f32.xlu1 %v6431_v22  ;;  %8164 = vrsqrt.f32 %v6671_v8  ;;  %v6803_v8 = vld [vmem:[%s13401_s19 + $0x8] sm:$0xff] }
 0x45d   : > { %v13375_v52 = vsub.f32 %v12753_v4, %v5985_v24  ;;  %v13378_v26 = vsub.f32 %v12749_v18, %v5985_v24  ;;  %v6434_v37 = vsel %vm5679_vm1, %v6223_v46, 0.0  ;;  %v6670_v4 = vadd.f32 1e-05, %v6604_v63 }
 0x45e   : > { %v13381_v3 = vpop.xlane.xlu1 %6296  ;;  %v5851_v20 = vpop.xlane.xlu0 %5850  ;;  %v6435_v54 = vadd.f32 %v6434_v37, %v6222_v41  ;;  %v6672_v24 = vadd.f32 1e-05, %v6606_v36 }
 0x45f   : > { %16928 = vst [vmem:[#allocation248_spill] sm:$0xff] %v13375_v52  ;;  %16929 = vst [vmem:[#allocation39_spill] sm:$0xff] %v13378_v26  ;;  %v6224_v19 = vmul.f32 %v13375_v52, %v13375_v52  ;;  %v6225_v42 = vmul.f32 %v13378_v26, %v13378_v26  ;;  %8166 = vrsqrt.f32 %v6670_v4  ;;  %v6804_v26 = vld [vmem:[%s13401_s19 + $0x10] sm:$0xff] }
 0x460   : > { %6436 = vadd.xlane.f32.xlu0 %v6435_v54  ;;  %8168 = vrsqrt.f32 %v6672_v24 }
 0x461   : > { %v6438_v18 = vsel %vm5679_vm1, %v6225_v42, 0.0  ;;  %v6802_v42 = vld [vmem:[%s13401_s19] sm:$0xff] }
 0x462   : > { %v5855_v11 = vpop.xlane.xlu1 %5854  ;;  %v13388_v22 = vpop.xlane.xlu0 %6300  ;;  %v6439_v46 = vadd.f32 %v6438_v18, %v6224_v19 }
 0x464   : > { %6440 = vadd.xlane.f32.xlu1 %v6439_v46 }
 0x466   : > { %v13390_v39 = vpop.xlane.xlu1 %6304  ;;  %v5859_v41 = vpop.xlane.xlu0 %5858 }
 0x469   : > { %v8165_v54 = vpop.eup %8164 }
 0x46a   : > { %v13392_v60 = vpop.xlane.xlu1 %5862  ;;  %v13394_v37 = vpop.xlane.xlu0 %6308  ;;  %v6869_v46 = vmul.f32 %v8165_v54, %v6803_v8  ;;  %v5986_v8 = vmul.f32 0.0051020407, %v5851_v20 }
 0x46c   : > { %v8167_v36 = vpop.eup %8166 }
 0x46d   : > { %v8169_v24 = vpop.eup %8168  ;;  %v6868_v47 = vmul.f32 %v8167_v36, %v6802_v42 }
 0x46e   : > { %v13403_v19 = vpop.xlane.xlu1 %6312  ;;  %v5867_v63 = vpop.xlane.xlu0 %5866  ;;  %v6870_v27 = vmul.f32 %v8169_v24, %v6804_v26  ;;  %v5987_v24 = vmul.f32 0.0051020407, %v5855_v11 }
 0x46f   : > { %v5990_v20 = vmul.f32 0.0051020407, %v5867_v63 }
 0x471   : > { %v13459_v63 = vsub.f32 %v12849_v31, %v5990_v20 }
 0x472   : > { %v13407_v4 = vpop.xlane.xlu1 %5870  ;;  %v13409_v18 = vpop.xlane.xlu0 %6316 }
 0x473   : > { %16936 = vst [vmem:[#allocation60_spill] sm:$0xff] %v13459_v63 }
 0x475   : > { %6941 = vperm.xlu1 %8162, %v6869_v46   ;;  %v13436_v46 = vsub.f32 %v12773_v10, %v5986_v8  ;;  %v13451_v10 = vsub.f32 %v12789_v35, %v5987_v24 }
 0x476   : > { %v13412_v52 = vpop.xlane.xlu1 %6320  ;;  %6936 = vperm.xlu0 %8163, %v6868_v47   ;;  %v5875_v34 = vpop.xlane.xlu0 %5874  ;;  %v13431_v47 = vsub.f32 %v12769_v56, %v5986_v8 }
 0x477   : > { %16931 = vst [vmem:[#allocation139_spill] sm:$0xff] %v13436_v46  ;;  %16934 = vst [vmem:[#allocation254_spill] sm:$0xff] %v13451_v10  ;;  %v5992_v8 = vmul.f32 0.0051020407, %v5875_v34 }
 0x478   : > { %16930 = vst [vmem:[#allocation250_spill] sm:$0xff] %v13431_v47  ;;  %v6227_v25 = vmul.f32 %v13431_v47, %v13431_v47  ;;  %v6607_v47 = vmax.f32 %v6541_v61, 0.0  ;;  %v6235_v61 = vmul.f32 %v13459_v63, %v13459_v63 }
 0x479   : > { %6946 = vperm.xlu1 %8162, %v6870_v27   ;;  %v5988_v27 = vmul.f32 0.0051020407, %v5859_v41  ;;  %v6226_v41 = vmul.f32 %v13436_v46, %v13436_v46  ;;  %v13464_v46 = vsub.f32 %v12793_v50, %v5987_v24  ;;  %v13480_v50 = vsub.f32 %v12889_v57, %v5992_v8 }
 0x47a   : > { %v13414_v38 = vpop.xlane.xlu1 %5878  ;;  %v6442_v6 = vsel %vm5679_vm1, %v6227_v25, 0.0  ;;  %v6229_v25 = vmul.f32 %v13451_v10, %v13451_v10  ;;  %v6458_v57 = vsel %vm5679_vm1, %v6235_v61, 0.0 }
 0x47b   : > { %v13416_v1 = vpop.xlane.xlu0 %6324  ;;  %v13441_v7 = vsub.f32 %v12809_v53, %v5988_v27  ;;  %v13454_v11 = vsub.f32 %v12813_v55, %v5988_v27  ;;  %16937 = vst [vmem:[#allocation259_spill] sm:$0xff] %v13464_v46  ;;  %v13469_v55 = vsub.f32 %v12853_v12, %v5990_v20  ;;  %v6443_v31 = vadd.f32 %v6442_v6, %v6226_v41 }
 0x47c   : > { %16939 = vst [vmem:[#allocation262_spill] sm:$0xff] %v13480_v50  ;;  %v6228_v12 = vmul.f32 %v13464_v46, %v13464_v46  ;;  %v13488_v20 = vsub.f32 %v12893_v59, %v5992_v8  ;;  %v6239_v63 = vmul.f32 %v13480_v50, %v13480_v50 }
 0x47d   : > { %16932 = vst [vmem:[#allocation251_spill] sm:$0xff] %v13441_v7  ;;  %16935 = vst [vmem:[#allocation256_spill] sm:$0xff] %v13454_v11  ;;  %v6231_v53 = vmul.f32 %v13441_v7, %v13441_v7  ;;  %v6230_v35 = vmul.f32 %v13454_v11, %v13454_v11  ;;  %v6234_v24 = vmul.f32 %v13469_v55, %v13469_v55 }
 0x47e   : > { %16938 = vst [vmem:[#allocation260_spill] sm:$0xff] %v13469_v55  ;;  %16940 = vst [vmem:[#allocation264_spill] sm:$0xff] %v13488_v20  ;;  %v6238_v59 = vmul.f32 %v13488_v20, %v13488_v20 }
 0x47f   : > { %v13418_v40 = vpop.xlane.xlu1 %6328  ;;  %v13420_v32 = vpop.xlane.xlu0 %5882  ;;  %v6450_v34 = vsel %vm5679_vm1, %v6231_v53, 0.0  ;;  %v6446_v53 = vsel %vm5679_vm1, %v6229_v25, 0.0  ;;  %v6459_v8 = vadd.f32 %v6458_v57, %v6234_v24 }
 0x480   : > { %v6451_v41 = vadd.f32 %v6450_v34, %v6230_v35  ;;  %v6447_v35 = vadd.f32 %v6446_v53, %v6228_v12  ;;  %v6466_v34 = vsel %vm5679_vm1, %v6239_v63, 0.0  ;;  %v6805_v63 = vld [vmem:[%s13401_s19 + $0x18] sm:$0xff] }
 0x481   : > { %v6467_v50 = vadd.f32 %v6466_v34, %v6238_v59  ;;  %v6811_v34 = vld [vmem:[%s13401_s19 + $0x48] sm:$0xff] }
 0x483   : > { %v13422_v33 = vpop.xlane.xlu1 %5886  ;;  %v13424_v54 = vpop.xlane.xlu0 %6332 }
 0x487   : > { %v13426_v36 = vpop.xlane.xlu1 %6336  ;;  %v13428_v42 = vpop.xlane.xlu0 %5890 }
 0x48b   : > { %v13433_v26 = vpop.xlane.xlu1 %5894  ;;  %v13443_v28 = vpop.xlane.xlu0 %6340 }
 0x48c   : > { %16933 = vst [vmem:[#allocation58_spill] sm:$0xff] %v13443_v28  ;;  %v6542_v28 = vmul.f32 0.0051020407, %v13368_v16  ;;  %v6673_v16 = vadd.f32 1e-05, %v6607_v47 }
 0x48d   : > { %v6547_v47 = vmul.f32 0.0051020407, %v13403_v19 }
 0x48e   : > { %v6608_v6 = vmax.f32 %v6542_v28, 0.0  ;;  %8170 = vrsqrt.f32 %v6673_v16 }
 0x48f   : > { %v13446_v56 = vpop.xlane.xlu1 %6344  ;;  %v13471_v27 = vpop.xlane.xlu0 %5898  ;;  %v6613_v61 = vmax.f32 %v6547_v47, 0.0 }
 0x490   : > { %v6674_v28 = vadd.f32 1e-05, %v6608_v6 }
 0x492   : > { %8172 = vrsqrt.f32 %v6674_v28 }
 0x493   : > { %v13473_v7 = vpop.xlane.xlu1 %5902 }
 0x495   : > { %6444 = vadd.xlane.f32.xlu0 %v6443_v31  ;;  %v13495_v31 = vpop.xlane.xlu0 %6348 }
 0x497   : > { %v13497_v11 = vpop.xlane.xlu1 %6352 }
 0x499   : > { %6452 = vadd.xlane.f32.xlu0 %v6451_v41  ;;  %v13502_v19 = vpop.xlane.xlu0 %5906  ;;  %v6679_v41 = vadd.f32 1e-05, %v6613_v61 }
 0x49b   : > { %v13504_v25 = vpop.xlane.xlu1 %5910  ;;  %8174 = vrsqrt.f32 %v6679_v41  ;;  %v8171_v24 = vpop.eup %8170 }
 0x49c   : > { %v6871_v53 = vmul.f32 %v8171_v24, %v6805_v63 }
 0x49d   : > { %6460 = vadd.xlane.f32.xlu0 %v6459_v8  ;;  %6448 = vadd.xlane.f32.xlu1 %v6447_v35  ;;  %v13506_v12 = vpop.xlane.xlu0 %6356  ;;  %v6806_v8 = vld [vmem:[%s13401_s19 + $0x20] sm:$0xff] }
 0x49f   : > { %v13508_v16 = vpop.xlane.xlu1 %6360  ;;  %v8173_v47 = vpop.eup %8172 }
 0x4a0   : > { %v6872_v59 = vmul.f32 %v8173_v47, %v6806_v8  ;;  %v5989_v47 = vmul.f32 0.0051020407, %v13392_v60  ;;  %v5994_v8 = vmul.f32 0.0051020407, %v13420_v32  ;;  %v6544_v32 = vmul.f32 0.0051020407, %v13388_v22 }
 0x4a1   : > { %6468 = vadd.xlane.f32.xlu0 %v6467_v50  ;;  %v13511_v6 = vpop.xlane.xlu0 %5914 }
 0x4a2   : > { %v13547_v46 = vsub.f32 %v12833_v2, %v5989_v47  ;;  %v6610_v22 = vmax.f32 %v6544_v32, 0.0 }
 0x4a3   : > { %v13513_v57 = vpop.xlane.xlu1 %5918 }
 0x4a4   : > { %16948 = vst [vmem:[#allocation63_spill] sm:$0xff] %v13547_v46  ;;  %v6232_v2 = vmul.f32 %v13547_v46, %v13547_v46 }
 0x4a5   : > { %v13516_v35 = vpop.xlane.xlu0 %6364 }
 0x4a6   : > { %16941 = vst [vmem:[#allocation140_spill] sm:$0xff] %v13516_v35 }
 0x4a7   : > { %v13518_v50 = vpop.xlane.xlu1 %6368 }
 0x4a8   : > { %v8175_v28 = vpop.eup %8174 }
 0x4a9   : > { %v6877_v61 = vmul.f32 %v8175_v28, %v6811_v34  ;;  %v13521_v41 = vpop.xlane.xlu0 %5922  ;;  %v13537_v28 = vsub.f32 %v12829_v45, %v5989_v47  ;;  %v13540_v34 = vsub.f32 %v12931_v9, %v5994_v8 }
 0x4ab   : > { %v13523_v20 = vpop.xlane.xlu1 %5926  ;;  %16945 = vst [vmem:[#allocation142_spill] sm:$0xff] %v13537_v28  ;;  %16946 = vst [vmem:[#allocation270_spill] sm:$0xff] %v13540_v34  ;;  %v6233_v45 = vmul.f32 %v13537_v28, %v13537_v28  ;;  %v6243_v9 = vmul.f32 %v13540_v34, %v13540_v34 }
 0x4ac   : > { %16942 = vst [vmem:[#allocation41_spill] sm:$0xff] %v13523_v20 }
 0x4ad   : > { %v13525_v55 = vpop.xlane.xlu0 %6372 }
 0x4ae   : > { %6951 = vperm.xlu1 %8162, %v6871_v53   ;;  %16943 = vst [vmem:[#allocation265_spill] sm:$0xff] %v13525_v55  ;;  %v13550_v55 = vsub.f32 %v12940_v23, %v5994_v8  ;;  %v6474_v8 = vsel %vm5679_vm1, %v6243_v9, 0.0 }
 0x4af   : > { %v13527_v24 = vpop.xlane.xlu1 %6376 }
 0x4b0   : > { %16949 = vst [vmem:[#allocation144_spill] sm:$0xff] %v13550_v55  ;;  %v6242_v23 = vmul.f32 %v13550_v55, %v13550_v55 }
 0x4b1   : > { %v13529_v63 = vpop.xlane.xlu0 %5930 }
 0x4b2   : > { %6956 = vperm.xlu1 %8162, %v6872_v59   ;;  %v6543_v59 = vmul.f32 0.0051020407, %v13381_v3  ;;  %v6549_v3 = vmul.f32 0.0051020407, %v13412_v52  ;;  %v6475_v34 = vadd.f32 %v6474_v8, %v6242_v23  ;;  %v6676_v52 = vadd.f32 1e-05, %v6610_v22 }
 0x4b3   : > { %v13531_v53 = vpop.xlane.xlu1 %5934  ;;  %v6808_v8 = vld [vmem:[%s13401_s19 + $0x30] sm:$0xff] }
 0x4b4   : > { %16944 = vst [vmem:[#allocation268_spill] sm:$0xff] %v13531_v53  ;;  %v6609_v60 = vmax.f32 %v6543_v59, 0.0  ;;  %v6454_v59 = vsel %vm5679_vm1, %v6233_v45, 0.0  ;;  %v6615_v28 = vmax.f32 %v6549_v3, 0.0 }
 0x4b5   : > { %v6455_v35 = vadd.f32 %v6454_v59, %v6232_v2 }
 0x4b6   : > { %v6675_v47 = vadd.f32 1e-05, %v6609_v60  ;;  %v6681_v46 = vadd.f32 1e-05, %v6615_v28  ;;  %v6807_v28 = vld [vmem:[%s13401_s19 + $0x28] sm:$0xff] }
 0x4b7   : > { %6981 = vperm.xlu0 %8163, %v6877_v61   ;;  %v13542_v61 = vpop.xlane.xlu0 %6380  ;;  %v13544_v10 = vpop.xlane.xlu1 %6384 }
 0x4b8   : > { %16947 = vst [vmem:[#allocation271_spill] sm:$0xff] %v13542_v61  ;;  %8176 = vrsqrt.f32 %v6675_v47 }
 0x4b9   : > { %8178 = vrsqrt.f32 %v6676_v52 }
 0x4ba   : > { %8180 = vrsqrt.f32 %v6681_v46  ;;  %v6813_v46 = vld [vmem:[%s13401_s19 + $0x58] sm:$0xff] }
 0x4bb   : > { %v13558_v61 = vpop.xlane.xlu0 %5938  ;;  %v13560_v53 = vpop.xlane.xlu1 %5942 }
 0x4bc   : > { %16950 = vst [vmem:[#allocation274_spill] sm:$0xff] %v13560_v53 }
 0x4bf   : > { %v13568_v20 = vpop.xlane.xlu0 %6388  ;;  %v13570_v53 = vpop.xlane.xlu1 %6392 }
 0x4c0   : > { %16951 = vst [vmem:[#allocation276_spill] sm:$0xff] %v13568_v20 }
 0x4c3   : > { %v13572_v60 = vpop.xlane.xlu0 %6396 }
 0x4c4   : > { %16952 = vst [vmem:[#allocation148_spill] sm:$0xff] %v13572_v60 }
 0x4c5   : > { %v13574_v32 = vpop.xlane.xlu1 %6400  ;;  %v8177_v23 = vpop.eup %8176 }
 0x4c6   : > { %16953 = vst [vmem:[#allocation45_spill] sm:$0xff] %v13574_v32  ;;  %v6873_v47 = vmul.f32 %v8177_v23, %v6807_v28  ;;  %v8179_v22 = vpop.eup %8178  ;;  %v16963_v28 = vld [vmem:[#allocation147_spill] sm:$0xff] }
 0x4c7   : > { %v8181_v59 = vpop.eup %8180 }
 0x4c9   : > { %v13576_v45 = vpop.xlane.xlu0 %6404 }
 0x4ca   : > { %16954 = vst [vmem:[#allocation278_spill] sm:$0xff] %v13576_v45  ;;  %v6879_v45 = vmul.f32 %v8181_v59, %v6813_v46 }
 0x4cd   : > { %v13578_v9 = vpop.xlane.xlu1 %6408 }
 0x4ce   : > { %16955 = vst [vmem:[#allocation280_spill] sm:$0xff] %v13578_v9 }
 0x4d1   : > { %v13580_v3 = vpop.xlane.xlu0 %6412 }
 0x4d2   : > { %16956 = vst [vmem:[#allocation43_spill] sm:$0xff] %v13580_v3  ;;  %v6874_v3 = vmul.f32 %v8179_v22, %v6808_v8  ;;  %v16967_v22 = vld [vmem:[#allocation238_spill] sm:$0xff] }
 0x4d5   : > { %v13582_v2 = vpop.xlane.xlu1 %6416 }
 0x4d6   : > { %6476 = vadd.xlane.f32.xlu0 %v6475_v34  ;;  %6456 = vadd.xlane.f32.xlu1 %v6455_v35  ;;  %16957 = vst [vmem:[#allocation47_spill] sm:$0xff] %v13582_v2  ;;  %v16964_v2 = vld [vmem:[#allocation20_spill] sm:$0xff] }
 0x4d9   : > { %v13585_v34 = vpop.xlane.xlu0 %6420 }
 0x4da   : > { %16958 = vst [vmem:[#allocation282_spill] sm:$0xff] %v13585_v34 }
 0x4dd   : > { %v13587_v35 = vpop.xlane.xlu1 %6424 }
 0x4de   : > { %16959 = vst [vmem:[#allocation284_spill] sm:$0xff] %v13587_v35 }
 0x4e1   : > { %v13591_v52 = vpop.xlane.xlu0 %6428 }
 0x4e2   : > { %16960 = vst [vmem:[#allocation67_spill] sm:$0xff] %v13591_v52  ;;  %v16970_v52 = vld [vmem:[#allocation24_spill] sm:$0xff] }
 0x4e5   : > { %v13593_v55 = vpop.xlane.xlu1 %6432 }
 0x4e7   : > { %6961 = vperm.xlu1 %8162, %v6873_v47   ;;  %v16965_v47 = vld [vmem:[#allocation150_spill] sm:$0xff] }
 0x4e9   : > { %v13595_v60 = vpop.xlane.xlu0 %6436 }
 0x4ea   : > { %16961 = vst [vmem:[#allocation65_spill] sm:$0xff] %v13595_v60 }
 0x4eb   : > { %6966 = vperm.xlu1 %8162, %v6874_v3   ;;  %v16966_v3 = vld [vmem:[#allocation104_spill] sm:$0xff] }
 0x4ec   : > { %6991 = vperm.xlu0 %8163, %v6879_v45  }
 0x4ed   : > { %v13597_v34 = vpop.xlane.xlu1 %6440 }
 0x4ee   : > { %16962 = vst [vmem:[#allocation286_spill] sm:$0xff] %v13597_v34 }
 0x4f1   : > { %v6937_v20 = vpop.permute.xlu0 %6936  ;;  %v6942_v23 = vpop.permute.xlu1 %6941 }
 0x4f2   : > { %v7264_v35 = vmul.f32 %v6937_v20, %v16963_v28  ;;  %v7265_v9 = vmul.f32 %v6937_v20, %v16964_v2  ;;  %v7266_v32 = vmul.f32 %v6942_v23, %v16965_v47  ;;  %v7267_v45 = vmul.f32 %v6942_v23, %v16966_v3  ;;  %v16968_v2 = vld [vmem:[#allocation229_spill] sm:$0xff]  ;;  %v16969_v47 = vld [vmem:[#allocation152_spill] sm:$0xff] }
 0x4f3   : > { %v16971_v23 = vld [vmem:[#allocation249_spill] sm:$0xff] }
 0x4f4   : > { %v7792_v8 = vadd.f32 %v16967_v22, %v7264_v35  ;;  %v7793_v20 = vadd.f32 %v16967_v22, %v7265_v9  ;;  %v7794_v59 = vadd.f32 %v16968_v2, %v7266_v32  ;;  %v7795_v46 = vadd.f32 %v16968_v2, %v7267_v45 }
 0x4f5   : > { %v6947_v28 = vpop.permute.xlu1 %6946  ;;  %v5996_v9 = vmul.f32 0.0051020407, %v13428_v42  ;;  %v5991_v32 = vmul.f32 0.0051020407, %v13407_v4  ;;  %v6551_v42 = vmul.f32 0.0051020407, %v13418_v40 }
 0x4f6   : > { %7924 = vst [vmem:[%s13607_s22] sm:$0xff] %v7792_v8  ;;  %7925 = vst.msk [vmem:[%s13607_s22 + $0x8] sm:$0xff] %vm5679_vm1, %v7793_v20  ;;  %v7268_v60 = vmul.f32 %v6947_v28, %v16969_v47  ;;  %v7269_v34 = vmul.f32 %v6947_v28, %v16970_v52  ;;  %v6545_v52 = vmul.f32 0.0051020407, %v13390_v39 }
 0x4f7   : > { %7926 = vst [vmem:[%s13607_s22 + $0x10] sm:$0xff] %v7794_v59  ;;  %7927 = vst.msk [vmem:[%s13607_s22 + $0x18] sm:$0xff] %vm5679_vm1, %v7795_v46  ;;  %v13630_v45 = vsub.f32 %v12971_v0, %v5996_v9  ;;  %v13633_v22 = vsub.f32 %v12980_v14, %v5996_v9  ;;  %v13637_v8 = vsub.f32 %v12869_v58, %v5991_v32  ;;  %v6546_v14 = vmul.f32 0.0051020407, %v13394_v37  ;;  %v6809_v9 = vld [vmem:[%s13401_s19 + $0x38] sm:$0xff] }
 0x4f8   : > { %v7796_v3 = vadd.f32 %v16971_v23, %v7268_v60  ;;  %v7797_v35 = vadd.f32 %v16971_v23, %v7269_v34  ;;  %v16972_v34 = vld [vmem:[#allocation171_spill] sm:$0xff]  ;;  %v6611_v4 = vmax.f32 %v6545_v52, 0.0  ;;  %v6617_v2 = vmax.f32 %v6551_v42, 0.0 }
 0x4f9   : > { %v6247_v60 = vmul.f32 %v13630_v45, %v13630_v45  ;;  %v13643_v20 = vsub.f32 %v16972_v34, %v5991_v32  ;;  %v6246_v0 = vmul.f32 %v13633_v22, %v13633_v22  ;;  %v6237_v39 = vmul.f32 %v13637_v8, %v13637_v8  ;;  %v6815_v52 = vld [vmem:[%s13401_s19 + $0x68] sm:$0xff] }
 0x4fa   : > { %7928 = vst [vmem:[%s13607_s22 + $0x20] sm:$0xff] %v7796_v3  ;;  %7929 = vst.msk [vmem:[%s13607_s22 + $0x28] sm:$0xff] %vm5679_vm1, %v7797_v35  ;;  %v6677_v46 = vadd.f32 1e-05, %v6611_v4  ;;  %v6612_v28 = vmax.f32 %v6546_v14, 0.0  ;;  %v6810_v4 = vld [vmem:[%s13401_s19 + $0x40] sm:$0xff] }
 0x4fb   : > { %v6482_v58 = vsel %vm5679_vm1, %v6247_v60, 0.0  ;;  %v6236_v59 = vmul.f32 %v13643_v20, %v13643_v20  ;;  %v6462_v47 = vsel %vm5679_vm1, %v6237_v39, 0.0  ;;  %v6683_v23 = vadd.f32 1e-05, %v6617_v2 }
 0x4fc   : > { %v6483_v40 = vadd.f32 %v6482_v58, %v6246_v0  ;;  %8182 = vrsqrt.f32 %v6677_v46  ;;  %v6678_v3 = vadd.f32 1e-05, %v6612_v28  ;;  %v16974_v28 = vld [vmem:[#allocation155_spill] sm:$0xff] }
 0x4fd   : > { %v6463_v37 = vadd.f32 %v6462_v47, %v6236_v59  ;;  %8184 = vrsqrt.f32 %v6683_v23  ;;  %v16975_v23 = vld [vmem:[#allocation237_spill] sm:$0xff] }
 0x4fe   : > { %8186 = vrsqrt.f32 %v6678_v3 }
 0x509   : > { %v8183_v35 = vpop.eup %8182 }
 0x50a   : > { %v8185_v32 = vpop.eup %8184  ;;  %v6875_v42 = vmul.f32 %v8183_v35, %v6809_v9 }
 0x50b   : > { %6484 = vadd.xlane.f32.xlu0 %v6483_v40  ;;  %v8187_v34 = vpop.eup %8186  ;;  %v6881_v0 = vmul.f32 %v8185_v32, %v6815_v52  ;;  %v16973_v40 = vld [vmem:[#allocation103_spill] sm:$0xff]  ;;  %v5998_v32 = vmul.f32 0.0051020407, %v13471_v27  ;;  %v16976_v52 = vld [vmem:[#allocation157_spill] sm:$0xff]  ;;  %v16980_v27 = vld [vmem:[#allocation166_spill] sm:$0xff] }
 0x50c   : > { %v6876_v39 = vmul.f32 %v8187_v34, %v6810_v4  ;;  %v16977_v34 = vld [vmem:[#allocation107_spill] sm:$0xff]  ;;  %v16978_v4 = vld [vmem:[#allocation258_spill] sm:$0xff] }
 0x50f   : > { %6464 = vadd.xlane.f32.xlu1 %v6463_v37 }
 0x51e   : > { %v13656_v60 = vpop.xlane.xlu0 %6444 }
 0x520   : > { %6971 = vperm.xlu1 %8162, %v6875_v42  }
 0x521   : > { %7001 = vperm.xlu0 %8163, %v6881_v0  }
 0x522   : > { %v13659_v14 = vpop.xlane.xlu0 %6452 }
 0x524   : > { %6976 = vperm.xlu1 %8162, %v6876_v39  }
 0x526   : > { %v13661_v58 = vpop.xlane.xlu1 %6448  ;;  %v13663_v2 = vpop.xlane.xlu0 %6460 }
 0x52a   : > { %v6952_v59 = vpop.permute.xlu1 %6951  ;;  %v13668_v3 = vpop.xlane.xlu0 %6468 }
 0x52b   : > { %v7270_v46 = vmul.f32 %v6952_v59, %v16973_v40  ;;  %v7271_v47 = vmul.f32 %v6952_v59, %v16974_v28 }
 0x52d   : > { %v7798_v37 = vadd.f32 %v16975_v23, %v7270_v46  ;;  %v7799_v35 = vadd.f32 %v16975_v23, %v7271_v47  ;;  %v13680_v46 = vsub.f32 %v13011_v43, %v5998_v32  ;;  %v16981_v47 = vld [vmem:[#allocation11_spill] sm:$0xff] }
 0x52e   : > { %v6957_v9 = vpop.permute.xlu1 %6956 }
 0x52f   : > { %7930 = vst [vmem:[%s13607_s22 + $0x30] sm:$0xff] %v7798_v37  ;;  %v7272_v42 = vmul.f32 %v6957_v9, %v16976_v52  ;;  %v7273_v0 = vmul.f32 %v6957_v9, %v16977_v34  ;;  %7931 = vst.msk [vmem:[%s13607_s22 + $0x38] sm:$0xff] %vm5679_vm1, %v7799_v35  ;;  %v16982_v37 = vld [vmem:[#allocation288_spill] sm:$0xff]  ;;  %v13690_v35 = vsub.f32 %v13020_v49, %v5998_v32  ;;  %v6553_v34 = vmul.f32 0.0051020407, %v13426_v36  ;;  %v16983_v32 = vld [vmem:[#allocation13_spill] sm:$0xff] }
 0x530   : > { %16979 = vst [vmem:[#allocation287_spill] sm:$0xff] %v13680_v46  ;;  %v6251_v43 = vmul.f32 %v13680_v46, %v13680_v46 }
 0x531   : > { %v7800_v39 = vadd.f32 %v16978_v4, %v7272_v42  ;;  %v7801_v59 = vadd.f32 %v16978_v4, %v7273_v0  ;;  %v5993_v42 = vmul.f32 0.0051020407, %v13414_v38  ;;  %v6250_v0 = vmul.f32 %v13690_v35, %v13690_v35 }
 0x532   : > { %v6982_v40 = vpop.permute.xlu0 %6981  ;;  %v6548_v4 = vmul.f32 0.0051020407, %v13409_v18  ;;  %v6490_v49 = vsel %vm5679_vm1, %v6251_v43, 0.0  ;;  %v6619_v38 = vmax.f32 %v6553_v34, 0.0  ;;  %v6812_v43 = vld [vmem:[%s13401_s19 + $0x50] sm:$0xff] }
 0x533   : > { %7932 = vst [vmem:[%s13607_s22 + $0x40] sm:$0xff] %v7800_v39  ;;  %7933 = vst.msk [vmem:[%s13607_s22 + $0x48] sm:$0xff] %vm5679_vm1, %v7801_v59  ;;  %v7282_v28 = vmul.f32 %v6982_v40, %v16980_v27  ;;  %v7283_v23 = vmul.f32 %v6982_v40, %v16981_v47  ;;  %v13703_v39 = vsub.f32 %v12911_v15, %v5993_v42 }
 0x534   : > { %v13707_v59 = vsub.f32 %v16983_v32, %v5993_v42  ;;  %v6491_v40 = vadd.f32 %v6490_v49, %v6250_v0  ;;  %v6614_v27 = vmax.f32 %v6548_v4, 0.0  ;;  %v6000_v4 = vmul.f32 0.0051020407, %v13502_v19  ;;  %v16984_v32 = vld [vmem:[#allocation160_spill] sm:$0xff]  ;;  %v16987_v19 = vld [vmem:[#allocation30_spill] sm:$0xff] }
 0x535   : > { %v7810_v9 = vadd.f32 %v16982_v37, %v7282_v28  ;;  %v7811_v52 = vadd.f32 %v16982_v37, %v7283_v23  ;;  %v6241_v36 = vmul.f32 %v13703_v39, %v13703_v39  ;;  %v6685_v28 = vadd.f32 1e-05, %v6619_v38 }
 0x536   : > { %v6240_v18 = vmul.f32 %v13707_v59, %v13707_v59  ;;  %v6680_v15 = vadd.f32 1e-05, %v6614_v27  ;;  %v16985_v27 = vld [vmem:[#allocation26_spill] sm:$0xff] }
 0x537   : > { %7942 = vst [vmem:[%s13607_s22 + $0x90] sm:$0xff] %v7810_v9  ;;  %7943 = vst.msk [vmem:[%s13607_s22 + $0x98] sm:$0xff] %vm5679_vm1, %v7811_v52  ;;  %v6470_v47 = vsel %vm5679_vm1, %v6241_v36, 0.0  ;;  %8188 = vrsqrt.f32 %v6685_v28  ;;  %v6817_v9 = vld [vmem:[%s13401_s19 + $0x78] sm:$0xff]  ;;  %v16986_v28 = vld [vmem:[#allocation247_spill] sm:$0xff] }
 0x538   : > { %v6471_v23 = vadd.f32 %v6470_v47, %v6240_v18  ;;  %8190 = vrsqrt.f32 %v6680_v15  ;;  %v13726_v47 = vsub.f32 %v13051_v29, %v6000_v4 }
 0x540   : > { %6492 = vadd.xlane.f32.xlu0 %v6491_v40 }
 0x544   : > { %v8189_v37 = vpop.eup %8188 }
 0x545   : > { %v8191_v52 = vpop.eup %8190  ;;  %v6883_v42 = vmul.f32 %v8189_v37, %v6817_v9 }
 0x546   : > { %v6878_v34 = vmul.f32 %v8191_v52, %v6812_v43  ;;  %v16988_v52 = vld [vmem:[#allocation2_spill] sm:$0xff]  ;;  %v16989_v43 = vld [vmem:[#allocation161_spill] sm:$0xff] }
 0x548   : > { %6472 = vadd.xlane.f32.xlu1 %v6471_v23 }
 0x556   : > { %7011 = vperm.xlu0 %8163, %v6883_v42  }
 0x559   : > { %6986 = vperm.xlu1 %8162, %v6878_v34  }
 0x55f   : > { %v13716_v0 = vpop.xlane.xlu1 %6456  ;;  %v13719_v49 = vpop.xlane.xlu0 %6476 }
 0x563   : > { %v6962_v38 = vpop.permute.xlu1 %6961 }
 0x564   : > { %v7274_v40 = vmul.f32 %v6962_v38, %v16984_v32  ;;  %v7275_v36 = vmul.f32 %v6962_v38, %v16985_v27  ;;  %v16990_v38 = vld [vmem:[#allocation28_spill] sm:$0xff] }
 0x566   : > { %v7802_v18 = vadd.f32 %v16986_v28, %v7274_v40  ;;  %v7803_v15 = vadd.f32 %v16986_v28, %v7275_v36  ;;  %v16991_v40 = vld [vmem:[#allocation269_spill] sm:$0xff]  ;;  %v16992_v36 = vld [vmem:[#allocation266_spill] sm:$0xff] }
 0x567   : > { %v6992_v23 = vpop.permute.xlu0 %6991  ;;  %v6967_v37 = vpop.permute.xlu1 %6966 }
 0x568   : > { %7934 = vst [vmem:[%s13607_s22 + $0x50] sm:$0xff] %v7802_v18  ;;  %7935 = vst.msk [vmem:[%s13607_s22 + $0x58] sm:$0xff] %vm5679_vm1, %v7803_v15  ;;  %v7286_v9 = vmul.f32 %v6992_v23, %v16987_v19  ;;  %v7287_v42 = vmul.f32 %v6992_v23, %v16988_v52  ;;  %v7276_v34 = vmul.f32 %v6967_v37, %v16989_v43  ;;  %v5995_v15 = vmul.f32 0.0051020407, %v13422_v33 }
 0x569   : > { %v7277_v32 = vmul.f32 %v6967_v37, %v16990_v38  ;;  %v13740_v18 = vsub.f32 %v13060_v13, %v6000_v4  ;;  %v6255_v23 = vmul.f32 %v13726_v47, %v13726_v47  ;;  %v6555_v37 = vmul.f32 0.0051020407, %v13446_v56 }
 0x56a   : > { %v7814_v29 = vadd.f32 %v16991_v40, %v7286_v9  ;;  %v7815_v27 = vadd.f32 %v16991_v40, %v7287_v42  ;;  %v7804_v28 = vadd.f32 %v16992_v36, %v7276_v34  ;;  %v6550_v9 = vmul.f32 0.0051020407, %v13416_v1 }
 0x56b   : > { %v7805_v46 = vadd.f32 %v16992_v36, %v7277_v32  ;;  %v6254_v19 = vmul.f32 %v13740_v18, %v13740_v18  ;;  %v13756_v13 = vsub.f32 %v12951_v17, %v5995_v15  ;;  %v6498_v33 = vsel %vm5679_vm1, %v6255_v23, 0.0  ;;  %v6819_v32 = vld [vmem:[%s13401_s19 + $0x88] sm:$0xff] }
 0x56c   : > { %7946 = vst [vmem:[%s13607_s22 + $0xb0] sm:$0xff] %v7814_v29  ;;  %7947 = vst.msk [vmem:[%s13607_s22 + $0xb8] sm:$0xff] %vm5679_vm1, %v7815_v27  ;;  %v6621_v4 = vmax.f32 %v6555_v37, 0.0  ;;  %v13760_v52 = vsub.f32 %v12953_v51, %v5995_v15  ;;  %v6814_v27 = vld [vmem:[%s13401_s19 + $0x60] sm:$0xff]  ;;  %v6002_v23 = vmul.f32 0.0051020407, %v13511_v6 }
 0x56d   : > { %7936 = vst [vmem:[%s13607_s22 + $0x60] sm:$0xff] %v7804_v28  ;;  %7937 = vst.msk [vmem:[%s13607_s22 + $0x68] sm:$0xff] %vm5679_vm1, %v7805_v46  ;;  %v6499_v42 = vadd.f32 %v6498_v33, %v6254_v19  ;;  %v6616_v46 = vmax.f32 %v6550_v9, 0.0  ;;  %v6245_v56 = vmul.f32 %v13756_v13, %v13756_v13  ;;  %v16993_v33 = vld [vmem:[#allocation176_spill] sm:$0xff] }
 0x56e   : > { %v6687_v43 = vadd.f32 1e-05, %v6621_v4  ;;  %v6244_v1 = vmul.f32 %v13760_v52, %v13760_v52  ;;  %v13775_v9 = vsub.f32 %v13091_v30, %v6002_v23 }
 0x56f   : > { %v6682_v17 = vadd.f32 1e-05, %v6616_v46  ;;  %v6478_v34 = vsel %vm5679_vm1, %v6245_v56, 0.0  ;;  %v16995_v56 = vld [vmem:[#allocation163_spill] sm:$0xff] }
 0x570   : > { %8192 = vrsqrt.f32 %v6687_v43  ;;  %v6479_v38 = vadd.f32 %v6478_v34, %v6244_v1  ;;  %v16996_v1 = vld [vmem:[#allocation9_spill] sm:$0xff]  ;;  %v16997_v34 = vld [vmem:[#allocation303_spill] sm:$0xff] }
 0x571   : > { %8194 = vrsqrt.f32 %v6682_v17 }
 0x575   : > { %6500 = vadd.xlane.f32.xlu0 %v6499_v42  ;;  %v16994_v42 = vld [vmem:[#allocation114_spill] sm:$0xff] }
 0x57d   : > { %6480 = vadd.xlane.f32.xlu1 %v6479_v38  ;;  %v8193_v51 = vpop.eup %8192 }
 0x57e   : > { %v8195_v40 = vpop.eup %8194  ;;  %v6885_v29 = vmul.f32 %v8193_v51, %v6819_v32  ;;  %v16998_v51 = vld [vmem:[#allocation257_spill] sm:$0xff] }
 0x57f   : > { %v6880_v36 = vmul.f32 %v8195_v40, %v6814_v27  ;;  %v13785_v40 = vsub.f32 %v13100_v44, %v6002_v23  ;;  %v5997_v27 = vmul.f32 0.0051020407, %v13433_v26  ;;  %v6557_v44 = vmul.f32 0.0051020407, %v13497_v11  ;;  %v17001_v23 = vld [vmem:[#allocation297_spill] sm:$0xff] }
 0x581   : > { %v6258_v26 = vmul.f32 %v13785_v40, %v13785_v40  ;;  %v6623_v11 = vmax.f32 %v6557_v44, 0.0 }
 0x58b   : > { %7021 = vperm.xlu0 %8163, %v6885_v29  }
 0x58e   : > { %6996 = vperm.xlu1 %8162, %v6880_v36   ;;  %v6259_v36 = vmul.f32 %v13775_v9, %v13775_v9 }
 0x594   : > { %v13769_v28 = vpop.xlane.xlu0 %6484 }
 0x598   : > { %v13771_v15 = vpop.xlane.xlu1 %6464 }
 0x59c   : > { %v7002_v37 = vpop.permute.xlu0 %7001  ;;  %v6972_v19 = vpop.permute.xlu1 %6971 }
 0x59d   : > { %v7290_v4 = vmul.f32 %v7002_v37, %v16993_v33  ;;  %v7291_v46 = vmul.f32 %v7002_v37, %v16994_v42  ;;  %v7278_v43 = vmul.f32 %v6972_v19, %v16995_v56  ;;  %v7279_v17 = vmul.f32 %v6972_v19, %v16996_v1  ;;  %v16999_v37 = vld [vmem:[#allocation165_spill] sm:$0xff]  ;;  %v17000_v33 = vld [vmem:[#allocation108_spill] sm:$0xff] }
 0x59e   : > { %v6552_v56 = vmul.f32 0.0051020407, %v13424_v54  ;;  %v6506_v1 = vsel %vm5679_vm1, %v6259_v36, 0.0  ;;  %v6689_v54 = vadd.f32 1e-05, %v6623_v11  ;;  %v17004_v11 = vld [vmem:[#allocation309_spill] sm:$0xff] }
 0x59f   : > { %v7818_v38 = vadd.f32 %v16997_v34, %v7290_v4  ;;  %v7819_v6 = vadd.f32 %v16997_v34, %v7291_v46  ;;  %v7806_v32 = vadd.f32 %v16998_v51, %v7278_v43  ;;  %v7807_v30 = vadd.f32 %v16998_v51, %v7279_v17 }
 0x5a0   : > { %v6977_v29 = vpop.permute.xlu1 %6976  ;;  %v13806_v43 = vsub.f32 %v12991_v62, %v5997_v27  ;;  %v13813_v17 = vsub.f32 %v12993_v48, %v5997_v27  ;;  %v6507_v34 = vadd.f32 %v6506_v1, %v6258_v26  ;;  %8196 = vrsqrt.f32 %v6689_v54 }
 0x5a1   : > { %7950 = vst [vmem:[%s13607_s22 + $0xd0] sm:$0xff] %v7818_v38  ;;  %7951 = vst.msk [vmem:[%s13607_s22 + $0xd8] sm:$0xff] %vm5679_vm1, %v7819_v6  ;;  %v7280_v19 = vmul.f32 %v6977_v29, %v16999_v37  ;;  %v7281_v4 = vmul.f32 %v6977_v29, %v17000_v33  ;;  %v6618_v38 = vmax.f32 %v6552_v56, 0.0  ;;  %v6821_v29 = vld [vmem:[%s13401_s19 + $0x98] sm:$0xff]  ;;  %v6816_v37 = vld [vmem:[%s13401_s19 + $0x70] sm:$0xff] }
 0x5a2   : > { %7938 = vst [vmem:[%s13607_s22 + $0x70] sm:$0xff] %v7806_v32  ;;  %7939 = vst.msk [vmem:[%s13607_s22 + $0x78] sm:$0xff] %vm5679_vm1, %v7807_v30  ;;  %v6249_v6 = vmul.f32 %v13806_v43, %v13806_v43  ;;  %v6248_v62 = vmul.f32 %v13813_v17, %v13813_v17  ;;  %v17003_v56 = vld [vmem:[#allocation115_spill] sm:$0xff]  ;;  %v5999_v54 = vmul.f32 0.0051020407, %v13473_v7  ;;  %v17008_v7 = vld [vmem:[#allocation58_spill] sm:$0xff] }
 0x5a3   : > { %v7808_v42 = vadd.f32 %v17001_v23, %v7280_v19  ;;  %v7809_v46 = vadd.f32 %v17001_v23, %v7281_v4  ;;  %v6684_v51 = vadd.f32 1e-05, %v6618_v38  ;;  %v6004_v4 = vmul.f32 0.0051020407, %v13521_v41 }
 0x5a4   : > { %v6486_v32 = vsel %vm5679_vm1, %v6249_v6, 0.0 }
 0x5a5   : > { %7940 = vst [vmem:[%s13607_s22 + $0x80] sm:$0xff] %v7808_v42  ;;  %7941 = vst.msk [vmem:[%s13607_s22 + $0x88] sm:$0xff] %vm5679_vm1, %v7809_v46  ;;  %v6487_v30 = vadd.f32 %v6486_v32, %v6248_v62  ;;  %8198 = vrsqrt.f32 %v6684_v51  ;;  %v13828_v42 = vsub.f32 %v13131_v21, %v6004_v4  ;;  %v17002_v46 = vld [vmem:[#allocation180_spill] sm:$0xff]  ;;  %v13835_v6 = vsub.f32 %v13140_v5, %v6004_v4  ;;  %v17005_v62 = vld [vmem:[#allocation169_spill] sm:$0xff] }
 0x5a6   : > { %v17006_v32 = vld [vmem:[#allocation111_spill] sm:$0xff] }
 0x5a7   : > { %v6263_v21 = vmul.f32 %v13828_v42, %v13828_v42 }
 0x5aa   : > { %6508 = vadd.xlane.f32.xlu0 %v6507_v34 }
 0x5ad   : > { %v8197_v48 = vpop.eup %8196 }
 0x5ae   : > { %v6887_v36 = vmul.f32 %v8197_v48, %v6821_v29  ;;  %v6559_v48 = vmul.f32 0.0051020407, %v13508_v16  ;;  %v17007_v29 = vld [vmem:[#allocation275_spill] sm:$0xff]  ;;  %v17010_v16 = vld [vmem:[#allocation117_spill] sm:$0xff] }
 0x5b2   : > { %6488 = vadd.xlane.f32.xlu1 %v6487_v30  ;;  %v8199_v27 = vpop.eup %8198 }
 0x5b3   : > { %v6882_v19 = vmul.f32 %v8199_v27, %v6816_v37  ;;  %v6554_v37 = vmul.f32 0.0051020407, %v17008_v7 }
 0x5c0   : > { %7031 = vperm.xlu0 %8163, %v6887_v36   ;;  %v6262_v36 = vmul.f32 %v13835_v6, %v13835_v6 }
 0x5c3   : > { %7006 = vperm.xlu1 %8162, %v6882_v19   ;;  %v17009_v19 = vld [vmem:[#allocation188_spill] sm:$0xff] }
 0x5c4   : > { %v13852_v4 = vsub.f32 %v17009_v19, %v5999_v54 }
 0x5c9   : > { %v13822_v33 = vpop.xlane.xlu0 %6492 }
 0x5d1   : > { %v7012_v44 = vpop.permute.xlu0 %7011  ;;  %v13825_v23 = vpop.xlane.xlu1 %6472 }
 0x5d2   : > { %v7294_v26 = vmul.f32 %v7012_v44, %v17002_v46  ;;  %v7295_v1 = vmul.f32 %v7012_v44, %v17003_v56  ;;  %v6514_v44 = vsel %vm5679_vm1, %v6263_v21, 0.0  ;;  %v6625_v46 = vmax.f32 %v6559_v48, 0.0  ;;  %v6818_v48 = vld [vmem:[%s13401_s19 + $0x80] sm:$0xff] }
 0x5d3   : > { %v6515_v56 = vadd.f32 %v6514_v44, %v6262_v36  ;;  %v17012_v44 = vld [vmem:[#allocation184_spill] sm:$0xff] }
 0x5d4   : > { %v7822_v34 = vadd.f32 %v17004_v11, %v7294_v26  ;;  %v7823_v38 = vadd.f32 %v17004_v11, %v7295_v1  ;;  %v13859_v26 = vsub.f32 %v17010_v16, %v5999_v54  ;;  %v6620_v1 = vmax.f32 %v6554_v37, 0.0  ;;  %v17011_v37 = vld [vmem:[#allocation210_spill] sm:$0xff]  ;;  %v17013_v16 = vld [vmem:[#allocation36_spill] sm:$0xff] }
 0x5d5   : > { %v6987_v41 = vpop.permute.xlu1 %6986  ;;  %v6253_v11 = vmul.f32 %v13852_v4, %v13852_v4 }
 0x5d6   : > { %7954 = vst [vmem:[%s13607_s22 + $0xf0] sm:$0xff] %v7822_v34  ;;  %7955 = vst.msk [vmem:[%s13607_s22 + $0xf8] sm:$0xff] %vm5679_vm1, %v7823_v38  ;;  %v7284_v51 = vmul.f32 %v6987_v41, %v17005_v62  ;;  %v7285_v30 = vmul.f32 %v6987_v41, %v17006_v32  ;;  %v6691_v34 = vadd.f32 1e-05, %v6625_v46  ;;  %v6252_v38 = vmul.f32 %v13859_v26, %v13859_v26 }
 0x5d7   : > { %v6686_v41 = vadd.f32 1e-05, %v6620_v1  ;;  %v6494_v62 = vsel %vm5679_vm1, %v6253_v11, 0.0  ;;  %v17014_v1 = vld [vmem:[#allocation316_spill] sm:$0xff] }
 0x5d8   : > { %v7812_v27 = vadd.f32 %v17007_v29, %v7284_v51  ;;  %v7813_v5 = vadd.f32 %v17007_v29, %v7285_v30  ;;  %8200 = vrsqrt.f32 %v6691_v34  ;;  %v6495_v21 = vadd.f32 %v6494_v62, %v6252_v38  ;;  %v6823_v51 = vld [vmem:[%s13401_s19 + $0xa8] sm:$0xff] }
 0x5d9   : > { %8202 = vrsqrt.f32 %v6686_v41  ;;  %v17015_v38 = vld [vmem:[#allocation27_spill] sm:$0xff]  ;;  %v6001_v62 = vmul.f32 0.0051020407, %v13504_v25  ;;  %v6556_v25 = vmul.f32 0.0051020407, %v13495_v31 }
 0x5da   : > { %7944 = vst [vmem:[%s13607_s22 + $0xa0] sm:$0xff] %v7812_v27  ;;  %7945 = vst.msk [vmem:[%s13607_s22 + $0xa8] sm:$0xff] %vm5679_vm1, %v7813_v5  ;;  %v6006_v5 = vmul.f32 0.0051020407, %v13529_v63 }
 0x5dc   : > { %v13874_v19 = vsub.f32 %v17011_v37, %v6006_v5  ;;  %v13881_v41 = vsub.f32 %v17015_v38, %v6006_v5 }
 0x5de   : > { %v6266_v37 = vmul.f32 %v13881_v41, %v13881_v41 }
 0x5df   : > { %6516 = vadd.xlane.f32.xlu0 %v6515_v56 }
 0x5e5   : > { %v8201_v54 = vpop.eup %8200 }
 0x5e6   : > { %v8203_v32 = vpop.eup %8202  ;;  %v6889_v30 = vmul.f32 %v8201_v54, %v6823_v51  ;;  %v17016_v54 = vld [vmem:[#allocation32_spill] sm:$0xff] }
 0x5e7   : > { %6496 = vadd.xlane.f32.xlu1 %v6495_v21  ;;  %v6884_v29 = vmul.f32 %v8203_v32, %v6818_v48  ;;  %v6267_v21 = vmul.f32 %v13874_v19, %v13874_v19  ;;  %v17017_v32 = vld [vmem:[#allocation174_spill] sm:$0xff]  ;;  %v6561_v48 = vmul.f32 0.0051020407, %v13518_v50 }
 0x5e8   : > { %v17020_v50 = vld [vmem:[#allocation38_spill] sm:$0xff] }
 0x5f5   : > { %7041 = vperm.xlu0 %8163, %v6889_v30  }
 0x5f8   : > { %7016 = vperm.xlu1 %8162, %v6884_v29   ;;  %v17018_v29 = vld [vmem:[#allocation281_spill] sm:$0xff] }
 0x5fe   : > { %v13868_v27 = vpop.xlane.xlu0 %6500 }
 0x606   : > { %v7022_v36 = vpop.permute.xlu0 %7021  ;;  %v13871_v7 = vpop.xlane.xlu1 %6480 }
 0x607   : > { %v7298_v46 = vmul.f32 %v7022_v36, %v17012_v44  ;;  %v7299_v56 = vmul.f32 %v7022_v36, %v17013_v16  ;;  %v17019_v44 = vld [vmem:[#allocation194_spill] sm:$0xff]  ;;  %v6522_v16 = vsel %vm5679_vm1, %v6267_v21, 0.0 }
 0x609   : > { %v7826_v11 = vadd.f32 %v17014_v1, %v7298_v46  ;;  %v7827_v34 = vadd.f32 %v17014_v1, %v7299_v56  ;;  %v13898_v46 = vsub.f32 %v17019_v44, %v6001_v62  ;;  %v6627_v56 = vmax.f32 %v6561_v48, 0.0 }
 0x60a   : > { %v6997_v63 = vpop.permute.xlu1 %6996  ;;  %v13905_v1 = vsub.f32 %v17020_v50, %v6001_v62  ;;  %v17022_v50 = vld [vmem:[#allocation190_spill] sm:$0xff] }
 0x60b   : > { %7958 = vst [vmem:[%s13607_s22 + $0x110] sm:$0xff] %v7826_v11  ;;  %7959 = vst.msk [vmem:[%s13607_s22 + $0x118] sm:$0xff] %vm5679_vm1, %v7827_v34  ;;  %v7288_v51 = vmul.f32 %v6997_v63, %v17016_v54  ;;  %v7289_v30 = vmul.f32 %v6997_v63, %v17017_v32  ;;  %v6523_v11 = vadd.f32 %v6522_v16, %v6266_v37  ;;  %v6622_v34 = vmax.f32 %v6556_v25, 0.0  ;;  %v6825_v32 = vld [vmem:[%s13401_s19 + $0xb8] sm:$0xff]  ;;  %v17021_v16 = vld [vmem:[#allocation219_spill] sm:$0xff] }
 0x60c   : > { %v6257_v38 = vmul.f32 %v13898_v46, %v13898_v46  ;;  %v6693_v31 = vadd.f32 1e-05, %v6627_v56  ;;  %v6256_v63 = vmul.f32 %v13905_v1, %v13905_v1  ;;  %v6008_v37 = vmul.f32 0.0051020407, %v13558_v61 }
 0x60d   : > { %v7816_v36 = vadd.f32 %v17018_v29, %v7288_v51  ;;  %v7817_v5 = vadd.f32 %v17018_v29, %v7289_v30  ;;  %v6688_v54 = vadd.f32 1e-05, %v6622_v34  ;;  %v6820_v29 = vld [vmem:[%s13401_s19 + $0x90] sm:$0xff]  ;;  %v17023_v34 = vld [vmem:[#allocation19_spill] sm:$0xff] }
 0x60e   : > { %v6502_v51 = vsel %vm5679_vm1, %v6257_v38, 0.0  ;;  %8204 = vrsqrt.f32 %v6693_v31  ;;  %v13920_v56 = vsub.f32 %v17021_v16, %v6008_v37  ;;  %v17024_v31 = vld [vmem:[#allocation292_spill] sm:$0xff] }
 0x60f   : > { %7948 = vst [vmem:[%s13607_s22 + $0xc0] sm:$0xff] %v7816_v36  ;;  %7949 = vst.msk [vmem:[%s13607_s22 + $0xc8] sm:$0xff] %vm5679_vm1, %v7817_v5  ;;  %v6503_v21 = vadd.f32 %v6502_v51, %v6256_v63  ;;  %8206 = vrsqrt.f32 %v6688_v54  ;;  %v17025_v51 = vld [vmem:[#allocation29_spill] sm:$0xff]  ;;  %v17028_v16 = vld [vmem:[#allocation320_spill] sm:$0xff] }
 0x614   : > { %6524 = vadd.xlane.f32.xlu0 %v6523_v11 }
 0x61b   : > { %v8205_v62 = vpop.eup %8204 }
 0x61c   : > { %6504 = vadd.xlane.f32.xlu1 %v6503_v21  ;;  %v8207_v30 = vpop.eup %8206  ;;  %v6891_v48 = vmul.f32 %v8205_v62, %v6825_v32  ;;  %v13927_v21 = vsub.f32 %v17025_v51, %v6008_v37  ;;  %v6003_v62 = vmul.f32 0.0051020407, %v13513_v57  ;;  %v6271_v32 = vmul.f32 %v13920_v56, %v13920_v56  ;;  %v17030_v51 = vld [vmem:[#allocation121_spill] sm:$0xff] }
 0x61d   : > { %v6886_v36 = vmul.f32 %v8207_v30, %v6820_v29  ;;  %v17026_v30 = vld [vmem:[#allocation179_spill] sm:$0xff] }
 0x61e   : > { %v17027_v29 = vld [vmem:[#allocation15_spill] sm:$0xff]  ;;  %v6270_v57 = vmul.f32 %v13927_v21, %v13927_v21 }
 0x62a   : > { %7051 = vperm.xlu0 %8163, %v6891_v48  }
 0x62d   : > { %7026 = vperm.xlu1 %8162, %v6886_v36  }
 0x633   : > { %v13914_v5 = vpop.xlane.xlu0 %6508 }
 0x63b   : > { %v7032_v25 = vpop.permute.xlu0 %7031  ;;  %v13917_v44 = vpop.xlane.xlu1 %6488 }
 0x63c   : > { %v7302_v11 = vmul.f32 %v7032_v25, %v17022_v50  ;;  %v7303_v38 = vmul.f32 %v7032_v25, %v17023_v34  ;;  %v6563_v25 = vmul.f32 0.0051020407, %v13527_v24  ;;  %v17029_v34 = vld [vmem:[#allocation200_spill] sm:$0xff]  ;;  %v6565_v24 = vmul.f32 0.0051020407, %v13544_v10 }
 0x63e   : > { %v7830_v63 = vadd.f32 %v17024_v31, %v7302_v11  ;;  %v7831_v54 = vadd.f32 %v17024_v31, %v7303_v38  ;;  %v6558_v11 = vmul.f32 0.0051020407, %v13506_v12  ;;  %v13944_v38 = vsub.f32 %v17029_v34, %v6003_v62 }
 0x63f   : > { %v7007_v61 = vpop.permute.xlu1 %7006  ;;  %v6530_v31 = vsel %vm5679_vm1, %v6271_v32, 0.0 }
 0x640   : > { %7962 = vst [vmem:[%s13607_s22 + $0x130] sm:$0xff] %v7830_v63  ;;  %7963 = vst.msk [vmem:[%s13607_s22 + $0x138] sm:$0xff] %vm5679_vm1, %v7831_v54  ;;  %v7292_v48 = vmul.f32 %v7007_v61, %v17026_v30  ;;  %v7293_v36 = vmul.f32 %v7007_v61, %v17027_v29  ;;  %v6629_v63 = vmax.f32 %v6563_v25, 0.0  ;;  %v6624_v54 = vmax.f32 %v6558_v11, 0.0 }
 0x641   : > { %v13952_v61 = vsub.f32 %v17030_v51, %v6003_v62  ;;  %v6531_v30 = vadd.f32 %v6530_v31, %v6270_v57  ;;  %v6261_v12 = vmul.f32 %v13944_v38, %v13944_v38  ;;  %v6631_v29 = vmax.f32 %v6565_v24, 0.0  ;;  %v17031_v62 = vld [vmem:[#allocation45_spill] sm:$0xff]  ;;  %v17032_v31 = vld [vmem:[#allocation280_spill] sm:$0xff] }
 0x642   : > { %v7820_v50 = vadd.f32 %v17028_v16, %v7292_v48  ;;  %v7821_v37 = vadd.f32 %v17028_v16, %v7293_v36  ;;  %v6695_v48 = vadd.f32 1e-05, %v6629_v63  ;;  %v6567_v36 = vmul.f32 0.0051020407, %v13570_v53  ;;  %v17033_v63 = vld [vmem:[#allocation47_spill] sm:$0xff] }
 0x643   : > { %v6690_v16 = vadd.f32 1e-05, %v6624_v54  ;;  %v6260_v32 = vmul.f32 %v13952_v61, %v13952_v61  ;;  %v6510_v25 = vsel %vm5679_vm1, %v6261_v12, 0.0  ;;  %v6697_v10 = vadd.f32 1e-05, %v6631_v29  ;;  %v17034_v12 = vld [vmem:[#allocation284_spill] sm:$0xff] }
 0x644   : > { %7952 = vst [vmem:[%s13607_s22 + $0xe0] sm:$0xff] %v7820_v50  ;;  %7953 = vst.msk [vmem:[%s13607_s22 + $0xe8] sm:$0xff] %vm5679_vm1, %v7821_v37  ;;  %8208 = vrsqrt.f32 %v6695_v48  ;;  %v6633_v50 = vmax.f32 %v6567_v36, 0.0  ;;  %v6569_v37 = vmul.f32 0.0051020407, %v17031_v62  ;;  %v6822_v62 = vld [vmem:[%s13401_s19 + $0xa0] sm:$0xff] }
 0x645   : > { %8210 = vrsqrt.f32 %v6690_v16  ;;  %v6511_v11 = vadd.f32 %v6510_v25, %v6260_v32  ;;  %v6571_v53 = vmul.f32 0.0051020407, %v17032_v31  ;;  %v6573_v24 = vmul.f32 0.0051020407, %v17033_v63  ;;  %v6827_v16 = vld [vmem:[%s13401_s19 + $0xc8] sm:$0xff]  ;;  %v17035_v63 = vld [vmem:[#allocation286_spill] sm:$0xff] }
 0x646   : > { %8212 = vrsqrt.f32 %v6697_v10  ;;  %v6699_v57 = vadd.f32 1e-05, %v6633_v50  ;;  %v6635_v34 = vmax.f32 %v6569_v37, 0.0  ;;  %v6575_v48 = vmul.f32 0.0051020407, %v17034_v12 }
 0x647   : > { %v6637_v51 = vmax.f32 %v6571_v53, 0.0  ;;  %v6577_v50 = vmul.f32 0.0051020407, %v13593_v55 }
 0x648   : > { %8214 = vrsqrt.f32 %v6699_v57  ;;  %v6701_v54 = vadd.f32 1e-05, %v6635_v34  ;;  %v6641_v10 = vmax.f32 %v6575_v48, 0.0  ;;  %v6829_v57 = vld [vmem:[%s13401_s19 + $0xd8] sm:$0xff]  ;;  %v6581_v48 = vmul.f32 0.0051020407, %v13661_v58 }
 0x649   : > { %6532 = vadd.xlane.f32.xlu0 %v6531_v30  ;;  %v6639_v30 = vmax.f32 %v6573_v24, 0.0  ;;  %v6703_v29 = vadd.f32 1e-05, %v6637_v51  ;;  %v6643_v53 = vmax.f32 %v6577_v50, 0.0  ;;  %v6579_v24 = vmul.f32 0.0051020407, %v17035_v63 }
 0x64a   : > { %8216 = vrsqrt.f32 %v6701_v54  ;;  %v6707_v31 = vadd.f32 1e-05, %v6641_v10  ;;  %v6647_v10 = vmax.f32 %v6581_v48, 0.0  ;;  %v6837_v63 = vld [vmem:[%s13401_s19 + $0x118] sm:$0xff]  ;;  %v17036_v48 = vld [vmem:[#allocation196_spill] sm:$0xff] }
 0x64b   : > { %v6705_v25 = vadd.f32 1e-05, %v6639_v30  ;;  %8218 = vrsqrt.f32 %v6703_v29  ;;  %v6831_v30 = vld [vmem:[%s13401_s19 + $0xe8] sm:$0xff]  ;;  %v6709_v55 = vadd.f32 1e-05, %v6643_v53  ;;  %v6645_v12 = vmax.f32 %v6579_v24, 0.0 }
 0x64d   : > { %8220 = vrsqrt.f32 %v6705_v25  ;;  %v6583_v25 = vmul.f32 0.0051020407, %v13716_v0 }
 0x64e   : > { %8222 = vrsqrt.f32 %v6707_v31  ;;  %v6713_v31 = vadd.f32 1e-05, %v6647_v10 }
 0x64f   : > { %8224 = vrsqrt.f32 %v6709_v55 }
 0x651   : > { %6512 = vadd.xlane.f32.xlu1 %v6511_v11  ;;  %v8209_v36 = vpop.eup %8208 }
 0x652   : > { %v8211_v32 = vpop.eup %8210  ;;  %v6893_v37 = vmul.f32 %v8209_v36, %v6827_v16  ;;  %v6833_v16 = vld [vmem:[%s13401_s19 + $0xf8] sm:$0xff] }
 0x653   : > { %v8213_v11 = vpop.eup %8212  ;;  %v6888_v34 = vmul.f32 %v8211_v32, %v6822_v62  ;;  %v6711_v32 = vadd.f32 1e-05, %v6645_v12  ;;  %v6587_v12 = vmul.f32 0.0051020407, %v13825_v23 }
 0x654   : > { %v6895_v54 = vmul.f32 %v8213_v11, %v6829_v57  ;;  %v6649_v11 = vmax.f32 %v6583_v25, 0.0  ;;  %v6585_v57 = vmul.f32 0.0051020407, %v13771_v15 }
 0x655   : > { %v8215_v51 = vpop.eup %8214  ;;  %8226 = vrsqrt.f32 %v6711_v32  ;;  %v17038_v32 = vld [vmem:[#allocation332_spill] sm:$0xff]  ;;  %v6653_v23 = vmax.f32 %v6587_v12, 0.0 }
 0x656   : > { %v6897_v29 = vmul.f32 %v8215_v51, %v6831_v30  ;;  %v6715_v24 = vadd.f32 1e-05, %v6649_v11  ;;  %8228 = vrsqrt.f32 %v6713_v31  ;;  %v6589_v31 = vmul.f32 0.0051020407, %v13871_v7 }
 0x657   : > { %v8217_v36 = vpop.eup %8216 }
 0x658   : > { %v6899_v50 = vmul.f32 %v8217_v36, %v6833_v16  ;;  %v8219_v62 = vpop.eup %8218  ;;  %v6839_v16 = vld [vmem:[%s13401_s19 + $0x128] sm:$0xff]  ;;  %8230 = vrsqrt.f32 %v6715_v24 }
 0x65a   : > { %v8221_v58 = vpop.eup %8220 }
 0x65b   : > { %v6903_v30 = vmul.f32 %v8221_v58, %v6837_v63  ;;  %v8223_v55 = vpop.eup %8222 }
 0x65c   : > { %v8225_v58 = vpop.eup %8224 }
 0x65f   : > { %7061 = vperm.xlu0 %8163, %v6893_v37   ;;  %v6835_v37 = vld [vmem:[%s13401_s19 + $0x108] sm:$0xff] }
 0x660   : > { %v6901_v53 = vmul.f32 %v8219_v62, %v6835_v37 }
 0x662   : > { %7036 = vperm.xlu1 %8162, %v6888_v34  }
 0x663   : > { %7071 = vperm.xlu0 %8163, %v6895_v54   ;;  %v6651_v54 = vmax.f32 %v6585_v57, 0.0  ;;  %v6905_v57 = vmul.f32 %v8223_v55, %v6839_v16  ;;  %v17043_v55 = vld [vmem:[#allocation140_spill] sm:$0xff]  ;;  %v8227_v16 = vpop.eup %8226 }
 0x664   : > { %v6560_v12 = vmul.f32 0.0051020407, %v17043_v55 }
 0x665   : > { %v6717_v37 = vadd.f32 1e-05, %v6651_v54 }
 0x667   : > { %7081 = vperm.xlu0 %8163, %v6897_v29   ;;  %v17037_v29 = vld [vmem:[#allocation40_spill] sm:$0xff]  ;;  %8232 = vrsqrt.f32 %v6717_v37 }
 0x668   : > { %v13975_v34 = vpop.xlane.xlu0 %6516 }
 0x66b   : > { %7091 = vperm.xlu0 %8163, %v6899_v50   ;;  %v17039_v50 = vld [vmem:[#allocation41_spill] sm:$0xff] }
 0x66c   : > { %v6005_v62 = vmul.f32 0.0051020407, %v17039_v50  ;;  %v6843_v50 = vld [vmem:[%s13401_s19 + $0x148] sm:$0xff] }
 0x66f   : > { %7101 = vperm.xlu0 %8163, %v6901_v53   ;;  %v17040_v53 = vld [vmem:[#allocation182_spill] sm:$0xff] }
 0x670   : > { %v7042_v0 = vpop.permute.xlu0 %7041  ;;  %v6497_v51 = vpop.xlane.xlu1 %6496 }
 0x671   : > { %v7306_v15 = vmul.f32 %v7042_v0, %v17036_v48  ;;  %v7307_v36 = vmul.f32 %v7042_v0, %v17037_v29  ;;  %v17041_v0 = vld [vmem:[#allocation34_spill] sm:$0xff]  ;;  %v6841_v48 = vld [vmem:[%s13401_s19 + $0x138] sm:$0xff] }
 0x672   : > { %v17044_v29 = vld [vmem:[#allocation205_spill] sm:$0xff] }
 0x673   : > { %v7834_v25 = vadd.f32 %v17038_v32, %v7306_v15  ;;  %v7835_v10 = vadd.f32 %v17038_v32, %v7307_v36  ;;  %7111 = vperm.xlu0 %8163, %v6903_v30   ;;  %v17042_v15 = vld [vmem:[#allocation326_spill] sm:$0xff]  ;;  %v13996_v7 = vsub.f32 %v17044_v29, %v6005_v62  ;;  %v6907_v36 = vmul.f32 %v8225_v58, %v6841_v48 }
 0x674   : > { %v7017_v11 = vpop.permute.xlu1 %7016  ;;  %v6719_v32 = vadd.f32 1e-05, %v6653_v23  ;;  %v6909_v58 = vmul.f32 %v8227_v16, %v6843_v50  ;;  %v6851_v50 = vld [vmem:[%s13401_s19 + $0x188] sm:$0xff] }
 0x675   : > { %7966 = vst [vmem:[%s13607_s22 + $0x150] sm:$0xff] %v7834_v25  ;;  %7967 = vst.msk [vmem:[%s13607_s22 + $0x158] sm:$0xff] %vm5679_vm1, %v7835_v10  ;;  %v7296_v63 = vmul.f32 %v7017_v11, %v17040_v53  ;;  %v7297_v30 = vmul.f32 %v7017_v11, %v17041_v0  ;;  %v6655_v25 = vmax.f32 %v6589_v31, 0.0  ;;  %v6591_v10 = vmul.f32 0.0051020407, %v13917_v44  ;;  %v8229_v0 = vpop.eup %8228  ;;  %v6845_v44 = vld [vmem:[%s13401_s19 + $0x158] sm:$0xff] }
 0x676   : > { %v6626_v11 = vmax.f32 %v6560_v12, 0.0  ;;  %8234 = vrsqrt.f32 %v6719_v32  ;;  %v6593_v31 = vmul.f32 0.0051020407, %v6497_v51  ;;  %v6911_v55 = vmul.f32 %v8229_v0, %v6845_v44  ;;  %v6847_v12 = vld [vmem:[%s13401_s19 + $0x168] sm:$0xff]  ;;  %v6849_v32 = vld [vmem:[%s13401_s19 + $0x178] sm:$0xff] }
 0x677   : > { %v7824_v24 = vadd.f32 %v17042_v15, %v7296_v63  ;;  %v7825_v54 = vadd.f32 %v17042_v15, %v7297_v30  ;;  %7121 = vperm.xlu0 %8163, %v6905_v57   ;;  %v17045_v57 = vld [vmem:[#allocation44_spill] sm:$0xff]  ;;  %v6265_v63 = vmul.f32 %v13996_v7, %v13996_v7  ;;  %v6721_v37 = vadd.f32 1e-05, %v6655_v25  ;;  %v8231_v15 = vpop.eup %8230  ;;  %v6855_v0 = vld [vmem:[%s13401_s19 + $0x1a8] sm:$0xff] }
 0x678   : > { %v14004_v53 = vsub.f32 %v17045_v57, %v6005_v62  ;;  %v6657_v23 = vmax.f32 %v6591_v10, 0.0  ;;  %v6692_v30 = vadd.f32 1e-05, %v6626_v11  ;;  %v8233_v16 = vpop.eup %8232 }
 0x679   : > { %7956 = vst [vmem:[%s13607_s22 + $0x100] sm:$0xff] %v7824_v24  ;;  %7957 = vst.msk [vmem:[%s13607_s22 + $0x108] sm:$0xff] %vm5679_vm1, %v7825_v54  ;;  %v6518_v62 = vsel %vm5679_vm1, %v6265_v63, 0.0  ;;  %8236 = vrsqrt.f32 %v6721_v37  ;;  %v6659_v54 = vmax.f32 %v6593_v31, 0.0  ;;  %v6915_v25 = vmul.f32 %v8233_v16, %v6849_v32  ;;  %v6853_v63 = vld [vmem:[%s13401_s19 + $0x198] sm:$0xff]  ;;  %v6824_v31 = vld [vmem:[%s13401_s19 + $0xb0] sm:$0xff] }
 0x67a   : > { %v6264_v48 = vmul.f32 %v14004_v53, %v14004_v53  ;;  %v6723_v24 = vadd.f32 1e-05, %v6657_v23  ;;  %8238 = vrsqrt.f32 %v6692_v30  ;;  %v17048_v32 = vld [vmem:[#allocation307_spill] sm:$0xff] }
 0x67b   : > { %7131 = vperm.xlu0 %8163, %v6907_v36   ;;  %v6725_v29 = vadd.f32 1e-05, %v6659_v54  ;;  %v6913_v36 = vmul.f32 %v8231_v15, %v6847_v12  ;;  %v17046_v12 = vld [vmem:[#allocation202_spill] sm:$0xff] }
 0x67c   : > { %v6519_v51 = vadd.f32 %v6518_v62, %v6264_v48  ;;  %8240 = vrsqrt.f32 %v6723_v24  ;;  %v6857_v62 = vld [vmem:[%s13401_s19 + $0x1b8] sm:$0xff] }
 0x67d   : > { %8242 = vrsqrt.f32 %v6725_v29  ;;  %v17047_v29 = vld [vmem:[#allocation123_spill] sm:$0xff] }
 0x67f   : > { %7141 = vperm.xlu0 %8163, %v6909_v58  }
 0x683   : > { %7151 = vperm.xlu0 %8163, %v6911_v55   ;;  %v8235_v10 = vpop.eup %8234 }
 0x684   : > { %v6917_v11 = vmul.f32 %v8235_v10, %v6851_v50 }
 0x686   : > { %6520 = vadd.xlane.f32.xlu1 %v6519_v51  ;;  %v8237_v57 = vpop.eup %8236 }
 0x687   : > { %7161 = vperm.xlu0 %8163, %v6913_v36   ;;  %v8239_v58 = vpop.eup %8238  ;;  %v6919_v37 = vmul.f32 %v8237_v57, %v6853_v63  ;;  %v17049_v57 = vld [vmem:[#allocation268_spill] sm:$0xff] }
 0x688   : > { %v6890_v44 = vmul.f32 %v8239_v58, %v6824_v31  ;;  %v6007_v63 = vmul.f32 0.0051020407, %v17049_v57  ;;  %v17051_v31 = vld [vmem:[#allocation17_spill] sm:$0xff] }
 0x689   : > { %v8241_v23 = vpop.eup %8240 }
 0x68a   : > { %v6921_v30 = vmul.f32 %v8241_v23, %v6855_v0  ;;  %v8243_v48 = vpop.eup %8242 }
 0x68b   : > { %7171 = vperm.xlu0 %8163, %v6915_v25   ;;  %v6923_v15 = vmul.f32 %v8243_v48, %v6857_v62  ;;  %v17053_v62 = vld [vmem:[#allocation265_spill] sm:$0xff] }
 0x68f   : > { %7181 = vperm.xlu0 %8163, %v6917_v11  }
 0x693   : > { %7191 = vperm.xlu0 %8163, %v6919_v37   ;;  %v17050_v37 = vld [vmem:[#allocation185_spill] sm:$0xff] }
 0x697   : > { %7046 = vperm.xlu1 %8162, %v6890_v44   ;;  %7201 = vperm.xlu0 %8163, %v6921_v30   ;;  %v17052_v44 = vld [vmem:[#allocation333_spill] sm:$0xff] }
 0x69b   : > { %7211 = vperm.xlu0 %8163, %v6923_v15   ;;  %v6562_v15 = vmul.f32 0.0051020407, %v17053_v62 }
 0x69d   : > { %v14019_v24 = vpop.xlane.xlu0 %6524 }
 0x6a5   : > { %v7052_v54 = vpop.permute.xlu0 %7051  ;;  %v6505_v55 = vpop.xlane.xlu1 %6504 }
 0x6a6   : > { %v7310_v51 = vmul.f32 %v7052_v54, %v17046_v12  ;;  %v7311_v36 = vmul.f32 %v7052_v54, %v17047_v29  ;;  %v6595_v16 = vmul.f32 0.0051020407, %v6505_v55  ;;  %v17054_v54 = vld [vmem:[#allocation214_spill] sm:$0xff]  ;;  %v6628_v29 = vmax.f32 %v6562_v15, 0.0 }
 0x6a7   : > { %v14035_v55 = vsub.f32 %v17054_v54, %v6007_v63  ;;  %v17056_v12 = vld [vmem:[#allocation126_spill] sm:$0xff]  ;;  %v17059_v54 = vld [vmem:[#allocation312_spill] sm:$0xff] }
 0x6a8   : > { %v7838_v25 = vadd.f32 %v17048_v32, %v7310_v51  ;;  %v7839_v10 = vadd.f32 %v17048_v32, %v7311_v36  ;;  %v6661_v50 = vmax.f32 %v6595_v16, 0.0  ;;  %v14041_v51 = vsub.f32 %v17056_v12, %v6007_v63  ;;  %v6826_v63 = vld [vmem:[%s13401_s19 + $0xc0] sm:$0xff] }
 0x6a9   : > { %v7027_v11 = vpop.permute.xlu1 %7026  ;;  %17055 = vst [vmem:[#allocation49_spill] sm:$0xff] %v14035_v55  ;;  %v6269_v36 = vmul.f32 %v14035_v55, %v14035_v55  ;;  %v6694_v32 = vadd.f32 1e-05, %v6628_v29 }
 0x6aa   : > { %7970 = vst [vmem:[%s13607_s22 + $0x170] sm:$0xff] %v7838_v25  ;;  %7971 = vst.msk [vmem:[%s13607_s22 + $0x178] sm:$0xff] %vm5679_vm1, %v7839_v10  ;;  %v6727_v58 = vadd.f32 1e-05, %v6661_v50  ;;  %v7300_v23 = vmul.f32 %v7027_v11, %v17050_v37  ;;  %v7301_v0 = vmul.f32 %v7027_v11, %v17051_v31  ;;  %v6268_v16 = vmul.f32 %v14041_v51, %v14041_v51  ;;  %v6859_v10 = vld [vmem:[%s13401_s19 + $0x1c8] sm:$0xff] }
 0x6ab   : > { %v6526_v25 = vsel %vm5679_vm1, %v6269_v36, 0.0 }
 0x6ac   : > { %8244 = vrsqrt.f32 %v6727_v58  ;;  %v7828_v30 = vadd.f32 %v17052_v44, %v7300_v23  ;;  %v7829_v48 = vadd.f32 %v17052_v44, %v7301_v0  ;;  %v6527_v11 = vadd.f32 %v6526_v25, %v6268_v16  ;;  %v17057_v44 = vld [vmem:[#allocation208_spill] sm:$0xff]  ;;  %v17060_v16 = vld [vmem:[#allocation274_spill] sm:$0xff] }
 0x6ad   : > { %8246 = vrsqrt.f32 %v6694_v32  ;;  %v6009_v32 = vmul.f32 0.0051020407, %v17060_v16 }
 0x6ae   : > { %7960 = vst [vmem:[%s13607_s22 + $0x120] sm:$0xff] %v7828_v30  ;;  %7961 = vst.msk [vmem:[%s13607_s22 + $0x128] sm:$0xff] %vm5679_vm1, %v7829_v48  ;;  %v17058_v48 = vld [vmem:[#allocation25_spill] sm:$0xff] }
 0x6b9   : > { %v8245_v50 = vpop.eup %8244 }
 0x6ba   : > { %v6925_v57 = vmul.f32 %v8245_v50, %v6859_v10  ;;  %v8247_v58 = vpop.eup %8246 }
 0x6bb   : > { %6528 = vadd.xlane.f32.xlu1 %v6527_v11  ;;  %v6892_v37 = vmul.f32 %v8247_v58, %v6826_v63  ;;  %v17061_v11 = vld [vmem:[#allocation216_spill] sm:$0xff]  ;;  %v17062_v58 = vld [vmem:[#allocation46_spill] sm:$0xff] }
 0x6bc   : > { %7221 = vperm.xlu0 %8163, %v6925_v57  }
 0x6cc   : > { %7056 = vperm.xlu1 %8162, %v6892_v37   ;;  %v17063_v37 = vld [vmem:[#allocation191_spill] sm:$0xff] }
 0x6d2   : > { %v14050_v23 = vpop.xlane.xlu0 %6532 }
 0x6da   : > { %v7062_v31 = vpop.permute.xlu0 %7061  ;;  %v6513_v0 = vpop.xlane.xlu1 %6512 }
 0x6db   : > { %v7314_v30 = vmul.f32 %v7062_v31, %v17057_v44  ;;  %v7315_v62 = vmul.f32 %v7062_v31, %v17058_v48  ;;  %v6597_v15 = vmul.f32 0.0051020407, %v6513_v0  ;;  %v17064_v0 = vld [vmem:[#allocation271_spill] sm:$0xff] }
 0x6dc   : > { %v6564_v44 = vmul.f32 0.0051020407, %v17064_v0 }
 0x6dd   : > { %v7842_v12 = vadd.f32 %v17059_v54, %v7314_v30  ;;  %v7843_v29 = vadd.f32 %v17059_v54, %v7315_v62  ;;  %v6663_v36 = vmax.f32 %v6597_v15, 0.0  ;;  %v17065_v30 = vld [vmem:[#allocation120_spill] sm:$0xff]  ;;  %v17066_v62 = vld [vmem:[#allocation319_spill] sm:$0xff] }
 0x6de   : > { %v7072_v25 = vpop.permute.xlu0 %7071  ;;  %v7037_v10 = vpop.permute.xlu1 %7036 }
 0x6df   : > { %7974 = vst [vmem:[%s13607_s22 + $0x190] sm:$0xff] %v7842_v12  ;;  %7975 = vst.msk [vmem:[%s13607_s22 + $0x198] sm:$0xff] %vm5679_vm1, %v7843_v29  ;;  %v6729_v50 = vadd.f32 1e-05, %v6663_v36  ;;  %v7318_v57 = vmul.f32 %v7072_v25, %v17061_v11  ;;  %v7319_v63 = vmul.f32 %v7072_v25, %v17062_v58  ;;  %v7304_v31 = vmul.f32 %v7037_v10, %v17063_v37  ;;  %v17067_v12 = vld [vmem:[#allocation336_spill] sm:$0xff]  ;;  %v17068_v11 = vld [vmem:[#allocation222_spill] sm:$0xff] }
 0x6e0   : > { %v7305_v48 = vmul.f32 %v7037_v10, %v17065_v30  ;;  %v14070_v25 = vsub.f32 %v17068_v11, %v6009_v32  ;;  %v17070_v10 = vld [vmem:[#allocation224_spill] sm:$0xff]  ;;  %v17071_v58 = vld [vmem:[#allocation31_spill] sm:$0xff] }
 0x6e1   : > { %8248 = vrsqrt.f32 %v6729_v50  ;;  %v7846_v15 = vadd.f32 %v17066_v62, %v7318_v57  ;;  %v7847_v54 = vadd.f32 %v17066_v62, %v7319_v63  ;;  %v7832_v29 = vadd.f32 %v17067_v12, %v7304_v31  ;;  %v17072_v37 = vld [vmem:[#allocation324_spill] sm:$0xff]  ;;  %v17074_v62 = vld [vmem:[#allocation129_spill] sm:$0xff] }
 0x6e2   : > { %v7833_v36 = vadd.f32 %v17067_v12, %v7305_v48  ;;  %v7082_v16 = vpop.permute.xlu0 %7081  ;;  %17069 = vst [vmem:[#allocation294_spill] sm:$0xff] %v14070_v25  ;;  %v6630_v63 = vmax.f32 %v6564_v44, 0.0  ;;  %v17073_v30 = vld [vmem:[#allocation276_spill] sm:$0xff]  ;;  %v6273_v12 = vmul.f32 %v14070_v25, %v14070_v25 }
 0x6e3   : > { %7978 = vst [vmem:[%s13607_s22 + $0x1b0] sm:$0xff] %v7846_v15  ;;  %7979 = vst.msk [vmem:[%s13607_s22 + $0x1b8] sm:$0xff] %vm5679_vm1, %v7847_v54  ;;  %v7322_v50 = vmul.f32 %v7082_v16, %v17070_v10  ;;  %v7323_v57 = vmul.f32 %v7082_v16, %v17071_v58  ;;  %v6566_v48 = vmul.f32 0.0051020407, %v17073_v30  ;;  %v14084_v15 = vsub.f32 %v17074_v62, %v6009_v32  ;;  %v17076_v44 = vld [vmem:[#allocation228_spill] sm:$0xff]  ;;  %v17078_v10 = vld [vmem:[#allocation330_spill] sm:$0xff] }
 0x6e4   : > { %7964 = vst [vmem:[%s13607_s22 + $0x140] sm:$0xff] %v7832_v29  ;;  %7965 = vst.msk [vmem:[%s13607_s22 + $0x148] sm:$0xff] %vm5679_vm1, %v7833_v36  ;;  %v17077_v36 = vld [vmem:[#allocation50_spill] sm:$0xff]  ;;  %v6696_v11 = vadd.f32 1e-05, %v6630_v63 }
 0x6e5   : > { %v7850_v31 = vadd.f32 %v17072_v37, %v7322_v50  ;;  %v7851_v0 = vadd.f32 %v17072_v37, %v7323_v57  ;;  %17075 = vst [vmem:[#allocation296_spill] sm:$0xff] %v14084_v15  ;;  %v6632_v57 = vmax.f32 %v6566_v48, 0.0  ;;  %v6272_v32 = vmul.f32 %v14084_v15, %v14084_v15  ;;  %v17079_v37 = vld [vmem:[#allocation148_spill] sm:$0xff]  ;;  %v17083_v15 = vld [vmem:[#allocation278_spill] sm:$0xff] }
 0x6e6   : > { %v7092_v54 = vpop.permute.xlu0 %7091  ;;  %v6568_v30 = vmul.f32 0.0051020407, %v17079_v37  ;;  %8250 = vrsqrt.f32 %v6696_v11  ;;  %v17082_v48 = vld [vmem:[#allocation68_spill] sm:$0xff] }
 0x6e7   : > { %7982 = vst [vmem:[%s13607_s22 + $0x1d0] sm:$0xff] %v7850_v31  ;;  %7983 = vst.msk [vmem:[%s13607_s22 + $0x1d8] sm:$0xff] %vm5679_vm1, %v7851_v0  ;;  %v7326_v29 = vmul.f32 %v7092_v54, %v17076_v44  ;;  %v7327_v16 = vmul.f32 %v7092_v54, %v17077_v36  ;;  %v17080_v31 = vld [vmem:[#allocation231_spill] sm:$0xff]  ;;  %v17081_v54 = vld [vmem:[#allocation33_spill] sm:$0xff]  ;;  %v6534_v44 = vsel %vm5679_vm1, %v6273_v12, 0.0 }
 0x6e8   : > { %v6698_v37 = vadd.f32 1e-05, %v6632_v57  ;;  %v6634_v25 = vmax.f32 %v6568_v30, 0.0 }
 0x6e9   : > { %v7854_v50 = vadd.f32 %v17078_v10, %v7326_v29  ;;  %v7855_v58 = vadd.f32 %v17078_v10, %v7327_v16  ;;  %v6861_v29 = vld [vmem:[%s13401_s19 + $0x1d8] sm:$0xff] }
 0x6ea   : > { %v7102_v62 = vpop.permute.xlu0 %7101  ;;  %8252 = vrsqrt.f32 %v6698_v37 }
 0x6eb   : > { %7986 = vst [vmem:[%s13607_s22 + $0x1f0] sm:$0xff] %v7854_v50  ;;  %7987 = vst.msk [vmem:[%s13607_s22 + $0x1f8] sm:$0xff] %vm5679_vm1, %v7855_v58  ;;  %v7330_v0 = vmul.f32 %v7102_v62, %v17080_v31  ;;  %v7331_v63 = vmul.f32 %v7102_v62, %v17081_v54  ;;  %v6570_v50 = vmul.f32 0.0051020407, %v17083_v15  ;;  %v6535_v58 = vadd.f32 %v6534_v44, %v6272_v32  ;;  %v17084_v62 = vld [vmem:[#allocation236_spill] sm:$0xff]  ;;  %v17085_v31 = vld [vmem:[#allocation35_spill] sm:$0xff] }
 0x6ec   : > { %v6700_v15 = vadd.f32 1e-05, %v6634_v25  ;;  %v17087_v44 = vld [vmem:[#allocation43_spill] sm:$0xff] }
 0x6ed   : > { %v7858_v36 = vadd.f32 %v17082_v48, %v7330_v0  ;;  %v7859_v16 = vadd.f32 %v17082_v48, %v7331_v63  ;;  %v17086_v0 = vld [vmem:[#allocation75_spill] sm:$0xff]  ;;  %v6636_v32 = vmax.f32 %v6570_v50, 0.0  ;;  %v6572_v48 = vmul.f32 0.0051020407, %v17087_v44 }
 0x6ee   : > { %v8249_v10 = vpop.eup %8248  ;;  %v7112_v55 = vpop.permute.xlu0 %7111  ;;  %8254 = vrsqrt.f32 %v6700_v15 }
 0x6ef   : > { %7990 = vst [vmem:[%s13607_s22 + $0x210] sm:$0xff] %v7858_v36  ;;  %7991 = vst.msk [vmem:[%s13607_s22 + $0x218] sm:$0xff] %vm5679_vm1, %v7859_v16  ;;  %v7334_v12 = vmul.f32 %v7112_v55, %v17084_v62  ;;  %v7335_v11 = vmul.f32 %v7112_v55, %v17085_v31  ;;  %v6927_v54 = vmul.f32 %v8249_v10, %v6861_v29  ;;  %v17088_v36 = vld [vmem:[#allocation240_spill] sm:$0xff]  ;;  %v17089_v29 = vld [vmem:[#allocation54_spill] sm:$0xff]  ;;  %v6702_v37 = vadd.f32 1e-05, %v6636_v32 }
 0x6f0   : > { %6536 = vadd.xlane.f32.xlu1 %v6535_v58  ;;  %v17090_v10 = vld [vmem:[#allocation83_spill] sm:$0xff]  ;;  %v6638_v31 = vmax.f32 %v6572_v48, 0.0 }
 0x6f1   : > { %v7862_v63 = vadd.f32 %v17086_v0, %v7334_v12  ;;  %v7863_v57 = vadd.f32 %v17086_v0, %v7335_v11  ;;  %7231 = vperm.xlu0 %8163, %v6927_v54   ;;  %v17091_v12 = vld [vmem:[#allocation282_spill] sm:$0xff]  ;;  %v17092_v11 = vld [vmem:[#allocation244_spill] sm:$0xff]  ;;  %v17093_v0 = vld [vmem:[#allocation37_spill] sm:$0xff]  ;;  %8256 = vrsqrt.f32 %v6702_v37 }
 0x6f2   : > { %v7122_v30 = vpop.permute.xlu0 %7121  ;;  %v6574_v25 = vmul.f32 0.0051020407, %v17091_v12  ;;  %v6704_v48 = vadd.f32 1e-05, %v6638_v31  ;;  %v6828_v12 = vld [vmem:[%s13401_s19 + $0xd0] sm:$0xff]  ;;  %v17099_v31 = vld [vmem:[#allocation65_spill] sm:$0xff] }
 0x6f3   : > { %7994 = vst [vmem:[%s13607_s22 + $0x230] sm:$0xff] %v7862_v63  ;;  %7995 = vst.msk [vmem:[%s13607_s22 + $0x238] sm:$0xff] %vm5679_vm1, %v7863_v57  ;;  %v7338_v55 = vmul.f32 %v7122_v30, %v17088_v36  ;;  %v7339_v16 = vmul.f32 %v7122_v30, %v17089_v29  ;;  %v17094_v57 = vld [vmem:[#allocation86_spill] sm:$0xff]  ;;  %v8251_v15 = vpop.eup %8250  ;;  %v17095_v36 = vld [vmem:[#allocation67_spill] sm:$0xff] }
 0x6f4   : > { %v6640_v32 = vmax.f32 %v6574_v25, 0.0  ;;  %8258 = vrsqrt.f32 %v6704_v48 }
 0x6f5   : > { %v7866_v58 = vadd.f32 %v17090_v10, %v7338_v55  ;;  %v7867_v62 = vadd.f32 %v17090_v10, %v7339_v16  ;;  %v6576_v55 = vmul.f32 0.0051020407, %v17095_v36  ;;  %v17096_v16 = vld [vmem:[#allocation248_spill] sm:$0xff] }
 0x6f6   : > { %v7132_v50 = vpop.permute.xlu0 %7131  ;;  %v6706_v25 = vadd.f32 1e-05, %v6640_v32 }
 0x6f7   : > { %7998 = vst [vmem:[%s13607_s22 + $0x250] sm:$0xff] %v7866_v58  ;;  %7999 = vst.msk [vmem:[%s13607_s22 + $0x258] sm:$0xff] %vm5679_vm1, %v7867_v62  ;;  %v7342_v54 = vmul.f32 %v7132_v50, %v17092_v11  ;;  %v7343_v63 = vmul.f32 %v7132_v50, %v17093_v0  ;;  %v17097_v58 = vld [vmem:[#allocation39_spill] sm:$0xff]  ;;  %v17098_v50 = vld [vmem:[#allocation90_spill] sm:$0xff] }
 0x6f8   : > { %8260 = vrsqrt.f32 %v6706_v25 }
 0x6f9   : > { %v7870_v30 = vadd.f32 %v17094_v57, %v7342_v54  ;;  %v7871_v44 = vadd.f32 %v17094_v57, %v7343_v63  ;;  %v6642_v54 = vmax.f32 %v6576_v55, 0.0  ;;  %v6894_v63 = vmul.f32 %v8251_v15, %v6828_v12  ;;  %v8253_v57 = vpop.eup %8252 }
 0x6fa   : > { %v7142_v29 = vpop.permute.xlu0 %7141 }
 0x6fb   : > { %8002 = vst [vmem:[%s13607_s22 + $0x270] sm:$0xff] %v7870_v30  ;;  %8003 = vst.msk [vmem:[%s13607_s22 + $0x278] sm:$0xff] %vm5679_vm1, %v7871_v44  ;;  %v7346_v10 = vmul.f32 %v7142_v29, %v17096_v16  ;;  %v7347_v62 = vmul.f32 %v7142_v29, %v17097_v58  ;;  %v6578_v30 = vmul.f32 0.0051020407, %v17099_v31  ;;  %v17100_v44 = vld [vmem:[#allocation259_spill] sm:$0xff]  ;;  %v17101_v29 = vld [vmem:[#allocation254_spill] sm:$0xff]  ;;  %v8255_v12 = vpop.eup %8254 }
 0x6fc   : > { %v17102_v58 = vld [vmem:[#allocation92_spill] sm:$0xff]  ;;  %v6708_v15 = vadd.f32 1e-05, %v6642_v54  ;;  %v17104_v31 = vld [vmem:[#allocation142_spill] sm:$0xff] }
 0x6fd   : > { %v7874_v11 = vadd.f32 %v17098_v50, %v7346_v10  ;;  %v7875_v37 = vadd.f32 %v17098_v50, %v7347_v62  ;;  %v6830_v10 = vld [vmem:[%s13401_s19 + $0xe0] sm:$0xff]  ;;  %v6644_v50 = vmax.f32 %v6578_v30, 0.0 }
 0x6fe   : > { %v7152_v0 = vpop.permute.xlu0 %7151  ;;  %v6896_v62 = vmul.f32 %v8253_v57, %v6830_v10  ;;  %8262 = vrsqrt.f32 %v6708_v15  ;;  %v6582_v57 = vmul.f32 0.0051020407, %v13659_v14  ;;  %v6584_v15 = vmul.f32 0.0051020407, %v13663_v2 }
 0x6ff   : > { %8006 = vst [vmem:[%s13607_s22 + $0x290] sm:$0xff] %v7874_v11  ;;  %8007 = vst.msk [vmem:[%s13607_s22 + $0x298] sm:$0xff] %vm5679_vm1, %v7875_v37  ;;  %v7350_v36 = vmul.f32 %v7152_v0, %v17100_v44  ;;  %v7351_v16 = vmul.f32 %v7152_v0, %v17101_v29  ;;  %v6580_v11 = vmul.f32 0.0051020407, %v13656_v60  ;;  %v17103_v37 = vld [vmem:[#allocation63_spill] sm:$0xff]  ;;  %v8257_v29 = vpop.eup %8256 }
 0x701   : > { %v7878_v32 = vadd.f32 %v17102_v58, %v7350_v36  ;;  %v7879_v55 = vadd.f32 %v17102_v58, %v7351_v16  ;;  %7066 = vperm.xlu1 %8162, %v6894_v63   ;;  %v6832_v36 = vld [vmem:[%s13401_s19 + $0xf0] sm:$0xff]  ;;  %v17105_v63 = vld [vmem:[#allocation97_spill] sm:$0xff]  ;;  %v6710_v16 = vadd.f32 1e-05, %v6644_v50  ;;  %v6646_v10 = vmax.f32 %v6580_v11, 0.0  ;;  %v8259_v2 = vpop.eup %8258 }
 0x702   : > { %v7162_v48 = vpop.permute.xlu0 %7161  ;;  %v6898_v30 = vmul.f32 %v8255_v12, %v6832_v36  ;;  %v6648_v12 = vmax.f32 %v6582_v57, 0.0  ;;  %v17107_v36 = vld [vmem:[#allocation101_spill] sm:$0xff] }
 0x703   : > { %8010 = vst [vmem:[%s13607_s22 + $0x2b0] sm:$0xff] %v7878_v32  ;;  %8011 = vst.msk [vmem:[%s13607_s22 + $0x2b8] sm:$0xff] %vm5679_vm1, %v7879_v55  ;;  %v7354_v0 = vmul.f32 %v7162_v48, %v17103_v37  ;;  %v7355_v44 = vmul.f32 %v7162_v48, %v17104_v31  ;;  %v6834_v55 = vld [vmem:[%s13401_s19 + $0x100] sm:$0xff]  ;;  %v17106_v48 = vld [vmem:[#allocation71_spill] sm:$0xff]  ;;  %8264 = vrsqrt.f32 %v6710_v16  ;;  %v6712_v37 = vadd.f32 1e-05, %v6646_v10 }
 0x704   : > { %v6900_v11 = vmul.f32 %v8257_v29, %v6834_v55  ;;  %v6650_v31 = vmax.f32 %v6584_v15, 0.0  ;;  %v6838_v16 = vld [vmem:[%s13401_s19 + $0x120] sm:$0xff] }
 0x705   : > { %v7882_v25 = vadd.f32 %v17105_v63, %v7354_v0  ;;  %v7883_v54 = vadd.f32 %v17105_v63, %v7355_v44  ;;  %7076 = vperm.xlu1 %8162, %v6896_v62   ;;  %v6836_v0 = vld [vmem:[%s13401_s19 + $0x110] sm:$0xff]  ;;  %v6586_v44 = vmul.f32 0.0051020407, %v13668_v3  ;;  %8266 = vrsqrt.f32 %v6712_v37 }
 0x706   : > { %v7172_v60 = vpop.permute.xlu0 %7171  ;;  %v6902_v3 = vmul.f32 %v8259_v2, %v6836_v0  ;;  %v6716_v10 = vadd.f32 1e-05, %v6650_v31  ;;  %v17110_v2 = vld [vmem:[#allocation21_spill] sm:$0xff] }
 0x707   : > { %8014 = vst [vmem:[%s13607_s22 + $0x2d0] sm:$0xff] %v7882_v25  ;;  %8015 = vst.msk [vmem:[%s13607_s22 + $0x2d8] sm:$0xff] %vm5679_vm1, %v7883_v54  ;;  %v7358_v58 = vmul.f32 %v7172_v60, %v13643_v20  ;;  %v7359_v32 = vmul.f32 %v7172_v60, %v13637_v8  ;;  %v6714_v54 = vadd.f32 1e-05, %v6648_v12  ;;  %v8261_v60 = vpop.eup %8260 }
 0x709   : > { %v7886_v14 = vadd.f32 %v17106_v48, %v7358_v58  ;;  %v7887_v62 = vadd.f32 %v17106_v48, %v7359_v32  ;;  %7086 = vperm.xlu1 %8162, %v6898_v30   ;;  %v6652_v58 = vmax.f32 %v6586_v44, 0.0  ;;  %v17108_v32 = vld [vmem:[#allocation5_spill] sm:$0xff]  ;;  %8268 = vrsqrt.f32 %v6714_v54  ;;  %v17111_v44 = vld [vmem:[#allocation6_spill] sm:$0xff] }
 0x70a   : > { %v7182_v50 = vpop.permute.xlu0 %7181  ;;  %v6588_v48 = vmul.f32 0.0051020407, %v13719_v49  ;;  %v6840_v49 = vld [vmem:[%s13401_s19 + $0x130] sm:$0xff]  ;;  %8270 = vrsqrt.f32 %v6716_v10 }
 0x70b   : > { %8018 = vst [vmem:[%s13607_s22 + $0x2f0] sm:$0xff] %v7886_v14  ;;  %8019 = vst.msk [vmem:[%s13607_s22 + $0x2f8] sm:$0xff] %vm5679_vm1, %v7887_v62  ;;  %v7362_v8 = vmul.f32 %v7182_v50, %v13707_v59  ;;  %v7363_v20 = vmul.f32 %v7182_v50, %v13703_v39  ;;  %v8263_v62 = vpop.eup %8262  ;;  %v6718_v31 = vadd.f32 1e-05, %v6652_v58 }
 0x70d   : > { %v7890_v63 = vadd.f32 %v17107_v36, %v7362_v8  ;;  %v7891_v25 = vadd.f32 %v17107_v36, %v7363_v20  ;;  %7096 = vperm.xlu1 %8162, %v6900_v11   ;;  %v6904_v11 = vmul.f32 %v8261_v60, %v6838_v16  ;;  %v17109_v8 = vld [vmem:[#allocation199_spill] sm:$0xff]  ;;  %v6590_v60 = vmul.f32 0.0051020407, %v13769_v28  ;;  %v17113_v16 = vld [vmem:[#allocation118_spill] sm:$0xff] }
 0x70e   : > { %v7192_v57 = vpop.permute.xlu0 %7191 }
 0x70f   : > { %8022 = vst [vmem:[%s13607_s22 + $0x310] sm:$0xff] %v7890_v63  ;;  %8023 = vst.msk [vmem:[%s13607_s22 + $0x318] sm:$0xff] %vm5679_vm1, %v7891_v25  ;;  %v7366_v39 = vmul.f32 %v7192_v57, %v13760_v52  ;;  %v7367_v59 = vmul.f32 %v7192_v57, %v13756_v13  ;;  %v6521_v30 = vpop.xlane.xlu1 %6520  ;;  %v17112_v63 = vld [vmem:[#allocation317_spill] sm:$0xff] }
 0x710   : > { %v6599_v29 = vmul.f32 0.0051020407, %v6521_v30  ;;  %v6906_v30 = vmul.f32 %v8263_v62, %v6840_v49  ;;  %v6594_v62 = vmul.f32 0.0051020407, %v13868_v27 }
 0x711   : > { %v7894_v55 = vadd.f32 %v17108_v32, %v7366_v39  ;;  %v7895_v15 = vadd.f32 %v17108_v32, %v7367_v59  ;;  %7106 = vperm.xlu1 %8162, %v6902_v3   ;;  %v8265_v3 = vpop.eup %8264  ;;  %v6656_v32 = vmax.f32 %v6590_v60, 0.0  ;;  %v6852_v60 = vld [vmem:[%s13401_s19 + $0x190] sm:$0xff] }
 0x712   : > { %v6665_v52 = vmax.f32 %v6599_v29, 0.0  ;;  %v7202_v14 = vpop.permute.xlu0 %7201  ;;  %v6842_v29 = vld [vmem:[%s13401_s19 + $0x140] sm:$0xff] }
 0x713   : > { %8026 = vst [vmem:[%s13607_s22 + $0x330] sm:$0xff] %v7894_v55  ;;  %8027 = vst.msk [vmem:[%s13607_s22 + $0x338] sm:$0xff] %vm5679_vm1, %v7895_v15  ;;  %v7370_v13 = vmul.f32 %v7202_v14, %v13813_v17  ;;  %v7371_v12 = vmul.f32 %v7202_v14, %v13806_v43  ;;  %v7047_v50 = vpop.permute.xlu1 %7046  ;;  %v6654_v43 = vmax.f32 %v6588_v48, 0.0  ;;  %v8267_v55 = vpop.eup %8266  ;;  %v6844_v15 = vld [vmem:[%s13401_s19 + $0x150] sm:$0xff] }
 0x714   : > { %v6731_v37 = vadd.f32 1e-05, %v6665_v52  ;;  %v7308_v20 = vmul.f32 %v7047_v50, %v17109_v8  ;;  %v7309_v0 = vmul.f32 %v7047_v50, %v17110_v2  ;;  %v6722_v52 = vadd.f32 1e-05, %v6656_v32  ;;  %v6863_v50 = vld [vmem:[%s13401_s19 + $0x1e8] sm:$0xff]  ;;  %v6856_v32 = vld [vmem:[%s13401_s19 + $0x1b0] sm:$0xff] }
 0x715   : > { %v7898_v36 = vadd.f32 %v17111_v44, %v7370_v13  ;;  %v7899_v17 = vadd.f32 %v17111_v44, %v7371_v12  ;;  %7116 = vperm.xlu1 %8162, %v6904_v11   ;;  %v6720_v58 = vadd.f32 1e-05, %v6654_v43  ;;  %v6910_v13 = vmul.f32 %v8267_v55, %v6844_v15  ;;  %v6846_v12 = vld [vmem:[%s13401_s19 + $0x160] sm:$0xff] }
 0x716   : > { %8272 = vrsqrt.f32 %v6731_v37  ;;  %v7836_v25 = vadd.f32 %v17112_v63, %v7308_v20  ;;  %v7837_v54 = vadd.f32 %v17112_v63, %v7309_v0  ;;  %v7212_v57 = vpop.permute.xlu0 %7211  ;;  %v8269_v48 = vpop.eup %8268  ;;  %v6660_v20 = vmax.f32 %v6594_v62, 0.0  ;;  %v6848_v0 = vld [vmem:[%s13401_s19 + $0x170] sm:$0xff]  ;;  %v6850_v43 = vld [vmem:[%s13401_s19 + $0x180] sm:$0xff] }
 0x717   : > { %8030 = vst [vmem:[%s13607_s22 + $0x350] sm:$0xff] %v7898_v36  ;;  %8031 = vst.msk [vmem:[%s13607_s22 + $0x358] sm:$0xff] %vm5679_vm1, %v7899_v17  ;;  %v7374_v39 = vmul.f32 %v7212_v57, %v13859_v26  ;;  %v7375_v59 = vmul.f32 %v7212_v57, %v13852_v4  ;;  %8274 = vrsqrt.f32 %v6718_v31  ;;  %v6592_v26 = vmul.f32 0.0051020407, %v13822_v33  ;;  %v8271_v11 = vpop.eup %8270 }
 0x718   : > { %7968 = vst [vmem:[%s13607_s22 + $0x160] sm:$0xff] %v7836_v25  ;;  %7969 = vst.msk [vmem:[%s13607_s22 + $0x168] sm:$0xff] %vm5679_vm1, %v7837_v54  ;;  %v6908_v4 = vmul.f32 %v8265_v3, %v6842_v29  ;;  %8276 = vrsqrt.f32 %v6720_v58  ;;  %v6912_v33 = vmul.f32 %v8269_v48, %v6846_v12  ;;  %v6596_v2 = vmul.f32 0.0051020407, %v13914_v5  ;;  %v6854_v29 = vld [vmem:[%s13401_s19 + $0x1a0] sm:$0xff] }
 0x719   : > { %v7902_v10 = vadd.f32 %v17113_v16, %v7374_v39  ;;  %v7903_v28 = vadd.f32 %v17113_v16, %v7375_v59  ;;  %7126 = vperm.xlu1 %8162, %v6906_v30   ;;  %v6658_v14 = vmax.f32 %v6592_v26, 0.0  ;;  %8278 = vrsqrt.f32 %v6722_v52  ;;  %v6858_v48 = vld [vmem:[%s13401_s19 + $0x1c0] sm:$0xff]  ;;  %v17114_v52 = vld [vmem:[#allocation12_spill] sm:$0xff] }
 0x71a   : > { %v6914_v31 = vmul.f32 %v8271_v11, %v6848_v0  ;;  %v6726_v44 = vadd.f32 1e-05, %v6660_v20  ;;  %v6662_v36 = vmax.f32 %v6596_v2, 0.0  ;;  %v6598_v17 = vmul.f32 0.0051020407, %v13975_v34  ;;  %v6864_v20 = vld [vmem:[%s13401_s19 + $0x1f0] sm:$0xff] }
 0x71b   : > { %8034 = vst [vmem:[%s13607_s22 + $0x370] sm:$0xff] %v7902_v10  ;;  %8035 = vst.msk [vmem:[%s13607_s22 + $0x378] sm:$0xff] %vm5679_vm1, %v7903_v28  ;;  %v6724_v8 = vadd.f32 1e-05, %v6658_v14  ;;  %v6600_v57 = vmul.f32 0.0051020407, %v14019_v24 }
 0x71c   : > { %v6728_v54 = vadd.f32 1e-05, %v6662_v36  ;;  %v6664_v5 = vmax.f32 %v6598_v17, 0.0  ;;  %v6602_v3 = vmul.f32 0.0051020407, %v14050_v23  ;;  %v17115_v17 = vld [vmem:[#allocation204_spill] sm:$0xff] }
 0x71d   : > { %7136 = vperm.xlu1 %8162, %v6908_v4   ;;  %8280 = vrsqrt.f32 %v6724_v8  ;;  %v6666_v30 = vmax.f32 %v6600_v57, 0.0 }
 0x71e   : > { %8282 = vrsqrt.f32 %v6726_v44  ;;  %v6730_v59 = vadd.f32 1e-05, %v6664_v5  ;;  %v6668_v10 = vmax.f32 %v6602_v3, 0.0  ;;  %v6866_v44 = vld [vmem:[%s13401_s19 + $0x200] sm:$0xff] }
 0x71f   : > { %8284 = vrsqrt.f32 %v6728_v54  ;;  %v6732_v16 = vadd.f32 1e-05, %v6666_v30  ;;  %v17117_v54 = vld [vmem:[#allocation321_spill] sm:$0xff] }
 0x720   : > { %8286 = vrsqrt.f32 %v6730_v59  ;;  %v6734_v24 = vadd.f32 1e-05, %v6668_v10  ;;  %v6865_v59 = vld [vmem:[%s13401_s19 + $0x1f8] sm:$0xff]  ;;  %v17118_v10 = vld [vmem:[#allocation128_spill] sm:$0xff] }
 0x721   : > { %7146 = vperm.xlu1 %8162, %v6910_v13   ;;  %8288 = vrsqrt.f32 %v6732_v16 }
 0x722   : > { %8290 = vrsqrt.f32 %v6734_v24 }
 0x723   : > { %v8273_v37 = vpop.eup %8272 }
 0x724   : > { %v6929_v49 = vmul.f32 %v8273_v37, %v6863_v50  ;;  %v8275_v27 = vpop.eup %8274  ;;  %v6860_v50 = vld [vmem:[%s13401_s19 + $0x1d0] sm:$0xff] }
 0x725   : > { %7156 = vperm.xlu1 %8162, %v6912_v33   ;;  %v6916_v63 = vmul.f32 %v8275_v27, %v6850_v43  ;;  %v8277_v25 = vpop.eup %8276  ;;  %v6862_v33 = vld [vmem:[%s13401_s19 + $0x1e0] sm:$0xff] }
 0x726   : > { %7241 = vperm.xlu0 %8163, %v6929_v49   ;;  %v6918_v39 = vmul.f32 %v8277_v25, %v6852_v60  ;;  %v8279_v34 = vpop.eup %8278 }
 0x727   : > { %v6920_v28 = vmul.f32 %v8279_v34, %v6854_v29 }
 0x729   : > { %7166 = vperm.xlu1 %8162, %v6914_v31  }
 0x72a   : > { %v8281_v58 = vpop.eup %8280 }
 0x72b   : > { %v6922_v4 = vmul.f32 %v8281_v58, %v6856_v32  ;;  %v8283_v55 = vpop.eup %8282 }
 0x72c   : > { %v6924_v13 = vmul.f32 %v8283_v55, %v6858_v48  ;;  %v8285_v12 = vpop.eup %8284  ;;  %v17121_v48 = vld [vmem:[#allocation327_spill] sm:$0xff] }
 0x72d   : > { %7176 = vperm.xlu1 %8162, %v6916_v63   ;;  %v6926_v11 = vmul.f32 %v8285_v12, %v6860_v50  ;;  %v17116_v63 = vld [vmem:[#allocation42_spill] sm:$0xff]  ;;  %v17123_v50 = vld [vmem:[#allocation220_spill] sm:$0xff] }
 0x731   : > { %7186 = vperm.xlu1 %8162, %v6918_v39   ;;  %v7460_v39 = vld [vmem:[%s11004_s14 + $0x200] sm:$0xff] }
 0x735   : > { %7196 = vperm.xlu1 %8162, %v6920_v28  }
 0x737   : > { %v7222_v26 = vpop.permute.xlu0 %7221 }
 0x738   : > { %v7378_v23 = vmul.f32 %v7222_v26, %v13905_v1  ;;  %v7379_v15 = vmul.f32 %v7222_v26, %v13898_v46  ;;  %v8287_v1 = vpop.eup %8286 }
 0x739   : > { %7206 = vperm.xlu1 %8162, %v6922_v4   ;;  %v6928_v46 = vmul.f32 %v8287_v1, %v6862_v33  ;;  %v8289_v37 = vpop.eup %8288  ;;  %v17124_v1 = vld [vmem:[#allocation337_spill] sm:$0xff] }
 0x73a   : > { %v7906_v14 = vadd.f32 %v17114_v52, %v7378_v23  ;;  %v7907_v62 = vadd.f32 %v17114_v52, %v7379_v15  ;;  %v6930_v49 = vmul.f32 %v8289_v37, %v6864_v20  ;;  %v8291_v31 = vpop.eup %8290  ;;  %v17119_v23 = vld [vmem:[#allocation125_spill] sm:$0xff]  ;;  %v17120_v15 = vld [vmem:[#allocation211_spill] sm:$0xff] }
 0x73b   : > { %v6932_v60 = vmul.f32 %v8291_v31, %v6866_v44 }
 0x73c   : > { %8038 = vst [vmem:[%s13607_s22 + $0x390] sm:$0xff] %v7906_v14  ;;  %8039 = vst.msk [vmem:[%s13607_s22 + $0x398] sm:$0xff] %vm5679_vm1, %v7907_v62 }
 0x73d   : > { %7216 = vperm.xlu1 %8162, %v6924_v13   ;;  %v17122_v13 = vld [vmem:[#allocation48_spill] sm:$0xff] }
 0x741   : > { %7226 = vperm.xlu1 %8162, %v6926_v11  }
 0x744   : > { %v6529_v8 = vpop.xlane.xlu1 %6528 }
 0x745   : > { %v6601_v2 = vmul.f32 0.0051020407, %v6529_v8  ;;  %7236 = vperm.xlu1 %8162, %v6928_v46   ;;  %v17125_v8 = vld [vmem:[#allocation225_spill] sm:$0xff] }
 0x747   : > { %v6667_v0 = vmax.f32 %v6601_v2, 0.0  ;;  %v17126_v2 = vld [vmem:[#allocation131_spill] sm:$0xff] }
 0x748   : > { %v7057_v27 = vpop.permute.xlu1 %7056 }
 0x749   : > { %v6733_v36 = vadd.f32 1e-05, %v6667_v0  ;;  %v7312_v43 = vmul.f32 %v7057_v27, %v17115_v17  ;;  %v7313_v25 = vmul.f32 %v7057_v27, %v17116_v63  ;;  %7246 = vperm.xlu1 %8162, %v6930_v49   ;;  %v17127_v49 = vld [vmem:[#allocation69_spill] sm:$0xff] }
 0x74b   : > { %8292 = vrsqrt.f32 %v6733_v36  ;;  %v7840_v5 = vadd.f32 %v17117_v54, %v7312_v43  ;;  %v7841_v57 = vadd.f32 %v17117_v54, %v7313_v25  ;;  %v17128_v36 = vld [vmem:[#allocation230_spill] sm:$0xff]  ;;  %v17129_v43 = vld [vmem:[#allocation52_spill] sm:$0xff]  ;;  %v6867_v25 = vld [vmem:[%s13401_s19 + $0x208] sm:$0xff] }
 0x74c   : > { %v17130_v54 = vld [vmem:[#allocation77_spill] sm:$0xff] }
 0x74d   : > { %7972 = vst [vmem:[%s13607_s22 + $0x180] sm:$0xff] %v7840_v5  ;;  %7973 = vst.msk [vmem:[%s13607_s22 + $0x188] sm:$0xff] %vm5679_vm1, %v7841_v57  ;;  %7256 = vperm.xlu1 %8162, %v6932_v60  }
 0x751   : > { %7784 = vperm.xlu1 %8162, %v7460_v39  }
 0x758   : > { %v8293_v30 = vpop.eup %8292 }
 0x759   : > { %v6931_v3 = vmul.f32 %v8293_v30, %v6865_v59  ;;  %v17131_v59 = vld [vmem:[#allocation234_spill] sm:$0xff] }
 0x75b   : > { %7251 = vperm.xlu0 %8163, %v6931_v3   ;;  %v17132_v3 = vld [vmem:[#allocation23_spill] sm:$0xff] }
 0x76c   : > { %v7232_v34 = vpop.permute.xlu0 %7231 }
 0x76d   : > { %v7382_v29 = vmul.f32 %v7232_v34, %v13952_v61  ;;  %v7383_v16 = vmul.f32 %v7232_v34, %v13944_v38 }
 0x76f   : > { %v7910_v28 = vadd.f32 %v17118_v10, %v7382_v29  ;;  %v7911_v58 = vadd.f32 %v17118_v10, %v7383_v16  ;;  %v17133_v16 = vld [vmem:[#allocation85_spill] sm:$0xff] }
 0x771   : > { %8042 = vst [vmem:[%s13607_s22 + $0x3b0] sm:$0xff] %v7910_v28  ;;  %8043 = vst.msk [vmem:[%s13607_s22 + $0x3b8] sm:$0xff] %vm5679_vm1, %v7911_v58 }
 0x779   : > { %v6537_v32 = vpop.xlane.xlu1 %6536 }
 0x77a   : > { %v6603_v24 = vmul.f32 0.0051020407, %v6537_v32  ;;  %v7461_v32 = vld [vmem:[%s11004_s14 + $0x208] sm:$0xff] }
 0x77c   : > { %v6669_v26 = vmax.f32 %v6603_v24, 0.0  ;;  %v17134_v24 = vld [vmem:[#allocation239_spill] sm:$0xff] }
 0x77d   : > { %v7067_v4 = vpop.permute.xlu1 %7066 }
 0x77e   : > { %v6735_v55 = vadd.f32 1e-05, %v6669_v26  ;;  %v7316_v61 = vmul.f32 %v7067_v4, %v17119_v23  ;;  %v7317_v38 = vmul.f32 %v7067_v4, %v17120_v15  ;;  %v17135_v4 = vld [vmem:[#allocation134_spill] sm:$0xff]  ;;  %v17136_v23 = vld [vmem:[#allocation87_spill] sm:$0xff] }
 0x780   : > { %8294 = vrsqrt.f32 %v6735_v55  ;;  %v7844_v52 = vadd.f32 %v17121_v48, %v7316_v61  ;;  %v7845_v14 = vadd.f32 %v17121_v48, %v7317_v38  ;;  %v17137_v48 = vld [vmem:[#allocation242_spill] sm:$0xff] }
 0x781   : > { %v7077_v62 = vpop.permute.xlu1 %7076 }
 0x782   : > { %7976 = vst [vmem:[%s13607_s22 + $0x1a0] sm:$0xff] %v7844_v52  ;;  %7977 = vst.msk [vmem:[%s13607_s22 + $0x1a8] sm:$0xff] %vm5679_vm1, %v7845_v14  ;;  %v7320_v12 = vmul.f32 %v7077_v62, %v17122_v13  ;;  %v7321_v11 = vmul.f32 %v7077_v62, %v17123_v50  ;;  %v17138_v14 = vld [vmem:[#allocation56_spill] sm:$0xff] }
 0x783   : > { %v17139_v13 = vld [vmem:[#allocation88_spill] sm:$0xff] }
 0x784   : > { %v7848_v33 = vadd.f32 %v17124_v1, %v7320_v12  ;;  %v7849_v46 = vadd.f32 %v17124_v1, %v7321_v11  ;;  %v17140_v1 = vld [vmem:[#allocation245_spill] sm:$0xff] }
 0x785   : > { %v7087_v37 = vpop.permute.xlu1 %7086 }
 0x786   : > { %7980 = vst [vmem:[%s13607_s22 + $0x1c0] sm:$0xff] %v7848_v33  ;;  %7981 = vst.msk [vmem:[%s13607_s22 + $0x1c8] sm:$0xff] %vm5679_vm1, %v7849_v46  ;;  %v7324_v20 = vmul.f32 %v7087_v37, %v17125_v8  ;;  %v7325_v0 = vmul.f32 %v7087_v37, %v17126_v2  ;;  %v17141_v46 = vld [vmem:[#allocation136_spill] sm:$0xff]  ;;  %v17142_v8 = vld [vmem:[#allocation93_spill] sm:$0xff] }
 0x788   : > { %v7852_v31 = vadd.f32 %v17127_v49, %v7324_v20  ;;  %v7853_v27 = vadd.f32 %v17127_v49, %v7325_v0  ;;  %v17143_v49 = vld [vmem:[#allocation139_spill] sm:$0xff] }
 0x789   : > { %v7097_v44 = vpop.permute.xlu1 %7096 }
 0x78a   : > { %7984 = vst [vmem:[%s13607_s22 + $0x1e0] sm:$0xff] %v7852_v31  ;;  %7985 = vst.msk [vmem:[%s13607_s22 + $0x1e8] sm:$0xff] %vm5679_vm1, %v7853_v27  ;;  %v7328_v17 = vmul.f32 %v7097_v44, %v17128_v36  ;;  %v7329_v63 = vmul.f32 %v7097_v44, %v17129_v43  ;;  %v17144_v27 = vld [vmem:[#allocation250_spill] sm:$0xff] }
 0x78b   : > { %v17145_v36 = vld [vmem:[#allocation98_spill] sm:$0xff] }
 0x78c   : > { %v7856_v5 = vadd.f32 %v17130_v54, %v7328_v17  ;;  %v7857_v57 = vadd.f32 %v17130_v54, %v7329_v63 }
 0x78d   : > { %v8295_v60 = vpop.eup %8294  ;;  %v7107_v39 = vpop.permute.xlu1 %7106 }
 0x78e   : > { %7988 = vst [vmem:[%s13607_s22 + $0x200] sm:$0xff] %v7856_v5  ;;  %7989 = vst.msk [vmem:[%s13607_s22 + $0x208] sm:$0xff] %vm5679_vm1, %v7857_v57  ;;  %v7332_v30 = vmul.f32 %v7107_v39, %v17131_v59  ;;  %v7333_v34 = vmul.f32 %v7107_v39, %v17132_v3  ;;  %v6933_v29 = vmul.f32 %v8295_v60, %v6867_v25  ;;  %v17146_v57 = vld [vmem:[#allocation256_spill] sm:$0xff]  ;;  %v17147_v39 = vld [vmem:[#allocation251_spill] sm:$0xff] }
 0x790   : > { %v7860_v10 = vadd.f32 %v17133_v16, %v7332_v30  ;;  %v7861_v28 = vadd.f32 %v17133_v16, %v7333_v34  ;;  %7261 = vperm.xlu0 %8163, %v6933_v29   ;;  %v17148_v30 = vld [vmem:[#allocation135_spill] sm:$0xff]  ;;  %v17149_v29 = vld [vmem:[#allocation102_spill] sm:$0xff] }
 0x791   : > { %v7117_v58 = vpop.permute.xlu1 %7116 }
 0x792   : > { %7992 = vst [vmem:[%s13607_s22 + $0x220] sm:$0xff] %v7860_v10  ;;  %7993 = vst.msk [vmem:[%s13607_s22 + $0x228] sm:$0xff] %vm5679_vm1, %v7861_v28  ;;  %v7336_v26 = vmul.f32 %v7117_v58, %v17134_v24  ;;  %v7337_v55 = vmul.f32 %v7117_v58, %v17135_v4  ;;  %v17151_v58 = vld [vmem:[#allocation60_spill] sm:$0xff]  ;;  %v17152_v24 = vld [vmem:[#allocation105_spill] sm:$0xff] }
 0x794   : > { %v7864_v61 = vadd.f32 %v17136_v23, %v7336_v26  ;;  %v7865_v15 = vadd.f32 %v17136_v23, %v7337_v55  ;;  %7789 = vperm.xlu0 %8163, %v7461_v32   ;;  %v17153_v23 = vld [vmem:[#allocation264_spill] sm:$0xff] }
 0x795   : > { %v7127_v38 = vpop.permute.xlu1 %7126 }
 0x796   : > { %7996 = vst [vmem:[%s13607_s22 + $0x240] sm:$0xff] %v7864_v61  ;;  %7997 = vst.msk [vmem:[%s13607_s22 + $0x248] sm:$0xff] %vm5679_vm1, %v7865_v15  ;;  %v7340_v52 = vmul.f32 %v7127_v38, %v17137_v48  ;;  %v7341_v62 = vmul.f32 %v7127_v38, %v17138_v14  ;;  %v17154_v15 = vld [vmem:[#allocation262_spill] sm:$0xff]  ;;  %v17155_v48 = vld [vmem:[#allocation109_spill] sm:$0xff] }
 0x798   : > { %v7868_v12 = vadd.f32 %v17139_v13, %v7340_v52  ;;  %v7869_v50 = vadd.f32 %v17139_v13, %v7341_v62  ;;  %v17156_v13 = vld [vmem:[#allocation144_spill] sm:$0xff] }
 0x799   : > { %v7137_v11 = vpop.permute.xlu1 %7136 }
 0x79a   : > { %8000 = vst [vmem:[%s13607_s22 + $0x260] sm:$0xff] %v7868_v12  ;;  %8001 = vst.msk [vmem:[%s13607_s22 + $0x268] sm:$0xff] %vm5679_vm1, %v7869_v50  ;;  %v7344_v33 = vmul.f32 %v7137_v11, %v17140_v1  ;;  %v7345_v37 = vmul.f32 %v7137_v11, %v17141_v46  ;;  %v17157_v50 = vld [vmem:[#allocation270_spill] sm:$0xff]  ;;  %v17158_v1 = vld [vmem:[#allocation8_spill] sm:$0xff] }
 0x79c   : > { %v7872_v20 = vadd.f32 %v17142_v8, %v7344_v33  ;;  %v7873_v2 = vadd.f32 %v17142_v8, %v7345_v37 }
 0x79d   : > { %v7147_v0 = vpop.permute.xlu1 %7146 }
 0x79e   : > { %8004 = vst [vmem:[%s13607_s22 + $0x280] sm:$0xff] %v7872_v20  ;;  %8005 = vst.msk [vmem:[%s13607_s22 + $0x288] sm:$0xff] %vm5679_vm1, %v7873_v2  ;;  %v7348_v31 = vmul.f32 %v7147_v0, %v17143_v49  ;;  %v7349_v44 = vmul.f32 %v7147_v0, %v17144_v27  ;;  %v17159_v2 = vld [vmem:[#allocation94_spill] sm:$0xff] }
 0x7a0   : > { %v7876_v17 = vadd.f32 %v17145_v36, %v7348_v31  ;;  %v7877_v43 = vadd.f32 %v17145_v36, %v7349_v44  ;;  %v17160_v44 = vld [vmem:[#allocation287_spill] sm:$0xff] }
 0x7a1   : > { %v7242_v63 = vpop.permute.xlu0 %7241  ;;  %v7157_v25 = vpop.permute.xlu1 %7156 }
 0x7a2   : > { %8008 = vst [vmem:[%s13607_s22 + $0x2a0] sm:$0xff] %v7876_v17  ;;  %8009 = vst.msk [vmem:[%s13607_s22 + $0x2a8] sm:$0xff] %vm5679_vm1, %v7877_v43  ;;  %v7386_v54 = vmul.f32 %v7242_v63, %v14004_v53  ;;  %v7387_v5 = vmul.f32 %v7242_v63, %v13996_v7  ;;  %v7352_v60 = vmul.f32 %v7157_v25, %v17146_v57  ;;  %v17150_v7 = vld [vmem:[#allocation260_spill] sm:$0xff]  ;;  %v17161_v17 = vld [vmem:[#allocation91_spill] sm:$0xff] }
 0x7a3   : > { %v7353_v59 = vmul.f32 %v7157_v25, %v17147_v39 }
 0x7a4   : > { %v7914_v3 = vadd.f32 %v17148_v30, %v7386_v54  ;;  %v7915_v34 = vadd.f32 %v17148_v30, %v7387_v5  ;;  %v7880_v16 = vadd.f32 %v17149_v29, %v7352_v60  ;;  %v17162_v54 = vld [vmem:[#allocation14_spill] sm:$0xff] }
 0x7a5   : > { %v7881_v10 = vadd.f32 %v17149_v29, %v7353_v59  ;;  %v7167_v28 = vpop.permute.xlu1 %7166  ;;  %v17163_v59 = vld [vmem:[#allocation16_spill] sm:$0xff]  ;;  %v17164_v29 = vld [vmem:[#allocation143_spill] sm:$0xff] }
 0x7a6   : > { %8046 = vst [vmem:[%s13607_s22 + $0x3d0] sm:$0xff] %v7914_v3  ;;  %8047 = vst.msk [vmem:[%s13607_s22 + $0x3d8] sm:$0xff] %vm5679_vm1, %v7915_v34  ;;  %v7356_v53 = vmul.f32 %v7167_v28, %v17150_v7  ;;  %v7357_v32 = vmul.f32 %v7167_v28, %v17151_v58  ;;  %v17165_v7 = vld [vmem:[#allocation18_spill] sm:$0xff] }
 0x7a7   : > { %8012 = vst [vmem:[%s13607_s22 + $0x2c0] sm:$0xff] %v7880_v16  ;;  %8013 = vst.msk [vmem:[%s13607_s22 + $0x2c8] sm:$0xff] %vm5679_vm1, %v7881_v10 }
 0x7a8   : > { %v7884_v26 = vadd.f32 %v17152_v24, %v7356_v53  ;;  %v7885_v4 = vadd.f32 %v17152_v24, %v7357_v32 }
 0x7a9   : > { %v7177_v55 = vpop.permute.xlu1 %7176 }
 0x7aa   : > { %8016 = vst [vmem:[%s13607_s22 + $0x2e0] sm:$0xff] %v7884_v26  ;;  %8017 = vst.msk [vmem:[%s13607_s22 + $0x2e8] sm:$0xff] %vm5679_vm1, %v7885_v4  ;;  %v7360_v61 = vmul.f32 %v7177_v55, %v17153_v23  ;;  %v7361_v38 = vmul.f32 %v7177_v55, %v17154_v15  ;;  %v17166_v55 = vld [vmem:[#allocation49_spill] sm:$0xff] }
 0x7ac   : > { %v7888_v52 = vadd.f32 %v17155_v48, %v7360_v61  ;;  %v7889_v14 = vadd.f32 %v17155_v48, %v7361_v38  ;;  %v17167_v61 = vld [vmem:[#allocation141_spill] sm:$0xff] }
 0x7ad   : > { %v7187_v62 = vpop.permute.xlu1 %7186 }
 0x7ae   : > { %8020 = vst [vmem:[%s13607_s22 + $0x300] sm:$0xff] %v7888_v52  ;;  %8021 = vst.msk [vmem:[%s13607_s22 + $0x308] sm:$0xff] %vm5679_vm1, %v7889_v14  ;;  %v7364_v12 = vmul.f32 %v7187_v62, %v17156_v13  ;;  %v7365_v11 = vmul.f32 %v7187_v62, %v17157_v50  ;;  %v17169_v52 = vld [vmem:[#allocation294_spill] sm:$0xff] }
 0x7b0   : > { %v7892_v33 = vadd.f32 %v17158_v1, %v7364_v12  ;;  %v7893_v46 = vadd.f32 %v17158_v1, %v7365_v11 }
 0x7b1   : > { %v7197_v37 = vpop.permute.xlu1 %7196 }
 0x7b2   : > { %8024 = vst [vmem:[%s13607_s22 + $0x320] sm:$0xff] %v7892_v33  ;;  %8025 = vst.msk [vmem:[%s13607_s22 + $0x328] sm:$0xff] %vm5679_vm1, %v7893_v46  ;;  %v7368_v8 = vmul.f32 %v7197_v37, %v13633_v22  ;;  %v7369_v20 = vmul.f32 %v7197_v37, %v13630_v45 }
 0x7b4   : > { %v7896_v0 = vadd.f32 %v17159_v2, %v7368_v8  ;;  %v7897_v49 = vadd.f32 %v17159_v2, %v7369_v20 }
 0x7b5   : > { %v7207_v31 = vpop.permute.xlu1 %7206 }
 0x7b6   : > { %8028 = vst [vmem:[%s13607_s22 + $0x340] sm:$0xff] %v7896_v0  ;;  %8029 = vst.msk [vmem:[%s13607_s22 + $0x348] sm:$0xff] %vm5679_vm1, %v7897_v49  ;;  %v7372_v27 = vmul.f32 %v7207_v31, %v13690_v35  ;;  %v7373_v36 = vmul.f32 %v7207_v31, %v17160_v44 }
 0x7b8   : > { %v7900_v43 = vadd.f32 %v17161_v17, %v7372_v27  ;;  %v7901_v22 = vadd.f32 %v17161_v17, %v7373_v36 }
 0x7b9   : > { %v7217_v45 = vpop.permute.xlu1 %7216 }
 0x7ba   : > { %8032 = vst [vmem:[%s13607_s22 + $0x360] sm:$0xff] %v7900_v43  ;;  %8033 = vst.msk [vmem:[%s13607_s22 + $0x368] sm:$0xff] %vm5679_vm1, %v7901_v22  ;;  %v7376_v63 = vmul.f32 %v7217_v45, %v13740_v18  ;;  %v7377_v25 = vmul.f32 %v7217_v45, %v13726_v47 }
 0x7bc   : > { %v7904_v5 = vadd.f32 %v17162_v54, %v7376_v63  ;;  %v7905_v35 = vadd.f32 %v17162_v54, %v7377_v25 }
 0x7bd   : > { %v7227_v57 = vpop.permute.xlu1 %7226 }
 0x7be   : > { %8036 = vst [vmem:[%s13607_s22 + $0x380] sm:$0xff] %v7904_v5  ;;  %8037 = vst.msk [vmem:[%s13607_s22 + $0x388] sm:$0xff] %vm5679_vm1, %v7905_v35  ;;  %v7380_v60 = vmul.f32 %v7227_v57, %v13785_v40  ;;  %v7381_v39 = vmul.f32 %v7227_v57, %v13775_v9 }
 0x7c0   : > { %v7908_v30 = vadd.f32 %v17163_v59, %v7380_v60  ;;  %v7909_v18 = vadd.f32 %v17163_v59, %v7381_v39 }
 0x7c1   : > { %v7237_v47 = vpop.permute.xlu1 %7236 }
 0x7c2   : > { %8040 = vst [vmem:[%s13607_s22 + $0x3a0] sm:$0xff] %v7908_v30  ;;  %8041 = vst.msk [vmem:[%s13607_s22 + $0x3a8] sm:$0xff] %vm5679_vm1, %v7909_v18  ;;  %v7384_v3 = vmul.f32 %v7237_v47, %v13835_v6  ;;  %v7385_v34 = vmul.f32 %v7237_v47, %v13828_v42 }
 0x7c4   : > { %v7912_v16 = vadd.f32 %v17164_v29, %v7384_v3  ;;  %v7913_v40 = vadd.f32 %v17164_v29, %v7385_v34 }
 0x7c5   : > { %v7247_v9 = vpop.permute.xlu1 %7246 }
 0x7c6   : > { %8044 = vst [vmem:[%s13607_s22 + $0x3c0] sm:$0xff] %v7912_v16  ;;  %8045 = vst.msk [vmem:[%s13607_s22 + $0x3c8] sm:$0xff] %vm5679_vm1, %v7913_v40  ;;  %v7388_v10 = vmul.f32 %v7247_v9, %v13881_v41  ;;  %v7389_v28 = vmul.f32 %v7247_v9, %v13874_v19 }
 0x7c8   : > { %v7916_v53 = vadd.f32 %v17165_v7, %v7388_v10  ;;  %v7917_v6 = vadd.f32 %v17165_v7, %v7389_v28 }
 0x7c9   : > { %v7257_v42 = vpop.permute.xlu1 %7256 }
 0x7ca   : > { %8048 = vst [vmem:[%s13607_s22 + $0x3e0] sm:$0xff] %v7916_v53  ;;  %8049 = vst.msk [vmem:[%s13607_s22 + $0x3e8] sm:$0xff] %vm5679_vm1, %v7917_v6  ;;  %v7392_v58 = vmul.f32 %v7257_v42, %v13927_v21  ;;  %v7393_v32 = vmul.f32 %v7257_v42, %v13920_v56  ;;  %v17168_v21 = vld [vmem:[#allocation296_spill] sm:$0xff] }
 0x7cd   : > { %v7785_v24 = vpop.permute.xlu1 %7784 }
 0x7ce   : > { %v7920_v26 = vadd.f32 %v7785_v24, %v7392_v58  ;;  %v7921_v4 = vadd.f32 %v7785_v24, %v7393_v32 }
 0x7d0   : > { %8052 = vst [vmem:[%s13607_s22 + $0x400] sm:$0xff] %v7920_v26  ;;  %8053 = vst.msk [vmem:[%s13607_s22 + $0x408] sm:$0xff] %vm5679_vm1, %v7921_v4 }
 0x7d6   : > { %v7252_v19 = vpop.permute.xlu0 %7251 }
 0x7d7   : > { %v7390_v41 = vmul.f32 %v7252_v19, %v14041_v51  ;;  %v7391_v23 = vmul.f32 %v7252_v19, %v17166_v55 }
 0x7d9   : > { %v7918_v15 = vadd.f32 %v17167_v61, %v7390_v41  ;;  %v7919_v38 = vadd.f32 %v17167_v61, %v7391_v23 }
 0x7db   : > { %8050 = vst [vmem:[%s13607_s22 + $0x3f0] sm:$0xff] %v7918_v15  ;;  %8051 = vst.msk [vmem:[%s13607_s22 + $0x3f8] sm:$0xff] %vm5679_vm1, %v7919_v38 }
 0x80b   : > { %v7262_v56 = vpop.permute.xlu0 %7261 }
 0x80c   : > { %v7394_v48 = vmul.f32 %v7262_v56, %v17168_v21  ;;  %v7395_v14 = vmul.f32 %v7262_v56, %v17169_v52 }
 0x80f   : > { %v7790_v62 = vpop.permute.xlu0 %7789 }
 0x810   : > { %v7922_v13 = vadd.f32 %v7790_v62, %v7394_v48  ;;  %v7923_v12 = vadd.f32 %v7790_v62, %v7395_v14 }
 0x812   : > { %8054 = vst [vmem:[%s13607_s22 + $0x410] sm:$0xff] %v7922_v13  ;;  %8055 = vst.msk [vmem:[%s13607_s22 + $0x418] sm:$0xff] %vm5679_vm1, %v7923_v12 }
 0x813 PF: > { %s14_s15 = sadd.s32 1, %s8302_s15  }
 0x814   : > { %p11_p4 = scmp.ge.s32.totalorder %s14_s15, 4  }
 0x816   :  { %13 = sbr.rel (!%p11_p4) target bundleno = 1 (0x1), region = 72 }

</bundles_post_ra>
